<compile_context>
chip_gen: v7x
topology: tpu7x:2x2x1
jax: 0.10.0
libtpu: 0.0.40
codegen_flags: <defaults>
</compile_context>

<pallas_src>
import functools

import jax
import jax.numpy as jnp
from jax.experimental import pallas as pl
from jax.experimental.pallas import tpu as pltpu

# ---------------- model config (small, T5-style) ----------------
VOCAB = 512
D_MODEL = 64                   # logical model dim
D_PAD = 128                    # lane-dense padded model dim (zero-padded)
N_HEADS = 4
D_KV = 16                      # N_HEADS * D_KV == D_MODEL
HD = N_HEADS * D_KV
D_FF = 128
N_LAYERS = 2
REL_BUCKETS = 32
REL_MAX_DIST = 128

_ARB = pltpu.CompilerParams(dimension_semantics=("arbitrary",))


# ---------------- small helpers ----------------
def _full_spec(shape):
    nd = len(shape)
    return pl.BlockSpec(shape, lambda i, _nd=nd: (0,) * _nd)


def _bf(x):
    return x.astype(jnp.bfloat16)


def _rms(x, w):
    """T5 LayerNorm (no mean subtraction, no bias). x: (M, D_PAD), w: (1, D_PAD).

    Divides by the logical D_MODEL: the padded lanes of x are identically zero,
    so the sum over D_PAD lanes equals the sum over the real D_MODEL lanes.
    """
    xf = x.astype(jnp.float32)
    var = jnp.sum(xf * xf, axis=-1, keepdims=True) * (1.0 / D_MODEL)
    return xf * jax.lax.rsqrt(var + 1e-6) * w


def _take(it, n):
    return [next(it) for _ in range(n)]


# ---------------- in-kernel attention helpers (pure array functions) ----------------
def _enc_attn(xn_bf, wqkv, wo, bias_full, B, S):
    """All-head, all-batch encoder self-attention over the fused (B*S) token dim.

    xn_bf:     (B*S, D_PAD) bf16  normed hidden
    wqkv:      (3*H, D_PAD, dk) bf16  per-head q/k/v projections (head-leading)
    wo:        (H, dk, D_PAD)  bf16  per-head output projection
    bias_full: (H, B*S, B*S)   f32   rel-pos bias with -1e30 on cross-batch entries
    Returns    (B*S, D_PAD)    f32   attention block output (pre-residual).
    """
    Hn, dk, BS = N_HEADS, D_KV, B * S
    xb = jnp.broadcast_to(xn_bf[None], (3 * Hn, BS, D_PAD))
    qkv = jnp.einsum("nmd,ndk->nmk", xb, wqkv,
                     preferred_element_type=jnp.float32)          # (3H, BS, dk)
    q, k, v = _bf(qkv[:Hn]), _bf(qkv[Hn:2 * Hn]), _bf(qkv[2 * Hn:])
    # T5 attention: no 1/sqrt(d) scaling; additive relative-position bias.
    s = jnp.einsum("nmd,npd->nmp", q, k,
                   preferred_element_type=jnp.float32) + bias_full  # (H, BS, BS)
    s = s - jnp.max(s, axis=-1, keepdims=True)
    p = jnp.exp(s)
    p = _bf(p / jnp.sum(p, axis=-1, keepdims=True))               # exact divide
    o = jnp.einsum("nmp,npd->nmd", p, v,
                   preferred_element_type=jnp.float32)            # (H, BS, dk)
    proj = jnp.einsum("nmd,nde->nme", _bf(o), wo,
                      preferred_element_type=jnp.float32)         # (H, BS, D_PAD)
    out = proj[0]
    for hh in range(1, Hn):                                       # sum over heads
        out = out + proj[hh]
    return out


def _cross_attn(xn_bf, enc_b, wq, wkv, wo, cross_mask, B, S):
    """Decoder->encoder cross-attention for a single decode position (Sq == 1).

    xn_bf:      (B, D_PAD)            bf16 normed decoder hidden
    enc_b:      (2*H, B*S, D_PAD)     bf16 encoder output, pre-broadcast over 2H
    wq:         (H, D_PAD, dk)        bf16
    wkv:        (2*H, D_PAD, dk)      bf16 fused per-head k/v projections
    wo:         (H, dk, D_PAD)        bf16
    cross_mask: (B, B*S)              f32  0 on own-batch keys, -1e30 elsewhere
    Returns     (B, D_PAD)            f32
    """
    Hn, dk = N_HEADS, D_KV
    qb = jnp.broadcast_to(xn_bf[None], (Hn, B, D_PAD))
    q = _bf(jnp.einsum("nmd,ndk->nmk", qb, wq,
                       preferred_element_type=jnp.float32))       # (H, B, dk)
    kv = jnp.einsum("nmd,ndk->nmk", enc_b, wkv,
                    preferred_element_type=jnp.float32)           # (2H, BS, dk)
    k, v = _bf(kv[:Hn]), _bf(kv[Hn:])
    # cross-attention relative-position bias is identically zero in T5.
    s = jnp.einsum("nmd,npd->nmp", q, k,
                   preferred_element_type=jnp.float32) + cross_mask  # (H, B, BS)
    s = s - jnp.max(s, axis=-1, keepdims=True)
    p = jnp.exp(s)
    p = _bf(p / jnp.sum(p, axis=-1, keepdims=True))
    o = jnp.einsum("nmp,npd->nmd", p, v,
                   preferred_element_type=jnp.float32)            # (H, B, dk)
    proj = jnp.einsum("nmd,nde->nme", _bf(o), wo,
                      preferred_element_type=jnp.float32)         # (H, B, D_PAD)
    out = proj[0]
    for hh in range(1, Hn):
        out = out + proj[hh]
    return out


# ---------------- the single fused forward kernel ----------------
def _forward_kernel(*refs, B, S):
    # refs layout (inputs..., output):
    #   0: h0         (B*S, D_PAD) f32   encoder token embeddings (lane-padded)
    #   1: bias_full  (H, B*S, B*S) f32  rel-pos bias + cross-batch -1e30 mask
    #   2: cross_mask (B, B*S)      f32  cross-attention batch mask
    #   3: d0         (B, D_PAD)    f32  decoder-start-token embedding
    #   4..: per encoder layer [ln1, wqkv, wo, ln2, wi, wo_ff]        x N_LAYERS
    #        enc_final_ln
    #        per decoder layer [ln1, wv_sa, wo_sa, ln2, wq_ca, wkv_ca,
    #                           wo_ca, ln3, wi, wo_ff]                x N_LAYERS
    #        dec_final_ln, lm_head
    #   -1: out       (B, 1) int32  greedy next-token ids
    o_ref = refs[-1]
    h_ref, bias_ref, cmask_ref, d0_ref = refs[:4]
    it = iter(refs[4:-1])

    bias_full = bias_ref[...]
    cross_mask = cmask_ref[...]
    h = h_ref[...]                                                # (B*S, D_PAD) f32

    # ---------------- encoder stack (unrolled) ----------------
    for _ in range(N_LAYERS):
        ln1, wqkv, wo, ln2, wi, wo_ff = _take(it, 6)
        xn = _bf(_rms(h, ln1[...]))
        h = h + _enc_attn(xn, wqkv[...], wo[...], bias_full, B, S)
        xn = _bf(_rms(h, ln2[...]))
        mid = jnp.maximum(
            jnp.dot(xn, wi[...], preferred_element_type=jnp.float32), 0.0)
        h = h + jnp.dot(_bf(mid), wo_ff[...], preferred_element_type=jnp.float32)

    (enc_ln,) = _take(it, 1)
    enc_bf = _bf(_rms(h, enc_ln[...]))                            # final enc LN, bf16 once
    # hoisted head-broadcast of the encoder output for all cross-attention layers
    enc_b = jnp.broadcast_to(enc_bf[None], (2 * N_HEADS, B * S, D_PAD))

    # ------------- decoder stack: single greedy step (unrolled) -------------
    d = d0_ref[...]                                               # (B, D_PAD) f32
    for _ in range(N_LAYERS):
        (ln1, wv_sa, wo_sa, ln2, wq_ca, wkv_ca,
         wo_ca, ln3, wi, wo_ff) = _take(it, 10)
        # self-attention at Sq = Sk = 1: softmax over one key == 1, so the
        # attention output == V; only the V and output projections matter.
        xn = _bf(_rms(d, ln1[...]))
        v_sa = jnp.dot(xn, wv_sa[...], preferred_element_type=jnp.float32)
        d = d + jnp.dot(_bf(v_sa), wo_sa[...], preferred_element_type=jnp.float32)
        # cross-attention over the encoder output
        xn = _bf(_rms(d, ln2[...]))
        d = d + _cross_attn(xn, enc_b, wq_ca[...], wkv_ca[...], wo_ca[...],
                            cross_mask, B, S)
        # FFN
        xn = _bf(_rms(d, ln3[...]))
        mid = jnp.maximum(
            jnp.dot(xn, wi[...], preferred_element_type=jnp.float32), 0.0)
        d = d + jnp.dot(_bf(mid), wo_ff[...], preferred_element_type=jnp.float32)

    # ------------- LM head: final RMSNorm + tied-embedding scale + argmax -------------
    dec_ln, lm_w = _take(it, 2)
    xn = _rms(d, dec_ln[...]) * (D_MODEL ** -0.5)
    logits = jnp.dot(_bf(xn), lm_w[...],
                     preferred_element_type=jnp.float32)          # (B, VOCAB) f32
    m = jnp.max(logits, axis=-1, keepdims=True)
    iota = jax.lax.broadcasted_iota(jnp.int32, logits.shape, 1)
    idx = jnp.min(jnp.where(logits == m, iota, VOCAB), axis=-1, keepdims=True)
    o_ref[...] = idx.astype(jnp.int32)                            # (B, 1)


# ---------------- plain-JAX glue ----------------
def _relative_position_bucket(rel_pos, bidirectional, num_buckets, max_distance):
    relative_buckets = jnp.zeros_like(rel_pos)
    if bidirectional:
        num_buckets //= 2
        relative_buckets += (rel_pos > 0).astype(jnp.int32) * num_buckets
        rel_pos = jnp.abs(rel_pos)
    else:
        rel_pos = -jnp.minimum(rel_pos, 0)
    max_exact = num_buckets // 2
    is_small = rel_pos < max_exact
    rel_large = max_exact + (
        jnp.log(rel_pos.astype(jnp.float32) / max_exact + 1e-9)
        / jnp.log(max_distance / max_exact)
        * (num_buckets - max_exact)
    ).astype(jnp.int32)
    rel_large = jnp.minimum(rel_large, num_buckets - 1)
    relative_buckets += jnp.where(is_small, rel_pos, rel_large)
    return relative_buckets


def compute_rel_bias(sq, sk, rel_emb, bidirectional):
    ctx = jnp.arange(sq)[:, None]
    mem = jnp.arange(sk)[None, :]
    buckets = _relative_position_bucket(mem - ctx, bidirectional,
                                        REL_BUCKETS, REL_MAX_DIST)
    vals = rel_emb[buckets]                      # (sq, sk, H)
    return jnp.transpose(vals, (2, 0, 1))        # (H, sq, sk)


# ---------------- parameters (deterministic synthetic) ----------------
def init_params(key):
    std = 0.02
    keys = iter(jax.random.split(key, 32))

    def nrm(shape):
        return std * jax.random.normal(next(keys), shape, jnp.float32)

    def padf(x, axis):
        """Zero-pad a D_MODEL-sized axis up to D_PAD (lane-dense layout)."""
        pads = [(0, 0)] * x.ndim
        pads[axis] = (0, D_PAD - x.shape[axis])
        return jnp.pad(x, pads)

    def ln():
        return padf(jnp.ones((1, D_MODEL), jnp.float32), 1)

    shared = nrm((VOCAB, D_MODEL))                                   # f32 embedding
    params = {
        "shared_pad": padf(shared, 1),                               # (V, D_PAD) f32
        "lm_head": padf(shared.T, 0).astype(jnp.bfloat16),           # tied, (D_PAD, V)
        "enc_rel_emb": nrm((REL_BUCKETS, N_HEADS)),
        # decoder self-attn rel-pos bias omitted: with a single decode position the
        # softmax over one key is identically 1 (bit-exact skip).
        "enc_final_ln": ln(),
        "dec_final_ln": ln(),
        "enc_layers": [],
        "dec_layers": [],
    }
    for _ in range(N_LAYERS):
        params["enc_layers"].append({
            "ln1": ln(),
            "wqkv": padf(nrm((3 * N_HEADS, D_MODEL, D_KV)), 1).astype(jnp.bfloat16),
            "wo": padf(nrm((N_HEADS, D_KV, D_MODEL)), 2).astype(jnp.bfloat16),
            "ln2": ln(),
            "wi": padf(nrm((D_MODEL, D_FF)), 0).astype(jnp.bfloat16),
            "wo_ff": padf(nrm((D_FF, D_MODEL)), 1).astype(jnp.bfloat16),
        })
        params["dec_layers"].append({
            "ln1": ln(),
            # self-attn wq/wk unused at decode step 0 (softmax over 1 key == 1)
            "wv_sa": padf(nrm((D_MODEL, HD)), 0).astype(jnp.bfloat16),
            "wo_sa": padf(nrm((HD, D_MODEL)), 1).astype(jnp.bfloat16),
            "ln2": ln(),
            "wq_ca": padf(nrm((N_HEADS, D_MODEL, D_KV)), 1).astype(jnp.bfloat16),
            "wkv_ca": padf(nrm((2 * N_HEADS, D_MODEL, D_KV)), 1).astype(jnp.bfloat16),
            "wo_ca": padf(nrm((N_HEADS, D_KV, D_MODEL)), 2).astype(jnp.bfloat16),
            "ln3": ln(),
            "wi": padf(nrm((D_MODEL, D_FF)), 0).astype(jnp.bfloat16),
            "wo_ff": padf(nrm((D_FF, D_MODEL)), 1).astype(jnp.bfloat16),
        })
    return params


# ---------------- forward == model.generate(inputs, max_new_tokens=1) ----------------
@jax.jit
def mask_predictor_forward(params, input_ids):
    B, S = input_ids.shape
    BS = B * S

    # encoder token embeddings (gather stays in plain JAX)
    h0 = params["shared_pad"][input_ids].reshape(BS, D_PAD)          # (B*S, D_PAD) f32

    # relative-position bias, expanded to the fused (B*S) token axis with an
    # additive -1e30 mask on cross-batch entries (softmax weight exactly 0).
    bias = compute_rel_bias(S, S, params["enc_rel_emb"], True)       # (H, S, S)
    bvec = jnp.repeat(jnp.arange(B), S)                               # (BS,)
    same = bvec[:, None] == bvec[None, :]                             # (BS, BS)
    bias_full = jnp.where(same[None], jnp.tile(bias, (1, B, B)),
                          -1e30).astype(jnp.float32)                  # (H, BS, BS)
    cross_mask = jnp.where(jnp.arange(B)[:, None] == bvec[None, :],
                           0.0, -1e30).astype(jnp.float32)            # (B, BS)

    # decoder start token (T5: decoder_start_token_id == pad == 0)
    dec_ids = jnp.zeros((B, 1), jnp.int32)
    d0 = jnp.broadcast_to(params["shared_pad"][0], (B, D_PAD))

    flat = [h0, bias_full, cross_mask, d0]
    for lyr in params["enc_layers"]:
        flat += [lyr["ln1"], lyr["wqkv"], lyr["wo"], lyr["ln2"],
                 lyr["wi"], lyr["wo_ff"]]
    flat.append(params["enc_final_ln"])
    for lyr in params["dec_layers"]:
        flat += [lyr["ln1"], lyr["wv_sa"], lyr["wo_sa"], lyr["ln2"],
                 lyr["wq_ca"], lyr["wkv_ca"], lyr["wo_ca"], lyr["ln3"],
                 lyr["wi"], lyr["wo_ff"]]
    flat += [params["dec_final_ln"], params["lm_head"]]

    kern = functools.partial(_forward_kernel, B=B, S=S)
    next_tok = pl.pallas_call(
        kern,
        out_shape=jax.ShapeDtypeStruct((B, 1), jnp.int32),
        grid=(1,),
        in_specs=[_full_spec(a.shape) for a in flat],
        out_specs=_full_spec((B, 1)),
        compiler_params=_ARB,
    )(*flat)

    # HF generate() output: [decoder_start_token, generated_token]
    return jnp.concatenate([dec_ids, next_tok], axis=1)               # (B, 2)


if __name__ == "__main__":
    key = jax.random.PRNGKey(0)
    k_param, k_data = jax.random.split(key)

    params = init_params(k_param)
    input_ids = jax.random.randint(k_data, (2, 8), 0, VOCAB, dtype=jnp.int32)

    out = mask_predictor_forward(params, input_ids)
    out = jax.block_until_ready(out)
    assert out.shape == (2, 2) and out.dtype == jnp.int32
    print("KERNEL_OK")
</pallas_src>

<mosaic_0001>
module attributes {stable_mosaic.version = 11 : i64} {
  func.func @_forward_kernel(%arg0: i32, %arg1: memref<16x128xf32, #tpu.memory_space<vmem>>, %arg2: memref<4x16x16xf32, #tpu.memory_space<vmem>>, %arg3: memref<2x16xf32, #tpu.memory_space<vmem>>, %arg4: memref<2x128xf32, #tpu.memory_space<vmem>>, %arg5: memref<1x128xf32, #tpu.memory_space<vmem>>, %arg6: memref<12x128x16xbf16, #tpu.memory_space<vmem>>, %arg7: memref<4x16x128xbf16, #tpu.memory_space<vmem>>, %arg8: memref<1x128xf32, #tpu.memory_space<vmem>>, %arg9: memref<128x128xbf16, #tpu.memory_space<vmem>>, %arg10: memref<128x128xbf16, #tpu.memory_space<vmem>>, %arg11: memref<1x128xf32, #tpu.memory_space<vmem>>, %arg12: memref<12x128x16xbf16, #tpu.memory_space<vmem>>, %arg13: memref<4x16x128xbf16, #tpu.memory_space<vmem>>, %arg14: memref<1x128xf32, #tpu.memory_space<vmem>>, %arg15: memref<128x128xbf16, #tpu.memory_space<vmem>>, %arg16: memref<128x128xbf16, #tpu.memory_space<vmem>>, %arg17: memref<1x128xf32, #tpu.memory_space<vmem>>, %arg18: memref<1x128xf32, #tpu.memory_space<vmem>>, %arg19: memref<128x64xbf16, #tpu.memory_space<vmem>>, %arg20: memref<64x128xbf16, #tpu.memory_space<vmem>>, %arg21: memref<1x128xf32, #tpu.memory_space<vmem>>, %arg22: memref<4x128x16xbf16, #tpu.memory_space<vmem>>, %arg23: memref<8x128x16xbf16, #tpu.memory_space<vmem>>, %arg24: memref<4x16x128xbf16, #tpu.memory_space<vmem>>, %arg25: memref<1x128xf32, #tpu.memory_space<vmem>>, %arg26: memref<128x128xbf16, #tpu.memory_space<vmem>>, %arg27: memref<128x128xbf16, #tpu.memory_space<vmem>>, %arg28: memref<1x128xf32, #tpu.memory_space<vmem>>, %arg29: memref<128x64xbf16, #tpu.memory_space<vmem>>, %arg30: memref<64x128xbf16, #tpu.memory_space<vmem>>, %arg31: memref<1x128xf32, #tpu.memory_space<vmem>>, %arg32: memref<4x128x16xbf16, #tpu.memory_space<vmem>>, %arg33: memref<8x128x16xbf16, #tpu.memory_space<vmem>>, %arg34: memref<4x16x128xbf16, #tpu.memory_space<vmem>>, %arg35: memref<1x128xf32, #tpu.memory_space<vmem>>, %arg36: memref<128x128xbf16, #tpu.memory_space<vmem>>, %arg37: memref<128x128xbf16, #tpu.memory_space<vmem>>, %arg38: memref<1x128xf32, #tpu.memory_space<vmem>>, %arg39: memref<128x512xbf16, #tpu.memory_space<vmem>>, %arg40: memref<2x1xi32, #tpu.memory_space<vmem>>) attributes {dimension_semantics = [#tpu.dimension_semantics<arbitrary>], iteration_bounds = array<i64: 1>, scalar_prefetch = 0 : i64, scratch_operands = 0 : i64, tpu.core_type = #tpu.core_type<tc>, window_params = [{pipeline_mode = #tpu.pipeline_mode<synchronous>, transform_indices = @transform_0, window_bounds = array<i64: 16, 128>}, {pipeline_mode = #tpu.pipeline_mode<synchronous>, transform_indices = @transform_1, window_bounds = array<i64: 4, 16, 16>}, {pipeline_mode = #tpu.pipeline_mode<synchronous>, transform_indices = @transform_2, window_bounds = array<i64: 2, 16>}, {pipeline_mode = #tpu.pipeline_mode<synchronous>, transform_indices = @transform_3, window_bounds = array<i64: 2, 128>}, {pipeline_mode = #tpu.pipeline_mode<synchronous>, transform_indices = @transform_4, window_bounds = array<i64: 1, 128>}, {pipeline_mode = #tpu.pipeline_mode<synchronous>, transform_indices = @transform_5, window_bounds = array<i64: 12, 128, 16>}, {pipeline_mode = #tpu.pipeline_mode<synchronous>, transform_indices = @transform_6, window_bounds = array<i64: 4, 16, 128>}, {pipeline_mode = #tpu.pipeline_mode<synchronous>, transform_indices = @transform_7, window_bounds = array<i64: 1, 128>}, {pipeline_mode = #tpu.pipeline_mode<synchronous>, transform_indices = @transform_8, window_bounds = array<i64: 128, 128>}, {pipeline_mode = #tpu.pipeline_mode<synchronous>, transform_indices = @transform_9, window_bounds = array<i64: 128, 128>}, {pipeline_mode = #tpu.pipeline_mode<synchronous>, transform_indices = @transform_10, window_bounds = array<i64: 1, 128>}, {pipeline_mode = #tpu.pipeline_mode<synchronous>, transform_indices = @transform_11, window_bounds = array<i64: 12, 128, 16>}, {pipeline_mode = #tpu.pipeline_mode<synchronous>, transform_indices = @transform_12, window_bounds = array<i64: 4, 16, 128>}, {pipeline_mode = #tpu.pipeline_mode<synchronous>, transform_indices = @transform_13, window_bounds = array<i64: 1, 128>}, {pipeline_mode = #tpu.pipeline_mode<synchronous>, transform_indices = @transform_14, window_bounds = array<i64: 128, 128>}, {pipeline_mode = #tpu.pipeline_mode<synchronous>, transform_indices = @transform_15, window_bounds = array<i64: 128, 128>}, {pipeline_mode = #tpu.pipeline_mode<synchronous>, transform_indices = @transform_16, window_bounds = array<i64: 1, 128>}, {pipeline_mode = #tpu.pipeline_mode<synchronous>, transform_indices = @transform_17, window_bounds = array<i64: 1, 128>}, {pipeline_mode = #tpu.pipeline_mode<synchronous>, transform_indices = @transform_18, window_bounds = array<i64: 128, 64>}, {pipeline_mode = #tpu.pipeline_mode<synchronous>, transform_indices = @transform_19, window_bounds = array<i64: 64, 128>}, {pipeline_mode = #tpu.pipeline_mode<synchronous>, transform_indices = @transform_20, window_bounds = array<i64: 1, 128>}, {pipeline_mode = #tpu.pipeline_mode<synchronous>, transform_indices = @transform_21, window_bounds = array<i64: 4, 128, 16>}, {pipeline_mode = #tpu.pipeline_mode<synchronous>, transform_indices = @transform_22, window_bounds = array<i64: 8, 128, 16>}, {pipeline_mode = #tpu.pipeline_mode<synchronous>, transform_indices = @transform_23, window_bounds = array<i64: 4, 16, 128>}, {pipeline_mode = #tpu.pipeline_mode<synchronous>, transform_indices = @transform_24, window_bounds = array<i64: 1, 128>}, {pipeline_mode = #tpu.pipeline_mode<synchronous>, transform_indices = @transform_25, window_bounds = array<i64: 128, 128>}, {pipeline_mode = #tpu.pipeline_mode<synchronous>, transform_indices = @transform_26, window_bounds = array<i64: 128, 128>}, {pipeline_mode = #tpu.pipeline_mode<synchronous>, transform_indices = @transform_27, window_bounds = array<i64: 1, 128>}, {pipeline_mode = #tpu.pipeline_mode<synchronous>, transform_indices = @transform_28, window_bounds = array<i64: 128, 64>}, {pipeline_mode = #tpu.pipeline_mode<synchronous>, transform_indices = @transform_29, window_bounds = array<i64: 64, 128>}, {pipeline_mode = #tpu.pipeline_mode<synchronous>, transform_indices = @transform_30, window_bounds = array<i64: 1, 128>}, {pipeline_mode = #tpu.pipeline_mode<synchronous>, transform_indices = @transform_31, window_bounds = array<i64: 4, 128, 16>}, {pipeline_mode = #tpu.pipeline_mode<synchronous>, transform_indices = @transform_32, window_bounds = array<i64: 8, 128, 16>}, {pipeline_mode = #tpu.pipeline_mode<synchronous>, transform_indices = @transform_33, window_bounds = array<i64: 4, 16, 128>}, {pipeline_mode = #tpu.pipeline_mode<synchronous>, transform_indices = @transform_34, window_bounds = array<i64: 1, 128>}, {pipeline_mode = #tpu.pipeline_mode<synchronous>, transform_indices = @transform_35, window_bounds = array<i64: 128, 128>}, {pipeline_mode = #tpu.pipeline_mode<synchronous>, transform_indices = @transform_36, window_bounds = array<i64: 128, 128>}, {pipeline_mode = #tpu.pipeline_mode<synchronous>, transform_indices = @transform_37, window_bounds = array<i64: 1, 128>}, {pipeline_mode = #tpu.pipeline_mode<synchronous>, transform_indices = @transform_38, window_bounds = array<i64: 128, 512>}, {pipeline_mode = #tpu.pipeline_mode<synchronous>, transform_indices = @transform_39, window_bounds = array<i64: 2, 1>}]} {
    %c0 = arith.constant 0 : index
    %c0_0 = arith.constant 0 : index
    %c0_1 = arith.constant 0 : index
    %0 = vector.load %arg2[%c0, %c0_0, %c0_1] : memref<4x16x16xf32, #tpu.memory_space<vmem>>, vector<4x16x16xf32>
    %c0_2 = arith.constant 0 : index
    %c0_3 = arith.constant 0 : index
    %1 = vector.load %arg3[%c0_2, %c0_3] : memref<2x16xf32, #tpu.memory_space<vmem>>, vector<2x16xf32>
    %c0_4 = arith.constant 0 : index
    %c0_5 = arith.constant 0 : index
    %2 = vector.load %arg1[%c0_4, %c0_5] : memref<16x128xf32, #tpu.memory_space<vmem>>, vector<16x128xf32>
    %c0_6 = arith.constant 0 : index
    %c0_7 = arith.constant 0 : index
    %3 = vector.load %arg5[%c0_6, %c0_7] : memref<1x128xf32, #tpu.memory_space<vmem>>, vector<1x128xf32>
    %4 = arith.mulf %2, %2 : vector<16x128xf32>
    %cst = arith.constant dense<0.000000e+00> : vector<16xf32>
    %5 = vector.multi_reduction <add>, %4, %cst [1] : vector<16x128xf32> to vector<16xf32>
    %6 = vector.shape_cast %5 : vector<16xf32> to vector<16x1xf32>
    %cst_8 = arith.constant 1.562500e-02 : f32
    %7 = vector.broadcast %cst_8 : f32 to vector<16x1xf32>
    %8 = arith.mulf %6, %7 : vector<16x1xf32>
    %cst_9 = arith.constant 9.99999997E-7 : f32
    %9 = vector.broadcast %cst_9 : f32 to vector<16x1xf32>
    %10 = arith.addf %8, %9 : vector<16x1xf32>
    %11 = math.rsqrt %10 : vector<16x1xf32>
    %12 = vector.broadcast %11 : vector<16x1xf32> to vector<16x128xf32>
    %13 = arith.mulf %2, %12 : vector<16x128xf32>
    %14 = vector.broadcast %3 : vector<1x128xf32> to vector<16x128xf32>
    %15 = arith.mulf %13, %14 : vector<16x128xf32>
    %16 = arith.truncf %15 : vector<16x128xf32> to vector<16x128xbf16>
    %c0_10 = arith.constant 0 : index
    %c0_11 = arith.constant 0 : index
    %c0_12 = arith.constant 0 : index
    %17 = vector.load %arg6[%c0_10, %c0_11, %c0_12] : memref<12x128x16xbf16, #tpu.memory_space<vmem>>, vector<12x128x16xbf16>
    %c0_13 = arith.constant 0 : index
    %c0_14 = arith.constant 0 : index
    %c0_15 = arith.constant 0 : index
    %18 = vector.load %arg7[%c0_13, %c0_14, %c0_15] : memref<4x16x128xbf16, #tpu.memory_space<vmem>>, vector<4x16x128xbf16>
    %19 = vector.shape_cast %16 : vector<16x128xbf16> to vector<1x16x128xbf16>
    %20 = vector.shape_cast %19 : vector<1x16x128xbf16> to vector<1x16x128xbf16>
    %21 = vector.broadcast %20 : vector<1x16x128xbf16> to vector<12x16x128xbf16>
    "tpu.trace_start"() <{level = 10 : i32, message = "nmd,ndk->nmk"}> : () -> ()
    %cst_16 = arith.constant dense<0.000000e+00> : vector<12x16x16xf32>
    %22 = tpu.matmul %21, %17, %cst_16 {dimension_numbers = #tpu.dot_dimension_numbers<[2], [1], [1], [2], [0, 0, 0, 1, 1, 2], [0], [0]>} : vector<12x16x128xbf16>, vector<12x128x16xbf16>, vector<12x16x16xf32> -> vector<12x16x16xf32>
    "tpu.trace_stop"() : () -> ()
    %23 = vector.extract_strided_slice %22 {offsets = [0, 0, 0], sizes = [4, 16, 16], strides = [1, 1, 1]} : vector<12x16x16xf32> to vector<4x16x16xf32>
    %24 = arith.truncf %23 : vector<4x16x16xf32> to vector<4x16x16xbf16>
    %25 = vector.extract_strided_slice %22 {offsets = [4, 0, 0], sizes = [4, 16, 16], strides = [1, 1, 1]} : vector<12x16x16xf32> to vector<4x16x16xf32>
    %26 = arith.truncf %25 : vector<4x16x16xf32> to vector<4x16x16xbf16>
    %27 = vector.extract_strided_slice %22 {offsets = [8, 0, 0], sizes = [4, 16, 16], strides = [1, 1, 1]} : vector<12x16x16xf32> to vector<4x16x16xf32>
    %28 = arith.truncf %27 : vector<4x16x16xf32> to vector<4x16x16xbf16>
    "tpu.trace_start"() <{level = 10 : i32, message = "nmd,npd->nmp"}> : () -> ()
    %cst_17 = arith.constant dense<0.000000e+00> : vector<4x16x16xf32>
    %29 = tpu.matmul %24, %26, %cst_17 {dimension_numbers = #tpu.dot_dimension_numbers<[2], [2], [1], [1], [0, 0, 0, 1, 1, 1], [0], [0]>} : vector<4x16x16xbf16>, vector<4x16x16xbf16>, vector<4x16x16xf32> -> vector<4x16x16xf32>
    "tpu.trace_stop"() : () -> ()
    %30 = arith.addf %29, %0 : vector<4x16x16xf32>
    %cst_18 = arith.constant dense<0xFF800000> : vector<4x16xf32>
    %31 = vector.multi_reduction <maximumf>, %30, %cst_18 [2] : vector<4x16x16xf32> to vector<4x16xf32>
    %32 = vector.shape_cast %31 : vector<4x16xf32> to vector<4x16x1xf32>
    %33 = vector.broadcast %32 : vector<4x16x1xf32> to vector<4x16x16xf32>
    %34 = arith.subf %30, %33 : vector<4x16x16xf32>
    %35 = math.exp %34 : vector<4x16x16xf32>
    %cst_19 = arith.constant dense<0.000000e+00> : vector<4x16xf32>
    %36 = vector.multi_reduction <add>, %35, %cst_19 [2] : vector<4x16x16xf32> to vector<4x16xf32>
    %37 = vector.shape_cast %36 : vector<4x16xf32> to vector<4x16x1xf32>
    %38 = vector.broadcast %37 : vector<4x16x1xf32> to vector<4x16x16xf32>
    %39 = arith.divf %35, %38 : vector<4x16x16xf32>
    %40 = arith.truncf %39 : vector<4x16x16xf32> to vector<4x16x16xbf16>
    "tpu.trace_start"() <{level = 10 : i32, message = "nmp,npd->nmd"}> : () -> ()
    %cst_20 = arith.constant dense<0.000000e+00> : vector<4x16x16xf32>
    %41 = tpu.matmul %40, %28, %cst_20 {dimension_numbers = #tpu.dot_dimension_numbers<[2], [1], [1], [2], [0, 0, 0, 1, 1, 2], [0], [0]>} : vector<4x16x16xbf16>, vector<4x16x16xbf16>, vector<4x16x16xf32> -> vector<4x16x16xf32>
    "tpu.trace_stop"() : () -> ()
    %42 = arith.truncf %41 : vector<4x16x16xf32> to vector<4x16x16xbf16>
    "tpu.trace_start"() <{level = 10 : i32, message = "nmd,nde->nme"}> : () -> ()
    %cst_21 = arith.constant dense<0.000000e+00> : vector<4x16x128xf32>
    %43 = tpu.matmul %42, %18, %cst_21 {dimension_numbers = #tpu.dot_dimension_numbers<[2], [1], [1], [2], [0, 0, 0, 1, 1, 2], [0], [0]>} : vector<4x16x16xbf16>, vector<4x16x128xbf16>, vector<4x16x128xf32> -> vector<4x16x128xf32>
    "tpu.trace_stop"() : () -> ()
    %44 = vector.extract_strided_slice %43 {offsets = [0, 0, 0], sizes = [1, 16, 128], strides = [1, 1, 1]} : vector<4x16x128xf32> to vector<1x16x128xf32>
    %45 = vector.shape_cast %44 : vector<1x16x128xf32> to vector<16x128xf32>
    %46 = vector.extract_strided_slice %43 {offsets = [1, 0, 0], sizes = [1, 16, 128], strides = [1, 1, 1]} : vector<4x16x128xf32> to vector<1x16x128xf32>
    %47 = vector.shape_cast %46 : vector<1x16x128xf32> to vector<16x128xf32>
    %48 = arith.addf %45, %47 : vector<16x128xf32>
    %49 = vector.extract_strided_slice %43 {offsets = [2, 0, 0], sizes = [1, 16, 128], strides = [1, 1, 1]} : vector<4x16x128xf32> to vector<1x16x128xf32>
    %50 = vector.shape_cast %49 : vector<1x16x128xf32> to vector<16x128xf32>
    %51 = arith.addf %48, %50 : vector<16x128xf32>
    %52 = vector.extract_strided_slice %43 {offsets = [3, 0, 0], sizes = [1, 16, 128], strides = [1, 1, 1]} : vector<4x16x128xf32> to vector<1x16x128xf32>
    %53 = vector.shape_cast %52 : vector<1x16x128xf32> to vector<16x128xf32>
    %54 = arith.addf %51, %53 : vector<16x128xf32>
    %55 = arith.addf %2, %54 : vector<16x128xf32>
    %c0_22 = arith.constant 0 : index
    %c0_23 = arith.constant 0 : index
    %56 = vector.load %arg8[%c0_22, %c0_23] : memref<1x128xf32, #tpu.memory_space<vmem>>, vector<1x128xf32>
    %57 = arith.mulf %55, %55 : vector<16x128xf32>
    %cst_24 = arith.constant dense<0.000000e+00> : vector<16xf32>
    %58 = vector.multi_reduction <add>, %57, %cst_24 [1] : vector<16x128xf32> to vector<16xf32>
    %59 = vector.shape_cast %58 : vector<16xf32> to vector<16x1xf32>
    %cst_25 = arith.constant 1.562500e-02 : f32
    %60 = vector.broadcast %cst_25 : f32 to vector<16x1xf32>
    %61 = arith.mulf %59, %60 : vector<16x1xf32>
    %cst_26 = arith.constant 9.99999997E-7 : f32
    %62 = vector.broadcast %cst_26 : f32 to vector<16x1xf32>
    %63 = arith.addf %61, %62 : vector<16x1xf32>
    %64 = math.rsqrt %63 : vector<16x1xf32>
    %65 = vector.broadcast %64 : vector<16x1xf32> to vector<16x128xf32>
    %66 = arith.mulf %55, %65 : vector<16x128xf32>
    %67 = vector.broadcast %56 : vector<1x128xf32> to vector<16x128xf32>
    %68 = arith.mulf %66, %67 : vector<16x128xf32>
    %69 = arith.truncf %68 : vector<16x128xf32> to vector<16x128xbf16>
    %c0_27 = arith.constant 0 : index
    %c0_28 = arith.constant 0 : index
    %70 = vector.load %arg9[%c0_27, %c0_28] : memref<128x128xbf16, #tpu.memory_space<vmem>>, vector<128x128xbf16>
    %cst_29 = arith.constant dense<0.000000e+00> : vector<16x128xf32>
    %71 = tpu.matmul %69, %70, %cst_29 {dimension_numbers = #tpu.dot_dimension_numbers<[1], [0], [0], [1], [0, 0, 1, 1], [], []>} : vector<16x128xbf16>, vector<128x128xbf16>, vector<16x128xf32> -> vector<16x128xf32>
    %cst_30 = arith.constant 0.000000e+00 : f32
    %72 = vector.broadcast %cst_30 : f32 to vector<16x128xf32>
    %73 = arith.maximumf %71, %72 : vector<16x128xf32>
    %74 = arith.truncf %73 : vector<16x128xf32> to vector<16x128xbf16>
    %c0_31 = arith.constant 0 : index
    %c0_32 = arith.constant 0 : index
    %75 = vector.load %arg10[%c0_31, %c0_32] : memref<128x128xbf16, #tpu.memory_space<vmem>>, vector<128x128xbf16>
    %cst_33 = arith.constant dense<0.000000e+00> : vector<16x128xf32>
    %76 = tpu.matmul %74, %75, %cst_33 {dimension_numbers = #tpu.dot_dimension_numbers<[1], [0], [0], [1], [0, 0, 1, 1], [], []>} : vector<16x128xbf16>, vector<128x128xbf16>, vector<16x128xf32> -> vector<16x128xf32>
    %77 = arith.addf %55, %76 : vector<16x128xf32>
    %c0_34 = arith.constant 0 : index
    %c0_35 = arith.constant 0 : index
    %78 = vector.load %arg11[%c0_34, %c0_35] : memref<1x128xf32, #tpu.memory_space<vmem>>, vector<1x128xf32>
    %79 = arith.mulf %77, %77 : vector<16x128xf32>
    %cst_36 = arith.constant dense<0.000000e+00> : vector<16xf32>
    %80 = vector.multi_reduction <add>, %79, %cst_36 [1] : vector<16x128xf32> to vector<16xf32>
    %81 = vector.shape_cast %80 : vector<16xf32> to vector<16x1xf32>
    %cst_37 = arith.constant 1.562500e-02 : f32
    %82 = vector.broadcast %cst_37 : f32 to vector<16x1xf32>
    %83 = arith.mulf %81, %82 : vector<16x1xf32>
    %cst_38 = arith.constant 9.99999997E-7 : f32
    %84 = vector.broadcast %cst_38 : f32 to vector<16x1xf32>
    %85 = arith.addf %83, %84 : vector<16x1xf32>
    %86 = math.rsqrt %85 : vector<16x1xf32>
    %87 = vector.broadcast %86 : vector<16x1xf32> to vector<16x128xf32>
    %88 = arith.mulf %77, %87 : vector<16x128xf32>
    %89 = vector.broadcast %78 : vector<1x128xf32> to vector<16x128xf32>
    %90 = arith.mulf %88, %89 : vector<16x128xf32>
    %91 = arith.truncf %90 : vector<16x128xf32> to vector<16x128xbf16>
    %c0_39 = arith.constant 0 : index
    %c0_40 = arith.constant 0 : index
    %c0_41 = arith.constant 0 : index
    %92 = vector.load %arg12[%c0_39, %c0_40, %c0_41] : memref<12x128x16xbf16, #tpu.memory_space<vmem>>, vector<12x128x16xbf16>
    %c0_42 = arith.constant 0 : index
    %c0_43 = arith.constant 0 : index
    %c0_44 = arith.constant 0 : index
    %93 = vector.load %arg13[%c0_42, %c0_43, %c0_44] : memref<4x16x128xbf16, #tpu.memory_space<vmem>>, vector<4x16x128xbf16>
    %94 = vector.shape_cast %91 : vector<16x128xbf16> to vector<1x16x128xbf16>
    %95 = vector.shape_cast %94 : vector<1x16x128xbf16> to vector<1x16x128xbf16>
    %96 = vector.broadcast %95 : vector<1x16x128xbf16> to vector<12x16x128xbf16>
    "tpu.trace_start"() <{level = 10 : i32, message = "nmd,ndk->nmk"}> : () -> ()
    %cst_45 = arith.constant dense<0.000000e+00> : vector<12x16x16xf32>
    %97 = tpu.matmul %96, %92, %cst_45 {dimension_numbers = #tpu.dot_dimension_numbers<[2], [1], [1], [2], [0, 0, 0, 1, 1, 2], [0], [0]>} : vector<12x16x128xbf16>, vector<12x128x16xbf16>, vector<12x16x16xf32> -> vector<12x16x16xf32>
    "tpu.trace_stop"() : () -> ()
    %98 = vector.extract_strided_slice %97 {offsets = [0, 0, 0], sizes = [4, 16, 16], strides = [1, 1, 1]} : vector<12x16x16xf32> to vector<4x16x16xf32>
    %99 = arith.truncf %98 : vector<4x16x16xf32> to vector<4x16x16xbf16>
    %100 = vector.extract_strided_slice %97 {offsets = [4, 0, 0], sizes = [4, 16, 16], strides = [1, 1, 1]} : vector<12x16x16xf32> to vector<4x16x16xf32>
    %101 = arith.truncf %100 : vector<4x16x16xf32> to vector<4x16x16xbf16>
    %102 = vector.extract_strided_slice %97 {offsets = [8, 0, 0], sizes = [4, 16, 16], strides = [1, 1, 1]} : vector<12x16x16xf32> to vector<4x16x16xf32>
    %103 = arith.truncf %102 : vector<4x16x16xf32> to vector<4x16x16xbf16>
    "tpu.trace_start"() <{level = 10 : i32, message = "nmd,npd->nmp"}> : () -> ()
    %cst_46 = arith.constant dense<0.000000e+00> : vector<4x16x16xf32>
    %104 = tpu.matmul %99, %101, %cst_46 {dimension_numbers = #tpu.dot_dimension_numbers<[2], [2], [1], [1], [0, 0, 0, 1, 1, 1], [0], [0]>} : vector<4x16x16xbf16>, vector<4x16x16xbf16>, vector<4x16x16xf32> -> vector<4x16x16xf32>
    "tpu.trace_stop"() : () -> ()
    %105 = arith.addf %104, %0 : vector<4x16x16xf32>
    %cst_47 = arith.constant dense<0xFF800000> : vector<4x16xf32>
    %106 = vector.multi_reduction <maximumf>, %105, %cst_47 [2] : vector<4x16x16xf32> to vector<4x16xf32>
    %107 = vector.shape_cast %106 : vector<4x16xf32> to vector<4x16x1xf32>
    %108 = vector.broadcast %107 : vector<4x16x1xf32> to vector<4x16x16xf32>
    %109 = arith.subf %105, %108 : vector<4x16x16xf32>
    %110 = math.exp %109 : vector<4x16x16xf32>
    %cst_48 = arith.constant dense<0.000000e+00> : vector<4x16xf32>
    %111 = vector.multi_reduction <add>, %110, %cst_48 [2] : vector<4x16x16xf32> to vector<4x16xf32>
    %112 = vector.shape_cast %111 : vector<4x16xf32> to vector<4x16x1xf32>
    %113 = vector.broadcast %112 : vector<4x16x1xf32> to vector<4x16x16xf32>
    %114 = arith.divf %110, %113 : vector<4x16x16xf32>
    %115 = arith.truncf %114 : vector<4x16x16xf32> to vector<4x16x16xbf16>
    "tpu.trace_start"() <{level = 10 : i32, message = "nmp,npd->nmd"}> : () -> ()
    %cst_49 = arith.constant dense<0.000000e+00> : vector<4x16x16xf32>
    %116 = tpu.matmul %115, %103, %cst_49 {dimension_numbers = #tpu.dot_dimension_numbers<[2], [1], [1], [2], [0, 0, 0, 1, 1, 2], [0], [0]>} : vector<4x16x16xbf16>, vector<4x16x16xbf16>, vector<4x16x16xf32> -> vector<4x16x16xf32>
    "tpu.trace_stop"() : () -> ()
    %117 = arith.truncf %116 : vector<4x16x16xf32> to vector<4x16x16xbf16>
    "tpu.trace_start"() <{level = 10 : i32, message = "nmd,nde->nme"}> : () -> ()
    %cst_50 = arith.constant dense<0.000000e+00> : vector<4x16x128xf32>
    %118 = tpu.matmul %117, %93, %cst_50 {dimension_numbers = #tpu.dot_dimension_numbers<[2], [1], [1], [2], [0, 0, 0, 1, 1, 2], [0], [0]>} : vector<4x16x16xbf16>, vector<4x16x128xbf16>, vector<4x16x128xf32> -> vector<4x16x128xf32>
    "tpu.trace_stop"() : () -> ()
    %119 = vector.extract_strided_slice %118 {offsets = [0, 0, 0], sizes = [1, 16, 128], strides = [1, 1, 1]} : vector<4x16x128xf32> to vector<1x16x128xf32>
    %120 = vector.shape_cast %119 : vector<1x16x128xf32> to vector<16x128xf32>
    %121 = vector.extract_strided_slice %118 {offsets = [1, 0, 0], sizes = [1, 16, 128], strides = [1, 1, 1]} : vector<4x16x128xf32> to vector<1x16x128xf32>
    %122 = vector.shape_cast %121 : vector<1x16x128xf32> to vector<16x128xf32>
    %123 = arith.addf %120, %122 : vector<16x128xf32>
    %124 = vector.extract_strided_slice %118 {offsets = [2, 0, 0], sizes = [1, 16, 128], strides = [1, 1, 1]} : vector<4x16x128xf32> to vector<1x16x128xf32>
    %125 = vector.shape_cast %124 : vector<1x16x128xf32> to vector<16x128xf32>
    %126 = arith.addf %123, %125 : vector<16x128xf32>
    %127 = vector.extract_strided_slice %118 {offsets = [3, 0, 0], sizes = [1, 16, 128], strides = [1, 1, 1]} : vector<4x16x128xf32> to vector<1x16x128xf32>
    %128 = vector.shape_cast %127 : vector<1x16x128xf32> to vector<16x128xf32>
    %129 = arith.addf %126, %128 : vector<16x128xf32>
    %130 = arith.addf %77, %129 : vector<16x128xf32>
    %c0_51 = arith.constant 0 : index
    %c0_52 = arith.constant 0 : index
    %131 = vector.load %arg14[%c0_51, %c0_52] : memref<1x128xf32, #tpu.memory_space<vmem>>, vector<1x128xf32>
    %132 = arith.mulf %130, %130 : vector<16x128xf32>
    %cst_53 = arith.constant dense<0.000000e+00> : vector<16xf32>
    %133 = vector.multi_reduction <add>, %132, %cst_53 [1] : vector<16x128xf32> to vector<16xf32>
    %134 = vector.shape_cast %133 : vector<16xf32> to vector<16x1xf32>
    %cst_54 = arith.constant 1.562500e-02 : f32
    %135 = vector.broadcast %cst_54 : f32 to vector<16x1xf32>
    %136 = arith.mulf %134, %135 : vector<16x1xf32>
    %cst_55 = arith.constant 9.99999997E-7 : f32
    %137 = vector.broadcast %cst_55 : f32 to vector<16x1xf32>
    %138 = arith.addf %136, %137 : vector<16x1xf32>
    %139 = math.rsqrt %138 : vector<16x1xf32>
    %140 = vector.broadcast %139 : vector<16x1xf32> to vector<16x128xf32>
    %141 = arith.mulf %130, %140 : vector<16x128xf32>
    %142 = vector.broadcast %131 : vector<1x128xf32> to vector<16x128xf32>
    %143 = arith.mulf %141, %142 : vector<16x128xf32>
    %144 = arith.truncf %143 : vector<16x128xf32> to vector<16x128xbf16>
    %c0_56 = arith.constant 0 : index
    %c0_57 = arith.constant 0 : index
    %145 = vector.load %arg15[%c0_56, %c0_57] : memref<128x128xbf16, #tpu.memory_space<vmem>>, vector<128x128xbf16>
    %cst_58 = arith.constant dense<0.000000e+00> : vector<16x128xf32>
    %146 = tpu.matmul %144, %145, %cst_58 {dimension_numbers = #tpu.dot_dimension_numbers<[1], [0], [0], [1], [0, 0, 1, 1], [], []>} : vector<16x128xbf16>, vector<128x128xbf16>, vector<16x128xf32> -> vector<16x128xf32>
    %cst_59 = arith.constant 0.000000e+00 : f32
    %147 = vector.broadcast %cst_59 : f32 to vector<16x128xf32>
    %148 = arith.maximumf %146, %147 : vector<16x128xf32>
    %149 = arith.truncf %148 : vector<16x128xf32> to vector<16x128xbf16>
    %c0_60 = arith.constant 0 : index
    %c0_61 = arith.constant 0 : index
    %150 = vector.load %arg16[%c0_60, %c0_61] : memref<128x128xbf16, #tpu.memory_space<vmem>>, vector<128x128xbf16>
    %cst_62 = arith.constant dense<0.000000e+00> : vector<16x128xf32>
    %151 = tpu.matmul %149, %150, %cst_62 {dimension_numbers = #tpu.dot_dimension_numbers<[1], [0], [0], [1], [0, 0, 1, 1], [], []>} : vector<16x128xbf16>, vector<128x128xbf16>, vector<16x128xf32> -> vector<16x128xf32>
    %152 = arith.addf %130, %151 : vector<16x128xf32>
    %c0_63 = arith.constant 0 : index
    %c0_64 = arith.constant 0 : index
    %153 = vector.load %arg17[%c0_63, %c0_64] : memref<1x128xf32, #tpu.memory_space<vmem>>, vector<1x128xf32>
    %154 = arith.mulf %152, %152 : vector<16x128xf32>
    %cst_65 = arith.constant dense<0.000000e+00> : vector<16xf32>
    %155 = vector.multi_reduction <add>, %154, %cst_65 [1] : vector<16x128xf32> to vector<16xf32>
    %156 = vector.shape_cast %155 : vector<16xf32> to vector<16x1xf32>
    %cst_66 = arith.constant 1.562500e-02 : f32
    %157 = vector.broadcast %cst_66 : f32 to vector<16x1xf32>
    %158 = arith.mulf %156, %157 : vector<16x1xf32>
    %cst_67 = arith.constant 9.99999997E-7 : f32
    %159 = vector.broadcast %cst_67 : f32 to vector<16x1xf32>
    %160 = arith.addf %158, %159 : vector<16x1xf32>
    %161 = math.rsqrt %160 : vector<16x1xf32>
    %162 = vector.broadcast %161 : vector<16x1xf32> to vector<16x128xf32>
    %163 = arith.mulf %152, %162 : vector<16x128xf32>
    %164 = vector.broadcast %153 : vector<1x128xf32> to vector<16x128xf32>
    %165 = arith.mulf %163, %164 : vector<16x128xf32>
    %166 = arith.truncf %165 : vector<16x128xf32> to vector<16x128xbf16>
    %167 = vector.shape_cast %166 : vector<16x128xbf16> to vector<1x16x128xbf16>
    %168 = vector.shape_cast %167 : vector<1x16x128xbf16> to vector<1x16x128xbf16>
    %169 = vector.broadcast %168 : vector<1x16x128xbf16> to vector<8x16x128xbf16>
    %c0_68 = arith.constant 0 : index
    %c0_69 = arith.constant 0 : index
    %170 = vector.load %arg4[%c0_68, %c0_69] : memref<2x128xf32, #tpu.memory_space<vmem>>, vector<2x128xf32>
    %c0_70 = arith.constant 0 : index
    %c0_71 = arith.constant 0 : index
    %171 = vector.load %arg18[%c0_70, %c0_71] : memref<1x128xf32, #tpu.memory_space<vmem>>, vector<1x128xf32>
    %172 = arith.mulf %170, %170 : vector<2x128xf32>
    %cst_72 = arith.constant dense<0.000000e+00> : vector<2xf32>
    %173 = vector.multi_reduction <add>, %172, %cst_72 [1] : vector<2x128xf32> to vector<2xf32>
    %174 = vector.shape_cast %173 : vector<2xf32> to vector<2x1xf32>
    %cst_73 = arith.constant 1.562500e-02 : f32
    %175 = vector.broadcast %cst_73 : f32 to vector<2x1xf32>
    %176 = arith.mulf %174, %175 : vector<2x1xf32>
    %cst_74 = arith.constant 9.99999997E-7 : f32
    %177 = vector.broadcast %cst_74 : f32 to vector<2x1xf32>
    %178 = arith.addf %176, %177 : vector<2x1xf32>
    %179 = math.rsqrt %178 : vector<2x1xf32>
    %180 = vector.broadcast %179 : vector<2x1xf32> to vector<2x128xf32>
    %181 = arith.mulf %170, %180 : vector<2x128xf32>
    %182 = vector.broadcast %171 : vector<1x128xf32> to vector<2x128xf32>
    %183 = arith.mulf %181, %182 : vector<2x128xf32>
    %184 = arith.truncf %183 : vector<2x128xf32> to vector<2x128xbf16>
    %c0_75 = arith.constant 0 : index
    %c0_76 = arith.constant 0 : index
    %185 = vector.load %arg19[%c0_75, %c0_76] : memref<128x64xbf16, #tpu.memory_space<vmem>>, vector<128x64xbf16>
    %cst_77 = arith.constant dense<0.000000e+00> : vector<2x64xf32>
    %186 = tpu.matmul %184, %185, %cst_77 {dimension_numbers = #tpu.dot_dimension_numbers<[1], [0], [0], [1], [0, 0, 1, 1], [], []>} : vector<2x128xbf16>, vector<128x64xbf16>, vector<2x64xf32> -> vector<2x64xf32>
    %187 = arith.truncf %186 : vector<2x64xf32> to vector<2x64xbf16>
    %c0_78 = arith.constant 0 : index
    %c0_79 = arith.constant 0 : index
    %188 = vector.load %arg20[%c0_78, %c0_79] : memref<64x128xbf16, #tpu.memory_space<vmem>>, vector<64x128xbf16>
    %cst_80 = arith.constant dense<0.000000e+00> : vector<2x128xf32>
    %189 = tpu.matmul %187, %188, %cst_80 {dimension_numbers = #tpu.dot_dimension_numbers<[1], [0], [0], [1], [0, 0, 1, 1], [], []>} : vector<2x64xbf16>, vector<64x128xbf16>, vector<2x128xf32> -> vector<2x128xf32>
    %190 = arith.addf %170, %189 : vector<2x128xf32>
    %c0_81 = arith.constant 0 : index
    %c0_82 = arith.constant 0 : index
    %191 = vector.load %arg21[%c0_81, %c0_82] : memref<1x128xf32, #tpu.memory_space<vmem>>, vector<1x128xf32>
    %192 = arith.mulf %190, %190 : vector<2x128xf32>
    %cst_83 = arith.constant dense<0.000000e+00> : vector<2xf32>
    %193 = vector.multi_reduction <add>, %192, %cst_83 [1] : vector<2x128xf32> to vector<2xf32>
    %194 = vector.shape_cast %193 : vector<2xf32> to vector<2x1xf32>
    %cst_84 = arith.constant 1.562500e-02 : f32
    %195 = vector.broadcast %cst_84 : f32 to vector<2x1xf32>
    %196 = arith.mulf %194, %195 : vector<2x1xf32>
    %cst_85 = arith.constant 9.99999997E-7 : f32
    %197 = vector.broadcast %cst_85 : f32 to vector<2x1xf32>
    %198 = arith.addf %196, %197 : vector<2x1xf32>
    %199 = math.rsqrt %198 : vector<2x1xf32>
    %200 = vector.broadcast %199 : vector<2x1xf32> to vector<2x128xf32>
    %201 = arith.mulf %190, %200 : vector<2x128xf32>
    %202 = vector.broadcast %191 : vector<1x128xf32> to vector<2x128xf32>
    %203 = arith.mulf %201, %202 : vector<2x128xf32>
    %204 = arith.truncf %203 : vector<2x128xf32> to vector<2x128xbf16>
    %c0_86 = arith.constant 0 : index
    %c0_87 = arith.constant 0 : index
    %c0_88 = arith.constant 0 : index
    %205 = vector.load %arg22[%c0_86, %c0_87, %c0_88] : memref<4x128x16xbf16, #tpu.memory_space<vmem>>, vector<4x128x16xbf16>
    %c0_89 = arith.constant 0 : index
    %c0_90 = arith.constant 0 : index
    %c0_91 = arith.constant 0 : index
    %206 = vector.load %arg23[%c0_89, %c0_90, %c0_91] : memref<8x128x16xbf16, #tpu.memory_space<vmem>>, vector<8x128x16xbf16>
    %c0_92 = arith.constant 0 : index
    %c0_93 = arith.constant 0 : index
    %c0_94 = arith.constant 0 : index
    %207 = vector.load %arg24[%c0_92, %c0_93, %c0_94] : memref<4x16x128xbf16, #tpu.memory_space<vmem>>, vector<4x16x128xbf16>
    %208 = vector.shape_cast %204 : vector<2x128xbf16> to vector<1x2x128xbf16>
    %209 = vector.shape_cast %208 : vector<1x2x128xbf16> to vector<1x2x128xbf16>
    %210 = vector.broadcast %209 : vector<1x2x128xbf16> to vector<4x2x128xbf16>
    "tpu.trace_start"() <{level = 10 : i32, message = "nmd,ndk->nmk"}> : () -> ()
    %cst_95 = arith.constant dense<0.000000e+00> : vector<4x2x16xf32>
    %211 = tpu.matmul %210, %205, %cst_95 {dimension_numbers = #tpu.dot_dimension_numbers<[2], [1], [1], [2], [0, 0, 0, 1, 1, 2], [0], [0]>} : vector<4x2x128xbf16>, vector<4x128x16xbf16>, vector<4x2x16xf32> -> vector<4x2x16xf32>
    "tpu.trace_stop"() : () -> ()
    %212 = arith.truncf %211 : vector<4x2x16xf32> to vector<4x2x16xbf16>
    "tpu.trace_start"() <{level = 10 : i32, message = "nmd,ndk->nmk"}> : () -> ()
    %cst_96 = arith.constant dense<0.000000e+00> : vector<8x16x16xf32>
    %213 = tpu.matmul %169, %206, %cst_96 {dimension_numbers = #tpu.dot_dimension_numbers<[2], [1], [1], [2], [0, 0, 0, 1, 1, 2], [0], [0]>} : vector<8x16x128xbf16>, vector<8x128x16xbf16>, vector<8x16x16xf32> -> vector<8x16x16xf32>
    "tpu.trace_stop"() : () -> ()
    %214 = vector.extract_strided_slice %213 {offsets = [0, 0, 0], sizes = [4, 16, 16], strides = [1, 1, 1]} : vector<8x16x16xf32> to vector<4x16x16xf32>
    %215 = arith.truncf %214 : vector<4x16x16xf32> to vector<4x16x16xbf16>
    %216 = vector.extract_strided_slice %213 {offsets = [4, 0, 0], sizes = [4, 16, 16], strides = [1, 1, 1]} : vector<8x16x16xf32> to vector<4x16x16xf32>
    %217 = arith.truncf %216 : vector<4x16x16xf32> to vector<4x16x16xbf16>
    "tpu.trace_start"() <{level = 10 : i32, message = "nmd,npd->nmp"}> : () -> ()
    %cst_97 = arith.constant dense<0.000000e+00> : vector<4x2x16xf32>
    %218 = tpu.matmul %212, %215, %cst_97 {dimension_numbers = #tpu.dot_dimension_numbers<[2], [2], [1], [1], [0, 0, 0, 1, 1, 1], [0], [0]>} : vector<4x2x16xbf16>, vector<4x16x16xbf16>, vector<4x2x16xf32> -> vector<4x2x16xf32>
    "tpu.trace_stop"() : () -> ()
    %219 = vector.shape_cast %1 : vector<2x16xf32> to vector<1x2x16xf32>
    %220 = vector.broadcast %219 : vector<1x2x16xf32> to vector<4x2x16xf32>
    %221 = arith.addf %218, %220 : vector<4x2x16xf32>
    %cst_98 = arith.constant dense<0xFF800000> : vector<4x2xf32>
    %222 = vector.multi_reduction <maximumf>, %221, %cst_98 [2] : vector<4x2x16xf32> to vector<4x2xf32>
    %223 = vector.shape_cast %222 : vector<4x2xf32> to vector<4x2x1xf32>
    %224 = vector.broadcast %223 : vector<4x2x1xf32> to vector<4x2x16xf32>
    %225 = arith.subf %221, %224 : vector<4x2x16xf32>
    %226 = math.exp %225 : vector<4x2x16xf32>
    %cst_99 = arith.constant dense<0.000000e+00> : vector<4x2xf32>
    %227 = vector.multi_reduction <add>, %226, %cst_99 [2] : vector<4x2x16xf32> to vector<4x2xf32>
    %228 = vector.shape_cast %227 : vector<4x2xf32> to vector<4x2x1xf32>
    %229 = vector.broadcast %228 : vector<4x2x1xf32> to vector<4x2x16xf32>
    %230 = arith.divf %226, %229 : vector<4x2x16xf32>
    %231 = arith.truncf %230 : vector<4x2x16xf32> to vector<4x2x16xbf16>
    "tpu.trace_start"() <{level = 10 : i32, message = "nmp,npd->nmd"}> : () -> ()
    %cst_100 = arith.constant dense<0.000000e+00> : vector<4x2x16xf32>
    %232 = tpu.matmul %231, %217, %cst_100 {dimension_numbers = #tpu.dot_dimension_numbers<[2], [1], [1], [2], [0, 0, 0, 1, 1, 2], [0], [0]>} : vector<4x2x16xbf16>, vector<4x16x16xbf16>, vector<4x2x16xf32> -> vector<4x2x16xf32>
    "tpu.trace_stop"() : () -> ()
    %233 = arith.truncf %232 : vector<4x2x16xf32> to vector<4x2x16xbf16>
    "tpu.trace_start"() <{level = 10 : i32, message = "nmd,nde->nme"}> : () -> ()
    %cst_101 = arith.constant dense<0.000000e+00> : vector<4x2x128xf32>
    %234 = tpu.matmul %233, %207, %cst_101 {dimension_numbers = #tpu.dot_dimension_numbers<[2], [1], [1], [2], [0, 0, 0, 1, 1, 2], [0], [0]>} : vector<4x2x16xbf16>, vector<4x16x128xbf16>, vector<4x2x128xf32> -> vector<4x2x128xf32>
    "tpu.trace_stop"() : () -> ()
    %235 = vector.extract_strided_slice %234 {offsets = [0, 0, 0], sizes = [1, 2, 128], strides = [1, 1, 1]} : vector<4x2x128xf32> to vector<1x2x128xf32>
    %236 = vector.shape_cast %235 : vector<1x2x128xf32> to vector<2x128xf32>
    %237 = vector.extract_strided_slice %234 {offsets = [1, 0, 0], sizes = [1, 2, 128], strides = [1, 1, 1]} : vector<4x2x128xf32> to vector<1x2x128xf32>
    %238 = vector.shape_cast %237 : vector<1x2x128xf32> to vector<2x128xf32>
    %239 = arith.addf %236, %238 : vector<2x128xf32>
    %240 = vector.extract_strided_slice %234 {offsets = [2, 0, 0], sizes = [1, 2, 128], strides = [1, 1, 1]} : vector<4x2x128xf32> to vector<1x2x128xf32>
    %241 = vector.shape_cast %240 : vector<1x2x128xf32> to vector<2x128xf32>
    %242 = arith.addf %239, %241 : vector<2x128xf32>
    %243 = vector.extract_strided_slice %234 {offsets = [3, 0, 0], sizes = [1, 2, 128], strides = [1, 1, 1]} : vector<4x2x128xf32> to vector<1x2x128xf32>
    %244 = vector.shape_cast %243 : vector<1x2x128xf32> to vector<2x128xf32>
    %245 = arith.addf %242, %244 : vector<2x128xf32>
    %246 = arith.addf %190, %245 : vector<2x128xf32>
    %c0_102 = arith.constant 0 : index
    %c0_103 = arith.constant 0 : index
    %247 = vector.load %arg25[%c0_102, %c0_103] : memref<1x128xf32, #tpu.memory_space<vmem>>, vector<1x128xf32>
    %248 = arith.mulf %246, %246 : vector<2x128xf32>
    %cst_104 = arith.constant dense<0.000000e+00> : vector<2xf32>
    %249 = vector.multi_reduction <add>, %248, %cst_104 [1] : vector<2x128xf32> to vector<2xf32>
    %250 = vector.shape_cast %249 : vector<2xf32> to vector<2x1xf32>
    %cst_105 = arith.constant 1.562500e-02 : f32
    %251 = vector.broadcast %cst_105 : f32 to vector<2x1xf32>
    %252 = arith.mulf %250, %251 : vector<2x1xf32>
    %cst_106 = arith.constant 9.99999997E-7 : f32
    %253 = vector.broadcast %cst_106 : f32 to vector<2x1xf32>
    %254 = arith.addf %252, %253 : vector<2x1xf32>
    %255 = math.rsqrt %254 : vector<2x1xf32>
    %256 = vector.broadcast %255 : vector<2x1xf32> to vector<2x128xf32>
    %257 = arith.mulf %246, %256 : vector<2x128xf32>
    %258 = vector.broadcast %247 : vector<1x128xf32> to vector<2x128xf32>
    %259 = arith.mulf %257, %258 : vector<2x128xf32>
    %260 = arith.truncf %259 : vector<2x128xf32> to vector<2x128xbf16>
    %c0_107 = arith.constant 0 : index
    %c0_108 = arith.constant 0 : index
    %261 = vector.load %arg26[%c0_107, %c0_108] : memref<128x128xbf16, #tpu.memory_space<vmem>>, vector<128x128xbf16>
    %cst_109 = arith.constant dense<0.000000e+00> : vector<2x128xf32>
    %262 = tpu.matmul %260, %261, %cst_109 {dimension_numbers = #tpu.dot_dimension_numbers<[1], [0], [0], [1], [0, 0, 1, 1], [], []>} : vector<2x128xbf16>, vector<128x128xbf16>, vector<2x128xf32> -> vector<2x128xf32>
    %cst_110 = arith.constant 0.000000e+00 : f32
    %263 = vector.broadcast %cst_110 : f32 to vector<2x128xf32>
    %264 = arith.maximumf %262, %263 : vector<2x128xf32>
    %265 = arith.truncf %264 : vector<2x128xf32> to vector<2x128xbf16>
    %c0_111 = arith.constant 0 : index
    %c0_112 = arith.constant 0 : index
    %266 = vector.load %arg27[%c0_111, %c0_112] : memref<128x128xbf16, #tpu.memory_space<vmem>>, vector<128x128xbf16>
    %cst_113 = arith.constant dense<0.000000e+00> : vector<2x128xf32>
    %267 = tpu.matmul %265, %266, %cst_113 {dimension_numbers = #tpu.dot_dimension_numbers<[1], [0], [0], [1], [0, 0, 1, 1], [], []>} : vector<2x128xbf16>, vector<128x128xbf16>, vector<2x128xf32> -> vector<2x128xf32>
    %268 = arith.addf %246, %267 : vector<2x128xf32>
    %c0_114 = arith.constant 0 : index
    %c0_115 = arith.constant 0 : index
    %269 = vector.load %arg28[%c0_114, %c0_115] : memref<1x128xf32, #tpu.memory_space<vmem>>, vector<1x128xf32>
    %270 = arith.mulf %268, %268 : vector<2x128xf32>
    %cst_116 = arith.constant dense<0.000000e+00> : vector<2xf32>
    %271 = vector.multi_reduction <add>, %270, %cst_116 [1] : vector<2x128xf32> to vector<2xf32>
    %272 = vector.shape_cast %271 : vector<2xf32> to vector<2x1xf32>
    %cst_117 = arith.constant 1.562500e-02 : f32
    %273 = vector.broadcast %cst_117 : f32 to vector<2x1xf32>
    %274 = arith.mulf %272, %273 : vector<2x1xf32>
    %cst_118 = arith.constant 9.99999997E-7 : f32
    %275 = vector.broadcast %cst_118 : f32 to vector<2x1xf32>
    %276 = arith.addf %274, %275 : vector<2x1xf32>
    %277 = math.rsqrt %276 : vector<2x1xf32>
    %278 = vector.broadcast %277 : vector<2x1xf32> to vector<2x128xf32>
    %279 = arith.mulf %268, %278 : vector<2x128xf32>
    %280 = vector.broadcast %269 : vector<1x128xf32> to vector<2x128xf32>
    %281 = arith.mulf %279, %280 : vector<2x128xf32>
    %282 = arith.truncf %281 : vector<2x128xf32> to vector<2x128xbf16>
    %c0_119 = arith.constant 0 : index
    %c0_120 = arith.constant 0 : index
    %283 = vector.load %arg29[%c0_119, %c0_120] : memref<128x64xbf16, #tpu.memory_space<vmem>>, vector<128x64xbf16>
    %cst_121 = arith.constant dense<0.000000e+00> : vector<2x64xf32>
    %284 = tpu.matmul %282, %283, %cst_121 {dimension_numbers = #tpu.dot_dimension_numbers<[1], [0], [0], [1], [0, 0, 1, 1], [], []>} : vector<2x128xbf16>, vector<128x64xbf16>, vector<2x64xf32> -> vector<2x64xf32>
    %285 = arith.truncf %284 : vector<2x64xf32> to vector<2x64xbf16>
    %c0_122 = arith.constant 0 : index
    %c0_123 = arith.constant 0 : index
    %286 = vector.load %arg30[%c0_122, %c0_123] : memref<64x128xbf16, #tpu.memory_space<vmem>>, vector<64x128xbf16>
    %cst_124 = arith.constant dense<0.000000e+00> : vector<2x128xf32>
    %287 = tpu.matmul %285, %286, %cst_124 {dimension_numbers = #tpu.dot_dimension_numbers<[1], [0], [0], [1], [0, 0, 1, 1], [], []>} : vector<2x64xbf16>, vector<64x128xbf16>, vector<2x128xf32> -> vector<2x128xf32>
    %288 = arith.addf %268, %287 : vector<2x128xf32>
    %c0_125 = arith.constant 0 : index
    %c0_126 = arith.constant 0 : index
    %289 = vector.load %arg31[%c0_125, %c0_126] : memref<1x128xf32, #tpu.memory_space<vmem>>, vector<1x128xf32>
    %290 = arith.mulf %288, %288 : vector<2x128xf32>
    %cst_127 = arith.constant dense<0.000000e+00> : vector<2xf32>
    %291 = vector.multi_reduction <add>, %290, %cst_127 [1] : vector<2x128xf32> to vector<2xf32>
    %292 = vector.shape_cast %291 : vector<2xf32> to vector<2x1xf32>
    %cst_128 = arith.constant 1.562500e-02 : f32
    %293 = vector.broadcast %cst_128 : f32 to vector<2x1xf32>
    %294 = arith.mulf %292, %293 : vector<2x1xf32>
    %cst_129 = arith.constant 9.99999997E-7 : f32
    %295 = vector.broadcast %cst_129 : f32 to vector<2x1xf32>
    %296 = arith.addf %294, %295 : vector<2x1xf32>
    %297 = math.rsqrt %296 : vector<2x1xf32>
    %298 = vector.broadcast %297 : vector<2x1xf32> to vector<2x128xf32>
    %299 = arith.mulf %288, %298 : vector<2x128xf32>
    %300 = vector.broadcast %289 : vector<1x128xf32> to vector<2x128xf32>
    %301 = arith.mulf %299, %300 : vector<2x128xf32>
    %302 = arith.truncf %301 : vector<2x128xf32> to vector<2x128xbf16>
    %c0_130 = arith.constant 0 : index
    %c0_131 = arith.constant 0 : index
    %c0_132 = arith.constant 0 : index
    %303 = vector.load %arg32[%c0_130, %c0_131, %c0_132] : memref<4x128x16xbf16, #tpu.memory_space<vmem>>, vector<4x128x16xbf16>
    %c0_133 = arith.constant 0 : index
    %c0_134 = arith.constant 0 : index
    %c0_135 = arith.constant 0 : index
    %304 = vector.load %arg33[%c0_133, %c0_134, %c0_135] : memref<8x128x16xbf16, #tpu.memory_space<vmem>>, vector<8x128x16xbf16>
    %c0_136 = arith.constant 0 : index
    %c0_137 = arith.constant 0 : index
    %c0_138 = arith.constant 0 : index
    %305 = vector.load %arg34[%c0_136, %c0_137, %c0_138] : memref<4x16x128xbf16, #tpu.memory_space<vmem>>, vector<4x16x128xbf16>
    %306 = vector.shape_cast %302 : vector<2x128xbf16> to vector<1x2x128xbf16>
    %307 = vector.shape_cast %306 : vector<1x2x128xbf16> to vector<1x2x128xbf16>
    %308 = vector.broadcast %307 : vector<1x2x128xbf16> to vector<4x2x128xbf16>
    "tpu.trace_start"() <{level = 10 : i32, message = "nmd,ndk->nmk"}> : () -> ()
    %cst_139 = arith.constant dense<0.000000e+00> : vector<4x2x16xf32>
    %309 = tpu.matmul %308, %303, %cst_139 {dimension_numbers = #tpu.dot_dimension_numbers<[2], [1], [1], [2], [0, 0, 0, 1, 1, 2], [0], [0]>} : vector<4x2x128xbf16>, vector<4x128x16xbf16>, vector<4x2x16xf32> -> vector<4x2x16xf32>
    "tpu.trace_stop"() : () -> ()
    %310 = arith.truncf %309 : vector<4x2x16xf32> to vector<4x2x16xbf16>
    "tpu.trace_start"() <{level = 10 : i32, message = "nmd,ndk->nmk"}> : () -> ()
    %cst_140 = arith.constant dense<0.000000e+00> : vector<8x16x16xf32>
    %311 = tpu.matmul %169, %304, %cst_140 {dimension_numbers = #tpu.dot_dimension_numbers<[2], [1], [1], [2], [0, 0, 0, 1, 1, 2], [0], [0]>} : vector<8x16x128xbf16>, vector<8x128x16xbf16>, vector<8x16x16xf32> -> vector<8x16x16xf32>
    "tpu.trace_stop"() : () -> ()
    %312 = vector.extract_strided_slice %311 {offsets = [0, 0, 0], sizes = [4, 16, 16], strides = [1, 1, 1]} : vector<8x16x16xf32> to vector<4x16x16xf32>
    %313 = arith.truncf %312 : vector<4x16x16xf32> to vector<4x16x16xbf16>
    %314 = vector.extract_strided_slice %311 {offsets = [4, 0, 0], sizes = [4, 16, 16], strides = [1, 1, 1]} : vector<8x16x16xf32> to vector<4x16x16xf32>
    %315 = arith.truncf %314 : vector<4x16x16xf32> to vector<4x16x16xbf16>
    "tpu.trace_start"() <{level = 10 : i32, message = "nmd,npd->nmp"}> : () -> ()
    %cst_141 = arith.constant dense<0.000000e+00> : vector<4x2x16xf32>
    %316 = tpu.matmul %310, %313, %cst_141 {dimension_numbers = #tpu.dot_dimension_numbers<[2], [2], [1], [1], [0, 0, 0, 1, 1, 1], [0], [0]>} : vector<4x2x16xbf16>, vector<4x16x16xbf16>, vector<4x2x16xf32> -> vector<4x2x16xf32>
    "tpu.trace_stop"() : () -> ()
    %317 = vector.shape_cast %1 : vector<2x16xf32> to vector<1x2x16xf32>
    %318 = vector.broadcast %317 : vector<1x2x16xf32> to vector<4x2x16xf32>
    %319 = arith.addf %316, %318 : vector<4x2x16xf32>
    %cst_142 = arith.constant dense<0xFF800000> : vector<4x2xf32>
    %320 = vector.multi_reduction <maximumf>, %319, %cst_142 [2] : vector<4x2x16xf32> to vector<4x2xf32>
    %321 = vector.shape_cast %320 : vector<4x2xf32> to vector<4x2x1xf32>
    %322 = vector.broadcast %321 : vector<4x2x1xf32> to vector<4x2x16xf32>
    %323 = arith.subf %319, %322 : vector<4x2x16xf32>
    %324 = math.exp %323 : vector<4x2x16xf32>
    %cst_143 = arith.constant dense<0.000000e+00> : vector<4x2xf32>
    %325 = vector.multi_reduction <add>, %324, %cst_143 [2] : vector<4x2x16xf32> to vector<4x2xf32>
    %326 = vector.shape_cast %325 : vector<4x2xf32> to vector<4x2x1xf32>
    %327 = vector.broadcast %326 : vector<4x2x1xf32> to vector<4x2x16xf32>
    %328 = arith.divf %324, %327 : vector<4x2x16xf32>
    %329 = arith.truncf %328 : vector<4x2x16xf32> to vector<4x2x16xbf16>
    "tpu.trace_start"() <{level = 10 : i32, message = "nmp,npd->nmd"}> : () -> ()
    %cst_144 = arith.constant dense<0.000000e+00> : vector<4x2x16xf32>
    %330 = tpu.matmul %329, %315, %cst_144 {dimension_numbers = #tpu.dot_dimension_numbers<[2], [1], [1], [2], [0, 0, 0, 1, 1, 2], [0], [0]>} : vector<4x2x16xbf16>, vector<4x16x16xbf16>, vector<4x2x16xf32> -> vector<4x2x16xf32>
    "tpu.trace_stop"() : () -> ()
    %331 = arith.truncf %330 : vector<4x2x16xf32> to vector<4x2x16xbf16>
    "tpu.trace_start"() <{level = 10 : i32, message = "nmd,nde->nme"}> : () -> ()
    %cst_145 = arith.constant dense<0.000000e+00> : vector<4x2x128xf32>
    %332 = tpu.matmul %331, %305, %cst_145 {dimension_numbers = #tpu.dot_dimension_numbers<[2], [1], [1], [2], [0, 0, 0, 1, 1, 2], [0], [0]>} : vector<4x2x16xbf16>, vector<4x16x128xbf16>, vector<4x2x128xf32> -> vector<4x2x128xf32>
    "tpu.trace_stop"() : () -> ()
    %333 = vector.extract_strided_slice %332 {offsets = [0, 0, 0], sizes = [1, 2, 128], strides = [1, 1, 1]} : vector<4x2x128xf32> to vector<1x2x128xf32>
    %334 = vector.shape_cast %333 : vector<1x2x128xf32> to vector<2x128xf32>
    %335 = vector.extract_strided_slice %332 {offsets = [1, 0, 0], sizes = [1, 2, 128], strides = [1, 1, 1]} : vector<4x2x128xf32> to vector<1x2x128xf32>
    %336 = vector.shape_cast %335 : vector<1x2x128xf32> to vector<2x128xf32>
    %337 = arith.addf %334, %336 : vector<2x128xf32>
    %338 = vector.extract_strided_slice %332 {offsets = [2, 0, 0], sizes = [1, 2, 128], strides = [1, 1, 1]} : vector<4x2x128xf32> to vector<1x2x128xf32>
    %339 = vector.shape_cast %338 : vector<1x2x128xf32> to vector<2x128xf32>
    %340 = arith.addf %337, %339 : vector<2x128xf32>
    %341 = vector.extract_strided_slice %332 {offsets = [3, 0, 0], sizes = [1, 2, 128], strides = [1, 1, 1]} : vector<4x2x128xf32> to vector<1x2x128xf32>
    %342 = vector.shape_cast %341 : vector<1x2x128xf32> to vector<2x128xf32>
    %343 = arith.addf %340, %342 : vector<2x128xf32>
    %344 = arith.addf %288, %343 : vector<2x128xf32>
    %c0_146 = arith.constant 0 : index
    %c0_147 = arith.constant 0 : index
    %345 = vector.load %arg35[%c0_146, %c0_147] : memref<1x128xf32, #tpu.memory_space<vmem>>, vector<1x128xf32>
    %346 = arith.mulf %344, %344 : vector<2x128xf32>
    %cst_148 = arith.constant dense<0.000000e+00> : vector<2xf32>
    %347 = vector.multi_reduction <add>, %346, %cst_148 [1] : vector<2x128xf32> to vector<2xf32>
    %348 = vector.shape_cast %347 : vector<2xf32> to vector<2x1xf32>
    %cst_149 = arith.constant 1.562500e-02 : f32
    %349 = vector.broadcast %cst_149 : f32 to vector<2x1xf32>
    %350 = arith.mulf %348, %349 : vector<2x1xf32>
    %cst_150 = arith.constant 9.99999997E-7 : f32
    %351 = vector.broadcast %cst_150 : f32 to vector<2x1xf32>
    %352 = arith.addf %350, %351 : vector<2x1xf32>
    %353 = math.rsqrt %352 : vector<2x1xf32>
    %354 = vector.broadcast %353 : vector<2x1xf32> to vector<2x128xf32>
    %355 = arith.mulf %344, %354 : vector<2x128xf32>
    %356 = vector.broadcast %345 : vector<1x128xf32> to vector<2x128xf32>
    %357 = arith.mulf %355, %356 : vector<2x128xf32>
    %358 = arith.truncf %357 : vector<2x128xf32> to vector<2x128xbf16>
    %c0_151 = arith.constant 0 : index
    %c0_152 = arith.constant 0 : index
    %359 = vector.load %arg36[%c0_151, %c0_152] : memref<128x128xbf16, #tpu.memory_space<vmem>>, vector<128x128xbf16>
    %cst_153 = arith.constant dense<0.000000e+00> : vector<2x128xf32>
    %360 = tpu.matmul %358, %359, %cst_153 {dimension_numbers = #tpu.dot_dimension_numbers<[1], [0], [0], [1], [0, 0, 1, 1], [], []>} : vector<2x128xbf16>, vector<128x128xbf16>, vector<2x128xf32> -> vector<2x128xf32>
    %cst_154 = arith.constant 0.000000e+00 : f32
    %361 = vector.broadcast %cst_154 : f32 to vector<2x128xf32>
    %362 = arith.maximumf %360, %361 : vector<2x128xf32>
    %363 = arith.truncf %362 : vector<2x128xf32> to vector<2x128xbf16>
    %c0_155 = arith.constant 0 : index
    %c0_156 = arith.constant 0 : index
    %364 = vector.load %arg37[%c0_155, %c0_156] : memref<128x128xbf16, #tpu.memory_space<vmem>>, vector<128x128xbf16>
    %cst_157 = arith.constant dense<0.000000e+00> : vector<2x128xf32>
    %365 = tpu.matmul %363, %364, %cst_157 {dimension_numbers = #tpu.dot_dimension_numbers<[1], [0], [0], [1], [0, 0, 1, 1], [], []>} : vector<2x128xbf16>, vector<128x128xbf16>, vector<2x128xf32> -> vector<2x128xf32>
    %366 = arith.addf %344, %365 : vector<2x128xf32>
    %c0_158 = arith.constant 0 : index
    %c0_159 = arith.constant 0 : index
    %367 = vector.load %arg38[%c0_158, %c0_159] : memref<1x128xf32, #tpu.memory_space<vmem>>, vector<1x128xf32>
    %368 = arith.mulf %366, %366 : vector<2x128xf32>
    %cst_160 = arith.constant dense<0.000000e+00> : vector<2xf32>
    %369 = vector.multi_reduction <add>, %368, %cst_160 [1] : vector<2x128xf32> to vector<2xf32>
    %370 = vector.shape_cast %369 : vector<2xf32> to vector<2x1xf32>
    %cst_161 = arith.constant 1.562500e-02 : f32
    %371 = vector.broadcast %cst_161 : f32 to vector<2x1xf32>
    %372 = arith.mulf %370, %371 : vector<2x1xf32>
    %cst_162 = arith.constant 9.99999997E-7 : f32
    %373 = vector.broadcast %cst_162 : f32 to vector<2x1xf32>
    %374 = arith.addf %372, %373 : vector<2x1xf32>
    %375 = math.rsqrt %374 : vector<2x1xf32>
    %376 = vector.broadcast %375 : vector<2x1xf32> to vector<2x128xf32>
    %377 = arith.mulf %366, %376 : vector<2x128xf32>
    %378 = vector.broadcast %367 : vector<1x128xf32> to vector<2x128xf32>
    %379 = arith.mulf %377, %378 : vector<2x128xf32>
    %cst_163 = arith.constant 1.250000e-01 : f32
    %380 = vector.broadcast %cst_163 : f32 to vector<2x128xf32>
    %381 = arith.mulf %379, %380 : vector<2x128xf32>
    %382 = arith.truncf %381 : vector<2x128xf32> to vector<2x128xbf16>
    %c0_164 = arith.constant 0 : index
    %c0_165 = arith.constant 0 : index
    %383 = vector.load %arg39[%c0_164, %c0_165] : memref<128x512xbf16, #tpu.memory_space<vmem>>, vector<128x512xbf16>
    %cst_166 = arith.constant dense<0.000000e+00> : vector<2x512xf32>
    %384 = tpu.matmul %382, %383, %cst_166 {dimension_numbers = #tpu.dot_dimension_numbers<[1], [0], [0], [1], [0, 0, 1, 1], [], []>} : vector<2x128xbf16>, vector<128x512xbf16>, vector<2x512xf32> -> vector<2x512xf32>
    %cst_167 = arith.constant dense<0xFF800000> : vector<2xf32>
    %385 = vector.multi_reduction <maximumf>, %384, %cst_167 [1] : vector<2x512xf32> to vector<2xf32>
    %386 = vector.shape_cast %385 : vector<2xf32> to vector<2x1xf32>
    %387 = tpu.iota {dimensions = array<i32: 1>} : vector<2x512xi32>
    %388 = vector.broadcast %386 : vector<2x1xf32> to vector<2x512xf32>
    %389 = arith.cmpf oeq, %384, %388 : vector<2x512xf32>
    %c512_i32 = arith.constant 512 : i32
    %390 = vector.broadcast %c512_i32 : i32 to vector<2x512xi32>
    %391 = arith.select %389, %387, %390 : vector<2x512xi1>, vector<2x512xi32>
    %cst_168 = arith.constant dense<2147483647> : vector<2xi32>
    %392 = vector.multi_reduction <minsi>, %391, %cst_168 [1] : vector<2x512xi32> to vector<2xi32>
    %393 = vector.shape_cast %392 : vector<2xi32> to vector<2x1xi32>
    %c0_169 = arith.constant 0 : index
    %c0_170 = arith.constant 0 : index
    %394 = vector.load %arg40[%c0_169, %c0_170] : memref<2x1xi32, #tpu.memory_space<vmem>>, vector<2x1xi32>
    tpu.vector_store %arg40[%c0_169, %c0_170], %393 {strides = array<i32>} : memref<2x1xi32, #tpu.memory_space<vmem>>, vector<2x1xi32>,
    return
  }
  func.func @transform_0(%arg0: i32) -> (i32, i32) {
    %c0_i32 = arith.constant 0 : i32
    %c0_i32_0 = arith.constant 0 : i32
    %c0_i32_1 = arith.constant 0 : i32
    return %c0_i32, %c0_i32_0 : i32, i32
  }
  func.func @transform_1(%arg0: i32) -> (i32, i32, i32) {
    %c0_i32 = arith.constant 0 : i32
    %c0_i32_0 = arith.constant 0 : i32
    %c0_i32_1 = arith.constant 0 : i32
    %c0_i32_2 = arith.constant 0 : i32
    return %c0_i32, %c0_i32_0, %c0_i32_1 : i32, i32, i32
  }
  func.func @transform_2(%arg0: i32) -> (i32, i32) {
    %c0_i32 = arith.constant 0 : i32
    %c0_i32_0 = arith.constant 0 : i32
    %c0_i32_1 = arith.constant 0 : i32
    return %c0_i32, %c0_i32_0 : i32, i32
  }
  func.func @transform_3(%arg0: i32) -> (i32, i32) {
    %c0_i32 = arith.constant 0 : i32
    %c0_i32_0 = arith.constant 0 : i32
    %c0_i32_1 = arith.constant 0 : i32
    return %c0_i32, %c0_i32_0 : i32, i32
  }
  func.func @transform_4(%arg0: i32) -> (i32, i32) {
    %c0_i32 = arith.constant 0 : i32
    %c0_i32_0 = arith.constant 0 : i32
    %c0_i32_1 = arith.constant 0 : i32
    return %c0_i32, %c0_i32_0 : i32, i32
  }
  func.func @transform_5(%arg0: i32) -> (i32, i32, i32) {
    %c0_i32 = arith.constant 0 : i32
    %c0_i32_0 = arith.constant 0 : i32
    %c0_i32_1 = arith.constant 0 : i32
    %c0_i32_2 = arith.constant 0 : i32
    return %c0_i32, %c0_i32_0, %c0_i32_1 : i32, i32, i32
  }
  func.func @transform_6(%arg0: i32) -> (i32, i32, i32) {
    %c0_i32 = arith.constant 0 : i32
    %c0_i32_0 = arith.constant 0 : i32
    %c0_i32_1 = arith.constant 0 : i32
    %c0_i32_2 = arith.constant 0 : i32
    return %c0_i32, %c0_i32_0, %c0_i32_1 : i32, i32, i32
  }
  func.func @transform_7(%arg0: i32) -> (i32, i32) {
    %c0_i32 = arith.constant 0 : i32
    %c0_i32_0 = arith.constant 0 : i32
    %c0_i32_1 = arith.constant 0 : i32
    return %c0_i32, %c0_i32_0 : i32, i32
  }
  func.func @transform_8(%arg0: i32) -> (i32, i32) {
    %c0_i32 = arith.constant 0 : i32
    %c0_i32_0 = arith.constant 0 : i32
    %c0_i32_1 = arith.constant 0 : i32
    return %c0_i32, %c0_i32_0 : i32, i32
  }
  func.func @transform_9(%arg0: i32) -> (i32, i32) {
    %c0_i32 = arith.constant 0 : i32
    %c0_i32_0 = arith.constant 0 : i32
    %c0_i32_1 = arith.constant 0 : i32
    return %c0_i32, %c0_i32_0 : i32, i32
  }
  func.func @transform_10(%arg0: i32) -> (i32, i32) {
    %c0_i32 = arith.constant 0 : i32
    %c0_i32_0 = arith.constant 0 : i32
    %c0_i32_1 = arith.constant 0 : i32
    return %c0_i32, %c0_i32_0 : i32, i32
  }
  func.func @transform_11(%arg0: i32) -> (i32, i32, i32) {
    %c0_i32 = arith.constant 0 : i32
    %c0_i32_0 = arith.constant 0 : i32
    %c0_i32_1 = arith.constant 0 : i32
    %c0_i32_2 = arith.constant 0 : i32
    return %c0_i32, %c0_i32_0, %c0_i32_1 : i32, i32, i32
  }
  func.func @transform_12(%arg0: i32) -> (i32, i32, i32) {
    %c0_i32 = arith.constant 0 : i32
    %c0_i32_0 = arith.constant 0 : i32
    %c0_i32_1 = arith.constant 0 : i32
    %c0_i32_2 = arith.constant 0 : i32
    return %c0_i32, %c0_i32_0, %c0_i32_1 : i32, i32, i32
  }
  func.func @transform_13(%arg0: i32) -> (i32, i32) {
    %c0_i32 = arith.constant 0 : i32
    %c0_i32_0 = arith.constant 0 : i32
    %c0_i32_1 = arith.constant 0 : i32
    return %c0_i32, %c0_i32_0 : i32, i32
  }
  func.func @transform_14(%arg0: i32) -> (i32, i32) {
    %c0_i32 = arith.constant 0 : i32
    %c0_i32_0 = arith.constant 0 : i32
    %c0_i32_1 = arith.constant 0 : i32
    return %c0_i32, %c0_i32_0 : i32, i32
  }
  func.func @transform_15(%arg0: i32) -> (i32, i32) {
    %c0_i32 = arith.constant 0 : i32
    %c0_i32_0 = arith.constant 0 : i32
    %c0_i32_1 = arith.constant 0 : i32
    return %c0_i32, %c0_i32_0 : i32, i32
  }
  func.func @transform_16(%arg0: i32) -> (i32, i32) {
    %c0_i32 = arith.constant 0 : i32
    %c0_i32_0 = arith.constant 0 : i32
    %c0_i32_1 = arith.constant 0 : i32
    return %c0_i32, %c0_i32_0 : i32, i32
  }
  func.func @transform_17(%arg0: i32) -> (i32, i32) {
    %c0_i32 = arith.constant 0 : i32
    %c0_i32_0 = arith.constant 0 : i32
    %c0_i32_1 = arith.constant 0 : i32
    return %c0_i32, %c0_i32_0 : i32, i32
  }
  func.func @transform_18(%arg0: i32) -> (i32, i32) {
    %c0_i32 = arith.constant 0 : i32
    %c0_i32_0 = arith.constant 0 : i32
    %c0_i32_1 = arith.constant 0 : i32
    return %c0_i32, %c0_i32_0 : i32, i32
  }
  func.func @transform_19(%arg0: i32) -> (i32, i32) {
    %c0_i32 = arith.constant 0 : i32
    %c0_i32_0 = arith.constant 0 : i32
    %c0_i32_1 = arith.constant 0 : i32
    return %c0_i32, %c0_i32_0 : i32, i32
  }
  func.func @transform_20(%arg0: i32) -> (i32, i32) {
    %c0_i32 = arith.constant 0 : i32
    %c0_i32_0 = arith.constant 0 : i32
    %c0_i32_1 = arith.constant 0 : i32
    return %c0_i32, %c0_i32_0 : i32, i32
  }
  func.func @transform_21(%arg0: i32) -> (i32, i32, i32) {
    %c0_i32 = arith.constant 0 : i32
    %c0_i32_0 = arith.constant 0 : i32
    %c0_i32_1 = arith.constant 0 : i32
    %c0_i32_2 = arith.constant 0 : i32
    return %c0_i32, %c0_i32_0, %c0_i32_1 : i32, i32, i32
  }
  func.func @transform_22(%arg0: i32) -> (i32, i32, i32) {
    %c0_i32 = arith.constant 0 : i32
    %c0_i32_0 = arith.constant 0 : i32
    %c0_i32_1 = arith.constant 0 : i32
    %c0_i32_2 = arith.constant 0 : i32
    return %c0_i32, %c0_i32_0, %c0_i32_1 : i32, i32, i32
  }
  func.func @transform_23(%arg0: i32) -> (i32, i32, i32) {
    %c0_i32 = arith.constant 0 : i32
    %c0_i32_0 = arith.constant 0 : i32
    %c0_i32_1 = arith.constant 0 : i32
    %c0_i32_2 = arith.constant 0 : i32
    return %c0_i32, %c0_i32_0, %c0_i32_1 : i32, i32, i32
  }
  func.func @transform_24(%arg0: i32) -> (i32, i32) {
    %c0_i32 = arith.constant 0 : i32
    %c0_i32_0 = arith.constant 0 : i32
    %c0_i32_1 = arith.constant 0 : i32
    return %c0_i32, %c0_i32_0 : i32, i32
  }
  func.func @transform_25(%arg0: i32) -> (i32, i32) {
    %c0_i32 = arith.constant 0 : i32
    %c0_i32_0 = arith.constant 0 : i32
    %c0_i32_1 = arith.constant 0 : i32
    return %c0_i32, %c0_i32_0 : i32, i32
  }
  func.func @transform_26(%arg0: i32) -> (i32, i32) {
    %c0_i32 = arith.constant 0 : i32
    %c0_i32_0 = arith.constant 0 : i32
    %c0_i32_1 = arith.constant 0 : i32
    return %c0_i32, %c0_i32_0 : i32, i32
  }
  func.func @transform_27(%arg0: i32) -> (i32, i32) {
    %c0_i32 = arith.constant 0 : i32
    %c0_i32_0 = arith.constant 0 : i32
    %c0_i32_1 = arith.constant 0 : i32
    return %c0_i32, %c0_i32_0 : i32, i32
  }
  func.func @transform_28(%arg0: i32) -> (i32, i32) {
    %c0_i32 = arith.constant 0 : i32
    %c0_i32_0 = arith.constant 0 : i32
    %c0_i32_1 = arith.constant 0 : i32
    return %c0_i32, %c0_i32_0 : i32, i32
  }
  func.func @transform_29(%arg0: i32) -> (i32, i32) {
    %c0_i32 = arith.constant 0 : i32
    %c0_i32_0 = arith.constant 0 : i32
    %c0_i32_1 = arith.constant 0 : i32
    return %c0_i32, %c0_i32_0 : i32, i32
  }
  func.func @transform_30(%arg0: i32) -> (i32, i32) {
    %c0_i32 = arith.constant 0 : i32
    %c0_i32_0 = arith.constant 0 : i32
    %c0_i32_1 = arith.constant 0 : i32
    return %c0_i32, %c0_i32_0 : i32, i32
  }
  func.func @transform_31(%arg0: i32) -> (i32, i32, i32) {
    %c0_i32 = arith.constant 0 : i32
    %c0_i32_0 = arith.constant 0 : i32
    %c0_i32_1 = arith.constant 0 : i32
    %c0_i32_2 = arith.constant 0 : i32
    return %c0_i32, %c0_i32_0, %c0_i32_1 : i32, i32, i32
  }
  func.func @transform_32(%arg0: i32) -> (i32, i32, i32) {
    %c0_i32 = arith.constant 0 : i32
    %c0_i32_0 = arith.constant 0 : i32
    %c0_i32_1 = arith.constant 0 : i32
    %c0_i32_2 = arith.constant 0 : i32
    return %c0_i32, %c0_i32_0, %c0_i32_1 : i32, i32, i32
  }
  func.func @transform_33(%arg0: i32) -> (i32, i32, i32) {
    %c0_i32 = arith.constant 0 : i32
    %c0_i32_0 = arith.constant 0 : i32
    %c0_i32_1 = arith.constant 0 : i32
    %c0_i32_2 = arith.constant 0 : i32
    return %c0_i32, %c0_i32_0, %c0_i32_1 : i32, i32, i32
  }
  func.func @transform_34(%arg0: i32) -> (i32, i32) {
    %c0_i32 = arith.constant 0 : i32
    %c0_i32_0 = arith.constant 0 : i32
    %c0_i32_1 = arith.constant 0 : i32
    return %c0_i32, %c0_i32_0 : i32, i32
  }
  func.func @transform_35(%arg0: i32) -> (i32, i32) {
    %c0_i32 = arith.constant 0 : i32
    %c0_i32_0 = arith.constant 0 : i32
    %c0_i32_1 = arith.constant 0 : i32
    return %c0_i32, %c0_i32_0 : i32, i32
  }
  func.func @transform_36(%arg0: i32) -> (i32, i32) {
    %c0_i32 = arith.constant 0 : i32
    %c0_i32_0 = arith.constant 0 : i32
    %c0_i32_1 = arith.constant 0 : i32
    return %c0_i32, %c0_i32_0 : i32, i32
  }
  func.func @transform_37(%arg0: i32) -> (i32, i32) {
    %c0_i32 = arith.constant 0 : i32
    %c0_i32_0 = arith.constant 0 : i32
    %c0_i32_1 = arith.constant 0 : i32
    return %c0_i32, %c0_i32_0 : i32, i32
  }
  func.func @transform_38(%arg0: i32) -> (i32, i32) {
    %c0_i32 = arith.constant 0 : i32
    %c0_i32_0 = arith.constant 0 : i32
    %c0_i32_1 = arith.constant 0 : i32
    return %c0_i32, %c0_i32_0 : i32, i32
  }
  func.func @transform_39(%arg0: i32) -> (i32, i32) {
    %c0_i32 = arith.constant 0 : i32
    %c0_i32_0 = arith.constant 0 : i32
    %c0_i32_1 = arith.constant 0 : i32
    return %c0_i32, %c0_i32_0 : i32, i32
  }
}

</mosaic_0001>

<bundles_post_ra>
// kernel: tile.9
= control target key start
LH: loop header
LB: loop body
LE: loop exit
PB: predicated region body
PF: predicated region fallthrough
CT: control target
= control target key end

     0   :  { %vm322_vm0 = vcmask 1047556   ;;  %s616_s10 = smov 8   ;;  %vm324_vm1 = vcmask 64512   ;;  %vm397_vm2 = vcmask 130112   ;;  %s907_s0 = inlined_call_operand.vmem [shape: f32[4,2,8,2,8], index: 0, kind: input, shape index: {}]   ;;  %s908_s1 = inlined_call_operand.vmem [shape: f32[4,16,16], index: 1, kind: output, shape index: {}]  }
   0x1   :  { %v594_v0 = vld [vmem:[%s907_s0 + $0xe] sm:$0x3]  ;;  %v595_v1 = vld [vmem:[%s907_s0 + $0xc] sm:$0x3]  ;;  %v596_v2 = vld [vmem:[%s907_s0 + $0xa] sm:$0x3] }
   0x2   :  { %288 = vst [vmem:[#allocation0 + $0x38] sm:$0x3] %v594_v0  ;;  %293 = vst [vmem:[#allocation0 + $0x30] sm:$0x3] %v595_v1  ;;  %v597_v3 = vld [vmem:[%s907_s0 + $0x8] sm:$0x3] }
   0x3   :  { %298 = vst [vmem:[#allocation0 + $0x28] sm:$0x3] %v596_v2  ;;  %v598_v4 = vld [vmem:[%s907_s0 + $0x6] sm:$0x3]  ;;  %v599_v5 = vld [vmem:[%s907_s0 + $0x4] sm:$0x3] }
   0x4   :  { %303 = vst [vmem:[#allocation0 + $0x20] sm:$0x3] %v597_v3  ;;  %308 = vst [vmem:[#allocation0 + $0x18] sm:$0x3] %v598_v4  ;;  %v600_v6 = vld [vmem:[%s907_s0 + $0x2] sm:$0x3] }
   0x5   :  { %313 = vst [vmem:[#allocation0 + $0x10] sm:$0x3] %v599_v5  ;;  %v318_v7 = vld [vmem:[%s907_s0] sm:$0x3]  ;;  %317 = vst [vmem:[#allocation0 + $0x8] sm:$0x3] %v600_v6 }
   0x6   :  { %319 = vst [vmem:[#allocation0] sm:$0x3] %v318_v7  ;;  %v586_v8 = vld [vmem:[%s907_s0 + $0x1e] sm:$0x3]  ;;  %v587_v9 = vld [vmem:[%s907_s0 + $0x1c] sm:$0x3] }
   0x7   :  { %v588_v10 = vld [vmem:[%s907_s0 + $0x1a] sm:$0x3]  ;;  %248 = vst [vmem:[#allocation0 + $0x78] sm:$0x3] %v586_v8  ;;  %253 = vst [vmem:[#allocation0 + $0x70] sm:$0x3] %v587_v9 }
   0x8   :  { %258 = vst [vmem:[#allocation0 + $0x68] sm:$0x3] %v588_v10  ;;  %v589_v11 = vld [vmem:[%s907_s0 + $0x18] sm:$0x3]  ;;  %v590_v12 = vld [vmem:[%s907_s0 + $0x16] sm:$0x3] }
   0x9   :  { %v591_v13 = vld [vmem:[%s907_s0 + $0x14] sm:$0x3]  ;;  %263 = vst [vmem:[#allocation0 + $0x60] sm:$0x3] %v589_v11  ;;  %268 = vst [vmem:[#allocation0 + $0x58] sm:$0x3] %v590_v12 }
   0xa   :  { %273 = vst [vmem:[#allocation0 + $0x50] sm:$0x3] %v591_v13  ;;  %v592_v14 = vld [vmem:[%s907_s0 + $0x12] sm:$0x3]  ;;  %v593_v15 = vld [vmem:[%s907_s0 + $0x10] sm:$0x3] }
   0xb   :  { %v562_v16 = vld [vmem:[%s907_s0 + $0x4e] sm:$0x3]  ;;  %278 = vst [vmem:[#allocation0 + $0x48] sm:$0x3] %v592_v14  ;;  %283 = vst [vmem:[#allocation0 + $0x40] sm:$0x3] %v593_v15 }
   0xc   :  { %128 = vst [vmem:[#allocation0 + $0x138] sm:$0x3] %v562_v16  ;;  %v563_v17 = vld [vmem:[%s907_s0 + $0x4c] sm:$0x3]  ;;  %v564_v18 = vld [vmem:[%s907_s0 + $0x4a] sm:$0x3] }
   0xd   :  { %v565_v19 = vld [vmem:[%s907_s0 + $0x48] sm:$0x3]  ;;  %133 = vst [vmem:[#allocation0 + $0x130] sm:$0x3] %v563_v17  ;;  %138 = vst [vmem:[#allocation0 + $0x128] sm:$0x3] %v564_v18 }
   0xe   :  { %143 = vst [vmem:[#allocation0 + $0x120] sm:$0x3] %v565_v19  ;;  %v566_v20 = vld [vmem:[%s907_s0 + $0x46] sm:$0x3]  ;;  %v567_v21 = vld [vmem:[%s907_s0 + $0x44] sm:$0x3] }
   0xf   :  { %v568_v22 = vld [vmem:[%s907_s0 + $0x42] sm:$0x3]  ;;  %148 = vst [vmem:[#allocation0 + $0x118] sm:$0x3] %v566_v20  ;;  %153 = vst [vmem:[#allocation0 + $0x110] sm:$0x3] %v567_v21 }
  0x10   :  { %158 = vst [vmem:[#allocation0 + $0x108] sm:$0x3] %v568_v22  ;;  %v569_v23 = vld [vmem:[%s907_s0 + $0x40] sm:$0x3]  ;;  %v554_v24 = vld [vmem:[%s907_s0 + $0x5e] sm:$0x3] }
  0x11   :  { %v555_v25 = vld [vmem:[%s907_s0 + $0x5c] sm:$0x3]  ;;  %v392_v26 = vld [vmem:[#allocation0 + $0x1] ss:$8 sm:$0xf0]  }
  0x12   :  { %163 = vst [vmem:[#allocation0 + $0x100] sm:$0x3] %v569_v23  ;;  %88 = vst [vmem:[#allocation0 + $0x178] sm:$0x3] %v554_v24  ;;  %v556_v27 = vld [vmem:[%s907_s0 + $0x5a] sm:$0x3] }
  0x13   :  { %93 = vst [vmem:[#allocation0 + $0x170] sm:$0x3] %v555_v25  ;;  %v390_v28 = vld [vmem:[#allocation0 + $0x1] ss:$8 sm:$0xf]  }
  0x14   :  { %98 = vst [vmem:[#allocation0 + $0x168] sm:$0x3] %v556_v27  ;;  %v557_v29 = vld [vmem:[%s907_s0 + $0x58] sm:$0x3]  ;;  %v394_v30 = vsel %vm322_vm0, %v392_v26, %v390_v28  ;;  %v558_v31 = vld [vmem:[%s907_s0 + $0x56] sm:$0x3] }
  0x15   :  { %103 = vst [vmem:[#allocation0 + $0x160] sm:$0x3] %v557_v29  ;;  %v559_v32 = vld [vmem:[%s907_s0 + $0x54] sm:$0x3]  ;;  %v560_v33 = vld [vmem:[%s907_s0 + $0x52] sm:$0x3]  ;;  %395 = vrot.lane.b32.xlu0 %v394_v30, %s616_s10 }
  0x16   :  { %v413_v34 = vld [vmem:[#allocation0 + $0x41] ss:$8 sm:$0xf0]   ;;  %108 = vst [vmem:[#allocation0 + $0x158] sm:$0x3] %v558_v31 }
  0x17   :  { %113 = vst [vmem:[#allocation0 + $0x150] sm:$0x3] %v559_v32  ;;  %118 = vst [vmem:[#allocation0 + $0x148] sm:$0x3] %v560_v33  ;;  %v561_v35 = vld [vmem:[%s907_s0 + $0x50] sm:$0x3] }
  0x18   :  { %v411_v36 = vld [vmem:[#allocation0 + $0x41] ss:$8 sm:$0xf]   ;;  %123 = vst [vmem:[#allocation0 + $0x140] sm:$0x3] %v561_v35 }
  0x19   :  { %v578_v37 = vld [vmem:[%s907_s0 + $0x2e] sm:$0x3]  ;;  %v415_v38 = vsel %vm322_vm0, %v413_v34, %v411_v36  ;;  %v402_v39 = vld [vmem:[#allocation0 + $0x101] ss:$8 sm:$0xf0]  }
  0x1a   :  { %208 = vst [vmem:[#allocation0 + $0xb8] sm:$0x3] %v578_v37  ;;  %v579_v40 = vld [vmem:[%s907_s0 + $0x2c] sm:$0x3]  ;;  %416 = vrot.lane.b32.xlu1 %v415_v38, %s616_s10  ;;  %v580_v41 = vld [vmem:[%s907_s0 + $0x2a] sm:$0x3] }
  0x1b   :  { %213 = vst [vmem:[#allocation0 + $0xb0] sm:$0x3] %v579_v40  ;;  %v581_v42 = vld [vmem:[%s907_s0 + $0x28] sm:$0x3]  ;;  %v582_v43 = vld [vmem:[%s907_s0 + $0x26] sm:$0x3] }
  0x1c   :  { %v400_v44 = vld [vmem:[#allocation0 + $0x101] ss:$8 sm:$0xf]   ;;  %218 = vst [vmem:[#allocation0 + $0xa8] sm:$0x3] %v580_v41 }
  0x1d   :  { %223 = vst [vmem:[#allocation0 + $0xa0] sm:$0x3] %v581_v42  ;;  %228 = vst [vmem:[#allocation0 + $0x98] sm:$0x3] %v582_v43  ;;  %v583_v45 = vld [vmem:[%s907_s0 + $0x24] sm:$0x3]  ;;  %v404_v46 = vsel %vm322_vm0, %v402_v39, %v400_v44 }
  0x1e   :  { %233 = vst [vmem:[#allocation0 + $0x90] sm:$0x3] %v583_v45  ;;  %v584_v47 = vld [vmem:[%s907_s0 + $0x22] sm:$0x3]  ;;  %v585_v48 = vld [vmem:[%s907_s0 + $0x20] sm:$0x3]  ;;  %405 = vrot.lane.b32.xlu0 %v404_v46, %s616_s10 }
  0x1f   :  { %v546_v49 = vld [vmem:[%s907_s0 + $0x6e] sm:$0x3]  ;;  %v424_v50 = vld [vmem:[#allocation0 + $0x141] ss:$8 sm:$0xf0]  }
  0x20   :  { %238 = vst [vmem:[#allocation0 + $0x88] sm:$0x3] %v584_v47  ;;  %243 = vst [vmem:[#allocation0 + $0x80] sm:$0x3] %v585_v48  ;;  %v547_v51 = vld [vmem:[%s907_s0 + $0x6c] sm:$0x3] }
  0x21   :  { %48 = vst [vmem:[#allocation0 + $0x1b8] sm:$0x3] %v546_v49  ;;  %53 = vst [vmem:[#allocation0 + $0x1b0] sm:$0x3] %v547_v51  ;;  %v548_v52 = vld [vmem:[%s907_s0 + $0x6a] sm:$0x3] }
  0x22   :  { %v549_v53 = vld [vmem:[%s907_s0 + $0x68] sm:$0x3]  ;;  %v550_v54 = vld [vmem:[%s907_s0 + $0x66] sm:$0x3]  ;;  %58 = vst [vmem:[#allocation0 + $0x1a8] sm:$0x3] %v548_v52 }
  0x23   :  { %v422_v55 = vld [vmem:[#allocation0 + $0x141] ss:$8 sm:$0xf]   ;;  %63 = vst [vmem:[#allocation0 + $0x1a0] sm:$0x3] %v549_v53 }
  0x24   :  { %68 = vst [vmem:[#allocation0 + $0x198] sm:$0x3] %v550_v54  ;;  %v551_v56 = vld [vmem:[%s907_s0 + $0x64] sm:$0x3]  ;;  %v426_v57 = vsel %vm322_vm0, %v424_v50, %v422_v55  ;;  %v552_v58 = vld [vmem:[%s907_s0 + $0x62] sm:$0x3] }
  0x25   :  { %73 = vst [vmem:[#allocation0 + $0x190] sm:$0x3] %v551_v56  ;;  %v553_v59 = vld [vmem:[%s907_s0 + $0x60] sm:$0x3]  ;;  %v570_v60 = vld [vmem:[%s907_s0 + $0x3e] sm:$0x3]  ;;  %427 = vrot.lane.b32.xlu1 %v426_v57, %s616_s10 }
  0x26   :  { %78 = vst [vmem:[#allocation0 + $0x188] sm:$0x3] %v552_v58  ;;  %83 = vst [vmem:[#allocation0 + $0x180] sm:$0x3] %v553_v59  ;;  %v571_v61 = vld [vmem:[%s907_s0 + $0x3c] sm:$0x3] }
  0x27   :  { %168 = vst [vmem:[#allocation0 + $0xf8] sm:$0x3] %v570_v60  ;;  %v572_v62 = vld [vmem:[%s907_s0 + $0x3a] sm:$0x3]  ;;  %v573_v63 = vld [vmem:[%s907_s0 + $0x38] sm:$0x3] }
  0x28   :  { %v435_v0 = vld [vmem:[#allocation0 + $0x81] ss:$8 sm:$0xf0]   ;;  %173 = vst [vmem:[#allocation0 + $0xf0] sm:$0x3] %v571_v61 }
  0x29   :  { %178 = vst [vmem:[#allocation0 + $0xe8] sm:$0x3] %v572_v62  ;;  %183 = vst [vmem:[#allocation0 + $0xe0] sm:$0x3] %v573_v63  ;;  %v574_v1 = vld [vmem:[%s907_s0 + $0x36] sm:$0x3] }
  0x2a   :  { %188 = vst [vmem:[#allocation0 + $0xd8] sm:$0x3] %v574_v1  ;;  %v575_v2 = vld [vmem:[%s907_s0 + $0x34] sm:$0x3]  ;;  %v576_v3 = vld [vmem:[%s907_s0 + $0x32] sm:$0x3] }
  0x2b   :  { %v577_v4 = vld [vmem:[%s907_s0 + $0x30] sm:$0x3]  ;;  %193 = vst [vmem:[#allocation0 + $0xd0] sm:$0x3] %v575_v2  ;;  %198 = vst [vmem:[#allocation0 + $0xc8] sm:$0x3] %v576_v3 }
  0x2c   :  { %v433_v5 = vld [vmem:[#allocation0 + $0x81] ss:$8 sm:$0xf]   ;;  %203 = vst [vmem:[#allocation0 + $0xc0] sm:$0x3] %v577_v4 }
  0x2d   :  { %v538_v6 = vld [vmem:[%s907_s0 + $0x7e] sm:$0x3]  ;;  %v437_v7 = vsel %vm322_vm0, %v435_v0, %v433_v5  ;;  %v539_v8 = vld [vmem:[%s907_s0 + $0x7c] sm:$0x3]  ;;  %v540_v9 = vld [vmem:[%s907_s0 + $0x7a] sm:$0x3] }
  0x2e   :  { %8 = vst [vmem:[#allocation0 + $0x1f8] sm:$0x3] %v538_v6  ;;  %v541_v10 = vld [vmem:[%s907_s0 + $0x78] sm:$0x3]  ;;  %438 = vrot.lane.b32.xlu0 %v437_v7, %s616_s10  ;;  %13 = vst [vmem:[#allocation0 + $0x1f0] sm:$0x3] %v539_v8 }
  0x2f   :  { %v446_v11 = vld [vmem:[#allocation0 + $0x181] ss:$8 sm:$0xf0]   ;;  %18 = vst [vmem:[#allocation0 + $0x1e8] sm:$0x3] %v540_v9 }
  0x30   :  { %23 = vst [vmem:[#allocation0 + $0x1e0] sm:$0x3] %v541_v10  ;;  %v542_v12 = vld [vmem:[%s907_s0 + $0x76] sm:$0x3]  ;;  %v543_v13 = vld [vmem:[%s907_s0 + $0x74] sm:$0x3] }
  0x31   :  { %28 = vst [vmem:[#allocation0 + $0x1d8] sm:$0x3] %v542_v12  ;;  %v544_v14 = vld [vmem:[%s907_s0 + $0x72] sm:$0x3]  ;;  %v545_v15 = vld [vmem:[%s907_s0 + $0x70] sm:$0x3] }
  0x32   :  { %v444_v16 = vld [vmem:[#allocation0 + $0x181] ss:$8 sm:$0xf]   ;;  %33 = vst [vmem:[#allocation0 + $0x1d0] sm:$0x3] %v543_v13 }
  0x33   :  { %38 = vst [vmem:[#allocation0 + $0x1c8] sm:$0x3] %v544_v14  ;;  %43 = vst [vmem:[#allocation0 + $0x1c0] sm:$0x3] %v545_v15  ;;  %v448_v18 = vsel %vm322_vm0, %v446_v11, %v444_v16 }
  0x34   :  { %v320_v17 = vld [vmem:[#allocation0] ss:$8 sm:$0xf]   ;;  %v457_v19 = vld [vmem:[#allocation0 + $0xc1] ss:$8 sm:$0xf0]   ;;  %449 = vrot.lane.b32.xlu1 %v448_v18, %s616_s10 }
  0x35   :  { %v321_v20 = vld [vmem:[#allocation0] ss:$8 sm:$0xf0]   ;;  %v455_v24 = vld [vmem:[#allocation0 + $0xc1] ss:$8 sm:$0xf]  }
  0x36   :  { %v323_v21 = vsel %vm322_vm0, %v321_v20, %v320_v17  ;;  %v327_v22 = vld [vmem:[#allocation0 + $0x40] ss:$8 sm:$0xf]   ;;  %v459_v27 = vsel %vm322_vm0, %v457_v19, %v455_v24 }
  0x37   :  { %v329_v23 = vld [vmem:[#allocation0 + $0x40] ss:$8 sm:$0xf0]   ;;  %325 = vst.msk [vmem:[%s908_s1] sm:$0xff] %vm324_vm1, %v323_v21   ;;  %460 = vrot.lane.b32.xlu0 %v459_v27, %s616_s10 }
  0x38   :  { %v331_v25 = vsel %vm322_vm0, %v329_v23, %v327_v22  ;;  %v354_v26 = vld [vmem:[#allocation0 + $0x100] ss:$8 sm:$0xf]   ;;  %v468_v30 = vld [vmem:[#allocation0 + $0x1c1] ss:$8 sm:$0xf0]  }
  0x39   :  { %601 = vst.msk [vmem:[%s908_s1 + $0x8] sm:$0xff] %vm324_vm1, %v331_v25   ;;  %v356_v28 = vld [vmem:[#allocation0 + $0x100] ss:$8 sm:$0xf0]  }
  0x3a   :  { %v363_v29 = vld [vmem:[#allocation0 + $0x140] ss:$8 sm:$0xf]   ;;  %v358_v31 = vsel %vm322_vm0, %v356_v28, %v354_v26  ;;  %v466_v36 = vld [vmem:[#allocation0 + $0x1c1] ss:$8 sm:$0xf]  }
  0x3b   :  { %v365_v32 = vld [vmem:[#allocation0 + $0x140] ss:$8 sm:$0xf0]   ;;  %604 = vst.msk [vmem:[%s908_s1 + $0x20] sm:$0xff] %vm324_vm1, %v358_v31   ;;  %v470_v39 = vsel %vm322_vm0, %v468_v30, %v466_v36 }
  0x3c   :  { %v367_v33 = vsel %vm322_vm0, %v365_v32, %v363_v29  ;;  %v336_v34 = vld [vmem:[#allocation0 + $0x80] ss:$8 sm:$0xf]   ;;  %471 = vrot.lane.b32.xlu1 %v470_v39, %s616_s10 }
  0x3d   :  { %v338_v35 = vld [vmem:[#allocation0 + $0x80] ss:$8 sm:$0xf0]   ;;  %605 = vst.msk [vmem:[%s908_s1 + $0x28] sm:$0xff] %vm324_vm1, %v367_v33  }
  0x3e   :  { %v340_v37 = vsel %vm322_vm0, %v338_v35, %v336_v34  ;;  %v372_v38 = vld [vmem:[#allocation0 + $0x180] ss:$8 sm:$0xf]  }
  0x3f   :  { %602 = vst.msk [vmem:[%s908_s1 + $0x10] sm:$0xff] %vm324_vm1, %v340_v37   ;;  %v374_v40 = vld [vmem:[#allocation0 + $0x180] ss:$8 sm:$0xf0]  }
  0x40   :  { %v345_v41 = vld [vmem:[#allocation0 + $0xc0] ss:$8 sm:$0xf]   ;;  %v376_v42 = vsel %vm322_vm0, %v374_v40, %v372_v38 }
  0x41   :  { %v347_v43 = vld [vmem:[#allocation0 + $0xc0] ss:$8 sm:$0xf0]   ;;  %606 = vst.msk [vmem:[%s908_s1 + $0x30] sm:$0xff] %vm324_vm1, %v376_v42  }
  0x42   :  { %v381_v44 = vld [vmem:[#allocation0 + $0x1c0] ss:$8 sm:$0xf]   ;;  %v349_v45 = vsel %vm322_vm0, %v347_v43, %v345_v41 }
  0x43   :  { %v383_v46 = vld [vmem:[#allocation0 + $0x1c0] ss:$8 sm:$0xf0]   ;;  %603 = vst.msk [vmem:[%s908_s1 + $0x18] sm:$0xff] %vm324_vm1, %v349_v45  }
  0x44   :  { %v385_v47 = vsel %vm322_vm0, %v383_v46, %v381_v44 }
  0x45   :  { %607 = vst.msk [vmem:[%s908_s1 + $0x38] sm:$0xff] %vm324_vm1, %v385_v47  }
  0x87   :  { %v396_v48 = vpop.permute.xlu0 %395  }
  0x88   :  { %398 = vst.msk [vmem:[%s908_s1] sm:$0xff] %vm397_vm2, %v396_v48  }
  0x8c   :  { %v417_v49 = vpop.permute.xlu1 %416  }
  0x8d   :  { %609 = vst.msk [vmem:[%s908_s1 + $0x8] sm:$0xff] %vm397_vm2, %v417_v49  }
  0x90   :  { %v406_v50 = vpop.permute.xlu0 %405  }
  0x91   :  { %608 = vst.msk [vmem:[%s908_s1 + $0x20] sm:$0xff] %vm397_vm2, %v406_v50  }
  0x97   :  { %v428_v51 = vpop.permute.xlu1 %427  }
  0x98   :  { %610 = vst.msk [vmem:[%s908_s1 + $0x28] sm:$0xff] %vm397_vm2, %v428_v51  }
  0xa0   :  { %v439_v52 = vpop.permute.xlu0 %438  }
  0xa1   :  { %611 = vst.msk [vmem:[%s908_s1 + $0x10] sm:$0xff] %vm397_vm2, %v439_v52  }
  0xa6   :  { %v450_v53 = vpop.permute.xlu1 %449  }
  0xa7   :  { %612 = vst.msk [vmem:[%s908_s1 + $0x30] sm:$0xff] %vm397_vm2, %v450_v53  }
  0xa9   :  { %v461_v54 = vpop.permute.xlu0 %460  }
  0xaa   :  { %613 = vst.msk [vmem:[%s908_s1 + $0x18] sm:$0xff] %vm397_vm2, %v461_v54  }
  0xae   :  { %v472_v55 = vpop.permute.xlu1 %471  }
  0xaf   :  { %614 = vst.msk [vmem:[%s908_s1 + $0x38] sm:$0xff] %vm397_vm2, %v472_v55  }

// kernel: mask_predictor_forward.1
= control target key start
LH: loop header
LB: loop body
LE: loop exit
PB: predicated region body
PF: predicated region fallthrough
CT: control target
= control target key end

     0   :  { %v13063_v0 = vmov 0.0   ;;  %s13064_s6 = smov 5   ;;  %vm13065_vm0 = vmmov 0   ;;  %s13066_s10 = smov 4   ;;  %vm1478_vm1 = vcmask 130048   ;;  %vm4624_vm2 = vcmask 1041408   ;;  %s14853_s0 = inlined_call_operand.smem [shape: u32[40], index: -1, kind: input, shape index: {}] }
   0x1   :  { %s13113_s5 = sld [smem:[%s14853_s0]]   ;;  %10872 = vmatprep.subr.bf16.mxu0 %v13063_v0  ;;  %10892 = vmatprep.subr.bf16.mxu1 %v13063_v0  ;;  %s13067_s14 = smov 1   ;;  %vm4777_vm3 = vcmask 523264   ;;  %vm6299_vm4 = vcmask 123904   ;;  %vm9617_vm13 = vcmask 1024  }
   0x2   :  { %s13120_s9 = sld [smem:[%s14853_s0 + %s13064_s6]]   ;;  %10888 = vmatprep.mubr.msk.bf16.mxu0 %vm13065_vm0, %v13063_v0  ;;  %10908 = vmatprep.mubr.msk.bf16.mxu1 %vm13065_vm0, %v13063_v0  ;;  %s13068_s18 = smov 6  }
   0x3   :  { %s9626_s13 = sld [smem:[%s14853_s0 + %s13066_s10]]   ;;  %s13069_s22 = smov 8  }
   0x4   :  { %s13408_s17 = sld [smem:[%s14853_s0 + %s13067_s14]]   ;;  %s13070_s26 = smov 9  }
   0x5   :  { %s9628_s21 = sld [smem:[%s14853_s0 + %s13068_s18]]   ;;  %s13071_s30 = smov 7  }
   0x6   :  { %s13476_s25 = sld [smem:[%s14853_s0 + %s13069_s22]]   ;;  %s13072_s4 = smov 11  }
   0x7   :  { %v13123_v1 = vld [vmem:[%s13113_s5] sm:$0xff]  ;;  %v13126_v2 = vld [vmem:[%s13113_s5 + $0x8] sm:$0xff]  ;;  %s13507_s29 = sld [smem:[%s14853_s0 + %s13070_s26]]   ;;  %s13073_s8 = smov 10  }
   0x8   :  { %v175_v3 = vmul.f32 %v13123_v1, %v13123_v1  ;;  %v12386_v4 = vld [vmem:[%s13120_s9] sm:$0xff]   ;;  %v176_v6 = vmul.f32 %v13126_v2, %v13126_v2  ;;  %v12388_v7 = vld [vmem:[%s13120_s9 + $0x8] sm:$0xff]   ;;  %v12390_v9 = vld [vmem:[%s13120_s9 + $0x10] sm:$0xff]   ;;  %s9629_s3 = sld [smem:[%s14853_s0 + %s13071_s30]]   ;;  %s13074_s12 = smov 12  }
   0x9   :  { %v12387_v5 = vld [vmem:[%s13120_s9 + $0x40] sm:$0xff]   ;;  %10873 = vmatpush3.bf16.msra.mxu0 %v12386_v4  ;;  %v12389_v8 = vld [vmem:[%s13120_s9 + $0x48] sm:$0xff]   ;;  %v12391_v10 = vld [vmem:[%s13120_s9 + $0x50] sm:$0xff]   ;;  %s13537_s7 = sld [smem:[%s14853_s0 + %s13072_s4]]   ;;  %s13075_s16 = smov 14  }
   0xa   :  { %177 = vadd.xlane.f32.xlu0 %v175_v3  ;;  %10893 = vmatpush3.bf16.msra.mxu1 %v12387_v5  ;;  %v12392_v11 = vld [vmem:[%s13120_s9 + $0x18] sm:$0xff]   ;;  %v12394_v13 = vld [vmem:[%s13120_s9 + $0x20] sm:$0xff]   ;;  %v12396_v15 = vld [vmem:[%s13120_s9 + $0x28] sm:$0xff]   ;;  %s9632_s11 = sld [smem:[%s14853_s0 + %s13073_s8]]   ;;  %s13076_s20 = smov 3  }
   0xb   :  { %10874 = vmatprep.subr.bf16.mxu0 %v13063_v0  ;;  %10894 = vmatprep.subr.bf16.mxu1 %v13063_v0  ;;  %v12393_v12 = vld [vmem:[%s13120_s9 + $0x58] sm:$0xff]   ;;  %v12395_v14 = vld [vmem:[%s13120_s9 + $0x60] sm:$0xff]   ;;  %v12397_v16 = vld [vmem:[%s13120_s9 + $0x68] sm:$0xff]   ;;  %s9634_s15 = sld [smem:[%s14853_s0 + %s13074_s12]]   ;;  %s13077_s24 = smov 18  }
   0xc   :  { %v12398_v17 = vld [vmem:[%s13120_s9 + $0x30] sm:$0xff]   ;;  %v12400_v19 = vld [vmem:[%s13120_s9 + $0x38] sm:$0xff]   ;;  %v9662_v30 = vld [vmem:[%s9626_s13] ss:$0 sm:$0xff]  ;;  %s13884_s19 = sld [smem:[%s14853_s0 + %s13075_s16]]   ;;  %s13078_s28 = smov 15  }
   0xd   :  { %10875 = vmatpush3.bf16.msra.mxu0 %v12388_v7  ;;  %v12399_v18 = vld [vmem:[%s13120_s9 + $0x70] sm:$0xff]   ;;  %v12401_v20 = vld [vmem:[%s13120_s9 + $0x78] sm:$0xff]   ;;  %v12402_v34 = vld [vmem:[%s13120_s9 + $0x80] sm:$0xff]   ;;  %s9625_s23 = sld [smem:[%s14853_s0 + %s13076_s20]]   ;;  %s13079_s2 = smov 13  }
   0xe   :  { %179 = vadd.xlane.f32.xlu0 %v176_v6  ;;  %10895 = vmatpush3.bf16.msra.mxu1 %v12389_v8  ;;  %v12403_v35 = vld [vmem:[%s13120_s9 + $0xc0] sm:$0xff]   ;;  %v12404_v37 = vld [vmem:[%s13120_s9 + $0x88] sm:$0xff]   ;;  %v12406_v39 = vld [vmem:[%s13120_s9 + $0x90] sm:$0xff]   ;;  %s13921_s27 = sld [smem:[%s14853_s0 + %s13077_s24]]   ;;  %s13080_s6 = smov 17  }
   0xf   :  { %10876 = vmatprep.subr.bf16.mxu0 %v13063_v0  ;;  %10896 = vmatprep.subr.bf16.mxu1 %v13063_v0  ;;  %v12405_v38 = vld [vmem:[%s13120_s9 + $0xc8] sm:$0xff]   ;;  %v12407_v40 = vld [vmem:[%s13120_s9 + $0xd0] sm:$0xff]   ;;  %v12408_v41 = vld [vmem:[%s13120_s9 + $0x98] sm:$0xff]   ;;  %s13928_s1 = sld [smem:[%s14853_s0 + %s13078_s28]]   ;;  %s13081_s10 = smov 19  }
  0x10   :  { %v12409_v42 = vld [vmem:[%s13120_s9 + $0xd8] sm:$0xff]   ;;  %v12410_v43 = vld [vmem:[%s13120_s9 + $0xa0] sm:$0xff]   ;;  %v12412_v45 = vld [vmem:[%s13120_s9 + $0xa8] sm:$0xff]   ;;  %s9641_s13 = sld [smem:[%s14853_s0 + %s13081_s10]]   ;;  %s13082_s14 = smov 21  }
  0x11   :  { %10877 = vmatpush3.bf16.msra.mxu0 %v12390_v9  ;;  %v12411_v44 = vld [vmem:[%s13120_s9 + $0xe0] sm:$0xff]   ;;  %v12413_v46 = vld [vmem:[%s13120_s9 + $0xe8] sm:$0xff]   ;;  %v12414_v47 = vld [vmem:[%s13120_s9 + $0xb0] sm:$0xff]   ;;  %s13083_s18 = smov 22   ;;  %s13084_s22 = smov 20  }
  0x12   :  { %10897 = vmatpush3.bf16.msra.mxu1 %v12391_v10  ;;  %10878 = vmatprep.subr.bf16.mxu0 %v13063_v0  ;;  %v12415_v48 = vld [vmem:[%s13120_s9 + $0xf0] sm:$0xff]   ;;  %v12416_v49 = vld [vmem:[%s13120_s9 + $0xb8] sm:$0xff]   ;;  %v12418_v51 = vld [vmem:[%s13120_s9 + $0x100] sm:$0xff]   ;;  %s13085_s26 = smov 16   ;;  %s13086_s30 = smov 2  }
  0x13   :  { %10898 = vmatprep.subr.bf16.mxu1 %v13063_v0  ;;  %v12417_v50 = vld [vmem:[%s13120_s9 + $0xf8] sm:$0xff]   ;;  %v12419_v52 = vld [vmem:[%s13120_s9 + $0x140] sm:$0xff]   ;;  %v12420_v53 = vld [vmem:[%s13120_s9 + $0x108] sm:$0xff]   ;;  %s13087_s4 = smov 23   ;;  %s13088_s8 = smov 25  }
  0x14   :  { %v12421_v54 = vld [vmem:[%s13120_s9 + $0x148] sm:$0xff]   ;;  %v12422_v55 = vld [vmem:[%s13120_s9 + $0x110] sm:$0xff]   ;;  %v12424_v57 = vld [vmem:[%s13120_s9 + $0x118] sm:$0xff]   ;;  %s13089_s12 = smov 26   ;;  %s13090_s16 = smov 24  }
  0x15   :  { %10879 = vmatpush3.bf16.msra.mxu0 %v12392_v11  ;;  %v12423_v56 = vld [vmem:[%s13120_s9 + $0x150] sm:$0xff]   ;;  %v12425_v58 = vld [vmem:[%s13120_s9 + $0x158] sm:$0xff]   ;;  %v12426_v59 = vld [vmem:[%s13120_s9 + $0x120] sm:$0xff]   ;;  %s13091_s20 = smov 28   ;;  %s13092_s24 = smov 29  }
  0x16   :  { %10899 = vmatpush3.bf16.msra.mxu1 %v12393_v12  ;;  %10880 = vmatprep.subr.bf16.mxu0 %v13063_v0  ;;  %v12427_v60 = vld [vmem:[%s13120_s9 + $0x160] sm:$0xff]   ;;  %v12428_v61 = vld [vmem:[%s13120_s9 + $0x128] sm:$0xff]   ;;  %v12430_v63 = vld [vmem:[%s13120_s9 + $0x130] sm:$0xff]   ;;  %s13093_s28 = smov 27  }
  0x17   :  { %10900 = vmatprep.subr.bf16.mxu1 %v13063_v0  ;;  %v12429_v62 = vld [vmem:[%s13120_s9 + $0x168] sm:$0xff]   ;;  %v12433_v3 = vld [vmem:[%s13120_s9 + $0x178] sm:$0xff]   ;;  %v12434_v4 = vld [vmem:[%s13120_s9 + $0x180] sm:$0xff]  }
  0x18   :  { %v12435_v5 = vld [vmem:[%s13120_s9 + $0x1c0] sm:$0xff]   ;;  %v12436_v6 = vld [vmem:[%s13120_s9 + $0x188] sm:$0xff]   ;;  %v12438_v8 = vld [vmem:[%s13120_s9 + $0x190] sm:$0xff]  }
  0x19   :  { %10881 = vmatpush3.bf16.msra.mxu0 %v12394_v13  ;;  %v12437_v7 = vld [vmem:[%s13120_s9 + $0x1c8] sm:$0xff]   ;;  %v12439_v9 = vld [vmem:[%s13120_s9 + $0x1d0] sm:$0xff]   ;;  %v12440_v10 = vld [vmem:[%s13120_s9 + $0x198] sm:$0xff]  }
  0x1a   :  { %10901 = vmatpush3.bf16.msra.mxu1 %v12395_v14  ;;  %10882 = vmatprep.subr.bf16.mxu0 %v13063_v0  ;;  %v12441_v11 = vld [vmem:[%s13120_s9 + $0x1d8] sm:$0xff]   ;;  %v12442_v12 = vld [vmem:[%s13120_s9 + $0x1a0] sm:$0xff]   ;;  %v12444_v14 = vld [vmem:[%s13120_s9 + $0x1a8] sm:$0xff]  }
  0x1b   :  { %10902 = vmatprep.subr.bf16.mxu1 %v13063_v0  ;;  %v12443_v13 = vld [vmem:[%s13120_s9 + $0x1e0] sm:$0xff]  }
  0x1d   :  { %10883 = vmatpush3.bf16.msra.mxu0 %v12396_v15  ;;  %v12445_v15 = vld [vmem:[%s13120_s9 + $0x1e8] sm:$0xff]  }
  0x1e   :  { %10903 = vmatpush3.bf16.msra.mxu1 %v12397_v16  ;;  %10884 = vmatprep.subr.bf16.mxu0 %v13063_v0  ;;  %v12446_v16 = vld [vmem:[%s13120_s9 + $0x1b0] sm:$0xff]  }
  0x1f   :  { %10904 = vmatprep.subr.bf16.mxu1 %v13063_v0 }
  0x21   :  { %10885 = vmatpush3.bf16.msra.mxu0 %v12398_v17  ;;  %v12447_v17 = vld [vmem:[%s13120_s9 + $0x1f0] sm:$0xff]  }
  0x22   :  { %10905 = vmatpush3.bf16.msra.mxu1 %v12399_v18  ;;  %10886 = vmatprep.subr.bf16.mxu0 %v13063_v0  ;;  %v12448_v18 = vld [vmem:[%s13120_s9 + $0x1b8] sm:$0xff]  }
  0x23   :  { %10906 = vmatprep.subr.bf16.mxu1 %v13063_v0 }
  0x25   :  { %10887 = vmatpush3.bf16.msra.mxu0 %v12400_v19  ;;  %v12449_v19 = vld [vmem:[%s13120_s9 + $0x1f8] sm:$0xff]  }
  0x26   :  { %10907 = vmatpush3.bf16.msra.mxu1 %v12401_v20  ;;  %10912 = vmatprep.subr.bf16.mxu0 %v13063_v0  ;;  %v12450_v20 = vld [vmem:[%s13120_s9 + $0x200] sm:$0xff]  }
  0x27   :  { %10932 = vmatprep.subr.bf16.mxu1 %v13063_v0 }
  0x97   :  { %v178_v21 = vpop.xlane.xlu0 %177 }
  0x98   :  { %v181_v22 = vmul.f32 0.015625, %v178_v21  ;;  %v12451_v21 = vld [vmem:[%s13120_s9 + $0x240] sm:$0xff]  }
  0x9a   :  { %v183_v23 = vadd.f32 1e-06, %v181_v22  ;;  %v12452_v22 = vld [vmem:[%s13120_s9 + $0x208] sm:$0xff]  }
  0x9b   :  { %v180_v24 = vpop.xlane.xlu0 %179 }
  0x9c   :  { %12922 = vrsqrt.f32 %v183_v23  ;;  %v182_v25 = vmul.f32 0.015625, %v180_v24  ;;  %v12453_v23 = vld [vmem:[%s13120_s9 + $0x248] sm:$0xff]   ;;  %v12454_v24 = vld [vmem:[%s13120_s9 + $0x210] sm:$0xff]  }
  0x9e   :  { %v184_v26 = vadd.f32 1e-06, %v182_v25  ;;  %v12455_v25 = vld [vmem:[%s13120_s9 + $0x250] sm:$0xff]  }
  0xa0   :  { %12924 = vrsqrt.f32 %v184_v26  ;;  %v12456_v26 = vld [vmem:[%s13120_s9 + $0x218] sm:$0xff]  }
  0xa6   :  { %v12923_v27 = vpop.eup %12922 }
  0xa7   :  { %v187_v28 = vmul.f32 %v12923_v27, %v13123_v1  ;;  %v12431_v1 = vld [vmem:[%s13120_s9 + $0x170] sm:$0xff]   ;;  %v12457_v27 = vld [vmem:[%s13120_s9 + $0x258] sm:$0xff]  }
  0xa9   :  { %v195_v32 = vmul.f32 %v9662_v30, %v187_v28  ;;  %v12458_v28 = vld [vmem:[%s13120_s9 + $0x220] sm:$0xff]  }
  0xaa   :  { %v12925_v29 = vpop.eup %12924 }
  0xab   :  { %v188_v31 = vmul.f32 %v12925_v29, %v13126_v2  ;;  %v12432_v2 = vld [vmem:[%s13120_s9 + $0x138] sm:$0xff]   ;;  %v12459_v29 = vld [vmem:[%s13120_s9 + $0x260] sm:$0xff]  }
  0xad   :  { %v196_v33 = vmul.f32 %v9662_v30, %v188_v31  ;;  %v12460_v30 = vld [vmem:[%s13120_s9 + $0x228] sm:$0xff]  }
  0xae   :  { %v12461_v31 = vld [vmem:[%s13120_s9 + $0x268] sm:$0xff]  }
  0xaf   :  { %v13175_v36 = vpack.c.bf16 %v196_v33, %v195_v32  ;;  %v12462_v32 = vld [vmem:[%s13120_s9 + $0x230] sm:$0xff]  }
  0xb0   :  { %v12463_v33 = vld [vmem:[%s13120_s9 + $0x270] sm:$0xff]  }
  0xb1   :  { %10889 = vmatmul.mubr.bf16.vlgmr.msra.gmra.mrb[0].mxu0 %v13175_v36  ;;  %10909 = vmatmul.mubr.bf16.vlgmr.msra.gmra.mrb[0].mxu1 %v13175_v36 }
  0xb2   :  { %10913 = vmatpush3.bf16.msra.mxu0 %v12402_v34  ;;  %10933 = vmatpush3.bf16.msra.mxu1 %v12403_v35  ;;  %v12464_v34 = vld [vmem:[%s13120_s9 + $0x238] sm:$0xff]  }
  0xb3   :  { %10914 = vmatprep.subr.bf16.mxu0 %v13063_v0  ;;  %10934 = vmatprep.subr.bf16.mxu1 %v13063_v0  ;;  %v12465_v35 = vld [vmem:[%s13120_s9 + $0x278] sm:$0xff]  }
  0xb4   :  { %10928 = vmatprep.mubr.msk.bf16.mxu0 %vm13065_vm0, %v13063_v0  ;;  %10948 = vmatprep.mubr.msk.bf16.mxu1 %vm13065_vm0, %v13063_v0 }
  0xb6   :  { %10915 = vmatpush3.bf16.msra.mxu0 %v12404_v37  ;;  %10935 = vmatpush3.bf16.msra.mxu1 %v12405_v38  ;;  %v12466_v37 = vld [vmem:[%s13120_s9 + $0x280] sm:$0xff]  }
  0xb7   :  { %10916 = vmatprep.subr.bf16.mxu0 %v13063_v0  ;;  %10936 = vmatprep.subr.bf16.mxu1 %v13063_v0  ;;  %v12467_v38 = vld [vmem:[%s13120_s9 + $0x2c0] sm:$0xff]  }
  0xba   :  { %10917 = vmatpush3.bf16.msra.mxu0 %v12406_v39  ;;  %10937 = vmatpush3.bf16.msra.mxu1 %v12407_v40  ;;  %v12468_v39 = vld [vmem:[%s13120_s9 + $0x288] sm:$0xff]  }
  0xbb   :  { %10918 = vmatprep.subr.bf16.mxu0 %v13063_v0  ;;  %10938 = vmatprep.subr.bf16.mxu1 %v13063_v0  ;;  %v12469_v40 = vld [vmem:[%s13120_s9 + $0x2c8] sm:$0xff]  }
  0xbe   :  { %10919 = vmatpush3.bf16.msra.mxu0 %v12408_v41  ;;  %10939 = vmatpush3.bf16.msra.mxu1 %v12409_v42  ;;  %v12470_v41 = vld [vmem:[%s13120_s9 + $0x290] sm:$0xff]  }
  0xbf   :  { %10920 = vmatprep.subr.bf16.mxu0 %v13063_v0  ;;  %10940 = vmatprep.subr.bf16.mxu1 %v13063_v0  ;;  %v12471_v42 = vld [vmem:[%s13120_s9 + $0x2d0] sm:$0xff]  }
  0xc2   :  { %10921 = vmatpush3.bf16.msra.mxu0 %v12410_v43  ;;  %10941 = vmatpush3.bf16.msra.mxu1 %v12411_v44  ;;  %v12472_v43 = vld [vmem:[%s13120_s9 + $0x298] sm:$0xff]  }
  0xc3   :  { %10922 = vmatprep.subr.bf16.mxu0 %v13063_v0  ;;  %10942 = vmatprep.subr.bf16.mxu1 %v13063_v0  ;;  %v12473_v44 = vld [vmem:[%s13120_s9 + $0x2d8] sm:$0xff]  }
  0xc6   :  { %10923 = vmatpush3.bf16.msra.mxu0 %v12412_v45  ;;  %10943 = vmatpush3.bf16.msra.mxu1 %v12413_v46  ;;  %v12474_v45 = vld [vmem:[%s13120_s9 + $0x2a0] sm:$0xff]  }
  0xc7   :  { %10924 = vmatprep.subr.bf16.mxu0 %v13063_v0  ;;  %10944 = vmatprep.subr.bf16.mxu1 %v13063_v0  ;;  %v12475_v46 = vld [vmem:[%s13120_s9 + $0x2e0] sm:$0xff]  }
  0xca   :  { %10925 = vmatpush3.bf16.msra.mxu0 %v12414_v47  ;;  %10945 = vmatpush3.bf16.msra.mxu1 %v12415_v48  ;;  %v12476_v47 = vld [vmem:[%s13120_s9 + $0x2a8] sm:$0xff]  }
  0xcb   :  { %10926 = vmatprep.subr.bf16.mxu0 %v13063_v0  ;;  %10946 = vmatprep.subr.bf16.mxu1 %v13063_v0  ;;  %v12477_v48 = vld [vmem:[%s13120_s9 + $0x2e8] sm:$0xff]  }
  0xce   :  { %10927 = vmatpush3.bf16.msra.mxu0 %v12416_v49  ;;  %10947 = vmatpush3.bf16.msra.mxu1 %v12417_v50  ;;  %v12478_v49 = vld [vmem:[%s13120_s9 + $0x2b0] sm:$0xff]  }
  0xcf   :  { %10952 = vmatprep.subr.bf16.mxu0 %v13063_v0  ;;  %10972 = vmatprep.subr.bf16.mxu1 %v13063_v0  ;;  %v12479_v50 = vld [vmem:[%s13120_s9 + $0x2f0] sm:$0xff]  }
  0xd1   :  { %10929 = vmatmul.mubr.bf16.vlgmr.msra.gmra.mrb[4].mxu0 %v13175_v36  ;;  %10949 = vmatmul.mubr.bf16.vlgmr.msra.gmra.mrb[4].mxu1 %v13175_v36 }
  0xd2   :  { %10953 = vmatpush3.bf16.msra.mxu0 %v12418_v51  ;;  %10973 = vmatpush3.bf16.msra.mxu1 %v12419_v52  ;;  %v12480_v51 = vld [vmem:[%s13120_s9 + $0x2b8] sm:$0xff]  }
  0xd3   :  { %10954 = vmatprep.subr.bf16.mxu0 %v13063_v0  ;;  %10974 = vmatprep.subr.bf16.mxu1 %v13063_v0  ;;  %v12481_v52 = vld [vmem:[%s13120_s9 + $0x2f8] sm:$0xff]   ;;  %s9639_s9 = sld [smem:[%s14853_s0 + %s13080_s6]]  }
  0xd4   :  { %10968 = vmatprep.mubr.msk.bf16.mxu0 %vm13065_vm0, %v13063_v0  ;;  %10988 = vmatprep.mubr.msk.bf16.mxu1 %vm13065_vm0, %v13063_v0 }
  0xd6   :  { %10955 = vmatpush3.bf16.msra.mxu0 %v12420_v53  ;;  %10975 = vmatpush3.bf16.msra.mxu1 %v12421_v54 }
  0xd7   :  { %10956 = vmatprep.subr.bf16.mxu0 %v13063_v0  ;;  %10976 = vmatprep.subr.bf16.mxu1 %v13063_v0 }
  0xda   :  { %10957 = vmatpush3.bf16.msra.mxu0 %v12422_v55  ;;  %10977 = vmatpush3.bf16.msra.mxu1 %v12423_v56 }
  0xdb   :  { %10958 = vmatprep.subr.bf16.mxu0 %v13063_v0  ;;  %10978 = vmatprep.subr.bf16.mxu1 %v13063_v0 }
  0xde   :  { %10959 = vmatpush3.bf16.msra.mxu0 %v12424_v57  ;;  %10979 = vmatpush3.bf16.msra.mxu1 %v12425_v58 }
  0xdf   :  { %10960 = vmatprep.subr.bf16.mxu0 %v13063_v0  ;;  %10980 = vmatprep.subr.bf16.mxu1 %v13063_v0 }
  0xe2   :  { %10961 = vmatpush3.bf16.msra.mxu0 %v12426_v59  ;;  %10981 = vmatpush3.bf16.msra.mxu1 %v12427_v60 }
  0xe3   :  { %10962 = vmatprep.subr.bf16.mxu0 %v13063_v0  ;;  %10982 = vmatprep.subr.bf16.mxu1 %v13063_v0 }
  0xe6   :  { %10963 = vmatpush3.bf16.msra.mxu0 %v12428_v61  ;;  %10983 = vmatpush3.bf16.msra.mxu1 %v12429_v62 }
  0xe7   :  { %10964 = vmatprep.subr.bf16.mxu0 %v13063_v0  ;;  %10984 = vmatprep.subr.bf16.mxu1 %v13063_v0 }
  0xea   :  { %10965 = vmatpush3.bf16.msra.mxu0 %v12430_v63  ;;  %10985 = vmatpush3.bf16.msra.mxu1 %v12431_v1 }
  0xeb   :  { %10966 = vmatprep.subr.bf16.mxu0 %v13063_v0  ;;  %10986 = vmatprep.subr.bf16.mxu1 %v13063_v0 }
  0xee   :  { %10967 = vmatpush3.bf16.msra.mxu0 %v12432_v2  ;;  %10987 = vmatpush3.bf16.msra.mxu1 %v12433_v3 }
  0xef   :  { %10992 = vmatprep.subr.bf16.mxu0 %v13063_v0  ;;  %11012 = vmatprep.subr.bf16.mxu1 %v13063_v0 }
  0xf1   :  { %10969 = vmatmul.mubr.bf16.vlgmr.msra.gmra.mrb[8].mxu0 %v13175_v36  ;;  %10989 = vmatmul.mubr.bf16.vlgmr.msra.gmra.mrb[8].mxu1 %v13175_v36 }
  0xf2   :  { %10993 = vmatpush3.bf16.msra.mxu0 %v12434_v4  ;;  %11013 = vmatpush3.bf16.msra.mxu1 %v12435_v5 }
  0xf3   :  { %10994 = vmatprep.subr.bf16.mxu0 %v13063_v0  ;;  %11014 = vmatprep.subr.bf16.mxu1 %v13063_v0 }
  0xf4   :  { %11008 = vmatprep.mubr.msk.bf16.mxu0 %vm13065_vm0, %v13063_v0  ;;  %11028 = vmatprep.mubr.msk.bf16.mxu1 %vm13065_vm0, %v13063_v0 }
  0xf6   :  { %10995 = vmatpush3.bf16.msra.mxu0 %v12436_v6  ;;  %11015 = vmatpush3.bf16.msra.mxu1 %v12437_v7 }
  0xf7   :  { %10996 = vmatprep.subr.bf16.mxu0 %v13063_v0  ;;  %11016 = vmatprep.subr.bf16.mxu1 %v13063_v0 }
  0xfa   :  { %10997 = vmatpush3.bf16.msra.mxu0 %v12438_v8  ;;  %11017 = vmatpush3.bf16.msra.mxu1 %v12439_v9 }
  0xfb   :  { %10998 = vmatprep.subr.bf16.mxu0 %v13063_v0  ;;  %11018 = vmatprep.subr.bf16.mxu1 %v13063_v0 }
  0xfe   :  { %10999 = vmatpush3.bf16.msra.mxu0 %v12440_v10  ;;  %11019 = vmatpush3.bf16.msra.mxu1 %v12441_v11 }
  0xff   :  { %11000 = vmatprep.subr.bf16.mxu0 %v13063_v0  ;;  %11020 = vmatprep.subr.bf16.mxu1 %v13063_v0 }
 0x102   :  { %11001 = vmatpush3.bf16.msra.mxu0 %v12442_v12  ;;  %11021 = vmatpush3.bf16.msra.mxu1 %v12443_v13 }
 0x103   :  { %11002 = vmatprep.subr.bf16.mxu0 %v13063_v0  ;;  %11022 = vmatprep.subr.bf16.mxu1 %v13063_v0 }
 0x106   :  { %11003 = vmatpush3.bf16.msra.mxu0 %v12444_v14  ;;  %11023 = vmatpush3.bf16.msra.mxu1 %v12445_v15 }
 0x107   :  { %11004 = vmatprep.subr.bf16.mxu0 %v13063_v0  ;;  %11024 = vmatprep.subr.bf16.mxu1 %v13063_v0 }
 0x10a   :  { %11005 = vmatpush3.bf16.msra.mxu0 %v12446_v16  ;;  %11025 = vmatpush3.bf16.msra.mxu1 %v12447_v17 }
 0x10b   :  { %11006 = vmatprep.subr.bf16.mxu0 %v13063_v0  ;;  %11026 = vmatprep.subr.bf16.mxu1 %v13063_v0 }
 0x10e   :  { %11007 = vmatpush3.bf16.msra.mxu0 %v12448_v18  ;;  %11027 = vmatpush3.bf16.msra.mxu1 %v12449_v19 }
 0x10f   :  { %11032 = vmatprep.subr.bf16.mxu0 %v13063_v0  ;;  %11052 = vmatprep.subr.bf16.mxu1 %v13063_v0 }
 0x111   :  { %11009 = vmatmul.mubr.bf16.vlgmr.msra.gmra.mrb[12].mxu0 %v13175_v36  ;;  %11029 = vmatmul.mubr.bf16.vlgmr.msra.gmra.mrb[12].mxu1 %v13175_v36 }
 0x112   :  { %11033 = vmatpush3.bf16.msra.mxu0 %v12450_v20  ;;  %11053 = vmatpush3.bf16.msra.mxu1 %v12451_v21 }
 0x113   :  { %11034 = vmatprep.subr.bf16.mxu0 %v13063_v0  ;;  %11054 = vmatprep.subr.bf16.mxu1 %v13063_v0 }
 0x114   :  { %11048 = vmatprep.mubr.msk.bf16.mxu0 %vm13065_vm0, %v13063_v0  ;;  %11068 = vmatprep.mubr.msk.bf16.mxu1 %vm13065_vm0, %v13063_v0 }
 0x116   :  { %11035 = vmatpush3.bf16.msra.mxu0 %v12452_v22  ;;  %11055 = vmatpush3.bf16.msra.mxu1 %v12453_v23 }
 0x117   :  { %11036 = vmatprep.subr.bf16.mxu0 %v13063_v0  ;;  %11056 = vmatprep.subr.bf16.mxu1 %v13063_v0 }
 0x11a   :  { %11037 = vmatpush3.bf16.msra.mxu0 %v12454_v24  ;;  %11057 = vmatpush3.bf16.msra.mxu1 %v12455_v25 }
 0x11b   :  { %11038 = vmatprep.subr.bf16.mxu0 %v13063_v0  ;;  %11058 = vmatprep.subr.bf16.mxu1 %v13063_v0 }
 0x11e   :  { %11039 = vmatpush3.bf16.msra.mxu0 %v12456_v26  ;;  %11059 = vmatpush3.bf16.msra.mxu1 %v12457_v27 }
 0x11f   :  { %11040 = vmatprep.subr.bf16.mxu0 %v13063_v0  ;;  %11060 = vmatprep.subr.bf16.mxu1 %v13063_v0 }
 0x122   :  { %11041 = vmatpush3.bf16.msra.mxu0 %v12458_v28  ;;  %11061 = vmatpush3.bf16.msra.mxu1 %v12459_v29 }
 0x123   :  { %11042 = vmatprep.subr.bf16.mxu0 %v13063_v0  ;;  %11062 = vmatprep.subr.bf16.mxu1 %v13063_v0 }
 0x126   :  { %11043 = vmatpush3.bf16.msra.mxu0 %v12460_v30  ;;  %11063 = vmatpush3.bf16.msra.mxu1 %v12461_v31 }
 0x127   :  { %11044 = vmatprep.subr.bf16.mxu0 %v13063_v0  ;;  %11064 = vmatprep.subr.bf16.mxu1 %v13063_v0 }
 0x12a   :  { %11045 = vmatpush3.bf16.msra.mxu0 %v12462_v32  ;;  %11065 = vmatpush3.bf16.msra.mxu1 %v12463_v33 }
 0x12b   :  { %11046 = vmatprep.subr.bf16.mxu0 %v13063_v0  ;;  %11066 = vmatprep.subr.bf16.mxu1 %v13063_v0 }
 0x12e   :  { %11047 = vmatpush3.bf16.msra.mxu0 %v12464_v34  ;;  %11067 = vmatpush3.bf16.msra.mxu1 %v12465_v35 }
 0x12f   :  { %11072 = vmatprep.subr.bf16.mxu0 %v13063_v0  ;;  %11092 = vmatprep.subr.bf16.mxu1 %v13063_v0 }
 0x131   :  { %11049 = vmatmul.mubr.bf16.vlgmr.msra.gmra.mrb[16].mxu0 %v13175_v36  ;;  %11069 = vmatmul.mubr.bf16.vlgmr.msra.gmra.mrb[16].mxu1 %v13175_v36 }
 0x132   :  { %11073 = vmatpush3.bf16.msra.mxu0 %v12466_v37  ;;  %11093 = vmatpush3.bf16.msra.mxu1 %v12467_v38 }
 0x133   :  { %11074 = vmatprep.subr.bf16.mxu0 %v13063_v0  ;;  %11094 = vmatprep.subr.bf16.mxu1 %v13063_v0 }
 0x134   :  { %11088 = vmatprep.mubr.msk.bf16.mxu0 %vm13065_vm0, %v13063_v0  ;;  %11108 = vmatprep.mubr.msk.bf16.mxu1 %vm13065_vm0, %v13063_v0 }
 0x136   :  { %11075 = vmatpush3.bf16.msra.mxu0 %v12468_v39  ;;  %11095 = vmatpush3.bf16.msra.mxu1 %v12469_v40 }
 0x137   :  { %11076 = vmatprep.subr.bf16.mxu0 %v13063_v0  ;;  %11096 = vmatprep.subr.bf16.mxu1 %v13063_v0 }
 0x13a   :  { %11077 = vmatpush3.bf16.msra.mxu0 %v12470_v41  ;;  %11097 = vmatpush3.bf16.msra.mxu1 %v12471_v42 }
 0x13b   :  { %11078 = vmatprep.subr.bf16.mxu0 %v13063_v0  ;;  %11098 = vmatprep.subr.bf16.mxu1 %v13063_v0 }
 0x13e   :  { %11079 = vmatpush3.bf16.msra.mxu0 %v12472_v43  ;;  %11099 = vmatpush3.bf16.msra.mxu1 %v12473_v44 }
 0x13f   :  { %11080 = vmatprep.subr.bf16.mxu0 %v13063_v0  ;;  %11100 = vmatprep.subr.bf16.mxu1 %v13063_v0 }
 0x142   :  { %11081 = vmatpush3.bf16.msra.mxu0 %v12474_v45  ;;  %11101 = vmatpush3.bf16.msra.mxu1 %v12475_v46 }
 0x143   :  { %11082 = vmatprep.subr.bf16.mxu0 %v13063_v0  ;;  %11102 = vmatprep.subr.bf16.mxu1 %v13063_v0 }
 0x146   :  { %11083 = vmatpush3.bf16.msra.mxu0 %v12476_v47  ;;  %11103 = vmatpush3.bf16.msra.mxu1 %v12477_v48 }
 0x147   :  { %11084 = vmatprep.subr.bf16.mxu0 %v13063_v0  ;;  %11104 = vmatprep.subr.bf16.mxu1 %v13063_v0 }
 0x14a   :  { %11085 = vmatpush3.bf16.msra.mxu0 %v12478_v49  ;;  %11105 = vmatpush3.bf16.msra.mxu1 %v12479_v50 }
 0x14b   :  { %11086 = vmatprep.subr.bf16.mxu0 %v13063_v0  ;;  %11106 = vmatprep.subr.bf16.mxu1 %v13063_v0 }
 0x14e   :  { %11087 = vmatpush3.bf16.msra.mxu0 %v12480_v51  ;;  %11107 = vmatpush3.bf16.msra.mxu1 %v12481_v52 }
 0x14f   :  { %11112 = vmatprep.subr.bf16.mxu0 %v13063_v0  ;;  %11118 = vmatprep.subr.bf16.mxu1 %v13063_v0 }
 0x151   :  { %11089 = vmatmul.mubr.bf16.vlgmr.msra.gmra.mrb[20].mxu0 %v13175_v36  ;;  %11109 = vmatmul.mubr.bf16.vlgmr.msra.gmra.mrb[20].mxu1 %v13175_v36 }
 0x152   :  { %11114 = vmatprep.mubr.msk.bf16.mxu0 %vm13065_vm0, %v13063_v0  ;;  %11120 = vmatprep.mubr.msk.bf16.mxu1 %vm13065_vm0, %v13063_v0 }
 0x184   :  { %v480_v53 = vpop.f32.mrb[0].mxu0  ;;  %v569_v54 = vpop.f32.mrb[0].mxu1 }
 0x185   :  { %v10890_v55 = vpop.f32.mrb[1].mxu0  ;;  %v10910_v56 = vpop.f32.mrb[1].mxu1 }
 0x186   :  { %v483_v57 = vpop.f32.mrb[2].mxu0  ;;  %v572_v58 = vpop.f32.mrb[2].mxu1  ;;  %v165_v55 = vld [vmem:[%s13408_s17 + $0x10] sm:$0xff] }
 0x187   :  { %v1466_v59 = vpack.c.bf16 %v483_v57, %v480_v53  ;;  %v1467_v60 = vpack.c.bf16 %v572_v58, %v569_v54  ;;  %v10891_v61 = vpop.f32.mrb[3].mxu0  ;;  %v10911_v62 = vpop.f32.mrb[3].mxu1  ;;  %v163_v54 = vld [vmem:[%s13408_s17] sm:$0xff]  ;;  %v164_v58 = vld [vmem:[%s13408_s17 + $0x8] sm:$0xff] }
 0x1a4   :  { %v658_v63 = vpop.f32.mrb[4].mxu0  ;;  %v747_v1 = vpop.f32.mrb[4].mxu1 }
 0x1a5   :  { %v10930_v2 = vpop.f32.mrb[5].mxu0  ;;  %v10950_v36 = vpop.f32.mrb[5].mxu1 }
 0x1a6   :  { %v661_v3 = vpop.f32.mrb[6].mxu0  ;;  %v750_v4 = vpop.f32.mrb[6].mxu1 }
 0x1a7   :  { %v1468_v5 = vpack.c.bf16 %v661_v3, %v658_v63  ;;  %v1469_v6 = vpack.c.bf16 %v750_v4, %v747_v1  ;;  %v10931_v7 = vpop.f32.mrb[7].mxu0  ;;  %v10951_v8 = vpop.f32.mrb[7].mxu1 }
 0x1c4   :  { %v836_v9 = vpop.f32.mrb[8].mxu0  ;;  %v925_v10 = vpop.f32.mrb[8].mxu1 }
 0x1c5   :  { %v10970_v11 = vpop.f32.mrb[9].mxu0  ;;  %v10990_v12 = vpop.f32.mrb[9].mxu1 }
 0x1c6   :  { %v839_v13 = vpop.f32.mrb[10].mxu0  ;;  %v928_v14 = vpop.f32.mrb[10].mxu1  ;;  %v169_v12 = vld [vmem:[%s13408_s17 + $0x30] sm:$0xff] }
 0x1c7   :  { %v1470_v15 = vpack.c.bf16 %v839_v13, %v836_v9  ;;  %v1471_v16 = vpack.c.bf16 %v928_v14, %v925_v10  ;;  %v10971_v17 = vpop.f32.mrb[11].mxu0  ;;  %v10991_v18 = vpop.f32.mrb[11].mxu1  ;;  %v167_v10 = vld [vmem:[%s13408_s17 + $0x20] sm:$0xff]  ;;  %v168_v14 = vld [vmem:[%s13408_s17 + $0x28] sm:$0xff] }
 0x1c9   :  { %v1483_v19 = vsel %vm1478_vm1, %v1470_v15, 0  ;;  %v1530_v20 = vsel %vm1478_vm1, %v1471_v16, 0 }
 0x1ca   :  { %11113 = vmatpush3.bf16.xpose.msra.mxu0 %v1483_v19  ;;  %11119 = vmatpush3.bf16.xpose.msra.mxu1 %v1530_v20  ;;  %v170_v19 = vld [vmem:[%s13408_s17 + $0x38] sm:$0xff] }
 0x1cb   :  { %11124 = vmatprep.subr.bf16.mxu0 %v13063_v0  ;;  %11130 = vmatprep.subr.bf16.mxu1 %v13063_v0 }
 0x1d1   :  { %11115 = vmatmul.mubr.msk.bf16.vlgmr.msra.gmra.mrb[24].mxu0 %vm1478_vm1, %v1466_v59  ;;  %11121 = vmatmul.mubr.msk.bf16.vlgmr.msra.gmra.mrb[24].mxu1 %vm1478_vm1, %v1467_v60 }
 0x1d2   :  { %11126 = vmatprep.mubr.msk.bf16.mxu0 %vm13065_vm0, %v13063_v0  ;;  %11132 = vmatprep.mubr.msk.bf16.mxu1 %vm13065_vm0, %v13063_v0 }
 0x1e4   :  { %v1014_v21 = vpop.f32.mrb[12].mxu0  ;;  %v1103_v22 = vpop.f32.mrb[12].mxu1 }
 0x1e5   :  { %v11010_v23 = vpop.f32.mrb[13].mxu0  ;;  %v11030_v24 = vpop.f32.mrb[13].mxu1 }
 0x1e6   :  { %v1017_v25 = vpop.f32.mrb[14].mxu0  ;;  %v1106_v26 = vpop.f32.mrb[14].mxu1 }
 0x1e7   :  { %v1472_v27 = vpack.c.bf16 %v1017_v25, %v1014_v21  ;;  %v1473_v28 = vpack.c.bf16 %v1106_v26, %v1103_v22  ;;  %v11011_v29 = vpop.f32.mrb[15].mxu0  ;;  %v11031_v30 = vpop.f32.mrb[15].mxu1 }
 0x1e9   :  { %v1577_v31 = vsel %vm1478_vm1, %v1472_v27, 0  ;;  %v1624_v32 = vsel %vm1478_vm1, %v1473_v28, 0 }
 0x1ea   :  { %11125 = vmatpush3.bf16.xpose.msra.mxu0 %v1577_v31  ;;  %11131 = vmatpush3.bf16.xpose.msra.mxu1 %v1624_v32 }
 0x1eb   :  { %11136 = vmatprep.subr.bf16.mxu0 %v13063_v0  ;;  %11142 = vmatprep.subr.bf16.mxu1 %v13063_v0 }
 0x1f1   :  { %11127 = vmatmul.mubr.msk.bf16.vlgmr.msra.gmra.mrb[28].mxu0 %vm1478_vm1, %v1468_v5  ;;  %11133 = vmatmul.mubr.msk.bf16.vlgmr.msra.gmra.mrb[28].mxu1 %vm1478_vm1, %v1469_v6  ;;  %v166_v6 = vld [vmem:[%s13408_s17 + $0x18] sm:$0xff] }
 0x1f2   :  { %11138 = vmatprep.mubr.msk.bf16.mxu0 %vm13065_vm0, %v13063_v0  ;;  %11144 = vmatprep.mubr.msk.bf16.mxu1 %vm13065_vm0, %v13063_v0 }
 0x204   :  { %v1192_v33 = vpop.f32.mrb[16].mxu0  ;;  %v1281_v34 = vpop.f32.mrb[16].mxu1 }
 0x205   :  { %v11050_v35 = vpop.f32.mrb[17].mxu0  ;;  %v11070_v37 = vpop.f32.mrb[17].mxu1 }
 0x206   :  { %v1195_v38 = vpop.f32.mrb[18].mxu0  ;;  %v1284_v39 = vpop.f32.mrb[18].mxu1 }
 0x207   :  { %v1474_v40 = vpack.c.bf16 %v1195_v38, %v1192_v33  ;;  %v1475_v41 = vpack.c.bf16 %v1284_v39, %v1281_v34  ;;  %v11051_v42 = vpop.f32.mrb[19].mxu0  ;;  %v11071_v43 = vpop.f32.mrb[19].mxu1 }
 0x209   :  { %11137 = vmatpush3.bf16.msra.mxu0 %v1474_v40  ;;  %11143 = vmatpush3.bf16.msra.mxu1 %v1475_v41 }
 0x20a   :  { %11148 = vmatprep.subr.bf16.mxu0 %v13063_v0  ;;  %11154 = vmatprep.subr.bf16.mxu1 %v13063_v0 }
 0x224   :  { %v13393_v44 = vpop.f32.mrb[20].mxu0  ;;  %v13395_v45 = vpop.f32.mrb[20].mxu1 }
 0x225   :  { %v11090_v46 = vpop.f32.mrb[21].mxu0  ;;  %v11110_v47 = vpop.f32.mrb[21].mxu1 }
 0x226   :  { %v13397_v48 = vpop.f32.mrb[22].mxu0  ;;  %v13399_v49 = vpop.f32.mrb[22].mxu1 }
 0x227   :  { %v1476_v50 = vpack.c.bf16 %v13397_v48, %v13393_v44  ;;  %v1477_v51 = vpack.c.bf16 %v13399_v49, %v13395_v45  ;;  %v11091_v52 = vpop.f32.mrb[23].mxu0  ;;  %v11111_v53 = vpop.f32.mrb[23].mxu1 }
 0x2a4   :  { %v1519_v56 = vpop.f32.mrb[24].mxu0  ;;  %v1566_v57 = vpop.f32.mrb[24].mxu1 }
 0x2a5   :  { %v1520_v59 = vadd.f32 %v1519_v56, %v163_v54  ;;  %v1567_v60 = vadd.f32 %v1566_v57, %v165_v55  ;;  %v11116_v61 = vpop.f32.mrb[25].mxu0  ;;  %v11122_v62 = vpop.f32.mrb[25].mxu1 }
 0x2a6   :  { %v1522_v63 = vpop.f32.mrb[26].mxu0  ;;  %v1569_v1 = vpop.f32.mrb[26].mxu1 }
 0x2a7   :  { %v1523_v2 = vadd.f32 %v1522_v63, %v164_v58  ;;  %v11117_v36 = vpop.f32.mrb[27].mxu0  ;;  %v11123_v3 = vpop.f32.mrb[27].mxu1  ;;  %v1673_v4 = vsel %vm1478_vm1, %v1567_v60, -inf  ;;  %v1667_v5 = vsel %vm1478_vm1, %v1520_v59, -inf  ;;  %v1570_v7 = vadd.f32 %v1569_v1, %v166_v6 }
 0x2a8   :  { %1674 = vmax.xlane.f32.xlu0 %v1673_v4  ;;  %1668 = vmax.xlane.f32.xlu1 %v1667_v5 }
 0x2a9   :  { %v1670_v8 = vsel %vm1478_vm1, %v1523_v2, -inf  ;;  %v1676_v9 = vsel %vm1478_vm1, %v1570_v7, -inf }
 0x2ac   :  { %1671 = vmax.xlane.f32.xlu1 %v1670_v8 }
 0x2b0   :  { %1677 = vmax.xlane.f32.xlu1 %v1676_v9 }
 0x2c4   :  { %v1613_v11 = vpop.f32.mrb[28].mxu0  ;;  %v1660_v13 = vpop.f32.mrb[28].mxu1 }
 0x2c5   :  { %v1614_v15 = vadd.f32 %v1613_v11, %v167_v10  ;;  %v11128_v16 = vpop.f32.mrb[29].mxu0  ;;  %v11134_v17 = vpop.f32.mrb[29].mxu1  ;;  %v1661_v21 = vadd.f32 %v1660_v13, %v169_v12 }
 0x2c6   :  { %v1616_v18 = vpop.f32.mrb[30].mxu0  ;;  %v1663_v20 = vpop.f32.mrb[30].mxu1 }
 0x2c7   :  { %v1617_v22 = vadd.f32 %v1616_v18, %v168_v14  ;;  %v11129_v23 = vpop.f32.mrb[31].mxu0  ;;  %v11135_v24 = vpop.f32.mrb[31].mxu1  ;;  %v1679_v25 = vsel %vm1478_vm1, %v1614_v15, -inf  ;;  %v1664_v26 = vadd.f32 %v1663_v20, %v170_v19  ;;  %v1685_v28 = vsel %vm1478_vm1, %v1661_v21, -inf }
 0x2c8   :  { %1680 = vmax.xlane.f32.xlu0 %v1679_v25 }
 0x2c9   :  { %v1682_v27 = vsel %vm1478_vm1, %v1617_v22, -inf  ;;  %v1688_v29 = vsel %vm1478_vm1, %v1664_v26, -inf }
 0x2ca   :  { %1683 = vmax.xlane.f32.xlu1 %v1682_v27 }
 0x2cc   :  { %1686 = vmax.xlane.f32.xlu0 %v1685_v28 }
 0x2ce   :  { %1689 = vmax.xlane.f32.xlu1 %v1688_v29 }
 0x335   :  { %v1675_v30 = vpop.xlane.xlu0 %1674  ;;  %v1669_v31 = vpop.xlane.xlu1 %1668 }
 0x336   :  { %v1693_v32 = vsub.f32 %v1567_v60, %v1675_v30  ;;  %v1691_v33 = vsub.f32 %v1520_v59, %v1669_v31 }
 0x338   :  { %v1699_v34 = vmul.f32 1.442695, %v1691_v33  ;;  %v1703_v35 = vmul.f32 1.442695, %v1693_v32 }
 0x339   :  { %v1672_v37 = vpop.xlane.xlu1 %1671 }
 0x33a   :  { %v1692_v38 = vsub.f32 %v1523_v2, %v1672_v37  ;;  %12926 = vpow2.f32 %v1699_v34  ;;  %v12483_v37 = vld [vmem:[%s9628_s21 + $0x8] sm:$0xff]  }
 0x33b   :  { %12928 = vpow2.f32 %v1703_v35  ;;  %v12482_v35 = vld [vmem:[%s9628_s21] sm:$0xff]  }
 0x33c   :  { %v1701_v39 = vmul.f32 1.442695, %v1692_v38 }
 0x33d   :  { %v1678_v40 = vpop.xlane.xlu1 %1677 }
 0x33e   :  { %12930 = vpow2.f32 %v1701_v39  ;;  %v1694_v41 = vsub.f32 %v1570_v7, %v1678_v40 }
 0x340   :  { %v1705_v42 = vmul.f32 1.442695, %v1694_v41  ;;  %v12484_v41 = vld [vmem:[%s9628_s21 + $0x10] sm:$0xff]  }
 0x342   :  { %12932 = vpow2.f32 %v1705_v42 }
 0x344   :  { %v12927_v43 = vpop.eup %12926 }
 0x345   :  { %v1715_v46 = vsel %vm1478_vm1, %v12927_v43, 0.0  ;;  %v12929_v47 = vpop.eup %12928 }
 0x346   :  { %1716 = vadd.xlane.f32.xlu0 %v1715_v46  ;;  %v1721_v54 = vsel %vm1478_vm1, %v12929_v47, 0.0 }
 0x348   :  { %v12931_v52 = vpop.eup %12930 }
 0x349   :  { %v1718_v53 = vsel %vm1478_vm1, %v12931_v52, 0.0 }
 0x34a   :  { %1719 = vadd.xlane.f32.xlu1 %v1718_v53  ;;  %1722 = vadd.xlane.f32.xlu0 %v1721_v54  ;;  %v12485_v53 = vld [vmem:[%s9628_s21 + $0x18] sm:$0xff]   ;;  %s14043_s21 = sld [smem:[%s14853_s0 + %s13083_s18]]   ;;  %s13098_s18 = smov 35  }
 0x34c   :  { %v12933_v55 = vpop.eup %12932 }
 0x34d   :  { %v1724_v56 = vsel %vm1478_vm1, %v12933_v55, 0.0 }
 0x34e   :  { %1725 = vadd.xlane.f32.xlu1 %v1724_v56 }
 0x355   :  { %v1681_v57 = vpop.xlane.xlu0 %1680 }
 0x356   :  { %v1695_v58 = vsub.f32 %v1614_v15, %v1681_v57 }
 0x357   :  { %v1684_v59 = vpop.xlane.xlu1 %1683 }
 0x358   :  { %v1707_v60 = vmul.f32 1.442695, %v1695_v58  ;;  %v1696_v61 = vsub.f32 %v1617_v22, %v1684_v59 }
 0x359   :  { %v1687_v62 = vpop.xlane.xlu0 %1686 }
 0x35a   :  { %12934 = vpow2.f32 %v1707_v60  ;;  %v1709_v63 = vmul.f32 1.442695, %v1696_v61  ;;  %v1697_v1 = vsub.f32 %v1661_v21, %v1687_v62 }
 0x35b   :  { %v1690_v2 = vpop.xlane.xlu1 %1689 }
 0x35c   :  { %12936 = vpow2.f32 %v1709_v63  ;;  %v1711_v36 = vmul.f32 1.442695, %v1697_v1  ;;  %v1698_v3 = vsub.f32 %v1664_v26, %v1690_v2 }
 0x35e   :  { %12938 = vpow2.f32 %v1711_v36  ;;  %v1713_v4 = vmul.f32 1.442695, %v1698_v3  ;;  %v12486_v36 = vld [vmem:[%s13476_s25] sm:$0xff]   ;;  %v12487_v3 = vld [vmem:[%s13476_s25 + $0x8] sm:$0xff]  }
 0x360   :  { %12940 = vpow2.f32 %v1713_v4 }
 0x364   :  { %v12935_v5 = vpop.eup %12934 }
 0x365   :  { %v1727_v6 = vsel %vm1478_vm1, %v12935_v5, 0.0 }
 0x366   :  { %v12937_v7 = vpop.eup %12936  ;;  %1728 = vadd.xlane.f32.xlu0 %v1727_v6 }
 0x367   :  { %v1730_v8 = vsel %vm1478_vm1, %v12937_v7, 0.0 }
 0x368   :  { %v12939_v9 = vpop.eup %12938  ;;  %1731 = vadd.xlane.f32.xlu1 %v1730_v8 }
 0x369   :  { %v1733_v10 = vsel %vm1478_vm1, %v12939_v9, 0.0 }
 0x36a   :  { %v12941_v11 = vpop.eup %12940  ;;  %1734 = vadd.xlane.f32.xlu0 %v1733_v10 }
 0x36b   :  { %v1736_v12 = vsel %vm1478_vm1, %v12941_v11, 0.0 }
 0x36c   :  { %1737 = vadd.xlane.f32.xlu1 %v1736_v12 }
 0x3d3   :  { %v1717_v13 = vpop.xlane.xlu0 %1716 }
 0x3d4   :  { %12942 = vrcp.f32 %v1717_v13 }
 0x3d7   :  { %v1720_v14 = vpop.xlane.xlu1 %1719  ;;  %v1723_v15 = vpop.xlane.xlu0 %1722 }
 0x3d8   :  { %12944 = vrcp.f32 %v1720_v14 }
 0x3d9   :  { %12946 = vrcp.f32 %v1723_v15 }
 0x3db   :  { %v1726_v16 = vpop.xlane.xlu1 %1725 }
 0x3dc   :  { %12948 = vrcp.f32 %v1726_v16 }
 0x3de   :  { %v12943_v17 = vpop.eup %12942 }
 0x3df   :  { %v1740_v19 = vmul.f32 %v12943_v17, %v12927_v43 }
 0x3e2   :  { %v12945_v18 = vpop.eup %12944 }
 0x3e3   :  { %v1742_v20 = vmul.f32 %v12945_v18, %v12931_v52  ;;  %v12947_v21 = vpop.eup %12946 }
 0x3e4   :  { %v1744_v24 = vmul.f32 %v12947_v21, %v12929_v47 }
 0x3e5   :  { %v1755_v22 = vpack.c.bf16 %v1742_v20, %v1740_v19 }
 0x3e6   :  { %v12949_v23 = vpop.eup %12948 }
 0x3e7   :  { %v1746_v25 = vmul.f32 %v12949_v23, %v12933_v55  ;;  %11139 = vmatmul.mubr.msk.bf16.vlgmr.msra.gmra.mrb[32].mxu0 %vm1478_vm1, %v1755_v22 }
 0x3e8   :  { %11149 = vmatpush3.bf16.msra.mxu0 %v1476_v50  ;;  %11150 = vmatprep.mubr.msk.bf16.mxu0 %vm13065_vm0, %v13063_v0 }
 0x3e9   :  { %v1756_v26 = vpack.c.bf16 %v1746_v25, %v1744_v24  ;;  %11160 = vmatprep.subr.bf16.mxu0 %v13063_v0  ;;  %v13052_v24 = vld [vmem:[%s13113_s5] sm:$0xff] }
 0x3eb   :  { %11145 = vmatmul.mubr.msk.bf16.vlgmr.msra.gmra.mrb[32].mxu1 %vm1478_vm1, %v1756_v26 }
 0x3ec   :  { %11155 = vmatpush3.bf16.msra.mxu1 %v1477_v51  ;;  %11156 = vmatprep.mubr.msk.bf16.mxu1 %vm13065_vm0, %v13063_v0 }
 0x3ed   :  { %11166 = vmatprep.subr.bf16.mxu1 %v13063_v0 }
 0x3f3   :  { %v1729_v27 = vpop.xlane.xlu0 %1728 }
 0x3f4   :  { %12950 = vrcp.f32 %v1729_v27 }
 0x3f5   :  { %v1732_v44 = vpop.xlane.xlu1 %1731 }
 0x3f6   :  { %12952 = vrcp.f32 %v1732_v44  ;;  %v13053_v44 = vld [vmem:[%s13113_s5 + $0x8] sm:$0xff]  ;;  %s9635_s5 = sld [smem:[%s14853_s0 + %s13079_s2]]   ;;  %s13094_s2 = smov 31  }
 0x3f7   :  { %v1735_v48 = vpop.xlane.xlu0 %1734  ;;  %s14427_s6 = sld [smem:[%s14853_s0 + %s13094_s2]]  }
 0x3f8   :  { %12954 = vrcp.f32 %v1735_v48 }
 0x3f9   :  { %v1738_v50 = vpop.xlane.xlu1 %1737 }
 0x3fa   :  { %12956 = vrcp.f32 %v1738_v50 }
 0x3fe   :  { %v12951_v28 = vpop.eup %12950 }
 0x3ff   :  { %v1748_v30 = vmul.f32 %v12951_v28, %v12935_v5 }
 0x400   :  { %v12953_v29 = vpop.eup %12952 }
 0x401   :  { %v1750_v31 = vmul.f32 %v12953_v29, %v12937_v7  ;;  %v12488_v29 = vld [vmem:[%s13476_s25 + $0x10] sm:$0xff]  }
 0x402   :  { %v12955_v32 = vpop.eup %12954 }
 0x403   :  { %v1757_v45 = vpack.c.bf16 %v1750_v31, %v1748_v30  ;;  %v1752_v51 = vmul.f32 %v12955_v32, %v12939_v9  ;;  %v12489_v30 = vld [vmem:[%s13476_s25 + $0x18] sm:$0xff]   ;;  %v12490_v31 = vld [vmem:[%s13476_s25 + $0x20] sm:$0xff]   ;;  %v12491_v32 = vld [vmem:[%s13476_s25 + $0x28] sm:$0xff]  }
 0x404   :  { %v12957_v49 = vpop.eup %12956 }
 0x405   :  { %v1754_v33 = vmul.f32 %v12957_v49, %v12941_v11  ;;  %11151 = vmatmul.mubr.msk.bf16.vlgmr.msra.gmra.mrb[36].mxu0 %vm1478_vm1, %v1757_v45  ;;  %v12492_v45 = vld [vmem:[%s13476_s25 + $0x30] sm:$0xff]   ;;  %v12493_v49 = vld [vmem:[%s13476_s25 + $0x38] sm:$0xff]   ;;  %s9642_s25 = sld [smem:[%s14853_s0 + %s13084_s22]]   ;;  %s13099_s22 = smov 36  }
 0x406   :  { %11162 = vmatprep.mubr.msk.bf16.mxu0 %vm13065_vm0, %v13063_v0  ;;  %11161 = vmatpush3.bf16.msra.mxu0 %v12482_v35  ;;  %v12497_v35 = vld [vmem:[%s13507_s29 + $0x18] sm:$0xff]  }
 0x407   :  { %v1758_v34 = vpack.c.bf16 %v1754_v33, %v1752_v51  ;;  %11172 = vmatprep.subr.bf16.mxu0 %v13063_v0  ;;  %v12494_v51 = vld [vmem:[%s13507_s29] sm:$0xff]   ;;  %v12495_v33 = vld [vmem:[%s13507_s29 + $0x8] sm:$0xff]  }
 0x409   :  { %11157 = vmatmul.mubr.msk.bf16.vlgmr.msra.gmra.mrb[36].mxu1 %vm1478_vm1, %v1758_v34  ;;  %v12496_v34 = vld [vmem:[%s13507_s29 + $0x10] sm:$0xff]  }
 0x40a   :  { %11168 = vmatprep.mubr.msk.bf16.mxu1 %vm13065_vm0, %v13063_v0  ;;  %11167 = vmatpush3.bf16.msra.mxu1 %v12483_v37  ;;  %v12498_v37 = vld [vmem:[%s13507_s29 + $0x20] sm:$0xff]  }
 0x40b   :  { %11178 = vmatprep.subr.bf16.mxu1 %v13063_v0 }
 0x4ba   :  { %v1796_v38 = vpop.f32.mrb[32].mxu0 }
 0x4bb   :  { %v11140_v39 = vpop.f32.mrb[33].mxu0 }
 0x4bc   :  { %v1799_v40 = vpop.f32.mrb[34].mxu0 }
 0x4bd   :  { %v1935_v42 = vpack.c.bf16 %v1799_v40, %v1796_v38  ;;  %v11141_v43 = vpop.f32.mrb[35].mxu0  ;;  %v12499_v38 = vld [vmem:[%s13507_s29 + $0x28] sm:$0xff]  }
 0x4be   :  { %v1840_v46 = vpop.f32.mrb[32].mxu1 }
 0x4bf   :  { %v11146_v47 = vpop.f32.mrb[33].mxu1  ;;  %11163 = vmatmul.mubr.msk.bf16.vlgmr.msra.gmra.mrb[40].mxu0 %vm1478_vm1, %v1935_v42 }
 0x4c0   :  { %v1843_v52 = vpop.f32.mrb[34].mxu1  ;;  %11173 = vmatpush3.bf16.msra.mxu0 %v12484_v41  ;;  %11174 = vmatprep.mubr.msk.bf16.mxu0 %vm13065_vm0, %v13063_v0 }
 0x4c1   :  { %v1936_v54 = vpack.c.bf16 %v1843_v52, %v1840_v46  ;;  %v11147_v55 = vpop.f32.mrb[35].mxu1  ;;  %11184 = vmatprep.subr.bf16.mxu0 %v13063_v0 }
 0x4c3   :  { %11169 = vmatmul.mubr.msk.bf16.vlgmr.msra.gmra.mrb[40].mxu1 %vm1478_vm1, %v1936_v54  ;;  %v9775_v54 = vld [vmem:[%s9629_s3] ss:$0 sm:$0xff]  ;;  %s14285_s3 = sld [smem:[%s14853_s0 + %s13086_s30]]   ;;  %s13101_s30 = smov 38  }
 0x4c4   :  { %11179 = vmatpush3.bf16.msra.mxu1 %v12485_v53  ;;  %11180 = vmatprep.mubr.msk.bf16.mxu1 %vm13065_vm0, %v13063_v0 }
 0x4c5   :  { %11204 = vmatprep.subr.bf16.mxu1 %v13063_v0 }
 0x4d8   :  { %v1884_v56 = vpop.f32.mrb[36].mxu0 }
 0x4d9   :  { %v11152_v57 = vpop.f32.mrb[37].mxu0 }
 0x4da   :  { %v1887_v58 = vpop.f32.mrb[38].mxu0 }
 0x4db   :  { %v1937_v59 = vpack.c.bf16 %v1887_v58, %v1884_v56  ;;  %v11153_v60 = vpop.f32.mrb[39].mxu0 }
 0x4dc   :  { %v1928_v61 = vpop.f32.mrb[36].mxu1  ;;  %v12501_v60 = vld [vmem:[%s13507_s29 + $0x38] sm:$0xff]  }
 0x4dd   :  { %v11158_v62 = vpop.f32.mrb[37].mxu1  ;;  %11175 = vmatmul.mubr.msk.bf16.vlgmr.msra.gmra.mrb[44].mxu0 %vm1478_vm1, %v1937_v59  ;;  %v12500_v59 = vld [vmem:[%s13507_s29 + $0x30] sm:$0xff]   ;;  %s9638_s29 = sld [smem:[%s14853_s0 + %s13085_s26]]   ;;  %s13100_s26 = smov 34  }
 0x4de   :  { %v1931_v63 = vpop.f32.mrb[38].mxu1  ;;  %11200 = vmatprep.mubr.msk.bf16.mxu0 %vm13065_vm0, %v13063_v0  ;;  %11185 = vmatpush3.bf16.msra.mxu0 %v12486_v36 }
 0x4df   :  { %v1938_v1 = vpack.c.bf16 %v1931_v63, %v1928_v61  ;;  %v11159_v2 = vpop.f32.mrb[39].mxu1  ;;  %11186 = vmatprep.subr.bf16.mxu0 %v13063_v0 }
 0x4e1   :  { %11181 = vmatmul.mubr.msk.bf16.vlgmr.msra.gmra.mrb[44].mxu1 %vm1478_vm1, %v1938_v1 }
 0x4e2   :  { %11220 = vmatprep.mubr.msk.bf16.mxu1 %vm13065_vm0, %v13063_v0  ;;  %11187 = vmatpush3.bf16.msra.mxu0 %v12487_v3 }
 0x4e3   :  { %11188 = vmatprep.subr.bf16.mxu0 %v13063_v0  ;;  %11205 = vmatpush3.bf16.msra.mxu1 %v12494_v51 }
 0x4e4   :  { %11206 = vmatprep.subr.bf16.mxu1 %v13063_v0 }
 0x4e6   :  { %11189 = vmatpush3.bf16.msra.mxu0 %v12488_v29 }
 0x4e7   :  { %11190 = vmatprep.subr.bf16.mxu0 %v13063_v0  ;;  %11207 = vmatpush3.bf16.msra.mxu1 %v12495_v33 }
 0x4e8   :  { %11208 = vmatprep.subr.bf16.mxu1 %v13063_v0 }
 0x4ea   :  { %11191 = vmatpush3.bf16.msra.mxu0 %v12489_v30 }
 0x4eb   :  { %11192 = vmatprep.subr.bf16.mxu0 %v13063_v0  ;;  %11209 = vmatpush3.bf16.msra.mxu1 %v12496_v34 }
 0x4ec   :  { %11210 = vmatprep.subr.bf16.mxu1 %v13063_v0 }
 0x4ee   :  { %11193 = vmatpush3.bf16.msra.mxu0 %v12490_v31 }
 0x4ef   :  { %11194 = vmatprep.subr.bf16.mxu0 %v13063_v0  ;;  %11211 = vmatpush3.bf16.msra.mxu1 %v12497_v35  ;;  %v12518_v35 = vld [vmem:[%s13537_s7 + $0x80] sm:$0xff]  }
 0x4f0   :  { %11212 = vmatprep.subr.bf16.mxu1 %v13063_v0 }
 0x4f2   :  { %11195 = vmatpush3.bf16.msra.mxu0 %v12491_v32 }
 0x4f3   :  { %11196 = vmatprep.subr.bf16.mxu0 %v13063_v0  ;;  %11213 = vmatpush3.bf16.msra.mxu1 %v12498_v37  ;;  %v12519_v37 = vld [vmem:[%s13537_s7 + $0xc0] sm:$0xff]  }
 0x4f4   :  { %11214 = vmatprep.subr.bf16.mxu1 %v13063_v0 }
 0x4f6   :  { %11197 = vmatpush3.bf16.msra.mxu0 %v12492_v45 }
 0x4f7   :  { %11198 = vmatprep.subr.bf16.mxu0 %v13063_v0  ;;  %11215 = vmatpush3.bf16.msra.mxu1 %v12499_v38 }
 0x4f8   :  { %11216 = vmatprep.subr.bf16.mxu1 %v13063_v0 }
 0x4fa   :  { %11199 = vmatpush3.bf16.msra.mxu0 %v12493_v49  ;;  %v9792_v49 = vld [vmem:[%s9632_s11] ss:$0 sm:$0xff]  ;;  %s14338_s11 = sld [smem:[%s14853_s0 + %s13088_s8]]  }
 0x4fb   :  { %11224 = vmatprep.subr.bf16.mxu0 %v13063_v0  ;;  %11217 = vmatpush3.bf16.msra.mxu1 %v12500_v59  ;;  %v12534_v59 = vld [vmem:[%s13537_s7 + $0x100] sm:$0xff]  }
 0x4fc   :  { %11218 = vmatprep.subr.bf16.mxu1 %v13063_v0 }
 0x4ff   :  { %11219 = vmatpush3.bf16.msra.mxu1 %v12501_v60  ;;  %v12535_v60 = vld [vmem:[%s13537_s7 + $0x140] sm:$0xff]  }
 0x500   :  { %11244 = vmatprep.subr.bf16.mxu1 %v13063_v0 }
 0x592   :  { %v1982_v4 = vpop.f32.mrb[40].mxu0 }
 0x593   :  { %v11164_v5 = vpop.f32.mrb[41].mxu0 }
 0x594   :  { %v1985_v6 = vpop.f32.mrb[42].mxu0  ;;  %v12503_v5 = vld [vmem:[%s13537_s7 + $0x40] sm:$0xff]  }
 0x595   :  { %v11165_v7 = vpop.f32.mrb[43].mxu0 }
 0x596   :  { %v2032_v8 = vpop.f32.mrb[40].mxu1  ;;  %v12505_v7 = vld [vmem:[%s13537_s7 + $0x48] sm:$0xff]  }
 0x597   :  { %v2139_v9 = vadd.f32 %v2032_v8, %v1982_v4  ;;  %v11170_v10 = vpop.f32.mrb[41].mxu1  ;;  %v12502_v4 = vld [vmem:[%s13537_s7] sm:$0xff]   ;;  %v12506_v8 = vld [vmem:[%s13537_s7 + $0x10] sm:$0xff]  }
 0x598   :  { %v2035_v11 = vpop.f32.mrb[42].mxu1 }
 0x599   :  { %v2140_v12 = vadd.f32 %v2035_v11, %v1985_v6  ;;  %v11171_v13 = vpop.f32.mrb[43].mxu1  ;;  %v12504_v6 = vld [vmem:[%s13537_s7 + $0x8] sm:$0xff]  }
 0x5b0   :  { %v2082_v14 = vpop.f32.mrb[44].mxu0 }
 0x5b1   :  { %v2141_v15 = vadd.f32 %v2139_v9, %v2082_v14  ;;  %v11176_v16 = vpop.f32.mrb[45].mxu0  ;;  %v12507_v9 = vld [vmem:[%s13537_s7 + $0x50] sm:$0xff]  }
 0x5b2   :  { %v2085_v17 = vpop.f32.mrb[46].mxu0 }
 0x5b3   :  { %v2142_v18 = vadd.f32 %v2140_v12, %v2085_v17  ;;  %v11177_v19 = vpop.f32.mrb[47].mxu0 }
 0x5b4   :  { %v2132_v20 = vpop.f32.mrb[44].mxu1  ;;  %v12509_v19 = vld [vmem:[%s13537_s7 + $0x58] sm:$0xff]  }
 0x5b5   :  { %v2143_v21 = vadd.f32 %v2141_v15, %v2132_v20  ;;  %v11182_v22 = vpop.f32.mrb[45].mxu1  ;;  %v12510_v20 = vld [vmem:[%s13537_s7 + $0x20] sm:$0xff]  }
 0x5b6   :  { %v2135_v23 = vpop.f32.mrb[46].mxu1  ;;  %v12512_v22 = vld [vmem:[%s13537_s7 + $0x28] sm:$0xff]  }
 0x5b7   :  { %v13483_v25 = vadd.f32 %v13052_v24, %v2143_v21  ;;  %v2144_v26 = vadd.f32 %v2142_v18, %v2135_v23  ;;  %v11183_v27 = vpop.f32.mrb[47].mxu1  ;;  %v12508_v18 = vld [vmem:[%s13537_s7 + $0x18] sm:$0xff]   ;;  %v12511_v21 = vld [vmem:[%s13537_s7 + $0x60] sm:$0xff]   ;;  %v12513_v23 = vld [vmem:[%s13537_s7 + $0x68] sm:$0xff]  }
 0x5b8   :  { %v12514_v24 = vld [vmem:[%s13537_s7 + $0x30] sm:$0xff]   ;;  %v12517_v27 = vld [vmem:[%s13537_s7 + $0x78] sm:$0xff]  }
 0x5b9   :  { %v13486_v48 = vadd.f32 %v13053_v44, %v2144_v26  ;;  %v2148_v50 = vmul.f32 %v13483_v25, %v13483_v25  ;;  %v12516_v26 = vld [vmem:[%s13537_s7 + $0x38] sm:$0xff]  }
 0x5bb   :  { %2150 = vadd.xlane.f32.xlu0 %v2148_v50  ;;  %v2149_v28 = vmul.f32 %v13486_v48, %v13486_v48 }
 0x5bd   :  { %2152 = vadd.xlane.f32.xlu1 %v2149_v28 }
 0x648   :  { %v2151_v39 = vpop.xlane.xlu0 %2150 }
 0x649   :  { %v2154_v40 = vmul.f32 0.015625, %v2151_v39  ;;  %v12520_v39 = vld [vmem:[%s13537_s7 + $0x88] sm:$0xff]  }
 0x64a   :  { %v2153_v41 = vpop.xlane.xlu1 %2152 }
 0x64b   :  { %v2156_v42 = vadd.f32 1e-06, %v2154_v40  ;;  %v2155_v43 = vmul.f32 0.015625, %v2153_v41  ;;  %v12521_v40 = vld [vmem:[%s13537_s7 + $0xc8] sm:$0xff]   ;;  %v12522_v41 = vld [vmem:[%s13537_s7 + $0x90] sm:$0xff]  }
 0x64d   :  { %12958 = vrsqrt.f32 %v2156_v42  ;;  %v2157_v46 = vadd.f32 1e-06, %v2155_v43  ;;  %v12523_v42 = vld [vmem:[%s13537_s7 + $0xd0] sm:$0xff]   ;;  %v12524_v43 = vld [vmem:[%s13537_s7 + $0x98] sm:$0xff]  }
 0x64f   :  { %12960 = vrsqrt.f32 %v2157_v46  ;;  %v12525_v46 = vld [vmem:[%s13537_s7 + $0xd8] sm:$0xff]  }
 0x657   :  { %v12959_v47 = vpop.eup %12958 }
 0x658   :  { %v2160_v52 = vmul.f32 %v12959_v47, %v13483_v25  ;;  %v12526_v47 = vld [vmem:[%s13537_s7 + $0xa0] sm:$0xff]  }
 0x659   :  { %v12961_v53 = vpop.eup %12960 }
 0x65a   :  { %v2161_v55 = vmul.f32 %v12961_v53, %v13486_v48  ;;  %v2168_v56 = vmul.f32 %v9775_v54, %v2160_v52  ;;  %v12527_v52 = vld [vmem:[%s13537_s7 + $0xe0] sm:$0xff]   ;;  %v12528_v53 = vld [vmem:[%s13537_s7 + $0xa8] sm:$0xff]  }
 0x65c   :  { %v2169_v57 = vmul.f32 %v9775_v54, %v2161_v55  ;;  %v12529_v54 = vld [vmem:[%s13537_s7 + $0xe8] sm:$0xff]   ;;  %v12530_v55 = vld [vmem:[%s13537_s7 + $0xb0] sm:$0xff]  }
 0x65e   :  { %v2170_v58 = vpack.c.bf16 %v2169_v57, %v2168_v56  ;;  %v12531_v56 = vld [vmem:[%s13537_s7 + $0xf0] sm:$0xff]   ;;  %v12532_v57 = vld [vmem:[%s13537_s7 + $0xb8] sm:$0xff]  }
 0x660   :  { %11201 = vmatmul.mubr.bf16.vlgmr.msra.gmra.mrb[48].mxu0 %v2170_v58  ;;  %v12533_v58 = vld [vmem:[%s13537_s7 + $0xf8] sm:$0xff]  }
 0x661   :  { %11240 = vmatprep.mubr.msk.bf16.mxu0 %vm13065_vm0, %v13063_v0  ;;  %11225 = vmatpush3.bf16.msra.mxu0 %v12502_v4  ;;  %v12543_v4 = vld [vmem:[%s13537_s7 + $0x160] sm:$0xff]  }
 0x662   :  { %11226 = vmatprep.subr.bf16.mxu0 %v13063_v0 }
 0x665   :  { %11227 = vmatpush3.bf16.msra.mxu0 %v12504_v6  ;;  %v12545_v6 = vld [vmem:[%s13537_s7 + $0x168] sm:$0xff]  }
 0x666   :  { %11228 = vmatprep.subr.bf16.mxu0 %v13063_v0 }
 0x669   :  { %11229 = vmatpush3.bf16.msra.mxu0 %v12506_v8  ;;  %v12547_v8 = vld [vmem:[%s13537_s7 + $0x170] sm:$0xff]  }
 0x66a   :  { %11230 = vmatprep.subr.bf16.mxu0 %v13063_v0 }
 0x66d   :  { %11231 = vmatpush3.bf16.msra.mxu0 %v12508_v18  ;;  %v12555_v18 = vld [vmem:[%s13537_s7 + $0x1d0] sm:$0xff]  }
 0x66e   :  { %11232 = vmatprep.subr.bf16.mxu0 %v13063_v0 }
 0x671   :  { %11233 = vmatpush3.bf16.msra.mxu0 %v12510_v20  ;;  %v12557_v20 = vld [vmem:[%s13537_s7 + $0x1d8] sm:$0xff]  }
 0x672   :  { %11234 = vmatprep.subr.bf16.mxu0 %v13063_v0 }
 0x675   :  { %11235 = vmatpush3.bf16.msra.mxu0 %v12512_v22  ;;  %v12559_v22 = vld [vmem:[%s13537_s7 + $0x1e0] sm:$0xff]  }
 0x676   :  { %11236 = vmatprep.subr.bf16.mxu0 %v13063_v0 }
 0x679   :  { %11237 = vmatpush3.bf16.msra.mxu0 %v12514_v24  ;;  %v12561_v24 = vld [vmem:[%s13537_s7 + $0x1e8] sm:$0xff]  }
 0x67a   :  { %11238 = vmatprep.subr.bf16.mxu0 %v13063_v0 }
 0x67d   :  { %11239 = vmatpush3.bf16.msra.mxu0 %v12516_v26  ;;  %v12563_v26 = vld [vmem:[%s13537_s7 + $0x1f0] sm:$0xff]  }
 0x67e   :  { %11264 = vmatprep.subr.bf16.mxu0 %v13063_v0 }
 0x733   :  { %v2269_v61 = vpop.f32.mrb[48].mxu0 }
 0x734   :  { %v11202_v62 = vpop.f32.mrb[49].mxu0  ;;  %v2276_v1 = vmax.f32 %v2269_v61, 0.0  ;;  %v12536_v61 = vld [vmem:[%s13537_s7 + $0x108] sm:$0xff]  }
 0x735   :  { %v2272_v63 = vpop.f32.mrb[50].mxu0  ;;  %v12537_v62 = vld [vmem:[%s13537_s7 + $0x148] sm:$0xff]  }
 0x736   :  { %v2277_v2 = vmax.f32 %v2272_v63, 0.0  ;;  %v11203_v36 = vpop.f32.mrb[51].mxu0  ;;  %v12538_v63 = vld [vmem:[%s13537_s7 + $0x110] sm:$0xff]  }
 0x737   :  { %v12541_v36 = vld [vmem:[%s13537_s7 + $0x158] sm:$0xff]  }
 0x738   :  { %v2278_v3 = vpack.c.bf16 %v2277_v2, %v2276_v1  ;;  %v12539_v1 = vld [vmem:[%s13537_s7 + $0x150] sm:$0xff]   ;;  %v12540_v2 = vld [vmem:[%s13537_s7 + $0x118] sm:$0xff]  }
 0x73a   :  { %11221 = vmatmul.mubr.bf16.vlgmr.msra.gmra.mrb[48].mxu1 %v2278_v3  ;;  %v12542_v3 = vld [vmem:[%s13537_s7 + $0x120] sm:$0xff]  }
 0x73b   :  { %11260 = vmatprep.mubr.msk.bf16.mxu1 %vm13065_vm0, %v13063_v0  ;;  %11245 = vmatpush3.bf16.msra.mxu1 %v12503_v5  ;;  %v12544_v5 = vld [vmem:[%s13537_s7 + $0x128] sm:$0xff]  }
 0x73c   :  { %11246 = vmatprep.subr.bf16.mxu1 %v13063_v0 }
 0x73f   :  { %11247 = vmatpush3.bf16.msra.mxu1 %v12505_v7  ;;  %v12546_v7 = vld [vmem:[%s13537_s7 + $0x130] sm:$0xff]  }
 0x740   :  { %11248 = vmatprep.subr.bf16.mxu1 %v13063_v0 }
 0x743   :  { %11249 = vmatpush3.bf16.msra.mxu1 %v12507_v9  ;;  %v12548_v9 = vld [vmem:[%s13537_s7 + $0x138] sm:$0xff]  }
 0x744   :  { %11250 = vmatprep.subr.bf16.mxu1 %v13063_v0 }
 0x747   :  { %11251 = vmatpush3.bf16.msra.mxu1 %v12509_v19  ;;  %v12556_v19 = vld [vmem:[%s13537_s7 + $0x198] sm:$0xff]  }
 0x748   :  { %11252 = vmatprep.subr.bf16.mxu1 %v13063_v0 }
 0x74b   :  { %11253 = vmatpush3.bf16.msra.mxu1 %v12511_v21  ;;  %v12558_v21 = vld [vmem:[%s13537_s7 + $0x1a0] sm:$0xff]  }
 0x74c   :  { %11254 = vmatprep.subr.bf16.mxu1 %v13063_v0 }
 0x74f   :  { %11255 = vmatpush3.bf16.msra.mxu1 %v12513_v23  ;;  %v12560_v23 = vld [vmem:[%s13537_s7 + $0x1a8] sm:$0xff]  }
 0x750   :  { %11256 = vmatprep.subr.bf16.mxu1 %v13063_v0 }
 0x80d   :  { %v2377_v10 = vpop.f32.mrb[48].mxu1 }
 0x80e   :  { %v13552_v11 = vadd.f32 %v2377_v10, %v13483_v25  ;;  %v11222_v12 = vpop.f32.mrb[49].mxu1  ;;  %v12515_v25 = vld [vmem:[%s13537_s7 + $0x70] sm:$0xff]   ;;  %v12549_v10 = vld [vmem:[%s13537_s7 + $0x178] sm:$0xff]  }
 0x80f   :  { %v2380_v13 = vpop.f32.mrb[50].mxu1  ;;  %11257 = vmatpush3.bf16.msra.mxu1 %v12515_v25  ;;  %v12550_v12 = vld [vmem:[%s13537_s7 + $0x180] sm:$0xff]   ;;  %v12562_v25 = vld [vmem:[%s13537_s7 + $0x1b0] sm:$0xff]  }
 0x810   :  { %v13555_v14 = vadd.f32 %v2380_v13, %v13486_v48  ;;  %v11223_v15 = vpop.f32.mrb[51].mxu1  ;;  %v2387_v16 = vmul.f32 %v13552_v11, %v13552_v11  ;;  %11258 = vmatprep.subr.bf16.mxu1 %v13063_v0  ;;  %v12551_v13 = vld [vmem:[%s13537_s7 + $0x1c0] sm:$0xff]  }
 0x811   :  { %v12552_v15 = vld [vmem:[%s13537_s7 + $0x188] sm:$0xff]  }
 0x812   :  { %2389 = vadd.xlane.f32.xlu0 %v2387_v16  ;;  %v2388_v17 = vmul.f32 %v13555_v14, %v13555_v14  ;;  %v12553_v16 = vld [vmem:[%s13537_s7 + $0x1c8] sm:$0xff]  }
 0x813   :  { %11259 = vmatpush3.bf16.msra.mxu1 %v12517_v27  ;;  %v12564_v27 = vld [vmem:[%s13537_s7 + $0x1b8] sm:$0xff]  }
 0x814   :  { %2391 = vadd.xlane.f32.xlu1 %v2388_v17  ;;  %11284 = vmatprep.subr.bf16.mxu1 %v13063_v0  ;;  %v12554_v17 = vld [vmem:[%s13537_s7 + $0x190] sm:$0xff]  }
 0x89f   :  { %v2390_v44 = vpop.xlane.xlu0 %2389 }
 0x8a0   :  { %v2393_v48 = vmul.f32 0.015625, %v2390_v44  ;;  %v12565_v44 = vld [vmem:[%s13537_s7 + $0x1f8] sm:$0xff]  }
 0x8a1   :  { %v2392_v50 = vpop.xlane.xlu1 %2391 }
 0x8a2   :  { %v2395_v28 = vadd.f32 1e-06, %v2393_v48  ;;  %v2394_v29 = vmul.f32 0.015625, %v2392_v50  ;;  %v12566_v48 = vld [vmem:[%s13537_s7 + $0x200] sm:$0xff]  }
 0x8a3   :  { %v12567_v50 = vld [vmem:[%s13537_s7 + $0x240] sm:$0xff]  }
 0x8a4   :  { %12962 = vrsqrt.f32 %v2395_v28  ;;  %v2396_v30 = vadd.f32 1e-06, %v2394_v29  ;;  %v12568_v28 = vld [vmem:[%s13537_s7 + $0x208] sm:$0xff]  }
 0x8a5   :  { %v12569_v29 = vld [vmem:[%s13537_s7 + $0x248] sm:$0xff]  }
 0x8a6   :  { %12964 = vrsqrt.f32 %v2396_v30  ;;  %v12570_v30 = vld [vmem:[%s13537_s7 + $0x210] sm:$0xff]  }
 0x8ae   :  { %v12963_v31 = vpop.eup %12962 }
 0x8af   :  { %v2399_v32 = vmul.f32 %v12963_v31, %v13552_v11  ;;  %v12571_v31 = vld [vmem:[%s13537_s7 + $0x250] sm:$0xff]  }
 0x8b0   :  { %v12965_v45 = vpop.eup %12964 }
 0x8b1   :  { %v2400_v51 = vmul.f32 %v12965_v45, %v13555_v14  ;;  %v2407_v33 = vmul.f32 %v9792_v49, %v2399_v32  ;;  %v12572_v32 = vld [vmem:[%s13537_s7 + $0x218] sm:$0xff]  }
 0x8b2   :  { %v12573_v45 = vld [vmem:[%s13537_s7 + $0x258] sm:$0xff]  }
 0x8b3   :  { %v2408_v34 = vmul.f32 %v9792_v49, %v2400_v51  ;;  %v12574_v49 = vld [vmem:[%s13537_s7 + $0x220] sm:$0xff]  }
 0x8b4   :  { %v12575_v51 = vld [vmem:[%s13537_s7 + $0x260] sm:$0xff]  }
 0x8b5   :  { %v13588_v38 = vpack.c.bf16 %v2408_v34, %v2407_v33  ;;  %v12576_v33 = vld [vmem:[%s13537_s7 + $0x228] sm:$0xff]  }
 0x8b6   :  { %v12577_v34 = vld [vmem:[%s13537_s7 + $0x268] sm:$0xff]  }
 0x8b7   :  { %11241 = vmatmul.mubr.bf16.vlgmr.msra.gmra.mrb[52].mxu0 %v13588_v38  ;;  %11261 = vmatmul.mubr.bf16.vlgmr.msra.gmra.mrb[52].mxu1 %v13588_v38 }
 0x8b8   :  { %11265 = vmatpush3.bf16.msra.mxu0 %v12518_v35  ;;  %11285 = vmatpush3.bf16.msra.mxu1 %v12519_v37  ;;  %v12578_v35 = vld [vmem:[%s13537_s7 + $0x230] sm:$0xff]  }
 0x8b9   :  { %11266 = vmatprep.subr.bf16.mxu0 %v13063_v0  ;;  %11286 = vmatprep.subr.bf16.mxu1 %v13063_v0  ;;  %v12579_v37 = vld [vmem:[%s13537_s7 + $0x270] sm:$0xff]  }
 0x8ba   :  { %11280 = vmatprep.mubr.msk.bf16.mxu0 %vm13065_vm0, %v13063_v0  ;;  %11300 = vmatprep.mubr.msk.bf16.mxu1 %vm13065_vm0, %v13063_v0 }
 0x8bc   :  { %11267 = vmatpush3.bf16.msra.mxu0 %v12520_v39  ;;  %11287 = vmatpush3.bf16.msra.mxu1 %v12521_v40  ;;  %v12580_v39 = vld [vmem:[%s13537_s7 + $0x238] sm:$0xff]  }
 0x8bd   :  { %11268 = vmatprep.subr.bf16.mxu0 %v13063_v0  ;;  %11288 = vmatprep.subr.bf16.mxu1 %v13063_v0  ;;  %v12581_v40 = vld [vmem:[%s13537_s7 + $0x278] sm:$0xff]  }
 0x8c0   :  { %11269 = vmatpush3.bf16.msra.mxu0 %v12522_v41  ;;  %11289 = vmatpush3.bf16.msra.mxu1 %v12523_v42  ;;  %v12582_v41 = vld [vmem:[%s13537_s7 + $0x280] sm:$0xff]  }
 0x8c1   :  { %11270 = vmatprep.subr.bf16.mxu0 %v13063_v0  ;;  %11290 = vmatprep.subr.bf16.mxu1 %v13063_v0  ;;  %v12583_v42 = vld [vmem:[%s13537_s7 + $0x2c0] sm:$0xff]  }
 0x8c4   :  { %11271 = vmatpush3.bf16.msra.mxu0 %v12524_v43  ;;  %11291 = vmatpush3.bf16.msra.mxu1 %v12525_v46  ;;  %v12584_v43 = vld [vmem:[%s13537_s7 + $0x288] sm:$0xff]  }
 0x8c5   :  { %11272 = vmatprep.subr.bf16.mxu0 %v13063_v0  ;;  %11292 = vmatprep.subr.bf16.mxu1 %v13063_v0  ;;  %v12585_v46 = vld [vmem:[%s13537_s7 + $0x2c8] sm:$0xff]  }
 0x8c8   :  { %11273 = vmatpush3.bf16.msra.mxu0 %v12526_v47  ;;  %11293 = vmatpush3.bf16.msra.mxu1 %v12527_v52  ;;  %v12586_v47 = vld [vmem:[%s13537_s7 + $0x290] sm:$0xff]  }
 0x8c9   :  { %11274 = vmatprep.subr.bf16.mxu0 %v13063_v0  ;;  %11294 = vmatprep.subr.bf16.mxu1 %v13063_v0  ;;  %v12587_v52 = vld [vmem:[%s13537_s7 + $0x2d0] sm:$0xff]  }
 0x8cc   :  { %11275 = vmatpush3.bf16.msra.mxu0 %v12528_v53  ;;  %11295 = vmatpush3.bf16.msra.mxu1 %v12529_v54  ;;  %v12588_v53 = vld [vmem:[%s13537_s7 + $0x298] sm:$0xff]  }
 0x8cd   :  { %11276 = vmatprep.subr.bf16.mxu0 %v13063_v0  ;;  %11296 = vmatprep.subr.bf16.mxu1 %v13063_v0  ;;  %v12589_v54 = vld [vmem:[%s13537_s7 + $0x2d8] sm:$0xff]  }
 0x8d0   :  { %11277 = vmatpush3.bf16.msra.mxu0 %v12530_v55  ;;  %11297 = vmatpush3.bf16.msra.mxu1 %v12531_v56  ;;  %v12590_v55 = vld [vmem:[%s13537_s7 + $0x2a0] sm:$0xff]  }
 0x8d1   :  { %11278 = vmatprep.subr.bf16.mxu0 %v13063_v0  ;;  %11298 = vmatprep.subr.bf16.mxu1 %v13063_v0  ;;  %v12591_v56 = vld [vmem:[%s13537_s7 + $0x2e0] sm:$0xff]  }
 0x8d4   :  { %11279 = vmatpush3.bf16.msra.mxu0 %v12532_v57  ;;  %11299 = vmatpush3.bf16.msra.mxu1 %v12533_v58  ;;  %v12592_v57 = vld [vmem:[%s13537_s7 + $0x2a8] sm:$0xff]  }
 0x8d5   :  { %11304 = vmatprep.subr.bf16.mxu0 %v13063_v0  ;;  %11324 = vmatprep.subr.bf16.mxu1 %v13063_v0  ;;  %v12593_v58 = vld [vmem:[%s13537_s7 + $0x2e8] sm:$0xff]  }
 0x8d7   :  { %11281 = vmatmul.mubr.bf16.vlgmr.msra.gmra.mrb[56].mxu0 %v13588_v38  ;;  %11301 = vmatmul.mubr.bf16.vlgmr.msra.gmra.mrb[56].mxu1 %v13588_v38 }
 0x8d8   :  { %11305 = vmatpush3.bf16.msra.mxu0 %v12534_v59  ;;  %11325 = vmatpush3.bf16.msra.mxu1 %v12535_v60  ;;  %v12594_v59 = vld [vmem:[%s13537_s7 + $0x2b0] sm:$0xff]  }
 0x8d9   :  { %11306 = vmatprep.subr.bf16.mxu0 %v13063_v0  ;;  %11326 = vmatprep.subr.bf16.mxu1 %v13063_v0  ;;  %v12595_v60 = vld [vmem:[%s13537_s7 + $0x2f0] sm:$0xff]  }
 0x8da   :  { %11320 = vmatprep.mubr.msk.bf16.mxu0 %vm13065_vm0, %v13063_v0  ;;  %11340 = vmatprep.mubr.msk.bf16.mxu1 %vm13065_vm0, %v13063_v0 }
 0x8dc   :  { %11307 = vmatpush3.bf16.msra.mxu0 %v12536_v61  ;;  %11327 = vmatpush3.bf16.msra.mxu1 %v12537_v62  ;;  %v12596_v61 = vld [vmem:[%s13537_s7 + $0x2b8] sm:$0xff]  }
 0x8dd   :  { %11308 = vmatprep.subr.bf16.mxu0 %v13063_v0  ;;  %11328 = vmatprep.subr.bf16.mxu1 %v13063_v0  ;;  %v12597_v62 = vld [vmem:[%s13537_s7 + $0x2f8] sm:$0xff]   ;;  %s9645_s7 = sld [smem:[%s14853_s0 + %s13087_s4]]  }
 0x8de   :  { %s14803_s4 = sld [smem:[%s14853_s0 + %s13101_s30]]  }
 0x8e0   :  { %11309 = vmatpush3.bf16.msra.mxu0 %v12538_v63  ;;  %11329 = vmatpush3.bf16.msra.mxu1 %v12539_v1 }
 0x8e1   :  { %11310 = vmatprep.subr.bf16.mxu0 %v13063_v0  ;;  %11330 = vmatprep.subr.bf16.mxu1 %v13063_v0 }
 0x8e4   :  { %11311 = vmatpush3.bf16.msra.mxu0 %v12540_v2  ;;  %11331 = vmatpush3.bf16.msra.mxu1 %v12541_v36 }
 0x8e5   :  { %11312 = vmatprep.subr.bf16.mxu0 %v13063_v0  ;;  %11332 = vmatprep.subr.bf16.mxu1 %v13063_v0 }
 0x8e8   :  { %11313 = vmatpush3.bf16.msra.mxu0 %v12542_v3  ;;  %11333 = vmatpush3.bf16.msra.mxu1 %v12543_v4 }
 0x8e9   :  { %11314 = vmatprep.subr.bf16.mxu0 %v13063_v0  ;;  %11334 = vmatprep.subr.bf16.mxu1 %v13063_v0 }
 0x8ec   :  { %11315 = vmatpush3.bf16.msra.mxu0 %v12544_v5  ;;  %11335 = vmatpush3.bf16.msra.mxu1 %v12545_v6 }
 0x8ed   :  { %11316 = vmatprep.subr.bf16.mxu0 %v13063_v0  ;;  %11336 = vmatprep.subr.bf16.mxu1 %v13063_v0 }
 0x8f0   :  { %11317 = vmatpush3.bf16.msra.mxu0 %v12546_v7  ;;  %11337 = vmatpush3.bf16.msra.mxu1 %v12547_v8 }
 0x8f1   :  { %11318 = vmatprep.subr.bf16.mxu0 %v13063_v0  ;;  %11338 = vmatprep.subr.bf16.mxu1 %v13063_v0 }
 0x8f4   :  { %11319 = vmatpush3.bf16.msra.mxu0 %v12548_v9  ;;  %11339 = vmatpush3.bf16.msra.mxu1 %v12549_v10 }
 0x8f5   :  { %11344 = vmatprep.subr.bf16.mxu0 %v13063_v0  ;;  %11364 = vmatprep.subr.bf16.mxu1 %v13063_v0 }
 0x8f7   :  { %11321 = vmatmul.mubr.bf16.vlgmr.msra.gmra.mrb[60].mxu0 %v13588_v38  ;;  %11341 = vmatmul.mubr.bf16.vlgmr.msra.gmra.mrb[60].mxu1 %v13588_v38 }
 0x8f8   :  { %11345 = vmatpush3.bf16.msra.mxu0 %v12550_v12  ;;  %11365 = vmatpush3.bf16.msra.mxu1 %v12551_v13 }
 0x8f9   :  { %11346 = vmatprep.subr.bf16.mxu0 %v13063_v0  ;;  %11366 = vmatprep.subr.bf16.mxu1 %v13063_v0 }
 0x8fa   :  { %11360 = vmatprep.mubr.msk.bf16.mxu0 %vm13065_vm0, %v13063_v0  ;;  %11380 = vmatprep.mubr.msk.bf16.mxu1 %vm13065_vm0, %v13063_v0 }
 0x8fc   :  { %11347 = vmatpush3.bf16.msra.mxu0 %v12552_v15  ;;  %11367 = vmatpush3.bf16.msra.mxu1 %v12553_v16 }
 0x8fd   :  { %11348 = vmatprep.subr.bf16.mxu0 %v13063_v0  ;;  %11368 = vmatprep.subr.bf16.mxu1 %v13063_v0 }
 0x900   :  { %11349 = vmatpush3.bf16.msra.mxu0 %v12554_v17  ;;  %11369 = vmatpush3.bf16.msra.mxu1 %v12555_v18 }
 0x901   :  { %11350 = vmatprep.subr.bf16.mxu0 %v13063_v0  ;;  %11370 = vmatprep.subr.bf16.mxu1 %v13063_v0 }
 0x904   :  { %11351 = vmatpush3.bf16.msra.mxu0 %v12556_v19  ;;  %11371 = vmatpush3.bf16.msra.mxu1 %v12557_v20 }
 0x905   :  { %11352 = vmatprep.subr.bf16.mxu0 %v13063_v0  ;;  %11372 = vmatprep.subr.bf16.mxu1 %v13063_v0 }
 0x908   :  { %11353 = vmatpush3.bf16.msra.mxu0 %v12558_v21  ;;  %11373 = vmatpush3.bf16.msra.mxu1 %v12559_v22 }
 0x909   :  { %11354 = vmatprep.subr.bf16.mxu0 %v13063_v0  ;;  %11374 = vmatprep.subr.bf16.mxu1 %v13063_v0 }
 0x90c   :  { %11355 = vmatpush3.bf16.msra.mxu0 %v12560_v23  ;;  %11375 = vmatpush3.bf16.msra.mxu1 %v12561_v24 }
 0x90d   :  { %11356 = vmatprep.subr.bf16.mxu0 %v13063_v0  ;;  %11376 = vmatprep.subr.bf16.mxu1 %v13063_v0 }
 0x910   :  { %11357 = vmatpush3.bf16.msra.mxu0 %v12562_v25  ;;  %11377 = vmatpush3.bf16.msra.mxu1 %v12563_v26 }
 0x911   :  { %11358 = vmatprep.subr.bf16.mxu0 %v13063_v0  ;;  %11378 = vmatprep.subr.bf16.mxu1 %v13063_v0 }
 0x914   :  { %11359 = vmatpush3.bf16.msra.mxu0 %v12564_v27  ;;  %11379 = vmatpush3.bf16.msra.mxu1 %v12565_v44 }
 0x915   :  { %11384 = vmatprep.subr.bf16.mxu0 %v13063_v0  ;;  %11404 = vmatprep.subr.bf16.mxu1 %v13063_v0 }
 0x917   :  { %11361 = vmatmul.mubr.bf16.vlgmr.msra.gmra.mrb[64].mxu0 %v13588_v38  ;;  %11381 = vmatmul.mubr.bf16.vlgmr.msra.gmra.mrb[64].mxu1 %v13588_v38 }
 0x918   :  { %11385 = vmatpush3.bf16.msra.mxu0 %v12566_v48  ;;  %11405 = vmatpush3.bf16.msra.mxu1 %v12567_v50 }
 0x919   :  { %11386 = vmatprep.subr.bf16.mxu0 %v13063_v0  ;;  %11406 = vmatprep.subr.bf16.mxu1 %v13063_v0 }
 0x91a   :  { %11400 = vmatprep.mubr.msk.bf16.mxu0 %vm13065_vm0, %v13063_v0  ;;  %11420 = vmatprep.mubr.msk.bf16.mxu1 %vm13065_vm0, %v13063_v0 }
 0x91c   :  { %11387 = vmatpush3.bf16.msra.mxu0 %v12568_v28  ;;  %11407 = vmatpush3.bf16.msra.mxu1 %v12569_v29 }
 0x91d   :  { %11388 = vmatprep.subr.bf16.mxu0 %v13063_v0  ;;  %11408 = vmatprep.subr.bf16.mxu1 %v13063_v0 }
 0x920   :  { %11389 = vmatpush3.bf16.msra.mxu0 %v12570_v30  ;;  %11409 = vmatpush3.bf16.msra.mxu1 %v12571_v31 }
 0x921   :  { %11390 = vmatprep.subr.bf16.mxu0 %v13063_v0  ;;  %11410 = vmatprep.subr.bf16.mxu1 %v13063_v0 }
 0x924   :  { %11391 = vmatpush3.bf16.msra.mxu0 %v12572_v32  ;;  %11411 = vmatpush3.bf16.msra.mxu1 %v12573_v45 }
 0x925   :  { %11392 = vmatprep.subr.bf16.mxu0 %v13063_v0  ;;  %11412 = vmatprep.subr.bf16.mxu1 %v13063_v0 }
 0x928   :  { %11393 = vmatpush3.bf16.msra.mxu0 %v12574_v49  ;;  %11413 = vmatpush3.bf16.msra.mxu1 %v12575_v51 }
 0x929   :  { %11394 = vmatprep.subr.bf16.mxu0 %v13063_v0  ;;  %11414 = vmatprep.subr.bf16.mxu1 %v13063_v0 }
 0x92c   :  { %11395 = vmatpush3.bf16.msra.mxu0 %v12576_v33  ;;  %11415 = vmatpush3.bf16.msra.mxu1 %v12577_v34 }
 0x92d   :  { %11396 = vmatprep.subr.bf16.mxu0 %v13063_v0  ;;  %11416 = vmatprep.subr.bf16.mxu1 %v13063_v0 }
 0x930   :  { %11397 = vmatpush3.bf16.msra.mxu0 %v12578_v35  ;;  %11417 = vmatpush3.bf16.msra.mxu1 %v12579_v37 }
 0x931   :  { %11398 = vmatprep.subr.bf16.mxu0 %v13063_v0  ;;  %11418 = vmatprep.subr.bf16.mxu1 %v13063_v0 }
 0x934   :  { %11399 = vmatpush3.bf16.msra.mxu0 %v12580_v39  ;;  %11419 = vmatpush3.bf16.msra.mxu1 %v12581_v40 }
 0x935   :  { %11424 = vmatprep.subr.bf16.mxu0 %v13063_v0  ;;  %11444 = vmatprep.subr.bf16.mxu1 %v13063_v0 }
 0x937   :  { %11401 = vmatmul.mubr.bf16.vlgmr.msra.gmra.mrb[68].mxu0 %v13588_v38  ;;  %11421 = vmatmul.mubr.bf16.vlgmr.msra.gmra.mrb[68].mxu1 %v13588_v38 }
 0x938   :  { %11425 = vmatpush3.bf16.msra.mxu0 %v12582_v41  ;;  %11445 = vmatpush3.bf16.msra.mxu1 %v12583_v42 }
 0x939   :  { %11426 = vmatprep.subr.bf16.mxu0 %v13063_v0  ;;  %11446 = vmatprep.subr.bf16.mxu1 %v13063_v0 }
 0x93a   :  { %11440 = vmatprep.mubr.msk.bf16.mxu0 %vm13065_vm0, %v13063_v0  ;;  %11460 = vmatprep.mubr.msk.bf16.mxu1 %vm13065_vm0, %v13063_v0 }
 0x93c   :  { %11427 = vmatpush3.bf16.msra.mxu0 %v12584_v43  ;;  %11447 = vmatpush3.bf16.msra.mxu1 %v12585_v46 }
 0x93d   :  { %11428 = vmatprep.subr.bf16.mxu0 %v13063_v0  ;;  %11448 = vmatprep.subr.bf16.mxu1 %v13063_v0 }
 0x940   :  { %11429 = vmatpush3.bf16.msra.mxu0 %v12586_v47  ;;  %11449 = vmatpush3.bf16.msra.mxu1 %v12587_v52 }
 0x941   :  { %11430 = vmatprep.subr.bf16.mxu0 %v13063_v0  ;;  %11450 = vmatprep.subr.bf16.mxu1 %v13063_v0 }
 0x944   :  { %11431 = vmatpush3.bf16.msra.mxu0 %v12588_v53  ;;  %11451 = vmatpush3.bf16.msra.mxu1 %v12589_v54 }
 0x945   :  { %11432 = vmatprep.subr.bf16.mxu0 %v13063_v0  ;;  %11452 = vmatprep.subr.bf16.mxu1 %v13063_v0 }
 0x948   :  { %11433 = vmatpush3.bf16.msra.mxu0 %v12590_v55  ;;  %11453 = vmatpush3.bf16.msra.mxu1 %v12591_v56 }
 0x949   :  { %11434 = vmatprep.subr.bf16.mxu0 %v13063_v0  ;;  %11454 = vmatprep.subr.bf16.mxu1 %v13063_v0 }
 0x94c   :  { %11435 = vmatpush3.bf16.msra.mxu0 %v12592_v57  ;;  %11455 = vmatpush3.bf16.msra.mxu1 %v12593_v58 }
 0x94d   :  { %11436 = vmatprep.subr.bf16.mxu0 %v13063_v0  ;;  %11456 = vmatprep.subr.bf16.mxu1 %v13063_v0 }
 0x950   :  { %11437 = vmatpush3.bf16.msra.mxu0 %v12594_v59  ;;  %11457 = vmatpush3.bf16.msra.mxu1 %v12595_v60 }
 0x951   :  { %11438 = vmatprep.subr.bf16.mxu0 %v13063_v0  ;;  %11458 = vmatprep.subr.bf16.mxu1 %v13063_v0 }
 0x954   :  { %11439 = vmatpush3.bf16.msra.mxu0 %v12596_v61  ;;  %11459 = vmatpush3.bf16.msra.mxu1 %v12597_v62 }
 0x955   :  { %11464 = vmatprep.subr.bf16.mxu0 %v13063_v0  ;;  %11470 = vmatprep.subr.bf16.mxu1 %v13063_v0 }
 0x957   :  { %11441 = vmatmul.mubr.bf16.vlgmr.msra.gmra.mrb[72].mxu0 %v13588_v38  ;;  %11461 = vmatmul.mubr.bf16.vlgmr.msra.gmra.mrb[72].mxu1 %v13588_v38 }
 0x958   :  { %11466 = vmatprep.mubr.msk.bf16.mxu0 %vm13065_vm0, %v13063_v0  ;;  %11472 = vmatprep.mubr.msk.bf16.mxu1 %vm13065_vm0, %v13063_v0 }
 0x98a   :  { %v2692_v63 = vpop.f32.mrb[52].mxu0  ;;  %v2781_v1 = vpop.f32.mrb[52].mxu1 }
 0x98b   :  { %v11242_v2 = vpop.f32.mrb[53].mxu0  ;;  %v11262_v36 = vpop.f32.mrb[53].mxu1 }
 0x98c   :  { %v2695_v3 = vpop.f32.mrb[54].mxu0  ;;  %v2784_v4 = vpop.f32.mrb[54].mxu1 }
 0x98d   :  { %v3678_v5 = vpack.c.bf16 %v2695_v3, %v2692_v63  ;;  %v3679_v6 = vpack.c.bf16 %v2784_v4, %v2781_v1  ;;  %v11243_v7 = vpop.f32.mrb[55].mxu0  ;;  %v11263_v8 = vpop.f32.mrb[55].mxu1  ;;  %v13054_v4 = vld [vmem:[%s13408_s17] sm:$0xff] }
 0x9aa   :  { %v2870_v9 = vpop.f32.mrb[56].mxu0  ;;  %v2959_v10 = vpop.f32.mrb[56].mxu1 }
 0x9ab   :  { %v11282_v12 = vpop.f32.mrb[57].mxu0  ;;  %v11302_v38 = vpop.f32.mrb[57].mxu1 }
 0x9ac   :  { %v2873_v13 = vpop.f32.mrb[58].mxu0  ;;  %v2962_v15 = vpop.f32.mrb[58].mxu1  ;;  %v13056_v38 = vld [vmem:[%s13408_s17 + $0x8] sm:$0xff] }
 0x9ad   :  { %v3680_v16 = vpack.c.bf16 %v2873_v13, %v2870_v9  ;;  %v3681_v17 = vpack.c.bf16 %v2962_v15, %v2959_v10  ;;  %v11283_v18 = vpop.f32.mrb[59].mxu0  ;;  %v11303_v19 = vpop.f32.mrb[59].mxu1  ;;  %v13055_v10 = vld [vmem:[%s13408_s17 + $0x10] sm:$0xff] }
 0x9ae   :  { %v13057_v18 = vld [vmem:[%s13408_s17 + $0x18] sm:$0xff] }
 0x9ca   :  { %v3048_v20 = vpop.f32.mrb[60].mxu0  ;;  %v3137_v21 = vpop.f32.mrb[60].mxu1 }
 0x9cb   :  { %v11322_v22 = vpop.f32.mrb[61].mxu0  ;;  %v11342_v23 = vpop.f32.mrb[61].mxu1 }
 0x9cc   :  { %v3051_v24 = vpop.f32.mrb[62].mxu0  ;;  %v3140_v25 = vpop.f32.mrb[62].mxu1 }
 0x9cd   :  { %v3682_v26 = vpack.c.bf16 %v3051_v24, %v3048_v20  ;;  %v3683_v27 = vpack.c.bf16 %v3140_v25, %v3137_v21  ;;  %v11323_v44 = vpop.f32.mrb[63].mxu0  ;;  %v11343_v48 = vpop.f32.mrb[63].mxu1  ;;  %v13058_v25 = vld [vmem:[%s13408_s17 + $0x20] sm:$0xff] }
 0x9cf   :  { %v3694_v50 = vsel %vm1478_vm1, %v3682_v26, 0  ;;  %v3741_v28 = vsel %vm1478_vm1, %v3683_v27, 0 }
 0x9d0   :  { %11465 = vmatpush3.bf16.xpose.msra.mxu0 %v3694_v50  ;;  %11471 = vmatpush3.bf16.xpose.msra.mxu1 %v3741_v28  ;;  %v13059_v28 = vld [vmem:[%s13408_s17 + $0x30] sm:$0xff] }
 0x9d1   :  { %11476 = vmatprep.subr.bf16.mxu0 %v13063_v0  ;;  %11482 = vmatprep.subr.bf16.mxu1 %v13063_v0 }
 0x9d7   :  { %11467 = vmatmul.mubr.msk.bf16.vlgmr.msra.gmra.mrb[76].mxu0 %vm1478_vm1, %v3678_v5  ;;  %11473 = vmatmul.mubr.msk.bf16.vlgmr.msra.gmra.mrb[76].mxu1 %vm1478_vm1, %v3679_v6 }
 0x9d8   :  { %11478 = vmatprep.mubr.msk.bf16.mxu0 %vm13065_vm0, %v13063_v0  ;;  %11484 = vmatprep.mubr.msk.bf16.mxu1 %vm13065_vm0, %v13063_v0 }
 0x9ea   :  { %v3226_v29 = vpop.f32.mrb[64].mxu0  ;;  %v3315_v30 = vpop.f32.mrb[64].mxu1 }
 0x9eb   :  { %v11362_v31 = vpop.f32.mrb[65].mxu0  ;;  %v11382_v32 = vpop.f32.mrb[65].mxu1 }
 0x9ec   :  { %v3229_v45 = vpop.f32.mrb[66].mxu0  ;;  %v3318_v49 = vpop.f32.mrb[66].mxu1 }
 0x9ed   :  { %v3684_v51 = vpack.c.bf16 %v3229_v45, %v3226_v29  ;;  %v3685_v33 = vpack.c.bf16 %v3318_v49, %v3315_v30  ;;  %v11363_v34 = vpop.f32.mrb[67].mxu0  ;;  %v11383_v35 = vpop.f32.mrb[67].mxu1  ;;  %v13060_v30 = vld [vmem:[%s13408_s17 + $0x28] sm:$0xff] }
 0x9ef   :  { %v3788_v37 = vsel %vm1478_vm1, %v3684_v51, 0  ;;  %v3835_v39 = vsel %vm1478_vm1, %v3685_v33, 0  ;;  %v13061_v51 = vld [vmem:[%s13408_s17 + $0x38] sm:$0xff]  ;;  %s13998_s17 = sld [smem:[%s14853_s0 + %s13082_s14]]  }
 0x9f0   :  { %11477 = vmatpush3.bf16.xpose.msra.mxu0 %v3788_v37  ;;  %11483 = vmatpush3.bf16.xpose.msra.mxu1 %v3835_v39 }
 0x9f1   :  { %11488 = vmatprep.subr.bf16.mxu0 %v13063_v0  ;;  %11494 = vmatprep.subr.bf16.mxu1 %v13063_v0 }
 0x9f7   :  { %11479 = vmatmul.mubr.msk.bf16.vlgmr.msra.gmra.mrb[80].mxu0 %vm1478_vm1, %v3680_v16  ;;  %11485 = vmatmul.mubr.msk.bf16.vlgmr.msra.gmra.mrb[80].mxu1 %vm1478_vm1, %v3681_v17 }
 0x9f8   :  { %11490 = vmatprep.mubr.msk.bf16.mxu0 %vm13065_vm0, %v13063_v0  ;;  %11496 = vmatprep.mubr.msk.bf16.mxu1 %vm13065_vm0, %v13063_v0 }
 0xa0a   :  { %v3404_v40 = vpop.f32.mrb[68].mxu0  ;;  %v3493_v41 = vpop.f32.mrb[68].mxu1 }
 0xa0b   :  { %v11402_v42 = vpop.f32.mrb[69].mxu0  ;;  %v11422_v43 = vpop.f32.mrb[69].mxu1 }
 0xa0c   :  { %v3407_v46 = vpop.f32.mrb[70].mxu0  ;;  %v3496_v47 = vpop.f32.mrb[70].mxu1 }
 0xa0d   :  { %v3686_v52 = vpack.c.bf16 %v3407_v46, %v3404_v40  ;;  %v3687_v53 = vpack.c.bf16 %v3496_v47, %v3493_v41  ;;  %v11403_v54 = vpop.f32.mrb[71].mxu0  ;;  %v11423_v55 = vpop.f32.mrb[71].mxu1 }
 0xa0f   :  { %11489 = vmatpush3.bf16.msra.mxu0 %v3686_v52  ;;  %11495 = vmatpush3.bf16.msra.mxu1 %v3687_v53 }
 0xa10   :  { %11500 = vmatprep.subr.bf16.mxu0 %v13063_v0  ;;  %11506 = vmatprep.subr.bf16.mxu1 %v13063_v0 }
 0xa2a   :  { %v13806_v56 = vpop.f32.mrb[72].mxu0  ;;  %v13808_v57 = vpop.f32.mrb[72].mxu1 }
 0xa2b   :  { %v11442_v58 = vpop.f32.mrb[73].mxu0  ;;  %v11462_v59 = vpop.f32.mrb[73].mxu1 }
 0xa2c   :  { %v13810_v60 = vpop.f32.mrb[74].mxu0  ;;  %v13812_v61 = vpop.f32.mrb[74].mxu1 }
 0xa2d   :  { %v3688_v62 = vpack.c.bf16 %v13810_v60, %v13806_v56  ;;  %v3689_v63 = vpack.c.bf16 %v13812_v61, %v13808_v57  ;;  %v11443_v1 = vpop.f32.mrb[75].mxu0  ;;  %v11463_v2 = vpop.f32.mrb[75].mxu1 }
 0xaaa   :  { %v3730_v36 = vpop.f32.mrb[76].mxu0  ;;  %v3777_v3 = vpop.f32.mrb[76].mxu1 }
 0xaab   :  { %v3731_v5 = vadd.f32 %v13054_v4, %v3730_v36  ;;  %v11468_v6 = vpop.f32.mrb[77].mxu0  ;;  %v11474_v7 = vpop.f32.mrb[77].mxu1  ;;  %v3778_v12 = vadd.f32 %v13055_v10, %v3777_v3 }
 0xaac   :  { %v3733_v8 = vpop.f32.mrb[78].mxu0  ;;  %v3780_v9 = vpop.f32.mrb[78].mxu1 }
 0xaad   :  { %v3734_v13 = vadd.f32 %v13056_v38, %v3733_v8  ;;  %v11469_v15 = vpop.f32.mrb[79].mxu0  ;;  %v11475_v16 = vpop.f32.mrb[79].mxu1  ;;  %v3878_v17 = vsel %vm1478_vm1, %v3731_v5, -inf  ;;  %v3781_v19 = vadd.f32 %v13057_v18, %v3780_v9  ;;  %v3884_v21 = vsel %vm1478_vm1, %v3778_v12, -inf }
 0xaae   :  { %3879 = vmax.xlane.f32.xlu0 %v3878_v17 }
 0xaaf   :  { %v3881_v20 = vsel %vm1478_vm1, %v3734_v13, -inf  ;;  %v3887_v22 = vsel %vm1478_vm1, %v3781_v19, -inf }
 0xab0   :  { %3882 = vmax.xlane.f32.xlu1 %v3881_v20 }
 0xab2   :  { %3885 = vmax.xlane.f32.xlu0 %v3884_v21 }
 0xab4   :  { %3888 = vmax.xlane.f32.xlu1 %v3887_v22 }
 0xaca   :  { %v3824_v23 = vpop.f32.mrb[80].mxu0  ;;  %v3871_v24 = vpop.f32.mrb[80].mxu1 }
 0xacb   :  { %v3825_v26 = vadd.f32 %v13058_v25, %v3824_v23  ;;  %v11480_v27 = vpop.f32.mrb[81].mxu0  ;;  %v11486_v44 = vpop.f32.mrb[81].mxu1  ;;  %v3872_v29 = vadd.f32 %v13059_v28, %v3871_v24 }
 0xacc   :  { %v3827_v48 = vpop.f32.mrb[82].mxu0  ;;  %v3874_v50 = vpop.f32.mrb[82].mxu1 }
 0xacd   :  { %v3828_v31 = vadd.f32 %v13060_v30, %v3827_v48  ;;  %v11481_v32 = vpop.f32.mrb[83].mxu0  ;;  %v11487_v45 = vpop.f32.mrb[83].mxu1  ;;  %v3890_v49 = vsel %vm1478_vm1, %v3825_v26, -inf  ;;  %v3875_v33 = vadd.f32 %v13061_v51, %v3874_v50  ;;  %v3896_v35 = vsel %vm1478_vm1, %v3872_v29, -inf }
 0xace   :  { %3891 = vmax.xlane.f32.xlu0 %v3890_v49 }
 0xacf   :  { %v3893_v34 = vsel %vm1478_vm1, %v3828_v31, -inf  ;;  %v3899_v37 = vsel %vm1478_vm1, %v3875_v33, -inf }
 0xad0   :  { %3894 = vmax.xlane.f32.xlu1 %v3893_v34 }
 0xad2   :  { %3897 = vmax.xlane.f32.xlu0 %v3896_v35 }
 0xad4   :  { %3900 = vmax.xlane.f32.xlu1 %v3899_v37 }
 0xb3b   :  { %v3880_v39 = vpop.xlane.xlu0 %3879 }
 0xb3c   :  { %v3902_v40 = vsub.f32 %v3731_v5, %v3880_v39 }
 0xb3d   :  { %v3883_v41 = vpop.xlane.xlu1 %3882 }
 0xb3e   :  { %v3910_v42 = vmul.f32 1.442695, %v3902_v40  ;;  %v3903_v43 = vsub.f32 %v3734_v13, %v3883_v41 }
 0xb3f   :  { %v3886_v46 = vpop.xlane.xlu0 %3885 }
 0xb40   :  { %12966 = vpow2.f32 %v3910_v42  ;;  %v3912_v47 = vmul.f32 1.442695, %v3903_v43  ;;  %v3904_v52 = vsub.f32 %v3778_v12, %v3886_v46 }
 0xb41   :  { %v3889_v53 = vpop.xlane.xlu1 %3888 }
 0xb42   :  { %12968 = vpow2.f32 %v3912_v47  ;;  %v3914_v54 = vmul.f32 1.442695, %v3904_v52  ;;  %v3905_v55 = vsub.f32 %v3781_v19, %v3889_v53  ;;  %v12598_v52 = vld [vmem:[%s9634_s15] sm:$0xff]   ;;  %v12599_v53 = vld [vmem:[%s9634_s15 + $0x8] sm:$0xff]  }
 0xb44   :  { %12970 = vpow2.f32 %v3914_v54  ;;  %v3916_v58 = vmul.f32 1.442695, %v3905_v55 }
 0xb46   :  { %12972 = vpow2.f32 %v3916_v58 }
 0xb4a   :  { %v12967_v59 = vpop.eup %12966 }
 0xb4b   :  { %v3926_v1 = vsel %vm1478_vm1, %v12967_v59, 0.0 }
 0xb4c   :  { %v12969_v2 = vpop.eup %12968  ;;  %3927 = vadd.xlane.f32.xlu0 %v3926_v1 }
 0xb4d   :  { %v3929_v36 = vsel %vm1478_vm1, %v12969_v2, 0.0 }
 0xb4e   :  { %v12971_v3 = vpop.eup %12970  ;;  %3930 = vadd.xlane.f32.xlu1 %v3929_v36 }
 0xb4f   :  { %v3932_v4 = vsel %vm1478_vm1, %v12971_v3, 0.0 }
 0xb50   :  { %v12973_v5 = vpop.eup %12972  ;;  %3933 = vadd.xlane.f32.xlu0 %v3932_v4 }
 0xb51   :  { %v3935_v6 = vsel %vm1478_vm1, %v12973_v5, 0.0 }
 0xb52   :  { %3936 = vadd.xlane.f32.xlu1 %v3935_v6 }
 0xb5b   :  { %v3892_v7 = vpop.xlane.xlu0 %3891 }
 0xb5c   :  { %v3906_v8 = vsub.f32 %v3825_v26, %v3892_v7 }
 0xb5d   :  { %v3895_v9 = vpop.xlane.xlu1 %3894 }
 0xb5e   :  { %v3918_v10 = vmul.f32 1.442695, %v3906_v8  ;;  %v3907_v12 = vsub.f32 %v3828_v31, %v3895_v9 }
 0xb5f   :  { %v3898_v38 = vpop.xlane.xlu0 %3897 }
 0xb60   :  { %12974 = vpow2.f32 %v3918_v10  ;;  %v3920_v13 = vmul.f32 1.442695, %v3907_v12  ;;  %v3908_v15 = vsub.f32 %v3872_v29, %v3898_v38 }
 0xb61   :  { %v3901_v16 = vpop.xlane.xlu1 %3900 }
 0xb62   :  { %12976 = vpow2.f32 %v3920_v13  ;;  %v3922_v17 = vmul.f32 1.442695, %v3908_v15  ;;  %v3909_v18 = vsub.f32 %v3875_v33, %v3901_v16 }
 0xb64   :  { %12978 = vpow2.f32 %v3922_v17  ;;  %v3924_v19 = vmul.f32 1.442695, %v3909_v18 }
 0xb66   :  { %12980 = vpow2.f32 %v3924_v19  ;;  %v12602_v19 = vld [vmem:[%s13884_s19] sm:$0xff]  }
 0xb6a   :  { %v12975_v20 = vpop.eup %12974 }
 0xb6b   :  { %v3938_v21 = vsel %vm1478_vm1, %v12975_v20, 0.0 }
 0xb6c   :  { %v12977_v22 = vpop.eup %12976  ;;  %3939 = vadd.xlane.f32.xlu0 %v3938_v21  ;;  %v12604_v21 = vld [vmem:[%s13884_s19 + $0x10] sm:$0xff]  }
 0xb6d   :  { %v3941_v23 = vsel %vm1478_vm1, %v12977_v22, 0.0 }
 0xb6e   :  { %v12979_v24 = vpop.eup %12978  ;;  %3942 = vadd.xlane.f32.xlu1 %v3941_v23 }
 0xb6f   :  { %v3944_v25 = vsel %vm1478_vm1, %v12979_v24, 0.0 }
 0xb70   :  { %v12981_v26 = vpop.eup %12980  ;;  %3945 = vadd.xlane.f32.xlu0 %v3944_v25 }
 0xb71   :  { %v3947_v27 = vsel %vm1478_vm1, %v12981_v26, 0.0 }
 0xb72   :  { %3948 = vadd.xlane.f32.xlu1 %v3947_v27 }
 0xbd9   :  { %v3928_v44 = vpop.xlane.xlu0 %3927 }
 0xbda   :  { %12982 = vrcp.f32 %v3928_v44 }
 0xbdb   :  { %v3931_v48 = vpop.xlane.xlu1 %3930 }
 0xbdc   :  { %12984 = vrcp.f32 %v3931_v48 }
 0xbdd   :  { %v3934_v50 = vpop.xlane.xlu0 %3933 }
 0xbde   :  { %12986 = vrcp.f32 %v3934_v50 }
 0xbdf   :  { %v3937_v28 = vpop.xlane.xlu1 %3936 }
 0xbe0   :  { %12988 = vrcp.f32 %v3937_v28 }
 0xbe4   :  { %v12983_v29 = vpop.eup %12982 }
 0xbe5   :  { %v3951_v31 = vmul.f32 %v12983_v29, %v12967_v59  ;;  %v12600_v59 = vld [vmem:[%s9634_s15 + $0x10] sm:$0xff]  }
 0xbe6   :  { %v12985_v30 = vpop.eup %12984 }
 0xbe7   :  { %v3953_v32 = vmul.f32 %v12985_v30, %v12969_v2 }
 0xbe8   :  { %v12987_v45 = vpop.eup %12986 }
 0xbe9   :  { %v3966_v49 = vpack.c.bf16 %v3953_v32, %v3951_v31  ;;  %v3955_v33 = vmul.f32 %v12987_v45, %v12971_v3 }
 0xbea   :  { %v12989_v51 = vpop.eup %12988 }
 0xbeb   :  { %v3957_v34 = vmul.f32 %v12989_v51, %v12973_v5  ;;  %11491 = vmatmul.mubr.msk.bf16.vlgmr.msra.gmra.mrb[84].mxu0 %vm1478_vm1, %v3966_v49  ;;  %v12601_v5 = vld [vmem:[%s9634_s15 + $0x18] sm:$0xff]   ;;  %s14365_s15 = sld [smem:[%s14853_s0 + %s13089_s12]]  }
 0xbec   :  { %11501 = vmatpush3.bf16.msra.mxu0 %v3688_v62  ;;  %11502 = vmatprep.mubr.msk.bf16.mxu0 %vm13065_vm0, %v13063_v0 }
 0xbed   :  { %v3967_v35 = vpack.c.bf16 %v3957_v34, %v3955_v33  ;;  %11512 = vmatprep.subr.bf16.mxu0 %v13063_v0 }
 0xbef   :  { %11497 = vmatmul.mubr.msk.bf16.vlgmr.msra.gmra.mrb[84].mxu1 %vm1478_vm1, %v3967_v35  ;;  %v13895_v35 = vld [vmem:[%s9625_s23] sm:$0x3]  ;;  %s9650_s23 = sld [smem:[%s14853_s0 + %s13091_s20]]  }
 0xbf0   :  { %11507 = vmatpush3.bf16.msra.mxu1 %v3689_v63  ;;  %11508 = vmatprep.mubr.msk.bf16.mxu1 %vm13065_vm0, %v13063_v0 }
 0xbf1   :  { %11518 = vmatprep.subr.bf16.mxu1 %v13063_v0 }
 0xbf9   :  { %v3940_v37 = vpop.xlane.xlu0 %3939 }
 0xbfa   :  { %12990 = vrcp.f32 %v3940_v37 }
 0xbfb   :  { %v3943_v56 = vpop.xlane.xlu1 %3942 }
 0xbfc   :  { %12992 = vrcp.f32 %v3943_v56 }
 0xbfd   :  { %v3946_v60 = vpop.xlane.xlu0 %3945 }
 0xbfe   :  { %12994 = vrcp.f32 %v3946_v60 }
 0xbff   :  { %v3949_v62 = vpop.xlane.xlu1 %3948 }
 0xc00   :  { %12996 = vrcp.f32 %v3949_v62 }
 0xc04   :  { %v12991_v39 = vpop.eup %12990 }
 0xc05   :  { %v3959_v41 = vmul.f32 %v12991_v39, %v12975_v20  ;;  %v12603_v20 = vld [vmem:[%s13884_s19 + $0x8] sm:$0xff]   ;;  %v4623_v39 = vmul.f32 %v13895_v35, %v13895_v35 }
 0xc06   :  { %v12993_v40 = vpop.eup %12992 }
 0xc07   :  { %v3961_v42 = vmul.f32 %v12993_v40, %v12977_v22 }
 0xc08   :  { %v12995_v43 = vpop.eup %12994 }
 0xc09   :  { %v3968_v57 = vpack.c.bf16 %v3961_v42, %v3959_v41  ;;  %v3963_v63 = vmul.f32 %v12995_v43, %v12979_v24  ;;  %v4625_v42 = vsel %vm4624_vm2, %v4623_v39, 0.0  ;;  %v12605_v43 = vld [vmem:[%s13884_s19 + $0x18] sm:$0xff]  }
 0xc0a   :  { %v12997_v61 = vpop.eup %12996 }
 0xc0b   :  { %v3965_v46 = vmul.f32 %v12997_v61, %v12981_v26  ;;  %11503 = vmatmul.mubr.msk.bf16.vlgmr.msra.gmra.mrb[88].mxu0 %vm1478_vm1, %v3968_v57  ;;  %v12607_v57 = vld [vmem:[%s13884_s19 + $0x28] sm:$0xff]   ;;  %v12608_v61 = vld [vmem:[%s13884_s19 + $0x30] sm:$0xff]  }
 0xc0c   :  { %11514 = vmatprep.mubr.msk.bf16.mxu0 %vm13065_vm0, %v13063_v0  ;;  %11513 = vmatpush3.bf16.msra.mxu0 %v12598_v52  ;;  %v12620_v52 = vld [vmem:[%s13928_s1 + $0x10] sm:$0xff]  }
 0xc0d   :  { %v3969_v47 = vpack.c.bf16 %v3965_v46, %v3963_v63  ;;  %11524 = vmatprep.subr.bf16.mxu0 %v13063_v0  ;;  %v12609_v63 = vld [vmem:[%s13884_s19 + $0x38] sm:$0xff]   ;;  %v12618_v46 = vld [vmem:[%s13928_s1] sm:$0xff]  }
 0xc0f   :  { %11509 = vmatmul.mubr.msk.bf16.vlgmr.msra.gmra.mrb[88].mxu1 %vm1478_vm1, %v3969_v47  ;;  %v12619_v47 = vld [vmem:[%s13928_s1 + $0x8] sm:$0xff]  }
 0xc10   :  { %11520 = vmatprep.mubr.msk.bf16.mxu1 %vm13065_vm0, %v13063_v0  ;;  %11519 = vmatpush3.bf16.msra.mxu1 %v12599_v53  ;;  %v12621_v53 = vld [vmem:[%s13928_s1 + $0x18] sm:$0xff]  }
 0xc11   :  { %11530 = vmatprep.subr.bf16.mxu1 %v13063_v0 }
 0xcbe   :  { %v4007_v54 = vpop.f32.mrb[84].mxu0 }
 0xcbf   :  { %v11492_v55 = vpop.f32.mrb[85].mxu0 }
 0xcc0   :  { %v4010_v58 = vpop.f32.mrb[86].mxu0  ;;  %v12623_v55 = vld [vmem:[%s13928_s1 + $0x28] sm:$0xff]  }
 0xcc1   :  { %v4146_v1 = vpack.c.bf16 %v4010_v58, %v4007_v54  ;;  %v11493_v2 = vpop.f32.mrb[87].mxu0  ;;  %v12622_v54 = vld [vmem:[%s13928_s1 + $0x20] sm:$0xff]  }
 0xcc2   :  { %v4051_v36 = vpop.f32.mrb[84].mxu1 }
 0xcc3   :  { %v11498_v3 = vpop.f32.mrb[85].mxu1  ;;  %11515 = vmatmul.mubr.msk.bf16.vlgmr.msra.gmra.mrb[92].mxu0 %vm1478_vm1, %v4146_v1 }
 0xcc4   :  { %v4054_v4 = vpop.f32.mrb[86].mxu1  ;;  %11525 = vmatpush3.bf16.msra.mxu0 %v12600_v59  ;;  %11526 = vmatprep.mubr.msk.bf16.mxu0 %vm13065_vm0, %v13063_v0 }
 0xcc5   :  { %v4147_v6 = vpack.c.bf16 %v4054_v4, %v4051_v36  ;;  %v11499_v7 = vpop.f32.mrb[87].mxu1  ;;  %11536 = vmatprep.subr.bf16.mxu0 %v13063_v0 }
 0xcc6   :  { %v9905_v7 = vld [vmem:[%s9635_s5] ss:$0 sm:$0xff]  ;;  %s13103_s5 = smov 37  }
 0xcc7   :  { %11521 = vmatmul.mubr.msk.bf16.vlgmr.msra.gmra.mrb[92].mxu1 %vm1478_vm1, %v4147_v6  ;;  %s9659_s8 = sld [smem:[%s14853_s0 + %s13103_s5]]  }
 0xcc8   :  { %11531 = vmatpush3.bf16.msra.mxu1 %v12601_v5  ;;  %11532 = vmatprep.mubr.msk.bf16.mxu1 %vm13065_vm0, %v13063_v0 }
 0xcc9   :  { %11556 = vmatprep.subr.bf16.mxu1 %v13063_v0 }
 0xcde   :  { %v4095_v8 = vpop.f32.mrb[88].mxu0 }
 0xcdf   :  { %v11504_v9 = vpop.f32.mrb[89].mxu0 }
 0xce0   :  { %v4098_v10 = vpop.f32.mrb[90].mxu0 }
 0xce1   :  { %v4148_v12 = vpack.c.bf16 %v4098_v10, %v4095_v8  ;;  %v11505_v38 = vpop.f32.mrb[91].mxu0 }
 0xce2   :  { %v4139_v13 = vpop.f32.mrb[88].mxu1  ;;  %v12610_v38 = vld [vmem:[%s13921_s27] sm:$0xff]  }
 0xce3   :  { %v11510_v15 = vpop.f32.mrb[89].mxu1  ;;  %11527 = vmatmul.mubr.msk.bf16.vlgmr.msra.gmra.mrb[96].mxu0 %vm1478_vm1, %v4148_v12 }
 0xce4   :  { %v4142_v16 = vpop.f32.mrb[90].mxu1  ;;  %11552 = vmatprep.mubr.msk.bf16.mxu0 %vm13065_vm0, %v13063_v0  ;;  %11537 = vmatpush3.bf16.msra.mxu0 %v12602_v19  ;;  %v12613_v19 = vld [vmem:[%s13921_s27 + $0x18] sm:$0xff]  }
 0xce5   :  { %v4149_v17 = vpack.c.bf16 %v4142_v16, %v4139_v13  ;;  %v11511_v18 = vpop.f32.mrb[91].mxu1  ;;  %11538 = vmatprep.subr.bf16.mxu0 %v13063_v0  ;;  %v12611_v16 = vld [vmem:[%s13921_s27 + $0x8] sm:$0xff]  }
 0xce6   :  { %v12612_v18 = vld [vmem:[%s13921_s27 + $0x10] sm:$0xff]  }
 0xce7   :  { %11533 = vmatmul.mubr.msk.bf16.vlgmr.msra.gmra.mrb[96].mxu1 %vm1478_vm1, %v4149_v17 }
 0xce8   :  { %11572 = vmatprep.mubr.msk.bf16.mxu1 %vm13065_vm0, %v13063_v0  ;;  %11539 = vmatpush3.bf16.msra.mxu0 %v12603_v20  ;;  %v12614_v20 = vld [vmem:[%s13921_s27 + $0x20] sm:$0xff]  }
 0xce9   :  { %11540 = vmatprep.subr.bf16.mxu0 %v13063_v0  ;;  %11557 = vmatpush3.bf16.msra.mxu1 %v12618_v46 }
 0xcea   :  { %11558 = vmatprep.subr.bf16.mxu1 %v13063_v0 }
 0xcec   :  { %11541 = vmatpush3.bf16.msra.mxu0 %v12604_v21 }
 0xced   :  { %11542 = vmatprep.subr.bf16.mxu0 %v13063_v0  ;;  %11559 = vmatpush3.bf16.msra.mxu1 %v12619_v47 }
 0xcee   :  { %11560 = vmatprep.subr.bf16.mxu1 %v13063_v0 }
 0xcf0   :  { %11543 = vmatpush3.bf16.msra.mxu0 %v12605_v43 }
 0xcf1   :  { %11544 = vmatprep.subr.bf16.mxu0 %v13063_v0  ;;  %11561 = vmatpush3.bf16.msra.mxu1 %v12620_v52 }
 0xcf2   :  { %11562 = vmatprep.subr.bf16.mxu1 %v13063_v0 }
 0xcf5   :  { %11563 = vmatpush3.bf16.msra.mxu1 %v12621_v53 }
 0xcf6   :  { %11564 = vmatprep.subr.bf16.mxu1 %v13063_v0 }
 0xcf9   :  { %11565 = vmatpush3.bf16.msra.mxu1 %v12622_v54 }
 0xcfa   :  { %11566 = vmatprep.subr.bf16.mxu1 %v13063_v0 }
 0xcfd   :  { %11567 = vmatpush3.bf16.msra.mxu1 %v12623_v55 }
 0xcfe   :  { %11568 = vmatprep.subr.bf16.mxu1 %v13063_v0 }
 0xd96   :  { %v4193_v22 = vpop.f32.mrb[92].mxu0 }
 0xd97   :  { %v11516_v23 = vpop.f32.mrb[93].mxu0 }
 0xd98   :  { %v4196_v24 = vpop.f32.mrb[94].mxu0 }
 0xd99   :  { %v11517_v25 = vpop.f32.mrb[95].mxu0 }
 0xd9a   :  { %v4243_v26 = vpop.f32.mrb[92].mxu1  ;;  %v9923_v25 = vld [vmem:[%s9639_s9] ss:$0 sm:$0xff]  ;;  %s13104_s9 = smov 39  }
 0xd9b   :  { %v4350_v27 = vadd.f32 %v4243_v26, %v4193_v22  ;;  %v11522_v44 = vpop.f32.mrb[93].mxu1  ;;  %v12615_v22 = vld [vmem:[%s13921_s27 + $0x28] sm:$0xff]   ;;  %s9661_s12 = sld [smem:[%s14853_s0 + %s13104_s9]]  }
 0xd9c   :  { %v4246_v48 = vpop.f32.mrb[94].mxu1 }
 0xd9d   :  { %v4351_v50 = vadd.f32 %v4246_v48, %v4196_v24  ;;  %v11523_v28 = vpop.f32.mrb[95].mxu1  ;;  %v12616_v24 = vld [vmem:[%s13921_s27 + $0x30] sm:$0xff]  }
 0xd9e   :  { %v12624_v48 = vld [vmem:[%s13928_s1 + $0x30] sm:$0xff]  }
 0xd9f   :  { %11569 = vmatpush3.bf16.msra.mxu1 %v12624_v48  ;;  %v12652_v48 = vld [vmem:[%s13998_s17 + $0x98] sm:$0xff]  }
 0xda0   :  { %11570 = vmatprep.subr.bf16.mxu1 %v13063_v0 }
 0xdb6   :  { %v4293_v29 = vpop.f32.mrb[96].mxu0 }
 0xdb7   :  { %v4352_v30 = vadd.f32 %v4350_v27, %v4293_v29  ;;  %v11528_v31 = vpop.f32.mrb[97].mxu0  ;;  %v12617_v27 = vld [vmem:[%s13921_s27 + $0x38] sm:$0xff]   ;;  %s9651_s27 = sld [smem:[%s14853_s0 + %s13092_s24]]  }
 0xdb8   :  { %v4296_v32 = vpop.f32.mrb[98].mxu0 }
 0xdb9   :  { %v4353_v45 = vadd.f32 %v4351_v50, %v4296_v32  ;;  %v11529_v49 = vpop.f32.mrb[99].mxu0  ;;  %v12625_v50 = vld [vmem:[%s13928_s1 + $0x38] sm:$0xff]   ;;  %s9649_s1 = sld [smem:[%s14853_s0 + %s13093_s28]]  }
 0xdba   :  { %v4343_v51 = vpop.f32.mrb[96].mxu1  ;;  %11571 = vmatpush3.bf16.msra.mxu1 %v12625_v50  ;;  %v12626_v49 = vld [vmem:[%s9641_s13] sm:$0xff]   ;;  %v12653_v50 = vld [vmem:[%s13998_s17 + $0xd8] sm:$0xff]  }
 0xdbb   :  { %v4354_v33 = vadd.f32 %v4352_v30, %v4343_v51  ;;  %v11534_v34 = vpop.f32.mrb[97].mxu1  ;;  %11596 = vmatprep.subr.bf16.mxu1 %v13063_v0 }
 0xdbc   :  { %v4346_v37 = vpop.f32.mrb[98].mxu1  ;;  %v12628_v34 = vld [vmem:[%s9641_s13 + $0x10] sm:$0xff]  }
 0xdbd   :  { %v13898_v56 = vadd.f32 %v4354_v33, %v13552_v11  ;;  %v4355_v60 = vadd.f32 %v4353_v45, %v4346_v37  ;;  %v11535_v62 = vpop.f32.mrb[99].mxu1  ;;  %v12627_v33 = vld [vmem:[%s9641_s13 + $0x8] sm:$0xff]   ;;  %v12629_v37 = vld [vmem:[%s9641_s13 + $0x18] sm:$0xff]  }
 0xdbf   :  { %v13903_v40 = vadd.f32 %v4355_v60, %v13555_v14  ;;  %v4359_v41 = vmul.f32 %v13898_v56, %v13898_v56  ;;  %v12606_v14 = vld [vmem:[%s13884_s19 + $0x20] sm:$0xff]   ;;  %s9646_s19 = sld [smem:[%s14853_s0 + %s13090_s16]]  }
 0xdc0   :  { %11545 = vmatpush3.bf16.msra.mxu0 %v12606_v14 }
 0xdc1   :  { %4361 = vadd.xlane.f32.xlu0 %v4359_v41  ;;  %v4360_v11 = vmul.f32 %v13903_v40, %v13903_v40  ;;  %11546 = vmatprep.subr.bf16.mxu0 %v13063_v0 }
 0xdc3   :  { %4363 = vadd.xlane.f32.xlu1 %v4360_v11 }
 0xdc4   :  { %11547 = vmatpush3.bf16.msra.mxu0 %v12607_v57 }
 0xdc5   :  { %4626 = vadd.xlane.f32.xlu0 %v4625_v42  ;;  %11548 = vmatprep.subr.bf16.mxu0 %v13063_v0 }
 0xdc8   :  { %11549 = vmatpush3.bf16.msra.mxu0 %v12608_v61 }
 0xdc9   :  { %11550 = vmatprep.subr.bf16.mxu0 %v13063_v0 }
 0xdcc   :  { %11551 = vmatpush3.bf16.msra.mxu0 %v12609_v63 }
 0xdcd   :  { %11576 = vmatprep.subr.bf16.mxu0 %v13063_v0 }
 0xe4e   :  { %v4362_v58 = vpop.xlane.xlu0 %4361 }
 0xe4f   :  { %v4365_v59 = vmul.f32 0.015625, %v4362_v58  ;;  %v12630_v58 = vld [vmem:[%s13998_s17] sm:$0xff]  }
 0xe50   :  { %v4364_v1 = vpop.xlane.xlu1 %4363 }
 0xe51   :  { %v4367_v2 = vadd.f32 1e-06, %v4365_v59  ;;  %v4366_v36 = vmul.f32 0.015625, %v4364_v1  ;;  %v12631_v1 = vld [vmem:[%s13998_s17 + $0x40] sm:$0xff]  }
 0xe52   :  { %v4627_v12 = vpop.xlane.xlu0 %4626 }
 0xe53   :  { %12998 = vrsqrt.f32 %v4367_v2  ;;  %v4368_v3 = vadd.f32 1e-06, %v4366_v36  ;;  %v4628_v15 = vmul.f32 0.015625, %v4627_v12  ;;  %v12632_v2 = vld [vmem:[%s13998_s17 + $0x8] sm:$0xff]   ;;  %v12643_v12 = vld [vmem:[%s13998_s17 + $0x70] sm:$0xff]  }
 0xe54   :  { %v12633_v36 = vld [vmem:[%s13998_s17 + $0x48] sm:$0xff]  }
 0xe55   :  { %13000 = vrsqrt.f32 %v4368_v3  ;;  %v4629_v17 = vadd.f32 1e-06, %v4628_v15  ;;  %v12635_v3 = vld [vmem:[%s13998_s17 + $0x50] sm:$0xff]  }
 0xe57   :  { %13002 = vrsqrt.f32 %v4629_v17 }
 0xe5d   :  { %v12999_v4 = vpop.eup %12998 }
 0xe5e   :  { %v4371_v5 = vmul.f32 %v12999_v4, %v13898_v56  ;;  %v12636_v4 = vld [vmem:[%s13998_s17 + $0x18] sm:$0xff]  }
 0xe5f   :  { %v13001_v6 = vpop.eup %13000 }
 0xe60   :  { %v4372_v8 = vmul.f32 %v13001_v6, %v13903_v40  ;;  %v4379_v9 = vmul.f32 %v9905_v7, %v4371_v5  ;;  %v12637_v5 = vld [vmem:[%s13998_s17 + $0x58] sm:$0xff]   ;;  %v12638_v6 = vld [vmem:[%s13998_s17 + $0x20] sm:$0xff]  }
 0xe61   :  { %v13003_v21 = vpop.eup %13002 }
 0xe62   :  { %v4380_v10 = vmul.f32 %v9905_v7, %v4372_v8  ;;  %v4631_v23 = vmul.f32 %v13003_v21, %v13895_v35  ;;  %v12639_v7 = vld [vmem:[%s13998_s17 + $0x60] sm:$0xff]   ;;  %v12640_v8 = vld [vmem:[%s13998_s17 + $0x28] sm:$0xff]  }
 0xe64   :  { %v4381_v13 = vpack.c.bf16 %v4380_v10, %v4379_v9  ;;  %v4638_v26 = vmul.f32 %v9923_v25, %v4631_v23  ;;  %v12641_v9 = vld [vmem:[%s13998_s17 + $0x68] sm:$0xff]   ;;  %v12642_v10 = vld [vmem:[%s13998_s17 + $0x30] sm:$0xff]   ;;  %v12647_v23 = vld [vmem:[%s13998_s17 + $0xc0] sm:$0xff]  }
 0xe65   :  { %v12648_v25 = vld [vmem:[%s13998_s17 + $0x88] sm:$0xff]  }
 0xe66   :  { %11553 = vmatmul.mubr.bf16.vlgmr.msra.gmra.mrb[100].mxu0 %v4381_v13  ;;  %v4639_v44 = vpack.c.bf16 %v4638_v26, %v4638_v26  ;;  %v12645_v13 = vld [vmem:[%s13998_s17 + $0x78] sm:$0xff]   ;;  %v12649_v26 = vld [vmem:[%s13998_s17 + $0xc8] sm:$0xff]  }
 0xe67   :  { %11577 = vmatpush3.bf16.msra.mxu0 %v12610_v38  ;;  %11592 = vmatprep.mubr.msk.bf16.mxu0 %vm13065_vm0, %v13063_v0  ;;  %v12644_v38 = vld [vmem:[%s13998_s17 + $0x38] sm:$0xff]  }
 0xe68   :  { %11578 = vmatprep.subr.bf16.mxu0 %v13063_v0 }
 0xe6b   :  { %11579 = vmatpush3.bf16.msra.mxu0 %v12611_v16 }
 0xe6c   :  { %11580 = vmatprep.subr.bf16.mxu0 %v13063_v0 }
 0xe6f   :  { %11581 = vmatpush3.bf16.msra.mxu0 %v12612_v18 }
 0xe70   :  { %11582 = vmatprep.subr.bf16.mxu0 %v13063_v0 }
 0xe73   :  { %11583 = vmatpush3.bf16.msra.mxu0 %v12613_v19  ;;  %v9937_v19 = vld [vmem:[%s9642_s25] ss:$0 sm:$0xff]  ;;  %s14779_s25 = sld [smem:[%s14853_s0 + %s13099_s22]]  }
 0xe74   :  { %11584 = vmatprep.subr.bf16.mxu0 %v13063_v0 }
 0xe77   :  { %11585 = vmatpush3.bf16.msra.mxu0 %v12614_v20 }
 0xe78   :  { %11586 = vmatprep.subr.bf16.mxu0 %v13063_v0 }
 0xe7b   :  { %11587 = vmatpush3.bf16.msra.mxu0 %v12615_v22  ;;  %v12646_v22 = vld [vmem:[%s13998_s17 + $0x80] sm:$0xff]  }
 0xe7c   :  { %11588 = vmatprep.subr.bf16.mxu0 %v13063_v0 }
 0xe7f   :  { %11589 = vmatpush3.bf16.msra.mxu0 %v12616_v24 }
 0xe80   :  { %11590 = vmatprep.subr.bf16.mxu0 %v13063_v0 }
 0xe83   :  { %11591 = vmatpush3.bf16.msra.mxu0 %v12617_v27  ;;  %v12650_v27 = vld [vmem:[%s13998_s17 + $0x90] sm:$0xff]  }
 0xe84   :  { %11628 = vmatprep.subr.bf16.mxu0 %v13063_v0 }
 0xe86   :  { %11593 = vmatmul.mubr.bf16.vlgmr.msra.gmra.mrb[104].mxu0 %v4639_v44  ;;  %v12651_v44 = vld [vmem:[%s13998_s17 + $0xd0] sm:$0xff]  }
 0xe87   :  { %11644 = vmatprep.mubr.msk.bf16.mxu0 %vm13065_vm0, %v13063_v0  ;;  %11629 = vmatpush3.bf16.msra.mxu0 %v12631_v1  ;;  %v12675_v1 = vld [vmem:[%s14043_s21 + $0x70] sm:$0xff]  }
 0xe88   :  { %11630 = vmatprep.subr.bf16.mxu0 %v13063_v0 }
 0xe8b   :  { %11631 = vmatpush3.bf16.msra.mxu0 %v12633_v36 }
 0xe8c   :  { %11632 = vmatprep.subr.bf16.mxu0 %v13063_v0 }
 0xe8f   :  { %11633 = vmatpush3.bf16.msra.mxu0 %v12635_v3  ;;  %v12676_v3 = vld [vmem:[%s14043_s21 + $0x38] sm:$0xff]  }
 0xe90   :  { %11634 = vmatprep.subr.bf16.mxu0 %v13063_v0 }
 0xe93   :  { %11635 = vmatpush3.bf16.msra.mxu0 %v12637_v5 }
 0xe94   :  { %11636 = vmatprep.subr.bf16.mxu0 %v13063_v0 }
 0xe97   :  { %11637 = vmatpush3.bf16.msra.mxu0 %v12639_v7  ;;  %v12679_v7 = vld [vmem:[%s14043_s21 + $0xc0] sm:$0xff]  }
 0xe98   :  { %11638 = vmatprep.subr.bf16.mxu0 %v13063_v0 }
 0xe9b   :  { %11639 = vmatpush3.bf16.msra.mxu0 %v12641_v9  ;;  %v12681_v9 = vld [vmem:[%s14043_s21 + $0xc8] sm:$0xff]  }
 0xe9c   :  { %11640 = vmatprep.subr.bf16.mxu0 %v13063_v0 }
 0xe9f   :  { %11641 = vmatpush3.bf16.msra.mxu0 %v12643_v12  ;;  %v12683_v12 = vld [vmem:[%s14043_s21 + $0xd0] sm:$0xff]  }
 0xea0   :  { %11642 = vmatprep.subr.bf16.mxu0 %v13063_v0 }
 0xea3   :  { %11643 = vmatpush3.bf16.msra.mxu0 %v12645_v13  ;;  %v12685_v13 = vld [vmem:[%s14043_s21 + $0xd8] sm:$0xff]  }
 0xea4   :  { %11668 = vmatprep.subr.bf16.mxu0 %v13063_v0 }
 0xf39   :  { %v4480_v28 = vpop.f32.mrb[100].mxu0 }
 0xf3a   :  { %v11554_v29 = vpop.f32.mrb[101].mxu0  ;;  %v4487_v31 = vmax.f32 %v4480_v28, 0.0  ;;  %v12654_v28 = vld [vmem:[%s13998_s17 + $0xa0] sm:$0xff]  }
 0xf3b   :  { %v4483_v30 = vpop.f32.mrb[102].mxu0  ;;  %v12655_v29 = vld [vmem:[%s13998_s17 + $0xe0] sm:$0xff]  }
 0xf3c   :  { %v4488_v32 = vmax.f32 %v4483_v30, 0.0  ;;  %v11555_v45 = vpop.f32.mrb[103].mxu0  ;;  %v12656_v30 = vld [vmem:[%s13998_s17 + $0xa8] sm:$0xff]  }
 0xf3d   :  { %v12659_v45 = vld [vmem:[%s13998_s17 + $0xf0] sm:$0xff]  }
 0xf3e   :  { %v4489_v51 = vpack.c.bf16 %v4488_v32, %v4487_v31  ;;  %v12657_v31 = vld [vmem:[%s13998_s17 + $0xe8] sm:$0xff]   ;;  %v12658_v32 = vld [vmem:[%s13998_s17 + $0xb0] sm:$0xff]  }
 0xf40   :  { %11573 = vmatmul.mubr.bf16.vlgmr.msra.gmra.mrb[100].mxu1 %v4489_v51  ;;  %v12661_v51 = vld [vmem:[%s13998_s17 + $0xf8] sm:$0xff]  }
 0xf41   :  { %11597 = vmatpush3.bf16.msra.mxu1 %v12626_v49  ;;  %11604 = vmatprep.mubr.msk.bf16.mxu1 %vm13065_vm0, %v13063_v0  ;;  %v12660_v49 = vld [vmem:[%s13998_s17 + $0xb8] sm:$0xff]  }
 0xf42   :  { %11598 = vmatprep.subr.bf16.mxu1 %v13063_v0 }
 0xf45   :  { %11599 = vmatpush3.bf16.msra.mxu1 %v12627_v33  ;;  %v12662_v33 = vld [vmem:[%s14043_s21] sm:$0xff]  }
 0xf46   :  { %11600 = vmatprep.subr.bf16.mxu1 %v13063_v0 }
 0xf49   :  { %11601 = vmatpush3.bf16.msra.mxu1 %v12628_v34  ;;  %v12663_v34 = vld [vmem:[%s14043_s21 + $0x40] sm:$0xff]  }
 0xf4a   :  { %11602 = vmatprep.subr.bf16.mxu1 %v13063_v0 }
 0xf4d   :  { %11603 = vmatpush3.bf16.msra.mxu1 %v12629_v37 }
 0xf4e   :  { %11608 = vmatprep.subr.bf16.mxu1 %v13063_v0 }
 0xf59   :  { %v4738_v60 = vpop.f32.mrb[104].mxu0 }
 0xf5a   :  { %v4744_v62 = vpack.c.bf16 %v4738_v60, %v4738_v60  ;;  %v11594_v39 = vpop.f32.mrb[105].mxu0 }
 0xf5b   :  { %v4741_v41 = vpop.f32.mrb[106].mxu0  ;;  %v12664_v39 = vld [vmem:[%s14043_s21 + $0x8] sm:$0xff]  }
 0xf5c   :  { %v11595_v11 = vpop.f32.mrb[107].mxu0  ;;  %11605 = vmatmul.mubr.msk.bf16.vlgmr.msra.gmra.mrb[104].mxu1 %vm4777_vm3, %v4744_v62  ;;  %v12665_v41 = vld [vmem:[%s14043_s21 + $0x48] sm:$0xff]  }
 0xf5d   :  { %11624 = vmatprep.mubr.msk.bf16.mxu1 %vm13065_vm0, %v13063_v0  ;;  %11609 = vmatpush3.bf16.msra.mxu1 %v12630_v58 }
 0xf5e   :  { %11610 = vmatprep.subr.bf16.mxu1 %v13063_v0 }
 0xf61   :  { %11611 = vmatpush3.bf16.msra.mxu1 %v12632_v2 }
 0xf62   :  { %11612 = vmatprep.subr.bf16.mxu1 %v13063_v0 }
0x1013   :  { %v4588_v42 = vpop.f32.mrb[100].mxu1 }
0x1014   :  { %v13988_v43 = vadd.f32 %v4588_v42, %v13898_v56  ;;  %v11574_v14 = vpop.f32.mrb[101].mxu1 }
0x1015   :  { %v4591_v57 = vpop.f32.mrb[102].mxu1  ;;  %v12666_v14 = vld [vmem:[%s14043_s21 + $0x10] sm:$0xff]  }
0x1016   :  { %v11575_v61 = vpop.f32.mrb[103].mxu1  ;;  %v4598_v63 = vmul.f32 %v13988_v43, %v13988_v43 }
0x1018   :  { %4600 = vadd.xlane.f32.xlu0 %v4598_v63  ;;  %v12668_v63 = vld [vmem:[%s14043_s21 + $0x18] sm:$0xff]  }
0x102f   :  { %v4815_v46 = vpop.f32.mrb[104].mxu1 }
0x1030   :  { %v13993_v47 = vadd.f32 %v4815_v46, %v13895_v35  ;;  %v11606_v52 = vpop.f32.mrb[105].mxu1  ;;  %v14003_v35 = vadd.f32 %v4591_v57, %v13903_v40  ;;  %v12634_v40 = vld [vmem:[%s13998_s17 + $0x10] sm:$0xff]   ;;  %v12669_v46 = vld [vmem:[%s14043_s21 + $0x58] sm:$0xff]  }
0x1031   :  { %v4818_v56 = vpop.f32.mrb[106].mxu1  ;;  %11613 = vmatpush3.bf16.msra.mxu1 %v12634_v40  ;;  %v12667_v57 = vld [vmem:[%s14043_s21 + $0x50] sm:$0xff]   ;;  %v12670_v52 = vld [vmem:[%s14043_s21 + $0x20] sm:$0xff]  }
0x1032   :  { %v11607_v53 = vpop.f32.mrb[107].mxu1  ;;  %v4823_v54 = vmul.f32 %v13993_v47, %v13993_v47  ;;  %v4599_v59 = vmul.f32 %v14003_v35, %v14003_v35  ;;  %11614 = vmatprep.subr.bf16.mxu1 %v13063_v0  ;;  %v12671_v56 = vld [vmem:[%s14043_s21 + $0x60] sm:$0xff]  }
0x1033   :  { %v12672_v53 = vld [vmem:[%s14043_s21 + $0x28] sm:$0xff]   ;;  %v9922_v40 = vld [vmem:[%s9638_s29] ss:$0 sm:$0xff]  ;;  %s9656_s29 = sld [smem:[%s14853_s0 + %s13100_s26]]  }
0x1034   :  { %v4824_v55 = vsel %vm4624_vm2, %v4823_v54, 0.0  ;;  %v12673_v54 = vld [vmem:[%s14043_s21 + $0x68] sm:$0xff]  }
0x1035   :  { %4825 = vadd.xlane.f32.xlu1 %v4824_v55  ;;  %11615 = vmatpush3.bf16.msra.mxu1 %v12636_v4  ;;  %v12677_v4 = vld [vmem:[%s14043_s21 + $0x78] sm:$0xff]  }
0x1036   :  { %11616 = vmatprep.subr.bf16.mxu1 %v13063_v0 }
0x1039   :  { %4602 = vadd.xlane.f32.xlu1 %v4599_v59  ;;  %11617 = vmatpush3.bf16.msra.mxu1 %v12638_v6  ;;  %v12674_v59 = vld [vmem:[%s14043_s21 + $0x30] sm:$0xff]   ;;  %v12678_v6 = vld [vmem:[%s14043_s21 + $0x80] sm:$0xff]  }
0x103a   :  { %11618 = vmatprep.subr.bf16.mxu1 %v13063_v0 }
0x103d   :  { %11619 = vmatpush3.bf16.msra.mxu1 %v12640_v8 }
0x103e   :  { %11620 = vmatprep.subr.bf16.mxu1 %v13063_v0 }
0x1041   :  { %11621 = vmatpush3.bf16.msra.mxu1 %v12642_v10  ;;  %v12682_v10 = vld [vmem:[%s14043_s21 + $0x90] sm:$0xff]  }
0x1042   :  { %11622 = vmatprep.subr.bf16.mxu1 %v13063_v0 }
0x1045   :  { %11623 = vmatpush3.bf16.msra.mxu1 %v12644_v38  ;;  %v12684_v38 = vld [vmem:[%s14043_s21 + $0x98] sm:$0xff]  }
0x1046   :  { %11648 = vmatprep.subr.bf16.mxu1 %v13063_v0 }
0x10a5   :  { %v4601_v60 = vpop.xlane.xlu0 %4600 }
0x10a6   :  { %v4604_v11 = vmul.f32 0.015625, %v4601_v60  ;;  %v12713_v60 = vld [vmem:[%s14043_s21 + $0x1c8] sm:$0xff]  }
0x10a8   :  { %v4606_v61 = vadd.f32 1e-06, %v4604_v11  ;;  %v12717_v11 = vld [vmem:[%s14043_s21 + $0x1d8] sm:$0xff]  }
0x10c2   :  { %v4826_v15 = vpop.xlane.xlu1 %4825 }
0x10c3   :  { %v4827_v16 = vmul.f32 0.015625, %v4826_v15  ;;  %v12686_v15 = vld [vmem:[%s14043_s21 + $0xa0] sm:$0xff]  }
0x10c5   :  { %v4828_v17 = vadd.f32 1e-06, %v4827_v16  ;;  %v12687_v16 = vld [vmem:[%s14043_s21 + $0xe0] sm:$0xff]  }
0x10c6   :  { %v4603_v37 = vpop.xlane.xlu1 %4602 }
0x10c7   :  { %13004 = vrsqrt.f32 %v4828_v17  ;;  %v4605_v62 = vmul.f32 0.015625, %v4603_v37  ;;  %v12688_v17 = vld [vmem:[%s14043_s21 + $0xa8] sm:$0xff]  }
0x10c8   :  { %v12712_v37 = vld [vmem:[%s14043_s21 + $0x188] sm:$0xff]  }
0x10c9   :  { %v4607_v42 = vadd.f32 1e-06, %v4605_v62  ;;  %v12714_v62 = vld [vmem:[%s14043_s21 + $0x190] sm:$0xff]  }
0x10cb   :  { %13006 = vrsqrt.f32 %v4607_v42  ;;  %v12718_v42 = vld [vmem:[%s14043_s21 + $0x1a0] sm:$0xff]  }
0x10cc   :  { %13008 = vrsqrt.f32 %v4606_v61  ;;  %v12721_v61 = vld [vmem:[%s14043_s21 + $0x1e8] sm:$0xff]  }
0x10d1   :  { %v13005_v18 = vpop.eup %13004 }
0x10d2   :  { %v4830_v20 = vmul.f32 %v13005_v18, %v13993_v47  ;;  %v12689_v18 = vld [vmem:[%s14043_s21 + $0xe8] sm:$0xff]  }
0x10d4   :  { %v4837_v21 = vmul.f32 %v9937_v19, %v4830_v20  ;;  %v12690_v19 = vld [vmem:[%s14043_s21 + $0xb0] sm:$0xff]  }
0x10d5   :  { %v13007_v55 = vpop.eup %13006  ;;  %v12691_v20 = vld [vmem:[%s14043_s21 + $0xf0] sm:$0xff]  }
0x10d6   :  { %v4838_v24 = vpack.c.bf16 %v4837_v21, %v4837_v21  ;;  %v13009_v58 = vpop.eup %13008  ;;  %v4611_v2 = vmul.f32 %v13007_v55, %v14003_v35  ;;  %v12692_v21 = vld [vmem:[%s14043_s21 + $0xb8] sm:$0xff]  }
0x10d7   :  { %v4610_v36 = vmul.f32 %v13009_v58, %v13988_v43  ;;  %v12680_v43 = vld [vmem:[%s14043_s21 + $0x88] sm:$0xff]  }
0x10d8   :  { %11625 = vmatmul.mubr.bf16.vlgmr.msra.gmra.mrb[108].mxu1 %v4838_v24  ;;  %11645 = vmatmul.mubr.bf16.vlgmr.msra.gmra.mrb[108].mxu0 %v4838_v24  ;;  %v4619_v5 = vmul.f32 %v9922_v40, %v4611_v2 }
0x10d9   :  { %11649 = vmatpush3.bf16.msra.mxu1 %v12646_v22  ;;  %11669 = vmatpush3.bf16.msra.mxu0 %v12647_v23  ;;  %v4618_v35 = vmul.f32 %v9922_v40, %v4610_v36  ;;  %v12693_v22 = vld [vmem:[%s14043_s21 + $0xf8] sm:$0xff]   ;;  %v12694_v23 = vld [vmem:[%s14043_s21 + $0x100] sm:$0xff]  }
0x10da   :  { %11650 = vmatprep.subr.bf16.mxu1 %v13063_v0  ;;  %11670 = vmatprep.subr.bf16.mxu0 %v13063_v0 }
0x10db   :  { %11664 = vmatprep.mubr.msk.bf16.mxu1 %vm13065_vm0, %v13063_v0  ;;  %11684 = vmatprep.mubr.msk.bf16.mxu0 %vm13065_vm0, %v13063_v0  ;;  %v14126_v8 = vpack.c.bf16 %v4619_v5, %v4618_v35 }
0x10dd   :  { %11651 = vmatpush3.bf16.msra.mxu1 %v12648_v25  ;;  %11671 = vmatpush3.bf16.msra.mxu0 %v12649_v26  ;;  %v12696_v25 = vld [vmem:[%s14043_s21 + $0x108] sm:$0xff]  }
0x10de   :  { %11652 = vmatprep.subr.bf16.mxu1 %v13063_v0  ;;  %11672 = vmatprep.subr.bf16.mxu0 %v13063_v0  ;;  %v12697_v26 = vld [vmem:[%s14043_s21 + $0x148] sm:$0xff]  }
0x10e1   :  { %11653 = vmatpush3.bf16.msra.mxu1 %v12650_v27  ;;  %11673 = vmatpush3.bf16.msra.mxu0 %v12651_v44  ;;  %v12698_v27 = vld [vmem:[%s14043_s21 + $0x110] sm:$0xff]  }
0x10e2   :  { %11654 = vmatprep.subr.bf16.mxu1 %v13063_v0  ;;  %11674 = vmatprep.subr.bf16.mxu0 %v13063_v0  ;;  %v12699_v44 = vld [vmem:[%s14043_s21 + $0x150] sm:$0xff]  }
0x10e5   :  { %11655 = vmatpush3.bf16.msra.mxu1 %v12652_v48  ;;  %11675 = vmatpush3.bf16.msra.mxu0 %v12653_v50  ;;  %v12700_v48 = vld [vmem:[%s14043_s21 + $0x118] sm:$0xff]  }
0x10e6   :  { %11656 = vmatprep.subr.bf16.mxu1 %v13063_v0  ;;  %11676 = vmatprep.subr.bf16.mxu0 %v13063_v0  ;;  %v12701_v50 = vld [vmem:[%s14043_s21 + $0x158] sm:$0xff]  }
0x10e9   :  { %11657 = vmatpush3.bf16.msra.mxu1 %v12654_v28  ;;  %11677 = vmatpush3.bf16.msra.mxu0 %v12655_v29  ;;  %v12702_v28 = vld [vmem:[%s14043_s21 + $0x120] sm:$0xff]  }
0x10ea   :  { %11658 = vmatprep.subr.bf16.mxu1 %v13063_v0  ;;  %11678 = vmatprep.subr.bf16.mxu0 %v13063_v0  ;;  %v12703_v29 = vld [vmem:[%s14043_s21 + $0x160] sm:$0xff]  }
0x10ed   :  { %11659 = vmatpush3.bf16.msra.mxu1 %v12656_v30  ;;  %11679 = vmatpush3.bf16.msra.mxu0 %v12657_v31  ;;  %v12704_v30 = vld [vmem:[%s14043_s21 + $0x128] sm:$0xff]  }
0x10ee   :  { %11660 = vmatprep.subr.bf16.mxu1 %v13063_v0  ;;  %11680 = vmatprep.subr.bf16.mxu0 %v13063_v0  ;;  %v12705_v31 = vld [vmem:[%s14043_s21 + $0x168] sm:$0xff]  }
0x10f1   :  { %11661 = vmatpush3.bf16.msra.mxu1 %v12658_v32  ;;  %11681 = vmatpush3.bf16.msra.mxu0 %v12659_v45  ;;  %v12706_v32 = vld [vmem:[%s14043_s21 + $0x130] sm:$0xff]  }
0x10f2   :  { %11662 = vmatprep.subr.bf16.mxu1 %v13063_v0  ;;  %11682 = vmatprep.subr.bf16.mxu0 %v13063_v0  ;;  %v12707_v45 = vld [vmem:[%s14043_s21 + $0x170] sm:$0xff]  }
0x10f5   :  { %11663 = vmatpush3.bf16.msra.mxu1 %v12660_v49  ;;  %11683 = vmatpush3.bf16.msra.mxu0 %v12661_v51  ;;  %v12708_v49 = vld [vmem:[%s14043_s21 + $0x138] sm:$0xff]  }
0x10f6   :  { %11688 = vmatprep.subr.bf16.mxu1 %v13063_v0  ;;  %11708 = vmatprep.subr.bf16.mxu0 %v13063_v0  ;;  %v12709_v51 = vld [vmem:[%s14043_s21 + $0x178] sm:$0xff]  }
0x10f8   :  { %11665 = vmatmul.mubr.bf16.vlgmr.msra.gmra.mrb[112].mxu1 %v4838_v24  ;;  %11685 = vmatmul.mubr.bf16.vlgmr.msra.gmra.mrb[112].mxu0 %v4838_v24  ;;  %v12695_v24 = vld [vmem:[%s14043_s21 + $0x140] sm:$0xff]  }
0x10f9   :  { %11689 = vmatpush3.bf16.msra.mxu1 %v12662_v33  ;;  %11709 = vmatpush3.bf16.msra.mxu0 %v12663_v34  ;;  %v12710_v33 = vld [vmem:[%s14043_s21 + $0x180] sm:$0xff]  }
0x10fa   :  { %11690 = vmatprep.subr.bf16.mxu1 %v13063_v0  ;;  %11710 = vmatprep.subr.bf16.mxu0 %v13063_v0  ;;  %v12711_v34 = vld [vmem:[%s14043_s21 + $0x1c0] sm:$0xff]  }
0x10fb   :  { %11704 = vmatprep.mubr.msk.bf16.mxu1 %vm13065_vm0, %v13063_v0  ;;  %11724 = vmatprep.mubr.msk.bf16.mxu0 %vm13065_vm0, %v13063_v0 }
0x10fd   :  { %11691 = vmatpush3.bf16.msra.mxu1 %v12664_v39  ;;  %11711 = vmatpush3.bf16.msra.mxu0 %v12665_v41  ;;  %v12715_v39 = vld [vmem:[%s14043_s21 + $0x1d0] sm:$0xff]   ;;  %v12716_v41 = vld [vmem:[%s14043_s21 + $0x198] sm:$0xff]  }
0x10fe   :  { %11692 = vmatprep.subr.bf16.mxu1 %v13063_v0  ;;  %11712 = vmatprep.subr.bf16.mxu0 %v13063_v0 }
0x1101   :  { %11693 = vmatpush3.bf16.msra.mxu1 %v12666_v14  ;;  %11713 = vmatpush3.bf16.msra.mxu0 %v12667_v57  ;;  %v12719_v14 = vld [vmem:[%s14043_s21 + $0x1e0] sm:$0xff]   ;;  %v12720_v57 = vld [vmem:[%s14043_s21 + $0x1a8] sm:$0xff]  }
0x1102   :  { %11694 = vmatprep.subr.bf16.mxu1 %v13063_v0  ;;  %11714 = vmatprep.subr.bf16.mxu0 %v13063_v0 }
0x1105   :  { %11695 = vmatpush3.bf16.msra.mxu1 %v12668_v63  ;;  %11715 = vmatpush3.bf16.msra.mxu0 %v12669_v46  ;;  %v12722_v63 = vld [vmem:[%s14043_s21 + $0x1b0] sm:$0xff]  }
0x1106   :  { %11696 = vmatprep.subr.bf16.mxu1 %v13063_v0  ;;  %11716 = vmatprep.subr.bf16.mxu0 %v13063_v0  ;;  %v12723_v46 = vld [vmem:[%s14043_s21 + $0x1f0] sm:$0xff]  }
0x1109   :  { %11697 = vmatpush3.bf16.msra.mxu1 %v12670_v52  ;;  %11717 = vmatpush3.bf16.msra.mxu0 %v12671_v56  ;;  %v12724_v52 = vld [vmem:[%s14043_s21 + $0x1b8] sm:$0xff]  }
0x110a   :  { %11698 = vmatprep.subr.bf16.mxu1 %v13063_v0  ;;  %11718 = vmatprep.subr.bf16.mxu0 %v13063_v0  ;;  %v12725_v56 = vld [vmem:[%s14043_s21 + $0x1f8] sm:$0xff]   ;;  %s14753_s21 = sld [smem:[%s14853_s0 + %s13098_s18]]  }
0x110d   :  { %11699 = vmatpush3.bf16.msra.mxu1 %v12672_v53  ;;  %11719 = vmatpush3.bf16.msra.mxu0 %v12673_v54 }
0x110e   :  { %11700 = vmatprep.subr.bf16.mxu1 %v13063_v0  ;;  %11720 = vmatprep.subr.bf16.mxu0 %v13063_v0 }
0x1111   :  { %11701 = vmatpush3.bf16.msra.mxu1 %v12674_v59  ;;  %11721 = vmatpush3.bf16.msra.mxu0 %v12675_v1 }
0x1112   :  { %11702 = vmatprep.subr.bf16.mxu1 %v13063_v0  ;;  %11722 = vmatprep.subr.bf16.mxu0 %v13063_v0 }
0x1115   :  { %11703 = vmatpush3.bf16.msra.mxu1 %v12676_v3  ;;  %11723 = vmatpush3.bf16.msra.mxu0 %v12677_v4 }
0x1116   :  { %11728 = vmatprep.subr.bf16.mxu1 %v13063_v0  ;;  %11748 = vmatprep.subr.bf16.mxu0 %v13063_v0 }
0x1118   :  { %11705 = vmatmul.mubr.bf16.vlgmr.msra.gmra.mrb[116].mxu1 %v14126_v8  ;;  %11725 = vmatmul.mubr.bf16.vlgmr.msra.gmra.mrb[116].mxu0 %v14126_v8 }
0x1119   :  { %11729 = vmatpush3.bf16.msra.mxu1 %v12678_v6  ;;  %11749 = vmatpush3.bf16.msra.mxu0 %v12679_v7 }
0x111a   :  { %11730 = vmatprep.subr.bf16.mxu1 %v13063_v0  ;;  %11750 = vmatprep.subr.bf16.mxu0 %v13063_v0 }
0x111b   :  { %11744 = vmatprep.mubr.msk.bf16.mxu1 %vm13065_vm0, %v13063_v0  ;;  %11764 = vmatprep.mubr.msk.bf16.mxu0 %vm13065_vm0, %v13063_v0 }
0x111d   :  { %11731 = vmatpush3.bf16.msra.mxu1 %v12680_v43  ;;  %11751 = vmatpush3.bf16.msra.mxu0 %v12681_v9 }
0x111e   :  { %11732 = vmatprep.subr.bf16.mxu1 %v13063_v0  ;;  %11752 = vmatprep.subr.bf16.mxu0 %v13063_v0 }
0x1121   :  { %11733 = vmatpush3.bf16.msra.mxu1 %v12682_v10  ;;  %11753 = vmatpush3.bf16.msra.mxu0 %v12683_v12 }
0x1122   :  { %11734 = vmatprep.subr.bf16.mxu1 %v13063_v0  ;;  %11754 = vmatprep.subr.bf16.mxu0 %v13063_v0 }
0x1125   :  { %11735 = vmatpush3.bf16.msra.mxu1 %v12684_v38  ;;  %11755 = vmatpush3.bf16.msra.mxu0 %v12685_v13 }
0x1126   :  { %11736 = vmatprep.subr.bf16.mxu1 %v13063_v0  ;;  %11756 = vmatprep.subr.bf16.mxu0 %v13063_v0 }
0x1129   :  { %11737 = vmatpush3.bf16.msra.mxu1 %v12686_v15  ;;  %11757 = vmatpush3.bf16.msra.mxu0 %v12687_v16 }
0x112a   :  { %11738 = vmatprep.subr.bf16.mxu1 %v13063_v0  ;;  %11758 = vmatprep.subr.bf16.mxu0 %v13063_v0 }
0x112d   :  { %11739 = vmatpush3.bf16.msra.mxu1 %v12688_v17  ;;  %11759 = vmatpush3.bf16.msra.mxu0 %v12689_v18 }
0x112e   :  { %11740 = vmatprep.subr.bf16.mxu1 %v13063_v0  ;;  %11760 = vmatprep.subr.bf16.mxu0 %v13063_v0 }
0x1131   :  { %11741 = vmatpush3.bf16.msra.mxu1 %v12690_v19  ;;  %11761 = vmatpush3.bf16.msra.mxu0 %v12691_v20 }
0x1132   :  { %11742 = vmatprep.subr.bf16.mxu1 %v13063_v0  ;;  %11762 = vmatprep.subr.bf16.mxu0 %v13063_v0 }
0x1135   :  { %11743 = vmatpush3.bf16.msra.mxu1 %v12692_v21  ;;  %11763 = vmatpush3.bf16.msra.mxu0 %v12693_v22 }
0x1136   :  { %11768 = vmatprep.subr.bf16.mxu1 %v13063_v0  ;;  %11788 = vmatprep.subr.bf16.mxu0 %v13063_v0 }
0x1138   :  { %11745 = vmatmul.mubr.bf16.vlgmr.msra.gmra.mrb[120].mxu1 %v14126_v8  ;;  %11765 = vmatmul.mubr.bf16.vlgmr.msra.gmra.mrb[120].mxu0 %v14126_v8 }
0x1139   :  { %11769 = vmatpush3.bf16.msra.mxu1 %v12694_v23  ;;  %11789 = vmatpush3.bf16.msra.mxu0 %v12695_v24 }
0x113a   :  { %11770 = vmatprep.subr.bf16.mxu1 %v13063_v0  ;;  %11790 = vmatprep.subr.bf16.mxu0 %v13063_v0 }
0x113b   :  { %11784 = vmatprep.mubr.msk.bf16.mxu1 %vm13065_vm0, %v13063_v0  ;;  %11804 = vmatprep.mubr.msk.bf16.mxu0 %vm13065_vm0, %v13063_v0 }
0x113d   :  { %11771 = vmatpush3.bf16.msra.mxu1 %v12696_v25  ;;  %11791 = vmatpush3.bf16.msra.mxu0 %v12697_v26 }
0x113e   :  { %11772 = vmatprep.subr.bf16.mxu1 %v13063_v0  ;;  %11792 = vmatprep.subr.bf16.mxu0 %v13063_v0 }
0x1141   :  { %11773 = vmatpush3.bf16.msra.mxu1 %v12698_v27  ;;  %11793 = vmatpush3.bf16.msra.mxu0 %v12699_v44 }
0x1142   :  { %11774 = vmatprep.subr.bf16.mxu1 %v13063_v0  ;;  %11794 = vmatprep.subr.bf16.mxu0 %v13063_v0 }
0x1145   :  { %11775 = vmatpush3.bf16.msra.mxu1 %v12700_v48  ;;  %11795 = vmatpush3.bf16.msra.mxu0 %v12701_v50 }
0x1146   :  { %11776 = vmatprep.subr.bf16.mxu1 %v13063_v0  ;;  %11796 = vmatprep.subr.bf16.mxu0 %v13063_v0 }
0x1149   :  { %11777 = vmatpush3.bf16.msra.mxu1 %v12702_v28  ;;  %11797 = vmatpush3.bf16.msra.mxu0 %v12703_v29 }
0x114a   :  { %11778 = vmatprep.subr.bf16.mxu1 %v13063_v0  ;;  %11798 = vmatprep.subr.bf16.mxu0 %v13063_v0 }
0x114d   :  { %11779 = vmatpush3.bf16.msra.mxu1 %v12704_v30  ;;  %11799 = vmatpush3.bf16.msra.mxu0 %v12705_v31 }
0x114e   :  { %11780 = vmatprep.subr.bf16.mxu1 %v13063_v0  ;;  %11800 = vmatprep.subr.bf16.mxu0 %v13063_v0 }
0x1151   :  { %11781 = vmatpush3.bf16.msra.mxu1 %v12706_v32  ;;  %11801 = vmatpush3.bf16.msra.mxu0 %v12707_v45 }
0x1152   :  { %11782 = vmatprep.subr.bf16.mxu1 %v13063_v0  ;;  %11802 = vmatprep.subr.bf16.mxu0 %v13063_v0 }
0x1155   :  { %11783 = vmatpush3.bf16.msra.mxu1 %v12708_v49  ;;  %11803 = vmatpush3.bf16.msra.mxu0 %v12709_v51 }
0x1156   :  { %11808 = vmatprep.subr.bf16.mxu1 %v13063_v0  ;;  %11828 = vmatprep.subr.bf16.mxu0 %v13063_v0 }
0x1158   :  { %11785 = vmatmul.mubr.bf16.vlgmr.msra.gmra.mrb[124].mxu1 %v14126_v8  ;;  %11805 = vmatmul.mubr.bf16.vlgmr.msra.gmra.mrb[124].mxu0 %v14126_v8 }
0x1159   :  { %11809 = vmatpush3.bf16.msra.mxu1 %v12710_v33  ;;  %11829 = vmatpush3.bf16.msra.mxu0 %v12711_v34 }
0x115a   :  { %11810 = vmatprep.subr.bf16.mxu1 %v13063_v0  ;;  %11830 = vmatprep.subr.bf16.mxu0 %v13063_v0 }
0x115b   :  { %11824 = vmatprep.mubr.msk.bf16.mxu1 %vm13065_vm0, %v13063_v0  ;;  %11844 = vmatprep.mubr.msk.bf16.mxu0 %vm13065_vm0, %v13063_v0 }
0x115d   :  { %11811 = vmatpush3.bf16.msra.mxu1 %v12712_v37  ;;  %11831 = vmatpush3.bf16.msra.mxu0 %v12713_v60 }
0x115e   :  { %11812 = vmatprep.subr.bf16.mxu1 %v13063_v0  ;;  %11832 = vmatprep.subr.bf16.mxu0 %v13063_v0 }
0x1161   :  { %11813 = vmatpush3.bf16.msra.mxu1 %v12714_v62  ;;  %11833 = vmatpush3.bf16.msra.mxu0 %v12715_v39 }
0x1162   :  { %11814 = vmatprep.subr.bf16.mxu1 %v13063_v0  ;;  %11834 = vmatprep.subr.bf16.mxu0 %v13063_v0 }
0x1165   :  { %11815 = vmatpush3.bf16.msra.mxu1 %v12716_v41  ;;  %11835 = vmatpush3.bf16.msra.mxu0 %v12717_v11 }
0x1166   :  { %11816 = vmatprep.subr.bf16.mxu1 %v13063_v0  ;;  %11836 = vmatprep.subr.bf16.mxu0 %v13063_v0 }
0x1169   :  { %11817 = vmatpush3.bf16.msra.mxu1 %v12718_v42  ;;  %11837 = vmatpush3.bf16.msra.mxu0 %v12719_v14 }
0x116a   :  { %11818 = vmatprep.subr.bf16.mxu1 %v13063_v0  ;;  %11838 = vmatprep.subr.bf16.mxu0 %v13063_v0 }
0x116d   :  { %11819 = vmatpush3.bf16.msra.mxu1 %v12720_v57  ;;  %11839 = vmatpush3.bf16.msra.mxu0 %v12721_v61 }
0x116e   :  { %11820 = vmatprep.subr.bf16.mxu1 %v13063_v0  ;;  %11840 = vmatprep.subr.bf16.mxu0 %v13063_v0 }
0x1171   :  { %11821 = vmatpush3.bf16.msra.mxu1 %v12722_v63  ;;  %11841 = vmatpush3.bf16.msra.mxu0 %v12723_v46 }
0x1172   :  { %11822 = vmatprep.subr.bf16.mxu1 %v13063_v0  ;;  %11842 = vmatprep.subr.bf16.mxu0 %v13063_v0 }
0x1175   :  { %11823 = vmatpush3.bf16.msra.mxu1 %v12724_v52  ;;  %11843 = vmatpush3.bf16.msra.mxu0 %v12725_v56 }
0x1176   :  { %11848 = vmatprep.subr.bf16.mxu1 %v13063_v0  ;;  %11860 = vmatprep.subr.bf16.mxu0 %v13063_v0 }
0x1178   :  { %11825 = vmatmul.mubr.bf16.vlgmr.msra.gmra.mrb[128].mxu1 %v14126_v8  ;;  %11845 = vmatmul.mubr.bf16.vlgmr.msra.gmra.mrb[128].mxu0 %v14126_v8 }
0x1179   :  { %11850 = vmatprep.mubr.msk.bf16.mxu1 %vm13065_vm0, %v13063_v0  ;;  %11862 = vmatprep.mubr.msk.bf16.mxu0 %vm13065_vm0, %v13063_v0 }
0x11ab   :  { %v5121_v53 = vpop.f32.mrb[108].mxu1  ;;  %v5209_v54 = vpop.f32.mrb[108].mxu0 }
0x11ac   :  { %v11626_v55 = vpop.f32.mrb[109].mxu1  ;;  %v11646_v58 = vpop.f32.mrb[109].mxu0  ;;  %v5391_v21 = vpack.c.bf16 %v5121_v53, %v5121_v53  ;;  %v5392_v23 = vpack.c.bf16 %v5209_v54, %v5209_v54 }
0x11ad   :  { %v5124_v59 = vpop.f32.mrb[110].mxu1  ;;  %v5212_v1 = vpop.f32.mrb[110].mxu0  ;;  %v171_v58 = vld [vmem:[%s14285_s3] sm:$0x3] }
0x11ae   :  { %v11627_v2 = vpop.f32.mrb[111].mxu1  ;;  %v11647_v36 = vpop.f32.mrb[111].mxu0 }
0x11cb   :  { %v5297_v40 = vpop.f32.mrb[112].mxu1  ;;  %v5385_v3 = vpop.f32.mrb[112].mxu0 }
0x11cc   :  { %v11666_v4 = vpop.f32.mrb[113].mxu1  ;;  %v11686_v5 = vpop.f32.mrb[113].mxu0  ;;  %v5393_v45 = vpack.c.bf16 %v5297_v40, %v5297_v40  ;;  %v5394_v49 = vpack.c.bf16 %v5385_v3, %v5385_v3 }
0x11cd   :  { %v5300_v35 = vpop.f32.mrb[114].mxu1  ;;  %v5388_v6 = vpop.f32.mrb[114].mxu0 }
0x11ce   :  { %v11667_v7 = vpop.f32.mrb[115].mxu1  ;;  %v11687_v43 = vpop.f32.mrb[115].mxu0 }
0x11eb   :  { %v5477_v9 = vpop.f32.mrb[116].mxu1  ;;  %v5566_v10 = vpop.f32.mrb[116].mxu0 }
0x11ec   :  { %v11706_v12 = vpop.f32.mrb[117].mxu1  ;;  %v11726_v38 = vpop.f32.mrb[117].mxu0 }
0x11ed   :  { %v5480_v13 = vpop.f32.mrb[118].mxu1  ;;  %v5569_v15 = vpop.f32.mrb[118].mxu0 }
0x11ee   :  { %v6107_v16 = vpack.c.bf16 %v5480_v13, %v5477_v9  ;;  %v6108_v17 = vpack.c.bf16 %v5569_v15, %v5566_v10  ;;  %v11707_v18 = vpop.f32.mrb[119].mxu1  ;;  %v11727_v19 = vpop.f32.mrb[119].mxu0 }
0x11f0   :  { %v6119_v20 = vsel %vm1478_vm1, %v6107_v16, 0  ;;  %v6165_v22 = vsel %vm1478_vm1, %v6108_v17, 0 }
0x11f1   :  { %11849 = vmatpush3.bf16.xpose.msra.mxu1 %v6119_v20 }
0x11f2   :  { %11854 = vmatprep.subr.bf16.mxu1 %v13063_v0 }
0x11f8   :  { %11851 = vmatmul.mubr.msk.bf16.vlgmr.msra.gmra.mrb[132].mxu1 %vm1478_vm1, %v5391_v21 }
0x11f9   :  { %11855 = vmatpush3.bf16.xpose.msra.mxu1 %v6165_v22  ;;  %11856 = vmatprep.mubr.msk.bf16.mxu1 %vm13065_vm0, %v13063_v0 }
0x11fa   :  { %11866 = vmatprep.subr.bf16.mxu1 %v13063_v0 }
0x1200   :  { %11857 = vmatmul.mubr.msk.bf16.vlgmr.msra.gmra.mrb[136].mxu1 %vm1478_vm1, %v5392_v23 }
0x1201   :  { %11868 = vmatprep.mubr.msk.bf16.mxu1 %vm13065_vm0, %v13063_v0 }
0x120b   :  { %v5655_v24 = vpop.f32.mrb[120].mxu1  ;;  %v5744_v25 = vpop.f32.mrb[120].mxu0 }
0x120c   :  { %v11746_v26 = vpop.f32.mrb[121].mxu1  ;;  %v11766_v27 = vpop.f32.mrb[121].mxu0 }
0x120d   :  { %v5658_v44 = vpop.f32.mrb[122].mxu1  ;;  %v5747_v48 = vpop.f32.mrb[122].mxu0 }
0x120e   :  { %v6109_v50 = vpack.c.bf16 %v5658_v44, %v5655_v24  ;;  %v6110_v28 = vpack.c.bf16 %v5747_v48, %v5744_v25  ;;  %v11747_v29 = vpop.f32.mrb[123].mxu1  ;;  %v11767_v30 = vpop.f32.mrb[123].mxu0 }
0x1210   :  { %v6211_v31 = vsel %vm1478_vm1, %v6109_v50, 0  ;;  %v6257_v32 = vsel %vm1478_vm1, %v6110_v28, 0 }
0x1211   :  { %11861 = vmatpush3.bf16.xpose.msra.mxu0 %v6211_v31  ;;  %11867 = vmatpush3.bf16.xpose.msra.mxu1 %v6257_v32 }
0x1212   :  { %11872 = vmatprep.subr.bf16.mxu0 %v13063_v0  ;;  %11878 = vmatprep.subr.bf16.mxu1 %v13063_v0 }
0x1218   :  { %11863 = vmatmul.mubr.msk.bf16.vlgmr.msra.gmra.mrb[132].mxu0 %vm1478_vm1, %v5393_v45  ;;  %11869 = vmatmul.mubr.msk.bf16.vlgmr.msra.gmra.mrb[140].mxu1 %vm1478_vm1, %v5394_v49 }
0x1219   :  { %11874 = vmatprep.mubr.msk.bf16.mxu0 %vm13065_vm0, %v13063_v0  ;;  %11880 = vmatprep.mubr.msk.bf16.mxu1 %vm13065_vm0, %v13063_v0 }
0x122b   :  { %v5833_v51 = vpop.f32.mrb[124].mxu1  ;;  %v5922_v33 = vpop.f32.mrb[124].mxu0 }
0x122c   :  { %v11786_v34 = vpop.f32.mrb[125].mxu1  ;;  %v11806_v37 = vpop.f32.mrb[125].mxu0 }
0x122d   :  { %v5836_v60 = vpop.f32.mrb[126].mxu1  ;;  %v5925_v62 = vpop.f32.mrb[126].mxu0 }
0x122e   :  { %v6111_v39 = vpack.c.bf16 %v5836_v60, %v5833_v51  ;;  %v6112_v41 = vpack.c.bf16 %v5925_v62, %v5922_v33  ;;  %v11787_v11 = vpop.f32.mrb[127].mxu1  ;;  %v11807_v42 = vpop.f32.mrb[127].mxu0 }
0x1230   :  { %11873 = vmatpush3.bf16.msra.mxu0 %v6111_v39  ;;  %11879 = vmatpush3.bf16.msra.mxu1 %v6112_v41 }
0x1231   :  { %11884 = vmatprep.subr.bf16.mxu0 %v13063_v0  ;;  %11890 = vmatprep.subr.bf16.mxu1 %v13063_v0 }
0x124b   :  { %v14270_v14 = vpop.f32.mrb[128].mxu1  ;;  %v14272_v57 = vpop.f32.mrb[128].mxu0 }
0x124c   :  { %v11826_v61 = vpop.f32.mrb[129].mxu1  ;;  %v11846_v63 = vpop.f32.mrb[129].mxu0 }
0x124d   :  { %v14274_v46 = vpop.f32.mrb[130].mxu1  ;;  %v14276_v52 = vpop.f32.mrb[130].mxu0 }
0x124e   :  { %v6113_v56 = vpack.c.bf16 %v14274_v46, %v14270_v14  ;;  %v6114_v53 = vpack.c.bf16 %v14276_v52, %v14272_v57  ;;  %v11827_v54 = vpop.f32.mrb[131].mxu1  ;;  %v11847_v55 = vpop.f32.mrb[131].mxu0  ;;  %v12726_v57 = vld [vmem:[%s9645_s7] sm:$0xff]   ;;  %v12727_v52 = vld [vmem:[%s9645_s7 + $0x8] sm:$0xff]  }
0x12cb   :  { %v6155_v59 = vpop.f32.mrb[132].mxu1 }
0x12cc   :  { %v6156_v1 = vadd.f32 %v6155_v59, %v171_v58  ;;  %v11852_v2 = vpop.f32.mrb[133].mxu1 }
0x12cd   :  { %v6158_v36 = vpop.f32.mrb[134].mxu1  ;;  %v12728_v2 = vld [vmem:[%s9645_s7 + $0x10] sm:$0xff]  }
0x12ce   :  { %v11853_v40 = vpop.f32.mrb[135].mxu1  ;;  %v6300_v3 = vsel %vm6299_vm4, %v6156_v1, -inf }
0x12cf   :  { %6301 = vmax.xlane.f32.xlu0 %v6300_v3 }
0x12d3   :  { %v6201_v4 = vpop.f32.mrb[136].mxu1 }
0x12d4   :  { %v6202_v5 = vadd.f32 %v6201_v4, %v171_v58  ;;  %v11858_v35 = vpop.f32.mrb[137].mxu1 }
0x12d5   :  { %v6204_v6 = vpop.f32.mrb[138].mxu1  ;;  %v12729_v35 = vld [vmem:[%s9645_s7 + $0x18] sm:$0xff]   ;;  %s13095_s7 = smov 32  }
0x12d6   :  { %v11859_v7 = vpop.f32.mrb[139].mxu1  ;;  %v6303_v43 = vsel %vm6299_vm4, %v6202_v5, -inf  ;;  %s14470_s10 = sld [smem:[%s14853_s0 + %s13095_s7]]  }
0x12d7   :  { %6304 = vmax.xlane.f32.xlu1 %v6303_v43 }
0x12eb   :  { %v6247_v9 = vpop.f32.mrb[132].mxu0  ;;  %v6293_v10 = vpop.f32.mrb[140].mxu1 }
0x12ec   :  { %v6248_v12 = vadd.f32 %v6247_v9, %v171_v58  ;;  %v6294_v38 = vadd.f32 %v6293_v10, %v171_v58  ;;  %v11864_v13 = vpop.f32.mrb[133].mxu0  ;;  %v11870_v15 = vpop.f32.mrb[141].mxu1 }
0x12ed   :  { %v6250_v16 = vpop.f32.mrb[134].mxu0  ;;  %v6296_v17 = vpop.f32.mrb[142].mxu1 }
0x12ee   :  { %v11865_v18 = vpop.f32.mrb[135].mxu0  ;;  %v11871_v19 = vpop.f32.mrb[143].mxu1  ;;  %v6309_v20 = vsel %vm6299_vm4, %v6294_v38, -inf  ;;  %v6306_v21 = vsel %vm6299_vm4, %v6248_v12, -inf }
0x12ef   :  { %6310 = vmax.xlane.f32.xlu1 %v6309_v20  ;;  %6307 = vmax.xlane.f32.xlu0 %v6306_v21  ;;  %v12730_v21 = vld [vmem:[%s14338_s11] sm:$0xff]  }
0x135c   :  { %v6302_v22 = vpop.xlane.xlu0 %6301 }
0x135d   :  { %v6312_v23 = vsub.f32 %v6156_v1, %v6302_v22  ;;  %v12731_v22 = vld [vmem:[%s14338_s11 + $0x8] sm:$0xff]  }
0x135f   :  { %v6316_v24 = vmul.f32 1.442695, %v6312_v23  ;;  %v12732_v23 = vld [vmem:[%s14338_s11 + $0x10] sm:$0xff]  }
0x1361   :  { %13010 = vpow2.f32 %v6316_v24 }
0x1364   :  { %v6305_v25 = vpop.xlane.xlu1 %6304 }
0x1365   :  { %v6313_v26 = vsub.f32 %v6202_v5, %v6305_v25 }
0x1367   :  { %v6318_v27 = vmul.f32 1.442695, %v6313_v26 }
0x1369   :  { %13012 = vpow2.f32 %v6318_v27 }
0x136b   :  { %v13011_v44 = vpop.eup %13010 }
0x136c   :  { %v6324_v48 = vsel %vm6299_vm4, %v13011_v44, 0.0 }
0x136d   :  { %6325 = vadd.xlane.f32.xlu0 %v6324_v48 }
0x1373   :  { %v13013_v50 = vpop.eup %13012 }
0x1374   :  { %v6327_v28 = vsel %vm6299_vm4, %v13013_v50, 0.0 }
0x1375   :  { %6328 = vadd.xlane.f32.xlu1 %v6327_v28 }
0x137c   :  { %v6311_v29 = vpop.xlane.xlu1 %6310  ;;  %v6308_v30 = vpop.xlane.xlu0 %6307 }
0x137d   :  { %v6315_v31 = vsub.f32 %v6294_v38, %v6311_v29  ;;  %v6314_v32 = vsub.f32 %v6248_v12, %v6308_v30 }
0x137f   :  { %v6322_v45 = vmul.f32 1.442695, %v6315_v31  ;;  %v6320_v49 = vmul.f32 1.442695, %v6314_v32 }
0x1381   :  { %13014 = vpow2.f32 %v6322_v45 }
0x1382   :  { %13016 = vpow2.f32 %v6320_v49 }
0x138b   :  { %v13015_v51 = vpop.eup %13014 }
0x138c   :  { %v13017_v33 = vpop.eup %13016  ;;  %v6333_v34 = vsel %vm6299_vm4, %v13015_v51, 0.0 }
0x138d   :  { %6334 = vadd.xlane.f32.xlu1 %v6333_v34  ;;  %v6330_v37 = vsel %vm6299_vm4, %v13017_v33, 0.0 }
0x138e   :  { %6331 = vadd.xlane.f32.xlu0 %v6330_v37 }
0x13fa   :  { %v6326_v60 = vpop.xlane.xlu0 %6325 }
0x13fb   :  { %13018 = vrcp.f32 %v6326_v60 }
0x1402   :  { %v6329_v62 = vpop.xlane.xlu1 %6328 }
0x1403   :  { %13020 = vrcp.f32 %v6329_v62 }
0x1405   :  { %v13019_v39 = vpop.eup %13018 }
0x1406   :  { %v6337_v41 = vmul.f32 %v13019_v39, %v13011_v44 }
0x1408   :  { %v6344_v11 = vpack.c.bf16 %v6337_v41, %v6337_v41 }
0x140a   :  { %11875 = vmatmul.mubr.msk.bf16.vlgmr.msra.gmra.mrb[136].mxu0 %vm1478_vm1, %v6344_v11  ;;  %v12733_v11 = vld [vmem:[%s14338_s11 + $0x18] sm:$0xff]  }
0x140b   :  { %11885 = vmatpush3.bf16.msra.mxu0 %v6113_v56  ;;  %11886 = vmatprep.mubr.msk.bf16.mxu0 %vm13065_vm0, %v13063_v0 }
0x140c   :  { %11896 = vmatprep.subr.bf16.mxu0 %v13063_v0 }
0x140d   :  { %v13021_v42 = vpop.eup %13020 }
0x140e   :  { %v6339_v61 = vmul.f32 %v13021_v42, %v13013_v50  ;;  %v12734_v42 = vld [vmem:[%s14338_s11 + $0x20] sm:$0xff]  }
0x1410   :  { %v6345_v63 = vpack.c.bf16 %v6339_v61, %v6339_v61  ;;  %v12735_v61 = vld [vmem:[%s14338_s11 + $0x28] sm:$0xff]  }
0x1412   :  { %11881 = vmatmul.mubr.msk.bf16.vlgmr.msra.gmra.mrb[144].mxu1 %vm1478_vm1, %v6345_v63  ;;  %v12736_v63 = vld [vmem:[%s14338_s11 + $0x30] sm:$0xff]  }
0x1413   :  { %11891 = vmatpush3.bf16.msra.mxu1 %v6114_v53  ;;  %11892 = vmatprep.mubr.msk.bf16.mxu1 %vm13065_vm0, %v13063_v0 }
0x1414   :  { %11902 = vmatprep.subr.bf16.mxu1 %v13063_v0 }
0x141a   :  { %v6335_v14 = vpop.xlane.xlu1 %6334 }
0x141b   :  { %13022 = vrcp.f32 %v6335_v14  ;;  %v6332_v46 = vpop.xlane.xlu0 %6331  ;;  %v12738_v14 = vld [vmem:[%s14365_s15] sm:$0xff]  }
0x141c   :  { %13024 = vrcp.f32 %v6332_v46  ;;  %v12739_v46 = vld [vmem:[%s14365_s15 + $0x8] sm:$0xff]  }
0x1425   :  { %v13023_v56 = vpop.eup %13022 }
0x1426   :  { %v13025_v54 = vpop.eup %13024  ;;  %v6343_v55 = vmul.f32 %v13023_v56, %v13015_v51  ;;  %v12740_v56 = vld [vmem:[%s14365_s15 + $0x10] sm:$0xff]  }
0x1427   :  { %v6341_v58 = vmul.f32 %v13025_v54, %v13017_v33  ;;  %v12741_v54 = vld [vmem:[%s14365_s15 + $0x18] sm:$0xff]  }
0x1428   :  { %v6347_v59 = vpack.c.bf16 %v6343_v55, %v6343_v55  ;;  %v12742_v55 = vld [vmem:[%s14365_s15 + $0x20] sm:$0xff]  }
0x1429   :  { %v6346_v1 = vpack.c.bf16 %v6341_v58, %v6341_v58  ;;  %v12743_v58 = vld [vmem:[%s14365_s15 + $0x28] sm:$0xff]  }
0x142a   :  { %11893 = vmatmul.mubr.msk.bf16.vlgmr.msra.gmra.mrb[148].mxu1 %vm1478_vm1, %v6347_v59  ;;  %v12744_v59 = vld [vmem:[%s14365_s15 + $0x30] sm:$0xff]  }
0x142b   :  { %11887 = vmatmul.mubr.msk.bf16.vlgmr.msra.gmra.mrb[140].mxu0 %vm1478_vm1, %v6346_v1  ;;  %11904 = vmatprep.mubr.msk.bf16.mxu1 %vm13065_vm0, %v13063_v0 }
0x142c   :  { %11898 = vmatprep.mubr.msk.bf16.mxu0 %vm13065_vm0, %v13063_v0  ;;  %11897 = vmatpush3.bf16.msra.mxu0 %v12726_v57 }
0x142d   :  { %11908 = vmatprep.subr.bf16.mxu0 %v13063_v0  ;;  %11903 = vmatpush3.bf16.msra.mxu1 %v12727_v52 }
0x142e   :  { %11914 = vmatprep.subr.bf16.mxu1 %v13063_v0 }
0x14dd   :  { %v6385_v53 = vpop.f32.mrb[136].mxu0 }
0x14de   :  { %v6520_v36 = vpack.c.bf16 %v6385_v53, %v6385_v53  ;;  %v11876_v40 = vpop.f32.mrb[137].mxu0 }
0x14df   :  { %v6388_v3 = vpop.f32.mrb[138].mxu0 }
0x14e0   :  { %v11877_v4 = vpop.f32.mrb[139].mxu0  ;;  %11899 = vmatmul.mubr.msk.bf16.vlgmr.msra.gmra.mrb[144].mxu0 %vm1478_vm1, %v6520_v36 }
0x14e1   :  { %11909 = vmatpush3.bf16.msra.mxu0 %v12728_v2  ;;  %11910 = vmatprep.mubr.msk.bf16.mxu0 %vm13065_vm0, %v13063_v0  ;;  %v10050_v2 = vld [vmem:[%s9646_s19] ss:$0 sm:$0xff]  ;;  %v12745_v4 = vld [vmem:[%s14365_s15 + $0x38] sm:$0xff]  }
0x14e2   :  { %11920 = vmatprep.subr.bf16.mxu0 %v13063_v0 }
0x14e5   :  { %v6428_v5 = vpop.f32.mrb[144].mxu1 }
0x14e6   :  { %v6521_v6 = vpack.c.bf16 %v6428_v5, %v6428_v5  ;;  %v11882_v7 = vpop.f32.mrb[145].mxu1 }
0x14e7   :  { %v6431_v43 = vpop.f32.mrb[146].mxu1 }
0x14e8   :  { %v11883_v9 = vpop.f32.mrb[147].mxu1  ;;  %11905 = vmatmul.mubr.msk.bf16.vlgmr.msra.gmra.mrb[152].mxu1 %vm1478_vm1, %v6521_v6 }
0x14e9   :  { %11915 = vmatpush3.bf16.msra.mxu1 %v12729_v35  ;;  %11916 = vmatprep.mubr.msk.bf16.mxu1 %vm13065_vm0, %v13063_v0 }
0x14ea   :  { %11940 = vmatprep.subr.bf16.mxu1 %v13063_v0 }
0x14fd   :  { %v6514_v10 = vpop.f32.mrb[148].mxu1 }
0x14fe   :  { %v6471_v12 = vpop.f32.mrb[140].mxu0  ;;  %v6523_v38 = vpack.c.bf16 %v6514_v10, %v6514_v10  ;;  %v11894_v13 = vpop.f32.mrb[149].mxu1  ;;  %v12746_v10 = vld [vmem:[%s9650_s23] sm:$0xff]  }
0x14ff   :  { %v6522_v15 = vpack.c.bf16 %v6471_v12, %v6471_v12  ;;  %v11888_v16 = vpop.f32.mrb[141].mxu0  ;;  %v6517_v17 = vpop.f32.mrb[150].mxu1  ;;  %v12747_v12 = vld [vmem:[%s9650_s23 + $0x8] sm:$0xff]  }
0x1500   :  { %v6474_v18 = vpop.f32.mrb[142].mxu0  ;;  %v11895_v19 = vpop.f32.mrb[151].mxu1  ;;  %11917 = vmatmul.mubr.msk.bf16.vlgmr.msra.gmra.mrb[156].mxu1 %vm1478_vm1, %v6523_v38  ;;  %v12748_v38 = vld [vmem:[%s9650_s23 + $0x10] sm:$0xff]  }
0x1501   :  { %v11889_v20 = vpop.f32.mrb[143].mxu0  ;;  %11911 = vmatmul.mubr.msk.bf16.vlgmr.msra.gmra.mrb[148].mxu0 %vm1478_vm1, %v6522_v15  ;;  %11956 = vmatprep.mubr.msk.bf16.mxu1 %vm13065_vm0, %v13063_v0 }
0x1502   :  { %11936 = vmatprep.mubr.msk.bf16.mxu0 %vm13065_vm0, %v13063_v0  ;;  %11921 = vmatpush3.bf16.msra.mxu0 %v12730_v21  ;;  %v12749_v21 = vld [vmem:[%s9650_s23 + $0x18] sm:$0xff]  }
0x1503   :  { %11922 = vmatprep.subr.bf16.mxu0 %v13063_v0  ;;  %11941 = vmatpush3.bf16.msra.mxu1 %v12738_v14 }
0x1504   :  { %11942 = vmatprep.subr.bf16.mxu1 %v13063_v0 }
0x1506   :  { %11923 = vmatpush3.bf16.msra.mxu0 %v12731_v22  ;;  %v12750_v22 = vld [vmem:[%s9650_s23 + $0x20] sm:$0xff]  }
0x1507   :  { %11924 = vmatprep.subr.bf16.mxu0 %v13063_v0  ;;  %11943 = vmatpush3.bf16.msra.mxu1 %v12739_v46 }
0x1508   :  { %11944 = vmatprep.subr.bf16.mxu1 %v13063_v0 }
0x150a   :  { %11925 = vmatpush3.bf16.msra.mxu0 %v12732_v23  ;;  %v12751_v23 = vld [vmem:[%s9650_s23 + $0x28] sm:$0xff]  }
0x150b   :  { %11926 = vmatprep.subr.bf16.mxu0 %v13063_v0  ;;  %11945 = vmatpush3.bf16.msra.mxu1 %v12740_v56 }
0x150c   :  { %11946 = vmatprep.subr.bf16.mxu1 %v13063_v0 }
0x150e   :  { %11927 = vmatpush3.bf16.msra.mxu0 %v12733_v11  ;;  %v12761_v11 = vld [vmem:[%s14427_s6 + $0x48] sm:$0xff]  }
0x150f   :  { %11928 = vmatprep.subr.bf16.mxu0 %v13063_v0  ;;  %11947 = vmatpush3.bf16.msra.mxu1 %v12741_v54 }
0x1510   :  { %11948 = vmatprep.subr.bf16.mxu1 %v13063_v0 }
0x1512   :  { %11929 = vmatpush3.bf16.msra.mxu0 %v12734_v42  ;;  %v12762_v42 = vld [vmem:[%s14427_s6 + $0x10] sm:$0xff]  }
0x1513   :  { %11930 = vmatprep.subr.bf16.mxu0 %v13063_v0  ;;  %11949 = vmatpush3.bf16.msra.mxu1 %v12742_v55 }
0x1514   :  { %11950 = vmatprep.subr.bf16.mxu1 %v13063_v0 }
0x1516   :  { %11931 = vmatpush3.bf16.msra.mxu0 %v12735_v61  ;;  %v12763_v61 = vld [vmem:[%s14427_s6 + $0x50] sm:$0xff]  }
0x1517   :  { %11932 = vmatprep.subr.bf16.mxu0 %v13063_v0  ;;  %11951 = vmatpush3.bf16.msra.mxu1 %v12743_v58  ;;  %v12764_v58 = vld [vmem:[%s14427_s6 + $0x18] sm:$0xff]  }
0x1518   :  { %11952 = vmatprep.subr.bf16.mxu1 %v13063_v0 }
0x151a   :  { %11933 = vmatpush3.bf16.msra.mxu0 %v12736_v63 }
0x151b   :  { %11934 = vmatprep.subr.bf16.mxu0 %v13063_v0  ;;  %11953 = vmatpush3.bf16.msra.mxu1 %v12744_v59  ;;  %v12765_v59 = vld [vmem:[%s14427_s6 + $0x58] sm:$0xff]  }
0x151c   :  { %11954 = vmatprep.subr.bf16.mxu1 %v13063_v0 }
0x151f   :  { %11955 = vmatpush3.bf16.msra.mxu1 %v12745_v4 }
0x1520   :  { %11980 = vmatprep.subr.bf16.mxu1 %v13063_v0 }
0x15b3   :  { %v6567_v24 = vpop.f32.mrb[144].mxu0 }
0x15b4   :  { %v11900_v25 = vpop.f32.mrb[145].mxu0 }
0x15b5   :  { %v6570_v26 = vpop.f32.mrb[146].mxu0  ;;  %v12753_v25 = vld [vmem:[%s9650_s23 + $0x38] sm:$0xff]  }
0x15b6   :  { %v11901_v27 = vpop.f32.mrb[147].mxu0  ;;  %v12754_v26 = vld [vmem:[%s9651_s27] sm:$0xff]  }
0x15b7   :  { %v12755_v27 = vld [vmem:[%s9651_s27 + $0x8] sm:$0xff]  }
0x15bb   :  { %v6616_v44 = vpop.f32.mrb[152].mxu1 }
0x15bc   :  { %v6720_v48 = vadd.f32 %v6616_v44, %v6567_v24  ;;  %v11906_v50 = vpop.f32.mrb[153].mxu1  ;;  %v12752_v24 = vld [vmem:[%s9650_s23 + $0x30] sm:$0xff]  }
0x15bd   :  { %v6619_v28 = vpop.f32.mrb[154].mxu1  ;;  %v12756_v44 = vld [vmem:[%s9651_s27 + $0x10] sm:$0xff]  }
0x15be   :  { %v11907_v29 = vpop.f32.mrb[155].mxu1 }
0x15d3   :  { %v6714_v30 = vpop.f32.mrb[156].mxu1 }
0x15d4   :  { %v6665_v31 = vpop.f32.mrb[148].mxu0  ;;  %v11918_v32 = vpop.f32.mrb[157].mxu1 }
0x15d5   :  { %v6721_v45 = vadd.f32 %v6720_v48, %v6665_v31  ;;  %v11912_v49 = vpop.f32.mrb[149].mxu0  ;;  %v6717_v51 = vpop.f32.mrb[158].mxu1 }
0x15d6   :  { %v6668_v33 = vpop.f32.mrb[150].mxu0  ;;  %v11919_v34 = vpop.f32.mrb[159].mxu1  ;;  %v12757_v49 = vld [vmem:[%s9651_s27 + $0x18] sm:$0xff]  }
0x15d7   :  { %v6722_v37 = vadd.f32 %v6721_v45, %v6714_v30  ;;  %v11913_v60 = vpop.f32.mrb[151].mxu0  ;;  %v10067_v30 = vld [vmem:[%s9649_s1] ss:$0 sm:$0xff] }
0x15d9   :  { %v14347_v62 = vadd.f32 %v6722_v37, %v13993_v47  ;;  %v12737_v47 = vld [vmem:[%s14338_s11 + $0x38] sm:$0xff]   ;;  %s13096_s11 = smov 30  }
0x15da   :  { %11935 = vmatpush3.bf16.msra.mxu0 %v12737_v47  ;;  %s9652_s14 = sld [smem:[%s14853_s0 + %s13096_s11]]  }
0x15db   :  { %v6725_v39 = vmul.f32 %v14347_v62, %v14347_v62  ;;  %11960 = vmatprep.subr.bf16.mxu0 %v13063_v0 }
0x15dd   :  { %v6726_v41 = vsel %vm4624_vm2, %v6725_v39, 0.0  ;;  %v12759_v39 = vld [vmem:[%s14427_s6 + $0x40] sm:$0xff]  }
0x15de   :  { %6727 = vadd.xlane.f32.xlu0 %v6726_v41  ;;  %v12760_v41 = vld [vmem:[%s14427_s6 + $0x8] sm:$0xff]  }
0x166b   :  { %v6728_v1 = vpop.xlane.xlu0 %6727 }
0x166c   :  { %v6729_v57 = vmul.f32 0.015625, %v6728_v1  ;;  %v12766_v1 = vld [vmem:[%s14427_s6 + $0x20] sm:$0xff]  }
0x166e   :  { %v6730_v52 = vadd.f32 1e-06, %v6729_v57  ;;  %v12767_v57 = vld [vmem:[%s14427_s6 + $0x60] sm:$0xff]  }
0x1670   :  { %13026 = vrsqrt.f32 %v6730_v52  ;;  %v12768_v52 = vld [vmem:[%s14427_s6 + $0x28] sm:$0xff]  }
0x167a   :  { %v13027_v53 = vpop.eup %13026 }
0x167b   :  { %v6732_v36 = vmul.f32 %v13027_v53, %v14347_v62  ;;  %v12769_v53 = vld [vmem:[%s14427_s6 + $0x68] sm:$0xff]  }
0x167d   :  { %v6739_v40 = vmul.f32 %v10050_v2, %v6732_v36  ;;  %v12770_v2 = vld [vmem:[%s14427_s6 + $0x30] sm:$0xff]  }
0x167e   :  { %v12771_v36 = vld [vmem:[%s14427_s6 + $0x70] sm:$0xff]  }
0x167f   :  { %v6740_v3 = vpack.c.bf16 %v6739_v40, %v6739_v40  ;;  %v12772_v40 = vld [vmem:[%s14427_s6 + $0x38] sm:$0xff]  }
0x1681   :  { %11937 = vmatmul.mubr.bf16.vlgmr.msra.gmra.mrb[152].mxu0 %v6740_v3  ;;  %v12773_v3 = vld [vmem:[%s14427_s6 + $0x78] sm:$0xff]  }
0x1682   :  { %11976 = vmatprep.mubr.msk.bf16.mxu0 %vm13065_vm0, %v13063_v0  ;;  %11961 = vmatpush3.bf16.msra.mxu0 %v12746_v10  ;;  %v12774_v10 = vld [vmem:[%s14427_s6 + $0x80] sm:$0xff]  }
0x1683   :  { %11962 = vmatprep.subr.bf16.mxu0 %v13063_v0 }
0x1686   :  { %11963 = vmatpush3.bf16.msra.mxu0 %v12747_v12  ;;  %v12775_v12 = vld [vmem:[%s14427_s6 + $0xc0] sm:$0xff]  }
0x1687   :  { %11964 = vmatprep.subr.bf16.mxu0 %v13063_v0 }
0x168a   :  { %11965 = vmatpush3.bf16.msra.mxu0 %v12748_v38 }
0x168b   :  { %11966 = vmatprep.subr.bf16.mxu0 %v13063_v0 }
0x168e   :  { %11967 = vmatpush3.bf16.msra.mxu0 %v12749_v21  ;;  %v12783_v21 = vld [vmem:[%s14427_s6 + $0xe0] sm:$0xff]  }
0x168f   :  { %11968 = vmatprep.subr.bf16.mxu0 %v13063_v0 }
0x1692   :  { %11969 = vmatpush3.bf16.msra.mxu0 %v12750_v22  ;;  %v12784_v22 = vld [vmem:[%s14427_s6 + $0xa8] sm:$0xff]  }
0x1693   :  { %11970 = vmatprep.subr.bf16.mxu0 %v13063_v0 }
0x1696   :  { %11971 = vmatpush3.bf16.msra.mxu0 %v12751_v23  ;;  %v12785_v23 = vld [vmem:[%s14427_s6 + $0xe8] sm:$0xff]  }
0x1697   :  { %11972 = vmatprep.subr.bf16.mxu0 %v13063_v0 }
0x169a   :  { %11973 = vmatpush3.bf16.msra.mxu0 %v12752_v24  ;;  %v12786_v24 = vld [vmem:[%s14427_s6 + $0xb0] sm:$0xff]  }
0x169b   :  { %11974 = vmatprep.subr.bf16.mxu0 %v13063_v0 }
0x169e   :  { %11975 = vmatpush3.bf16.msra.mxu0 %v12753_v25  ;;  %v12787_v25 = vld [vmem:[%s14427_s6 + $0xf0] sm:$0xff]  }
0x169f   :  { %12012 = vmatprep.subr.bf16.mxu0 %v13063_v0 }
0x1754   :  { %v6839_v5 = vpop.f32.mrb[152].mxu0 }
0x1755   :  { %v6845_v35 = vmax.f32 %v6839_v5, 0.0  ;;  %v11938_v6 = vpop.f32.mrb[153].mxu0 }
0x1756   :  { %v6842_v7 = vpop.f32.mrb[154].mxu0 }
0x1757   :  { %v6846_v43 = vpack.c.bf16 %v6845_v35, %v6845_v35  ;;  %v11939_v9 = vpop.f32.mrb[155].mxu0  ;;  %v10081_v7 = vld [vmem:[%s9652_s14] ss:$0 sm:$0xff] }
0x1759   :  { %11957 = vmatmul.mubr.bf16.vlgmr.msra.gmra.mrb[160].mxu1 %v6846_v43 }
0x175a   :  { %11988 = vmatprep.mubr.msk.bf16.mxu1 %vm13065_vm0, %v13063_v0  ;;  %11981 = vmatpush3.bf16.msra.mxu1 %v12754_v26  ;;  %v12788_v26 = vld [vmem:[%s14427_s6 + $0xb8] sm:$0xff]  }
0x175b   :  { %11982 = vmatprep.subr.bf16.mxu1 %v13063_v0 }
0x175e   :  { %11983 = vmatpush3.bf16.msra.mxu1 %v12755_v27  ;;  %v12789_v27 = vld [vmem:[%s14427_s6 + $0xf8] sm:$0xff]  }
0x175f   :  { %11984 = vmatprep.subr.bf16.mxu1 %v13063_v0 }
0x1762   :  { %11985 = vmatpush3.bf16.msra.mxu1 %v12756_v44  ;;  %v12790_v44 = vld [vmem:[%s14470_s10] sm:$0xff]  }
0x1763   :  { %11986 = vmatprep.subr.bf16.mxu1 %v13063_v0 }
0x1766   :  { %11987 = vmatpush3.bf16.msra.mxu1 %v12757_v49  ;;  %v12799_v49 = vld [vmem:[%s14470_s10 + $0x60] sm:$0xff]  }
0x1767   :  { %11992 = vmatprep.subr.bf16.mxu1 %v13063_v0 }
0x182c   :  { %v6945_v13 = vpop.f32.mrb[160].mxu1 }
0x182d   :  { %v14398_v15 = vadd.f32 %v6945_v13, %v14347_v62  ;;  %v11958_v16 = vpop.f32.mrb[161].mxu1  ;;  %v12758_v62 = vld [vmem:[%s14427_s6] sm:$0xff]   ;;  %v12776_v13 = vld [vmem:[%s14427_s6 + $0x88] sm:$0xff]  }
0x182e   :  { %v6948_v17 = vpop.f32.mrb[162].mxu1  ;;  %v12778_v16 = vld [vmem:[%s14427_s6 + $0x90] sm:$0xff]  }
0x182f   :  { %v11959_v18 = vpop.f32.mrb[163].mxu1  ;;  %v6953_v19 = vmul.f32 %v14398_v15, %v14398_v15  ;;  %v12779_v17 = vld [vmem:[%s14427_s6 + $0xd0] sm:$0xff]  }
0x1830   :  { %v12780_v18 = vld [vmem:[%s14427_s6 + $0x98] sm:$0xff]  }
0x1831   :  { %v6954_v20 = vsel %vm4624_vm2, %v6953_v19, 0.0  ;;  %v12781_v19 = vld [vmem:[%s14427_s6 + $0xd8] sm:$0xff]  }
0x1832   :  { %6955 = vadd.xlane.f32.xlu1 %v6954_v20  ;;  %v12782_v20 = vld [vmem:[%s14427_s6 + $0xa0] sm:$0xff]  }
0x18bf   :  { %v6956_v48 = vpop.xlane.xlu1 %6955 }
0x18c0   :  { %v6957_v50 = vmul.f32 0.015625, %v6956_v48  ;;  %v12791_v48 = vld [vmem:[%s14470_s10 + $0x40] sm:$0xff]  }
0x18c2   :  { %v6958_v28 = vadd.f32 1e-06, %v6957_v50  ;;  %v12792_v50 = vld [vmem:[%s14470_s10 + $0x8] sm:$0xff]  }
0x18c4   :  { %13028 = vrsqrt.f32 %v6958_v28  ;;  %v12793_v28 = vld [vmem:[%s14470_s10 + $0x48] sm:$0xff]  }
0x18ce   :  { %v13029_v29 = vpop.eup %13028 }
0x18cf   :  { %v6960_v31 = vmul.f32 %v13029_v29, %v14398_v15  ;;  %v12794_v29 = vld [vmem:[%s14470_s10 + $0x10] sm:$0xff]  }
0x18d1   :  { %v6967_v32 = vmul.f32 %v10067_v30, %v6960_v31  ;;  %v12795_v30 = vld [vmem:[%s14470_s10 + $0x50] sm:$0xff]   ;;  %v12796_v31 = vld [vmem:[%s14470_s10 + $0x18] sm:$0xff]  }
0x18d3   :  { %v6968_v45 = vpack.c.bf16 %v6967_v32, %v6967_v32  ;;  %v12797_v32 = vld [vmem:[%s14470_s10 + $0x58] sm:$0xff]  }
0x18d5   :  { %11977 = vmatmul.mubr.bf16.vlgmr.msra.gmra.mrb[156].mxu0 %v6968_v45  ;;  %v12798_v45 = vld [vmem:[%s14470_s10 + $0x20] sm:$0xff]  }
0x18d6   :  { %12028 = vmatprep.mubr.msk.bf16.mxu0 %vm13065_vm0, %v13063_v0  ;;  %12013 = vmatpush3.bf16.msra.mxu0 %v12759_v39  ;;  %v12806_v39 = vld [vmem:[%s14470_s10 + $0x80] sm:$0xff]  }
0x18d7   :  { %12014 = vmatprep.subr.bf16.mxu0 %v13063_v0 }
0x18da   :  { %12015 = vmatpush3.bf16.msra.mxu0 %v12761_v11  ;;  %v12808_v11 = vld [vmem:[%s14470_s10 + $0x88] sm:$0xff]  }
0x18db   :  { %12016 = vmatprep.subr.bf16.mxu0 %v13063_v0 }
0x18de   :  { %12017 = vmatpush3.bf16.msra.mxu0 %v12763_v61  ;;  %v12810_v61 = vld [vmem:[%s14470_s10 + $0x90] sm:$0xff]  }
0x18df   :  { %12018 = vmatprep.subr.bf16.mxu0 %v13063_v0 }
0x18e2   :  { %12019 = vmatpush3.bf16.msra.mxu0 %v12765_v59  ;;  %v12818_v59 = vld [vmem:[%s14470_s10 + $0xb0] sm:$0xff]  }
0x18e3   :  { %12020 = vmatprep.subr.bf16.mxu0 %v13063_v0 }
0x18e6   :  { %12021 = vmatpush3.bf16.msra.mxu0 %v12767_v57  ;;  %v12820_v57 = vld [vmem:[%s14470_s10 + $0xb8] sm:$0xff]  }
0x18e7   :  { %12022 = vmatprep.subr.bf16.mxu0 %v13063_v0 }
0x18ea   :  { %12023 = vmatpush3.bf16.msra.mxu0 %v12769_v53  ;;  %v12822_v53 = vld [vmem:[%s14470_s10 + $0x100] sm:$0xff]  }
0x18eb   :  { %12024 = vmatprep.subr.bf16.mxu0 %v13063_v0 }
0x18ee   :  { %12025 = vmatpush3.bf16.msra.mxu0 %v12771_v36  ;;  %v12824_v36 = vld [vmem:[%s14470_s10 + $0x108] sm:$0xff]  }
0x18ef   :  { %12026 = vmatprep.subr.bf16.mxu0 %v13063_v0 }
0x18f2   :  { %12027 = vmatpush3.bf16.msra.mxu0 %v12773_v3  ;;  %v12826_v3 = vld [vmem:[%s14470_s10 + $0x110] sm:$0xff]  }
0x18f3   :  { %12052 = vmatprep.subr.bf16.mxu0 %v13063_v0 }
0x19a8   :  { %v7067_v51 = vpop.f32.mrb[156].mxu0 }
0x19a9   :  { %v7073_v33 = vpack.c.bf16 %v7067_v51, %v7067_v51  ;;  %v11978_v34 = vpop.f32.mrb[157].mxu0  ;;  %v12800_v51 = vld [vmem:[%s14470_s10 + $0x28] sm:$0xff]  }
0x19aa   :  { %v7070_v37 = vpop.f32.mrb[158].mxu0  ;;  %v12802_v34 = vld [vmem:[%s14470_s10 + $0x30] sm:$0xff]  }
0x19ab   :  { %v11979_v60 = vpop.f32.mrb[159].mxu0  ;;  %11989 = vmatmul.mubr.msk.bf16.vlgmr.msra.gmra.mrb[164].mxu1 %vm4777_vm3, %v7073_v33  ;;  %v12801_v33 = vld [vmem:[%s14470_s10 + $0x68] sm:$0xff]   ;;  %v12803_v37 = vld [vmem:[%s14470_s10 + $0x70] sm:$0xff]  }
0x19ac   :  { %12008 = vmatprep.mubr.msk.bf16.mxu1 %vm13065_vm0, %v13063_v0  ;;  %11993 = vmatpush3.bf16.msra.mxu1 %v12758_v62  ;;  %v12804_v60 = vld [vmem:[%s14470_s10 + $0x38] sm:$0xff]  }
0x19ad   :  { %11994 = vmatprep.subr.bf16.mxu1 %v13063_v0  ;;  %v12805_v62 = vld [vmem:[%s14470_s10 + $0x78] sm:$0xff]  }
0x19b0   :  { %11995 = vmatpush3.bf16.msra.mxu1 %v12760_v41  ;;  %v12807_v41 = vld [vmem:[%s14470_s10 + $0xc0] sm:$0xff]  }
0x19b1   :  { %11996 = vmatprep.subr.bf16.mxu1 %v13063_v0 }
0x19b4   :  { %11997 = vmatpush3.bf16.msra.mxu1 %v12762_v42  ;;  %v12809_v42 = vld [vmem:[%s14470_s10 + $0xc8] sm:$0xff]  }
0x19b5   :  { %11998 = vmatprep.subr.bf16.mxu1 %v13063_v0 }
0x19b8   :  { %11999 = vmatpush3.bf16.msra.mxu1 %v12764_v58  ;;  %v12817_v58 = vld [vmem:[%s14470_s10 + $0xe8] sm:$0xff]  }
0x19b9   :  { %12000 = vmatprep.subr.bf16.mxu1 %v13063_v0 }
0x19bc   :  { %12001 = vmatpush3.bf16.msra.mxu1 %v12766_v1  ;;  %v12819_v1 = vld [vmem:[%s14470_s10 + $0xf0] sm:$0xff]  }
0x19bd   :  { %12002 = vmatprep.subr.bf16.mxu1 %v13063_v0 }
0x19c0   :  { %12003 = vmatpush3.bf16.msra.mxu1 %v12768_v52  ;;  %v12821_v52 = vld [vmem:[%s14470_s10 + $0xf8] sm:$0xff]  }
0x19c1   :  { %12004 = vmatprep.subr.bf16.mxu1 %v13063_v0 }
0x19c4   :  { %12005 = vmatpush3.bf16.msra.mxu1 %v12770_v2  ;;  %v12823_v2 = vld [vmem:[%s14470_s10 + $0x140] sm:$0xff]  }
0x19c5   :  { %12006 = vmatprep.subr.bf16.mxu1 %v13063_v0 }
0x19c8   :  { %12007 = vmatpush3.bf16.msra.mxu1 %v12772_v40  ;;  %v12825_v40 = vld [vmem:[%s14470_s10 + $0x148] sm:$0xff]  }
0x19c9   :  { %12032 = vmatprep.subr.bf16.mxu1 %v13063_v0 }
0x1a7e   :  { %v7143_v63 = vpop.f32.mrb[164].mxu1 }
0x1a7f   :  { %v14442_v47 = vadd.f32 %v7143_v63, %v14398_v15  ;;  %v11990_v14 = vpop.f32.mrb[165].mxu1  ;;  %v12777_v15 = vld [vmem:[%s14427_s6 + $0xc8] sm:$0xff]   ;;  %v12811_v63 = vld [vmem:[%s14470_s10 + $0xd0] sm:$0xff]  }
0x1a80   :  { %v7146_v46 = vpop.f32.mrb[166].mxu1  ;;  %v12812_v14 = vld [vmem:[%s14470_s10 + $0x98] sm:$0xff]  }
0x1a81   :  { %v11991_v56 = vpop.f32.mrb[167].mxu1  ;;  %v7151_v54 = vmul.f32 %v14442_v47, %v14442_v47  ;;  %v12813_v46 = vld [vmem:[%s14470_s10 + $0xd8] sm:$0xff]  }
0x1a82   :  { %v12814_v56 = vld [vmem:[%s14470_s10 + $0xa0] sm:$0xff]  }
0x1a83   :  { %v7152_v55 = vsel %vm4624_vm2, %v7151_v54, 0.0  ;;  %v12815_v54 = vld [vmem:[%s14470_s10 + $0xe0] sm:$0xff]  }
0x1a84   :  { %7153 = vadd.xlane.f32.xlu0 %v7152_v55  ;;  %v12816_v55 = vld [vmem:[%s14470_s10 + $0xa8] sm:$0xff]  }
0x1b11   :  { %v7154_v4 = vpop.xlane.xlu0 %7153 }
0x1b12   :  { %v7155_v5 = vmul.f32 0.015625, %v7154_v4  ;;  %v12827_v4 = vld [vmem:[%s14470_s10 + $0x150] sm:$0xff]  }
0x1b14   :  { %v7156_v35 = vadd.f32 1e-06, %v7155_v5  ;;  %v12828_v5 = vld [vmem:[%s14470_s10 + $0x118] sm:$0xff]  }
0x1b16   :  { %13030 = vrsqrt.f32 %v7156_v35  ;;  %v12829_v35 = vld [vmem:[%s14470_s10 + $0x158] sm:$0xff]  }
0x1b20   :  { %v13031_v6 = vpop.eup %13030 }
0x1b21   :  { %v7158_v43 = vmul.f32 %v13031_v6, %v14442_v47  ;;  %v12830_v6 = vld [vmem:[%s14470_s10 + $0x120] sm:$0xff]  }
0x1b23   :  { %v7165_v9 = vmul.f32 %v10081_v7, %v7158_v43  ;;  %v12831_v7 = vld [vmem:[%s14470_s10 + $0x160] sm:$0xff]   ;;  %v12832_v43 = vld [vmem:[%s14470_s10 + $0x128] sm:$0xff]  }
0x1b25   :  { %v7166_v38 = vpack.c.bf16 %v7165_v9, %v7165_v9  ;;  %v12833_v9 = vld [vmem:[%s14470_s10 + $0x168] sm:$0xff]  }
0x1b27   :  { %12009 = vmatmul.mubr.bf16.vlgmr.msra.gmra.mrb[168].mxu1 %v7166_v38  ;;  %12029 = vmatmul.mubr.bf16.vlgmr.msra.gmra.mrb[160].mxu0 %v7166_v38 }
0x1b28   :  { %12033 = vmatpush3.bf16.msra.mxu1 %v12774_v10  ;;  %12053 = vmatpush3.bf16.msra.mxu0 %v12775_v12  ;;  %v12834_v10 = vld [vmem:[%s14470_s10 + $0x130] sm:$0xff]  }
0x1b29   :  { %12034 = vmatprep.subr.bf16.mxu1 %v13063_v0  ;;  %12054 = vmatprep.subr.bf16.mxu0 %v13063_v0  ;;  %v12835_v12 = vld [vmem:[%s14470_s10 + $0x170] sm:$0xff]  }
0x1b2a   :  { %12048 = vmatprep.mubr.msk.bf16.mxu1 %vm13065_vm0, %v13063_v0  ;;  %12068 = vmatprep.mubr.msk.bf16.mxu0 %vm13065_vm0, %v13063_v0 }
0x1b2c   :  { %12035 = vmatpush3.bf16.msra.mxu1 %v12776_v13  ;;  %12055 = vmatpush3.bf16.msra.mxu0 %v12777_v15  ;;  %v12837_v13 = vld [vmem:[%s14470_s10 + $0x178] sm:$0xff]   ;;  %v12838_v15 = vld [vmem:[%s14470_s10 + $0x180] sm:$0xff]  }
0x1b2d   :  { %12036 = vmatprep.subr.bf16.mxu1 %v13063_v0  ;;  %12056 = vmatprep.subr.bf16.mxu0 %v13063_v0 }
0x1b30   :  { %12037 = vmatpush3.bf16.msra.mxu1 %v12778_v16  ;;  %12057 = vmatpush3.bf16.msra.mxu0 %v12779_v17  ;;  %v12839_v16 = vld [vmem:[%s14470_s10 + $0x1c0] sm:$0xff]   ;;  %v12840_v17 = vld [vmem:[%s14470_s10 + $0x188] sm:$0xff]  }
0x1b31   :  { %12038 = vmatprep.subr.bf16.mxu1 %v13063_v0  ;;  %12058 = vmatprep.subr.bf16.mxu0 %v13063_v0 }
0x1b34   :  { %12039 = vmatpush3.bf16.msra.mxu1 %v12780_v18  ;;  %12059 = vmatpush3.bf16.msra.mxu0 %v12781_v19  ;;  %v12841_v18 = vld [vmem:[%s14470_s10 + $0x1c8] sm:$0xff]   ;;  %v12842_v19 = vld [vmem:[%s14470_s10 + $0x190] sm:$0xff]  }
0x1b35   :  { %12040 = vmatprep.subr.bf16.mxu1 %v13063_v0  ;;  %12060 = vmatprep.subr.bf16.mxu0 %v13063_v0 }
0x1b38   :  { %12041 = vmatpush3.bf16.msra.mxu1 %v12782_v20  ;;  %12061 = vmatpush3.bf16.msra.mxu0 %v12783_v21  ;;  %v12843_v20 = vld [vmem:[%s14470_s10 + $0x1d0] sm:$0xff]   ;;  %v12844_v21 = vld [vmem:[%s14470_s10 + $0x198] sm:$0xff]  }
0x1b39   :  { %12042 = vmatprep.subr.bf16.mxu1 %v13063_v0  ;;  %12062 = vmatprep.subr.bf16.mxu0 %v13063_v0 }
0x1b3c   :  { %12043 = vmatpush3.bf16.msra.mxu1 %v12784_v22  ;;  %12063 = vmatpush3.bf16.msra.mxu0 %v12785_v23  ;;  %v12845_v22 = vld [vmem:[%s14470_s10 + $0x1d8] sm:$0xff]   ;;  %v12846_v23 = vld [vmem:[%s14470_s10 + $0x1a0] sm:$0xff]  }
0x1b3d   :  { %12044 = vmatprep.subr.bf16.mxu1 %v13063_v0  ;;  %12064 = vmatprep.subr.bf16.mxu0 %v13063_v0 }
0x1b40   :  { %12045 = vmatpush3.bf16.msra.mxu1 %v12786_v24  ;;  %12065 = vmatpush3.bf16.msra.mxu0 %v12787_v25  ;;  %v12847_v24 = vld [vmem:[%s14470_s10 + $0x1e0] sm:$0xff]   ;;  %v12848_v25 = vld [vmem:[%s14470_s10 + $0x1a8] sm:$0xff]  }
0x1b41   :  { %12046 = vmatprep.subr.bf16.mxu1 %v13063_v0  ;;  %12066 = vmatprep.subr.bf16.mxu0 %v13063_v0 }
0x1b44   :  { %12047 = vmatpush3.bf16.msra.mxu1 %v12788_v26  ;;  %12067 = vmatpush3.bf16.msra.mxu0 %v12789_v27  ;;  %v12849_v26 = vld [vmem:[%s14470_s10 + $0x1e8] sm:$0xff]   ;;  %v12850_v27 = vld [vmem:[%s14470_s10 + $0x1b0] sm:$0xff]  }
0x1b45   :  { %12072 = vmatprep.subr.bf16.mxu1 %v13063_v0  ;;  %12092 = vmatprep.subr.bf16.mxu0 %v13063_v0 }
0x1b47   :  { %12049 = vmatmul.mubr.bf16.vlgmr.msra.gmra.mrb[172].mxu1 %v7166_v38  ;;  %12069 = vmatmul.mubr.bf16.vlgmr.msra.gmra.mrb[164].mxu0 %v7166_v38  ;;  %v12836_v38 = vld [vmem:[%s14470_s10 + $0x138] sm:$0xff]  }
0x1b48   :  { %12073 = vmatpush3.bf16.msra.mxu1 %v12790_v44  ;;  %12093 = vmatpush3.bf16.msra.mxu0 %v12791_v48  ;;  %v12851_v44 = vld [vmem:[%s14470_s10 + $0x1f0] sm:$0xff]   ;;  %v12852_v48 = vld [vmem:[%s14470_s10 + $0x1b8] sm:$0xff]  }
0x1b49   :  { %12074 = vmatprep.subr.bf16.mxu1 %v13063_v0  ;;  %12094 = vmatprep.subr.bf16.mxu0 %v13063_v0 }
0x1b4a   :  { %12088 = vmatprep.mubr.msk.bf16.mxu1 %vm13065_vm0, %v13063_v0  ;;  %12108 = vmatprep.mubr.msk.bf16.mxu0 %vm13065_vm0, %v13063_v0 }
0x1b4c   :  { %12075 = vmatpush3.bf16.msra.mxu1 %v12792_v50  ;;  %12095 = vmatpush3.bf16.msra.mxu0 %v12793_v28  ;;  %v12853_v50 = vld [vmem:[%s14470_s10 + $0x1f8] sm:$0xff]  }
0x1b4d   :  { %12076 = vmatprep.subr.bf16.mxu1 %v13063_v0  ;;  %12096 = vmatprep.subr.bf16.mxu0 %v13063_v0 }
0x1b50   :  { %12077 = vmatpush3.bf16.msra.mxu1 %v12794_v29  ;;  %12097 = vmatpush3.bf16.msra.mxu0 %v12795_v30 }
0x1b51   :  { %12078 = vmatprep.subr.bf16.mxu1 %v13063_v0  ;;  %12098 = vmatprep.subr.bf16.mxu0 %v13063_v0 }
0x1b54   :  { %12079 = vmatpush3.bf16.msra.mxu1 %v12796_v31  ;;  %12099 = vmatpush3.bf16.msra.mxu0 %v12797_v32 }
0x1b55   :  { %12080 = vmatprep.subr.bf16.mxu1 %v13063_v0  ;;  %12100 = vmatprep.subr.bf16.mxu0 %v13063_v0 }
0x1b58   :  { %12081 = vmatpush3.bf16.msra.mxu1 %v12798_v45  ;;  %12101 = vmatpush3.bf16.msra.mxu0 %v12799_v49 }
0x1b59   :  { %12082 = vmatprep.subr.bf16.mxu1 %v13063_v0  ;;  %12102 = vmatprep.subr.bf16.mxu0 %v13063_v0 }
0x1b5c   :  { %12083 = vmatpush3.bf16.msra.mxu1 %v12800_v51  ;;  %12103 = vmatpush3.bf16.msra.mxu0 %v12801_v33 }
0x1b5d   :  { %12084 = vmatprep.subr.bf16.mxu1 %v13063_v0  ;;  %12104 = vmatprep.subr.bf16.mxu0 %v13063_v0 }
0x1b60   :  { %12085 = vmatpush3.bf16.msra.mxu1 %v12802_v34  ;;  %12105 = vmatpush3.bf16.msra.mxu0 %v12803_v37 }
0x1b61   :  { %12086 = vmatprep.subr.bf16.mxu1 %v13063_v0  ;;  %12106 = vmatprep.subr.bf16.mxu0 %v13063_v0 }
0x1b64   :  { %12087 = vmatpush3.bf16.msra.mxu1 %v12804_v60  ;;  %12107 = vmatpush3.bf16.msra.mxu0 %v12805_v62 }
0x1b65   :  { %12112 = vmatprep.subr.bf16.mxu1 %v13063_v0  ;;  %12132 = vmatprep.subr.bf16.mxu0 %v13063_v0 }
0x1b67   :  { %12089 = vmatmul.mubr.bf16.vlgmr.msra.gmra.mrb[176].mxu1 %v14126_v8  ;;  %12109 = vmatmul.mubr.bf16.vlgmr.msra.gmra.mrb[168].mxu0 %v14126_v8 }
0x1b68   :  { %12113 = vmatpush3.bf16.msra.mxu1 %v12806_v39  ;;  %12133 = vmatpush3.bf16.msra.mxu0 %v12807_v41 }
0x1b69   :  { %12114 = vmatprep.subr.bf16.mxu1 %v13063_v0  ;;  %12134 = vmatprep.subr.bf16.mxu0 %v13063_v0 }
0x1b6a   :  { %12128 = vmatprep.mubr.msk.bf16.mxu1 %vm13065_vm0, %v13063_v0  ;;  %12148 = vmatprep.mubr.msk.bf16.mxu0 %vm13065_vm0, %v13063_v0 }
0x1b6c   :  { %12115 = vmatpush3.bf16.msra.mxu1 %v12808_v11  ;;  %12135 = vmatpush3.bf16.msra.mxu0 %v12809_v42 }
0x1b6d   :  { %12116 = vmatprep.subr.bf16.mxu1 %v13063_v0  ;;  %12136 = vmatprep.subr.bf16.mxu0 %v13063_v0 }
0x1b70   :  { %12117 = vmatpush3.bf16.msra.mxu1 %v12810_v61  ;;  %12137 = vmatpush3.bf16.msra.mxu0 %v12811_v63 }
0x1b71   :  { %12118 = vmatprep.subr.bf16.mxu1 %v13063_v0  ;;  %12138 = vmatprep.subr.bf16.mxu0 %v13063_v0 }
0x1b74   :  { %12119 = vmatpush3.bf16.msra.mxu1 %v12812_v14  ;;  %12139 = vmatpush3.bf16.msra.mxu0 %v12813_v46 }
0x1b75   :  { %12120 = vmatprep.subr.bf16.mxu1 %v13063_v0  ;;  %12140 = vmatprep.subr.bf16.mxu0 %v13063_v0 }
0x1b78   :  { %12121 = vmatpush3.bf16.msra.mxu1 %v12814_v56  ;;  %12141 = vmatpush3.bf16.msra.mxu0 %v12815_v54 }
0x1b79   :  { %12122 = vmatprep.subr.bf16.mxu1 %v13063_v0  ;;  %12142 = vmatprep.subr.bf16.mxu0 %v13063_v0 }
0x1b7c   :  { %12123 = vmatpush3.bf16.msra.mxu1 %v12816_v55  ;;  %12143 = vmatpush3.bf16.msra.mxu0 %v12817_v58 }
0x1b7d   :  { %12124 = vmatprep.subr.bf16.mxu1 %v13063_v0  ;;  %12144 = vmatprep.subr.bf16.mxu0 %v13063_v0 }
0x1b80   :  { %12125 = vmatpush3.bf16.msra.mxu1 %v12818_v59  ;;  %12145 = vmatpush3.bf16.msra.mxu0 %v12819_v1 }
0x1b81   :  { %12126 = vmatprep.subr.bf16.mxu1 %v13063_v0  ;;  %12146 = vmatprep.subr.bf16.mxu0 %v13063_v0 }
0x1b84   :  { %12127 = vmatpush3.bf16.msra.mxu1 %v12820_v57  ;;  %12147 = vmatpush3.bf16.msra.mxu0 %v12821_v52 }
0x1b85   :  { %12152 = vmatprep.subr.bf16.mxu1 %v13063_v0  ;;  %12172 = vmatprep.subr.bf16.mxu0 %v13063_v0 }
0x1b87   :  { %12129 = vmatmul.mubr.bf16.vlgmr.msra.gmra.mrb[180].mxu1 %v14126_v8  ;;  %12149 = vmatmul.mubr.bf16.vlgmr.msra.gmra.mrb[172].mxu0 %v14126_v8 }
0x1b88   :  { %12153 = vmatpush3.bf16.msra.mxu1 %v12822_v53  ;;  %12173 = vmatpush3.bf16.msra.mxu0 %v12823_v2 }
0x1b89   :  { %12154 = vmatprep.subr.bf16.mxu1 %v13063_v0  ;;  %12174 = vmatprep.subr.bf16.mxu0 %v13063_v0 }
0x1b8a   :  { %12168 = vmatprep.mubr.msk.bf16.mxu1 %vm13065_vm0, %v13063_v0  ;;  %12188 = vmatprep.mubr.msk.bf16.mxu0 %vm13065_vm0, %v13063_v0 }
0x1b8c   :  { %12155 = vmatpush3.bf16.msra.mxu1 %v12824_v36  ;;  %12175 = vmatpush3.bf16.msra.mxu0 %v12825_v40 }
0x1b8d   :  { %12156 = vmatprep.subr.bf16.mxu1 %v13063_v0  ;;  %12176 = vmatprep.subr.bf16.mxu0 %v13063_v0 }
0x1b90   :  { %12157 = vmatpush3.bf16.msra.mxu1 %v12826_v3  ;;  %12177 = vmatpush3.bf16.msra.mxu0 %v12827_v4 }
0x1b91   :  { %12158 = vmatprep.subr.bf16.mxu1 %v13063_v0  ;;  %12178 = vmatprep.subr.bf16.mxu0 %v13063_v0 }
0x1b94   :  { %12159 = vmatpush3.bf16.msra.mxu1 %v12828_v5  ;;  %12179 = vmatpush3.bf16.msra.mxu0 %v12829_v35 }
0x1b95   :  { %12160 = vmatprep.subr.bf16.mxu1 %v13063_v0  ;;  %12180 = vmatprep.subr.bf16.mxu0 %v13063_v0 }
0x1b98   :  { %12161 = vmatpush3.bf16.msra.mxu1 %v12830_v6  ;;  %12181 = vmatpush3.bf16.msra.mxu0 %v12831_v7 }
0x1b99   :  { %12162 = vmatprep.subr.bf16.mxu1 %v13063_v0  ;;  %12182 = vmatprep.subr.bf16.mxu0 %v13063_v0 }
0x1b9c   :  { %12163 = vmatpush3.bf16.msra.mxu1 %v12832_v43  ;;  %12183 = vmatpush3.bf16.msra.mxu0 %v12833_v9 }
0x1b9d   :  { %12164 = vmatprep.subr.bf16.mxu1 %v13063_v0  ;;  %12184 = vmatprep.subr.bf16.mxu0 %v13063_v0 }
0x1ba0   :  { %12165 = vmatpush3.bf16.msra.mxu1 %v12834_v10  ;;  %12185 = vmatpush3.bf16.msra.mxu0 %v12835_v12 }
0x1ba1   :  { %12166 = vmatprep.subr.bf16.mxu1 %v13063_v0  ;;  %12186 = vmatprep.subr.bf16.mxu0 %v13063_v0 }
0x1ba4   :  { %12167 = vmatpush3.bf16.msra.mxu1 %v12836_v38  ;;  %12187 = vmatpush3.bf16.msra.mxu0 %v12837_v13 }
0x1ba5   :  { %12192 = vmatprep.subr.bf16.mxu1 %v13063_v0  ;;  %12212 = vmatprep.subr.bf16.mxu0 %v13063_v0 }
0x1ba7   :  { %12169 = vmatmul.mubr.bf16.vlgmr.msra.gmra.mrb[184].mxu1 %v14126_v8  ;;  %12189 = vmatmul.mubr.bf16.vlgmr.msra.gmra.mrb[176].mxu0 %v14126_v8 }
0x1ba8   :  { %12193 = vmatpush3.bf16.msra.mxu1 %v12838_v15  ;;  %12213 = vmatpush3.bf16.msra.mxu0 %v12839_v16 }
0x1ba9   :  { %12194 = vmatprep.subr.bf16.mxu1 %v13063_v0  ;;  %12214 = vmatprep.subr.bf16.mxu0 %v13063_v0 }
0x1baa   :  { %12208 = vmatprep.mubr.msk.bf16.mxu1 %vm13065_vm0, %v13063_v0  ;;  %12228 = vmatprep.mubr.msk.bf16.mxu0 %vm13065_vm0, %v13063_v0 }
0x1bac   :  { %12195 = vmatpush3.bf16.msra.mxu1 %v12840_v17  ;;  %12215 = vmatpush3.bf16.msra.mxu0 %v12841_v18 }
0x1bad   :  { %12196 = vmatprep.subr.bf16.mxu1 %v13063_v0  ;;  %12216 = vmatprep.subr.bf16.mxu0 %v13063_v0 }
0x1bb0   :  { %12197 = vmatpush3.bf16.msra.mxu1 %v12842_v19  ;;  %12217 = vmatpush3.bf16.msra.mxu0 %v12843_v20 }
0x1bb1   :  { %12198 = vmatprep.subr.bf16.mxu1 %v13063_v0  ;;  %12218 = vmatprep.subr.bf16.mxu0 %v13063_v0 }
0x1bb4   :  { %12199 = vmatpush3.bf16.msra.mxu1 %v12844_v21  ;;  %12219 = vmatpush3.bf16.msra.mxu0 %v12845_v22 }
0x1bb5   :  { %12200 = vmatprep.subr.bf16.mxu1 %v13063_v0  ;;  %12220 = vmatprep.subr.bf16.mxu0 %v13063_v0 }
0x1bb8   :  { %12201 = vmatpush3.bf16.msra.mxu1 %v12846_v23  ;;  %12221 = vmatpush3.bf16.msra.mxu0 %v12847_v24 }
0x1bb9   :  { %12202 = vmatprep.subr.bf16.mxu1 %v13063_v0  ;;  %12222 = vmatprep.subr.bf16.mxu0 %v13063_v0 }
0x1bbc   :  { %12203 = vmatpush3.bf16.msra.mxu1 %v12848_v25  ;;  %12223 = vmatpush3.bf16.msra.mxu0 %v12849_v26 }
0x1bbd   :  { %12204 = vmatprep.subr.bf16.mxu1 %v13063_v0  ;;  %12224 = vmatprep.subr.bf16.mxu0 %v13063_v0 }
0x1bc0   :  { %12205 = vmatpush3.bf16.msra.mxu1 %v12850_v27  ;;  %12225 = vmatpush3.bf16.msra.mxu0 %v12851_v44 }
0x1bc1   :  { %12206 = vmatprep.subr.bf16.mxu1 %v13063_v0  ;;  %12226 = vmatprep.subr.bf16.mxu0 %v13063_v0 }
0x1bc4   :  { %12207 = vmatpush3.bf16.msra.mxu1 %v12852_v48  ;;  %12227 = vmatpush3.bf16.msra.mxu0 %v12853_v50 }
0x1bc5   :  { %12232 = vmatprep.subr.bf16.mxu1 %v13063_v0  ;;  %12244 = vmatprep.subr.bf16.mxu0 %v13063_v0 }
0x1bc7   :  { %12209 = vmatmul.mubr.bf16.vlgmr.msra.gmra.mrb[188].mxu1 %v14126_v8  ;;  %12229 = vmatmul.mubr.bf16.vlgmr.msra.gmra.mrb[180].mxu0 %v14126_v8 }
0x1bc8   :  { %12234 = vmatprep.mubr.msk.bf16.mxu1 %vm13065_vm0, %v13063_v0  ;;  %12246 = vmatprep.mubr.msk.bf16.mxu0 %vm13065_vm0, %v13063_v0 }
0x1bfa   :  { %v7449_v28 = vpop.f32.mrb[168].mxu1  ;;  %v7537_v29 = vpop.f32.mrb[160].mxu0 }
0x1bfb   :  { %v12010_v30 = vpop.f32.mrb[169].mxu1  ;;  %v12030_v31 = vpop.f32.mrb[161].mxu0  ;;  %v7719_v1 = vpack.c.bf16 %v7449_v28, %v7449_v28  ;;  %v7720_v52 = vpack.c.bf16 %v7537_v29, %v7537_v29 }
0x1bfc   :  { %v7452_v32 = vpop.f32.mrb[170].mxu1  ;;  %v7540_v45 = vpop.f32.mrb[162].mxu0  ;;  %v13062_v31 = vld [vmem:[%s14285_s3] sm:$0x3]  ;;  %s13097_s3 = smov 33  }
0x1bfd   :  { %v12011_v49 = vpop.f32.mrb[171].mxu1  ;;  %v12031_v51 = vpop.f32.mrb[163].mxu0  ;;  %s9655_s17 = sld [smem:[%s14853_s0 + %s13097_s3]]  }
0x1c1a   :  { %v7625_v33 = vpop.f32.mrb[172].mxu1  ;;  %v7713_v34 = vpop.f32.mrb[164].mxu0 }
0x1c1b   :  { %v12050_v37 = vpop.f32.mrb[173].mxu1  ;;  %v12070_v60 = vpop.f32.mrb[165].mxu0  ;;  %v7721_v10 = vpack.c.bf16 %v7625_v33, %v7625_v33  ;;  %v7722_v12 = vpack.c.bf16 %v7713_v34, %v7713_v34 }
0x1c1c   :  { %v7628_v62 = vpop.f32.mrb[174].mxu1  ;;  %v7716_v8 = vpop.f32.mrb[166].mxu0 }
0x1c1d   :  { %v12051_v39 = vpop.f32.mrb[175].mxu1  ;;  %v12071_v41 = vpop.f32.mrb[167].mxu0 }
0x1c3a   :  { %v7805_v11 = vpop.f32.mrb[176].mxu1  ;;  %v7894_v42 = vpop.f32.mrb[168].mxu0 }
0x1c3b   :  { %v12090_v61 = vpop.f32.mrb[177].mxu1  ;;  %v12110_v63 = vpop.f32.mrb[169].mxu0 }
0x1c3c   :  { %v7808_v14 = vpop.f32.mrb[178].mxu1  ;;  %v7897_v46 = vpop.f32.mrb[170].mxu0 }
0x1c3d   :  { %v8435_v56 = vpack.c.bf16 %v7808_v14, %v7805_v11  ;;  %v8436_v54 = vpack.c.bf16 %v7897_v46, %v7894_v42  ;;  %v12091_v55 = vpop.f32.mrb[179].mxu1  ;;  %v12111_v58 = vpop.f32.mrb[171].mxu0 }
0x1c3f   :  { %v8447_v59 = vsel %vm1478_vm1, %v8435_v56, 0  ;;  %v8493_v57 = vsel %vm1478_vm1, %v8436_v54, 0 }
0x1c40   :  { %12233 = vmatpush3.bf16.xpose.msra.mxu1 %v8447_v59 }
0x1c41   :  { %12238 = vmatprep.subr.bf16.mxu1 %v13063_v0 }
0x1c47   :  { %12235 = vmatmul.mubr.msk.bf16.vlgmr.msra.gmra.mrb[192].mxu1 %vm1478_vm1, %v7719_v1 }
0x1c48   :  { %12239 = vmatpush3.bf16.xpose.msra.mxu1 %v8493_v57  ;;  %12240 = vmatprep.mubr.msk.bf16.mxu1 %vm13065_vm0, %v13063_v0 }
0x1c49   :  { %12250 = vmatprep.subr.bf16.mxu1 %v13063_v0 }
0x1c4f   :  { %12241 = vmatmul.mubr.msk.bf16.vlgmr.msra.gmra.mrb[196].mxu1 %vm1478_vm1, %v7720_v52 }
0x1c50   :  { %12252 = vmatprep.mubr.msk.bf16.mxu1 %vm13065_vm0, %v13063_v0 }
0x1c5a   :  { %v7983_v53 = vpop.f32.mrb[180].mxu1  ;;  %v8072_v2 = vpop.f32.mrb[172].mxu0 }
0x1c5b   :  { %v12130_v36 = vpop.f32.mrb[181].mxu1  ;;  %v12150_v40 = vpop.f32.mrb[173].mxu0 }
0x1c5c   :  { %v7986_v3 = vpop.f32.mrb[182].mxu1  ;;  %v8075_v4 = vpop.f32.mrb[174].mxu0 }
0x1c5d   :  { %v8437_v5 = vpack.c.bf16 %v7986_v3, %v7983_v53  ;;  %v8438_v35 = vpack.c.bf16 %v8075_v4, %v8072_v2  ;;  %v12131_v6 = vpop.f32.mrb[183].mxu1  ;;  %v12151_v7 = vpop.f32.mrb[175].mxu0 }
0x1c5f   :  { %v8539_v43 = vsel %vm1478_vm1, %v8437_v5, 0  ;;  %v8585_v9 = vsel %vm1478_vm1, %v8438_v35, 0 }
0x1c60   :  { %12245 = vmatpush3.bf16.xpose.msra.mxu0 %v8539_v43  ;;  %12251 = vmatpush3.bf16.xpose.msra.mxu1 %v8585_v9 }
0x1c61   :  { %12256 = vmatprep.subr.bf16.mxu0 %v13063_v0  ;;  %12262 = vmatprep.subr.bf16.mxu1 %v13063_v0 }
0x1c67   :  { %12247 = vmatmul.mubr.msk.bf16.vlgmr.msra.gmra.mrb[184].mxu0 %vm1478_vm1, %v7721_v10  ;;  %12253 = vmatmul.mubr.msk.bf16.vlgmr.msra.gmra.mrb[200].mxu1 %vm1478_vm1, %v7722_v12 }
0x1c68   :  { %12258 = vmatprep.mubr.msk.bf16.mxu0 %vm13065_vm0, %v13063_v0  ;;  %12264 = vmatprep.mubr.msk.bf16.mxu1 %vm13065_vm0, %v13063_v0 }
0x1c7a   :  { %v8161_v38 = vpop.f32.mrb[184].mxu1  ;;  %v8250_v13 = vpop.f32.mrb[176].mxu0 }
0x1c7b   :  { %v12170_v15 = vpop.f32.mrb[185].mxu1  ;;  %v12190_v16 = vpop.f32.mrb[177].mxu0 }
0x1c7c   :  { %v8164_v17 = vpop.f32.mrb[186].mxu1  ;;  %v8253_v18 = vpop.f32.mrb[178].mxu0 }
0x1c7d   :  { %v8439_v19 = vpack.c.bf16 %v8164_v17, %v8161_v38  ;;  %v8440_v20 = vpack.c.bf16 %v8253_v18, %v8250_v13  ;;  %v12171_v21 = vpop.f32.mrb[187].mxu1  ;;  %v12191_v22 = vpop.f32.mrb[179].mxu0 }
0x1c7f   :  { %12257 = vmatpush3.bf16.msra.mxu0 %v8439_v19  ;;  %12263 = vmatpush3.bf16.msra.mxu1 %v8440_v20 }
0x1c80   :  { %12268 = vmatprep.subr.bf16.mxu0 %v13063_v0  ;;  %12274 = vmatprep.subr.bf16.mxu1 %v13063_v0 }
0x1c9a   :  { %v14690_v23 = vpop.f32.mrb[188].mxu1  ;;  %v14692_v24 = vpop.f32.mrb[180].mxu0 }
0x1c9b   :  { %v12210_v25 = vpop.f32.mrb[189].mxu1  ;;  %v12230_v26 = vpop.f32.mrb[181].mxu0 }
0x1c9c   :  { %v14694_v27 = vpop.f32.mrb[190].mxu1  ;;  %v14696_v44 = vpop.f32.mrb[182].mxu0 }
0x1c9d   :  { %v8441_v48 = vpack.c.bf16 %v14694_v27, %v14690_v23  ;;  %v8442_v50 = vpack.c.bf16 %v14696_v44, %v14692_v24  ;;  %v12211_v28 = vpop.f32.mrb[191].mxu1  ;;  %v12231_v29 = vpop.f32.mrb[183].mxu0  ;;  %v12854_v24 = vld [vmem:[%s9655_s17] sm:$0xff]   ;;  %v12855_v44 = vld [vmem:[%s9655_s17 + $0x8] sm:$0xff]  }
0x1d1a   :  { %v8483_v30 = vpop.f32.mrb[192].mxu1 }
0x1d1b   :  { %v8484_v32 = vadd.f32 %v13062_v31, %v8483_v30  ;;  %v12236_v45 = vpop.f32.mrb[193].mxu1 }
0x1d1c   :  { %v8486_v49 = vpop.f32.mrb[194].mxu1 }
0x1d1d   :  { %v12237_v51 = vpop.f32.mrb[195].mxu1  ;;  %v8627_v33 = vsel %vm6299_vm4, %v8484_v32, -inf }
0x1d1e   :  { %8628 = vmax.xlane.f32.xlu1 %v8627_v33 }
0x1d22   :  { %v8529_v34 = vpop.f32.mrb[196].mxu1 }
0x1d23   :  { %v8530_v37 = vadd.f32 %v13062_v31, %v8529_v34  ;;  %v12242_v60 = vpop.f32.mrb[197].mxu1 }
0x1d24   :  { %v8532_v62 = vpop.f32.mrb[198].mxu1 }
0x1d25   :  { %v12243_v8 = vpop.f32.mrb[199].mxu1  ;;  %v8630_v39 = vsel %vm6299_vm4, %v8530_v37, -inf }
0x1d26   :  { %8631 = vmax.xlane.f32.xlu0 %v8630_v39 }
0x1d3a   :  { %v8575_v41 = vpop.f32.mrb[184].mxu0  ;;  %v8621_v11 = vpop.f32.mrb[200].mxu1 }
0x1d3b   :  { %v8576_v42 = vadd.f32 %v13062_v31, %v8575_v41  ;;  %v8622_v61 = vadd.f32 %v13062_v31, %v8621_v11  ;;  %v12248_v63 = vpop.f32.mrb[185].mxu0  ;;  %v12254_v14 = vpop.f32.mrb[201].mxu1 }
0x1d3c   :  { %v8578_v46 = vpop.f32.mrb[186].mxu0  ;;  %v8624_v56 = vpop.f32.mrb[202].mxu1 }
0x1d3d   :  { %v12249_v54 = vpop.f32.mrb[187].mxu0  ;;  %v12255_v55 = vpop.f32.mrb[203].mxu1  ;;  %v8636_v58 = vsel %vm6299_vm4, %v8622_v61, -inf  ;;  %v8633_v59 = vsel %vm6299_vm4, %v8576_v42, -inf }
0x1d3e   :  { %8637 = vmax.xlane.f32.xlu0 %v8636_v58  ;;  %8634 = vmax.xlane.f32.xlu1 %v8633_v59  ;;  %v12858_v58 = vld [vmem:[%s14753_s21] sm:$0xff]   ;;  %v12859_v59 = vld [vmem:[%s14753_s21 + $0x8] sm:$0xff]  }
0x1dab   :  { %v8629_v1 = vpop.xlane.xlu1 %8628 }
0x1dac   :  { %v8639_v57 = vsub.f32 %v8484_v32, %v8629_v1  ;;  %v12856_v32 = vld [vmem:[%s9655_s17 + $0x10] sm:$0xff]  }
0x1dad   :  { %v12860_v1 = vld [vmem:[%s14753_s21 + $0x10] sm:$0xff]  }
0x1dae   :  { %v8643_v52 = vmul.f32 1.442695, %v8639_v57 }
0x1db0   :  { %13032 = vpow2.f32 %v8643_v52 }
0x1db3   :  { %v8632_v53 = vpop.xlane.xlu0 %8631 }
0x1db4   :  { %v8640_v2 = vsub.f32 %v8530_v37, %v8632_v53  ;;  %v12857_v37 = vld [vmem:[%s9655_s17 + $0x18] sm:$0xff]  }
0x1db6   :  { %v8645_v36 = vmul.f32 1.442695, %v8640_v2 }
0x1db8   :  { %13034 = vpow2.f32 %v8645_v36 }
0x1dba   :  { %v13033_v40 = vpop.eup %13032 }
0x1dbb   :  { %v8651_v3 = vsel %vm6299_vm4, %v13033_v40, 0.0 }
0x1dbc   :  { %8652 = vadd.xlane.f32.xlu1 %v8651_v3 }
0x1dc2   :  { %v13035_v4 = vpop.eup %13034 }
0x1dc3   :  { %v8654_v5 = vsel %vm6299_vm4, %v13035_v4, 0.0 }
0x1dc4   :  { %8655 = vadd.xlane.f32.xlu0 %v8654_v5 }
0x1dcb   :  { %v8638_v35 = vpop.xlane.xlu0 %8637  ;;  %v8635_v6 = vpop.xlane.xlu1 %8634 }
0x1dcc   :  { %v8642_v7 = vsub.f32 %v8622_v61, %v8638_v35  ;;  %v8641_v43 = vsub.f32 %v8576_v42, %v8635_v6 }
0x1dce   :  { %v8649_v9 = vmul.f32 1.442695, %v8642_v7  ;;  %v8647_v10 = vmul.f32 1.442695, %v8641_v43 }
0x1dd0   :  { %13036 = vpow2.f32 %v8649_v9 }
0x1dd1   :  { %13038 = vpow2.f32 %v8647_v10 }
0x1dda   :  { %v13037_v12 = vpop.eup %13036 }
0x1ddb   :  { %v13039_v38 = vpop.eup %13038  ;;  %v8660_v13 = vsel %vm6299_vm4, %v13037_v12, 0.0 }
0x1ddc   :  { %8661 = vadd.xlane.f32.xlu0 %v8660_v13  ;;  %v8657_v15 = vsel %vm6299_vm4, %v13039_v38, 0.0 }
0x1ddd   :  { %8658 = vadd.xlane.f32.xlu1 %v8657_v15 }
0x1e49   :  { %v8653_v16 = vpop.xlane.xlu1 %8652 }
0x1e4a   :  { %13040 = vrcp.f32 %v8653_v16 }
0x1e51   :  { %v8656_v17 = vpop.xlane.xlu0 %8655 }
0x1e52   :  { %13042 = vrcp.f32 %v8656_v17 }
0x1e54   :  { %v13041_v18 = vpop.eup %13040 }
0x1e55   :  { %v8664_v19 = vmul.f32 %v13041_v18, %v13033_v40 }
0x1e57   :  { %v8671_v20 = vpack.c.bf16 %v8664_v19, %v8664_v19  ;;  %v12861_v19 = vld [vmem:[%s14753_s21 + $0x18] sm:$0xff]  }
0x1e59   :  { %12259 = vmatmul.mubr.msk.bf16.vlgmr.msra.gmra.mrb[188].mxu0 %vm1478_vm1, %v8671_v20  ;;  %v12862_v20 = vld [vmem:[%s14753_s21 + $0x20] sm:$0xff]  }
0x1e5a   :  { %12269 = vmatpush3.bf16.msra.mxu0 %v8441_v48  ;;  %12270 = vmatprep.mubr.msk.bf16.mxu0 %vm13065_vm0, %v13063_v0 }
0x1e5b   :  { %12280 = vmatprep.subr.bf16.mxu0 %v13063_v0 }
0x1e5c   :  { %v13043_v21 = vpop.eup %13042 }
0x1e5d   :  { %v8666_v22 = vmul.f32 %v13043_v21, %v13035_v4  ;;  %v12863_v21 = vld [vmem:[%s14753_s21 + $0x28] sm:$0xff]  }
0x1e5f   :  { %v8672_v25 = vpack.c.bf16 %v8666_v22, %v8666_v22  ;;  %v12864_v22 = vld [vmem:[%s14753_s21 + $0x30] sm:$0xff]  }
0x1e61   :  { %12265 = vmatmul.mubr.msk.bf16.vlgmr.msra.gmra.mrb[204].mxu1 %vm1478_vm1, %v8672_v25  ;;  %v12866_v25 = vld [vmem:[%s14779_s25] sm:$0xff]  }
0x1e62   :  { %12275 = vmatpush3.bf16.msra.mxu1 %v8442_v50  ;;  %12276 = vmatprep.mubr.msk.bf16.mxu1 %vm13065_vm0, %v13063_v0 }
0x1e63   :  { %12286 = vmatprep.subr.bf16.mxu1 %v13063_v0 }
0x1e69   :  { %v8662_v23 = vpop.xlane.xlu0 %8661 }
0x1e6a   :  { %13044 = vrcp.f32 %v8662_v23  ;;  %v8659_v26 = vpop.xlane.xlu1 %8658  ;;  %v12867_v23 = vld [vmem:[%s14779_s25 + $0x8] sm:$0xff]  }
0x1e6b   :  { %13046 = vrcp.f32 %v8659_v26  ;;  %v12868_v26 = vld [vmem:[%s14779_s25 + $0x10] sm:$0xff]  }
0x1e74   :  { %v13045_v27 = vpop.eup %13044 }
0x1e75   :  { %v13047_v48 = vpop.eup %13046  ;;  %v8670_v28 = vmul.f32 %v13045_v27, %v13037_v12  ;;  %v12869_v27 = vld [vmem:[%s14779_s25 + $0x18] sm:$0xff]  }
0x1e76   :  { %v8668_v29 = vmul.f32 %v13047_v48, %v13039_v38  ;;  %v12870_v48 = vld [vmem:[%s14779_s25 + $0x20] sm:$0xff]  }
0x1e77   :  { %v8674_v30 = vpack.c.bf16 %v8670_v28, %v8670_v28  ;;  %v12871_v28 = vld [vmem:[%s14779_s25 + $0x28] sm:$0xff]  }
0x1e78   :  { %v8673_v31 = vpack.c.bf16 %v8668_v29, %v8668_v29  ;;  %v12872_v29 = vld [vmem:[%s14779_s25 + $0x30] sm:$0xff]  }
0x1e79   :  { %12277 = vmatmul.mubr.msk.bf16.vlgmr.msra.gmra.mrb[208].mxu1 %vm1478_vm1, %v8674_v30 }
0x1e7a   :  { %12271 = vmatmul.mubr.msk.bf16.vlgmr.msra.gmra.mrb[192].mxu0 %vm1478_vm1, %v8673_v31  ;;  %12288 = vmatprep.mubr.msk.bf16.mxu1 %vm13065_vm0, %v13063_v0 }
0x1e7b   :  { %12282 = vmatprep.mubr.msk.bf16.mxu0 %vm13065_vm0, %v13063_v0  ;;  %12281 = vmatpush3.bf16.msra.mxu0 %v12854_v24 }
0x1e7c   :  { %12292 = vmatprep.subr.bf16.mxu0 %v13063_v0  ;;  %12287 = vmatpush3.bf16.msra.mxu1 %v12855_v44 }
0x1e7d   :  { %12298 = vmatprep.subr.bf16.mxu1 %v13063_v0 }
0x1f2c   :  { %v8712_v50 = vpop.f32.mrb[188].mxu0 }
0x1f2d   :  { %v8847_v45 = vpack.c.bf16 %v8712_v50, %v8712_v50  ;;  %v12260_v49 = vpop.f32.mrb[189].mxu0  ;;  %v10194_v50 = vld [vmem:[%s9656_s29] ss:$0 sm:$0xff] }
0x1f2e   :  { %v8715_v51 = vpop.f32.mrb[190].mxu0 }
0x1f2f   :  { %v12261_v33 = vpop.f32.mrb[191].mxu0  ;;  %12283 = vmatmul.mubr.msk.bf16.vlgmr.msra.gmra.mrb[196].mxu0 %vm1478_vm1, %v8847_v45  ;;  %v12873_v51 = vld [vmem:[%s14779_s25 + $0x38] sm:$0xff]  }
0x1f30   :  { %12293 = vmatpush3.bf16.msra.mxu0 %v12856_v32  ;;  %12294 = vmatprep.mubr.msk.bf16.mxu0 %vm13065_vm0, %v13063_v0 }
0x1f31   :  { %12304 = vmatprep.subr.bf16.mxu0 %v13063_v0 }
0x1f34   :  { %v8755_v34 = vpop.f32.mrb[204].mxu1 }
0x1f35   :  { %v8848_v60 = vpack.c.bf16 %v8755_v34, %v8755_v34  ;;  %v12266_v62 = vpop.f32.mrb[205].mxu1 }
0x1f36   :  { %v8758_v8 = vpop.f32.mrb[206].mxu1 }
0x1f37   :  { %v12267_v39 = vpop.f32.mrb[207].mxu1  ;;  %12289 = vmatmul.mubr.msk.bf16.vlgmr.msra.gmra.mrb[212].mxu1 %vm1478_vm1, %v8848_v60  ;;  %v12874_v8 = vld [vmem:[%s14803_s4] ss:$16 sps:$4 sm:$0xff]  }
0x1f38   :  { %12299 = vmatpush3.bf16.msra.mxu1 %v12857_v37  ;;  %12300 = vmatprep.mubr.msk.bf16.mxu1 %vm13065_vm0, %v13063_v0  ;;  %v12876_v39 = vld [vmem:[%s14803_s4 + $0x4] ss:$16 sps:$4 sm:$0xff]  }
0x1f39   :  { %12324 = vmatprep.subr.bf16.mxu1 %v13063_v0 }
0x1f4c   :  { %v8841_v41 = vpop.f32.mrb[208].mxu1 }
0x1f4d   :  { %v8798_v11 = vpop.f32.mrb[192].mxu0  ;;  %v8850_v42 = vpack.c.bf16 %v8841_v41, %v8841_v41  ;;  %v12278_v61 = vpop.f32.mrb[209].mxu1  ;;  %v12877_v41 = vld [vmem:[%s14803_s4 + $0x8] ss:$16 sps:$4 sm:$0xff]  }
0x1f4e   :  { %v8849_v63 = vpack.c.bf16 %v8798_v11, %v8798_v11  ;;  %v12272_v14 = vpop.f32.mrb[193].mxu0  ;;  %v8844_v46 = vpop.f32.mrb[210].mxu1  ;;  %v12879_v11 = vld [vmem:[%s14803_s4 + $0xc] ss:$16 sps:$4 sm:$0xff]   ;;  %v12882_v61 = vld [vmem:[%s14803_s4 + $0x24] ss:$16 sps:$4 sm:$0xff]  }
0x1f4f   :  { %v8801_v56 = vpop.f32.mrb[194].mxu0  ;;  %v12279_v54 = vpop.f32.mrb[211].mxu1  ;;  %12301 = vmatmul.mubr.msk.bf16.vlgmr.msra.gmra.mrb[216].mxu1 %vm1478_vm1, %v8850_v42  ;;  %v12880_v42 = vld [vmem:[%s14803_s4 + $0x20] ss:$16 sps:$4 sm:$0xff]   ;;  %v12885_v14 = vld [vmem:[%s14803_s4 + $0x2c] ss:$16 sps:$4 sm:$0xff]  }
0x1f50   :  { %v12273_v55 = vpop.f32.mrb[195].mxu0  ;;  %12295 = vmatmul.mubr.msk.bf16.vlgmr.msra.gmra.mrb[200].mxu0 %vm1478_vm1, %v8849_v63  ;;  %12340 = vmatprep.mubr.msk.bf16.mxu1 %vm13065_vm0, %v13063_v0  ;;  %v12883_v63 = vld [vmem:[%s14803_s4 + $0x28] ss:$16 sps:$4 sm:$0xff]   ;;  %v12886_v46 = vld [vmem:[%s14803_s4 + $0x40] ss:$16 sps:$4 sm:$0xff]  }
0x1f51   :  { %12320 = vmatprep.mubr.msk.bf16.mxu0 %vm13065_vm0, %v13063_v0  ;;  %12305 = vmatpush3.bf16.msra.mxu0 %v12858_v58  ;;  %v12888_v56 = vld [vmem:[%s14803_s4 + $0x44] ss:$16 sps:$4 sm:$0xff]   ;;  %v12889_v54 = vld [vmem:[%s14803_s4 + $0x48] ss:$16 sps:$4 sm:$0xff]   ;;  %v12891_v55 = vld [vmem:[%s14803_s4 + $0x4c] ss:$16 sps:$4 sm:$0xff]  }
0x1f52   :  { %12306 = vmatprep.subr.bf16.mxu0 %v13063_v0  ;;  %12325 = vmatpush3.bf16.msra.mxu1 %v12866_v25 }
0x1f53   :  { %12326 = vmatprep.subr.bf16.mxu1 %v13063_v0 }
0x1f55   :  { %12307 = vmatpush3.bf16.msra.mxu0 %v12859_v59 }
0x1f56   :  { %12308 = vmatprep.subr.bf16.mxu0 %v13063_v0  ;;  %12327 = vmatpush3.bf16.msra.mxu1 %v12867_v23 }
0x1f57   :  { %12328 = vmatprep.subr.bf16.mxu1 %v13063_v0 }
0x1f59   :  { %12309 = vmatpush3.bf16.msra.mxu0 %v12860_v1 }
0x1f5a   :  { %12310 = vmatprep.subr.bf16.mxu0 %v13063_v0  ;;  %12329 = vmatpush3.bf16.msra.mxu1 %v12868_v26  ;;  %v10211_v26 = vld [vmem:[%s9659_s8] ss:$0 sm:$0xff] }
0x1f5b   :  { %12330 = vmatprep.subr.bf16.mxu1 %v13063_v0 }
0x1f5d   :  { %12311 = vmatpush3.bf16.msra.mxu0 %v12861_v19  ;;  %v12921_v19 = vld [vmem:[%s14803_s4 + $0xec] ss:$16 sps:$4 sm:$0xff]  }
0x1f5e   :  { %12312 = vmatprep.subr.bf16.mxu0 %v13063_v0  ;;  %12331 = vmatpush3.bf16.msra.mxu1 %v12869_v27 }
0x1f5f   :  { %12332 = vmatprep.subr.bf16.mxu1 %v13063_v0 }
0x1f61   :  { %12313 = vmatpush3.bf16.msra.mxu0 %v12862_v20  ;;  %v12916_v20 = vld [vmem:[%s14803_s4 + $0xe0] ss:$16 sps:$4 sm:$0xff]  }
0x1f62   :  { %12314 = vmatprep.subr.bf16.mxu0 %v13063_v0  ;;  %12333 = vmatpush3.bf16.msra.mxu1 %v12870_v48 }
0x1f63   :  { %12334 = vmatprep.subr.bf16.mxu1 %v13063_v0 }
0x1f65   :  { %12315 = vmatpush3.bf16.msra.mxu0 %v12863_v21  ;;  %v12919_v21 = vld [vmem:[%s14803_s4 + $0xe8] ss:$16 sps:$4 sm:$0xff]  }
0x1f66   :  { %12316 = vmatprep.subr.bf16.mxu0 %v13063_v0  ;;  %12335 = vmatpush3.bf16.msra.mxu1 %v12871_v28 }
0x1f67   :  { %12336 = vmatprep.subr.bf16.mxu1 %v13063_v0 }
0x1f69   :  { %12317 = vmatpush3.bf16.msra.mxu0 %v12864_v22 }
0x1f6a   :  { %12318 = vmatprep.subr.bf16.mxu0 %v13063_v0  ;;  %12337 = vmatpush3.bf16.msra.mxu1 %v12872_v29 }
0x1f6b   :  { %12338 = vmatprep.subr.bf16.mxu1 %v13063_v0 }
0x1f6e   :  { %12339 = vmatpush3.bf16.msra.mxu1 %v12873_v51 }
0x1f6f   :  { %9530 = vmatprep.subr.bf16.mxu1 %v12879_v11 }
0x2002   :  { %v8894_v57 = vpop.f32.mrb[196].mxu0 }
0x2003   :  { %v12284_v52 = vpop.f32.mrb[197].mxu0 }
0x2004   :  { %v8897_v53 = vpop.f32.mrb[198].mxu0 }
0x2005   :  { %v12285_v2 = vpop.f32.mrb[199].mxu0 }
0x200a   :  { %v8943_v36 = vpop.f32.mrb[212].mxu1 }
0x200b   :  { %v9047_v40 = vadd.f32 %v8943_v36, %v8894_v57  ;;  %v12290_v3 = vpop.f32.mrb[213].mxu1  ;;  %v12894_v36 = vld [vmem:[%s14803_s4 + $0x64] ss:$16 sps:$4 sm:$0xff]  }
0x200c   :  { %v8946_v4 = vpop.f32.mrb[214].mxu1  ;;  %v12892_v3 = vld [vmem:[%s14803_s4 + $0x60] ss:$16 sps:$4 sm:$0xff]  }
0x200d   :  { %v12291_v5 = vpop.f32.mrb[215].mxu1  ;;  %v12895_v4 = vld [vmem:[%s14803_s4 + $0x68] ss:$16 sps:$4 sm:$0xff]  }
0x200e   :  { %v12898_v5 = vld [vmem:[%s14803_s4 + $0x80] ss:$16 sps:$4 sm:$0xff]  }
0x2022   :  { %v9041_v35 = vpop.f32.mrb[216].mxu1 }
0x2023   :  { %v8992_v6 = vpop.f32.mrb[200].mxu0  ;;  %v12302_v7 = vpop.f32.mrb[217].mxu1 }
0x2024   :  { %v9048_v43 = vadd.f32 %v9047_v40, %v8992_v6  ;;  %v12296_v9 = vpop.f32.mrb[201].mxu0  ;;  %v9044_v10 = vpop.f32.mrb[218].mxu1  ;;  %v12897_v40 = vld [vmem:[%s14803_s4 + $0x6c] ss:$16 sps:$4 sm:$0xff]   ;;  %v12901_v6 = vld [vmem:[%s14803_s4 + $0x88] ss:$16 sps:$4 sm:$0xff]  }
0x2025   :  { %v8995_v12 = vpop.f32.mrb[202].mxu0  ;;  %v12303_v38 = vpop.f32.mrb[219].mxu1  ;;  %v12903_v7 = vld [vmem:[%s14803_s4 + $0x8c] ss:$16 sps:$4 sm:$0xff]   ;;  %v12904_v10 = vld [vmem:[%s14803_s4 + $0xa0] ss:$16 sps:$4 sm:$0xff]  }
0x2026   :  { %v9049_v13 = vadd.f32 %v9048_v43, %v9041_v35  ;;  %v12297_v15 = vpop.f32.mrb[203].mxu0  ;;  %v12900_v35 = vld [vmem:[%s14803_s4 + $0x84] ss:$16 sps:$4 sm:$0xff]   ;;  %v12909_v9 = vld [vmem:[%s14803_s4 + $0xac] ss:$16 sps:$4 sm:$0xff]  }
0x2027   :  { %v12906_v43 = vld [vmem:[%s14803_s4 + $0xa4] ss:$16 sps:$4 sm:$0xff]   ;;  %v12907_v12 = vld [vmem:[%s14803_s4 + $0xa8] ss:$16 sps:$4 sm:$0xff]   ;;  %v13102_v15 = vmov 0  }
0x2028   :  { %v14762_v16 = vadd.f32 %v9049_v13, %v14442_v47  ;;  %v12865_v47 = vld [vmem:[%s14753_s21 + $0x38] sm:$0xff]   ;;  %v12912_v38 = vld [vmem:[%s14803_s4 + $0xc4] ss:$16 sps:$4 sm:$0xff]  }
0x2029   :  { %12319 = vmatpush3.bf16.msra.mxu0 %v12865_v47  ;;  %v12915_v13 = vld [vmem:[%s14803_s4 + $0xcc] ss:$16 sps:$4 sm:$0xff]  }
0x202a   :  { %v9052_v17 = vmul.f32 %v14762_v16, %v14762_v16  ;;  %9489 = vmatprep.subr.bf16.mxu0 %v12876_v39 }
0x202c   :  { %v9053_v18 = vsel %vm4624_vm2, %v9052_v17, 0.0  ;;  %v12913_v17 = vld [vmem:[%s14803_s4 + $0xc8] ss:$16 sps:$4 sm:$0xff]  }
0x202d   :  { %9054 = vadd.xlane.f32.xlu1 %v9053_v18  ;;  %v12918_v18 = vld [vmem:[%s14803_s4 + $0xe4] ss:$16 sps:$4 sm:$0xff]  }
0x20ba   :  { %v9055_v30 = vpop.xlane.xlu1 %9054 }
0x20bb   :  { %v9056_v31 = vmul.f32 0.015625, %v9055_v30 }
0x20bd   :  { %v9057_v24 = vadd.f32 1e-06, %v9056_v31 }
0x20bf   :  { %13048 = vrsqrt.f32 %v9057_v24 }
0x20c9   :  { %v13049_v44 = vpop.eup %13048 }
0x20ca   :  { %v9059_v32 = vmul.f32 %v13049_v44, %v14762_v16 }
0x20cc   :  { %v9066_v45 = vmul.f32 %v10194_v50, %v9059_v32 }
0x20ce   :  { %v9067_v49 = vpack.c.bf16 %v9066_v45, %v9066_v45 }
0x20d0   :  { %12321 = vmatmul.mubr.bf16.vlgmr.msra.gmra.mrb[204].mxu0 %v9067_v49 }
0x20d1   :  { %9490 = vmatpush1.bf16.msra.mxu0 %v12874_v8  ;;  %9521 = vmatprep.mubr.bf16.mxu0 %v13102_v15  ;;  %v9580_v8 = vlaneseq }
0x20d2   :  { %9491 = vmatprep.subr.bf16.mxu0 %v12882_v61 }
0x20d3   :  { %v9581_v39 = vand.u32 127, %v9580_v8 }
0x20d5   :  { %9492 = vmatpush1.bf16.msra.mxu0 %v12880_v42  ;;  %v9583_v11 = vadd.s32 256, %v9581_v39  ;;  %v9584_v42 = vadd.s32 384, %v9581_v39 }
0x20d6   :  { %9493 = vmatprep.subr.bf16.mxu0 %v12888_v56 }
0x20d9   :  { %9494 = vmatpush1.bf16.msra.mxu0 %v12886_v46 }
0x20da   :  { %9495 = vmatprep.subr.bf16.mxu0 %v12894_v36 }
0x20dd   :  { %9496 = vmatpush1.bf16.msra.mxu0 %v12892_v3 }
0x20de   :  { %9497 = vmatprep.subr.bf16.mxu0 %v12900_v35 }
0x20e1   :  { %9498 = vmatpush1.bf16.msra.mxu0 %v12898_v5 }
0x20e2   :  { %9499 = vmatprep.subr.bf16.mxu0 %v12906_v43 }
0x20e5   :  { %9500 = vmatpush1.bf16.msra.mxu0 %v12904_v10 }
0x20e6   :  { %9501 = vmatprep.subr.bf16.mxu0 %v12912_v38 }
0x21a3   :  { %v9166_v33 = vpop.f32.mrb[204].mxu0 }
0x21a4   :  { %v9172_v0 = vmax.f32 %v9166_v33, 0.0  ;;  %v12322_v34 = vpop.f32.mrb[205].mxu0 }
0x21a5   :  { %v9169_v37 = vpop.f32.mrb[206].mxu0 }
0x21a6   :  { %v9173_v60 = vpack.c.bf16 %v9172_v0, %v9172_v0  ;;  %v12323_v62 = vpop.f32.mrb[207].mxu0 }
0x21a8   :  { %12341 = vmatmul.mubr.bf16.vlgmr.msra.gmra.mrb[220].mxu1 %v9173_v60 }
0x21a9   :  { %9531 = vmatpush1.bf16.msra.mxu1 %v12877_v41  ;;  %9562 = vmatprep.mubr.bf16.mxu1 %v13102_v15  ;;  %v9582_v41 = vadd.s32 128, %v9581_v39 }
0x21aa   :  { %9532 = vmatprep.subr.bf16.mxu1 %v12885_v14 }
0x21ad   :  { %9533 = vmatpush1.bf16.msra.mxu1 %v12883_v63 }
0x21ae   :  { %9534 = vmatprep.subr.bf16.mxu1 %v12891_v55 }
0x21b1   :  { %9535 = vmatpush1.bf16.msra.mxu1 %v12889_v54 }
0x21b2   :  { %9536 = vmatprep.subr.bf16.mxu1 %v12897_v40 }
0x21b5   :  { %9537 = vmatpush1.bf16.msra.mxu1 %v12895_v4 }
0x21b6   :  { %9538 = vmatprep.subr.bf16.mxu1 %v12903_v7 }
0x21b9   :  { %9539 = vmatpush1.bf16.msra.mxu1 %v12901_v6 }
0x21ba   :  { %9540 = vmatprep.subr.bf16.mxu1 %v12909_v9 }
0x21bd   :  { %9541 = vmatpush1.bf16.msra.mxu1 %v12907_v12 }
0x21be   :  { %9542 = vmatprep.subr.bf16.mxu1 %v12915_v13 }
0x21c1   :  { %9543 = vmatpush1.bf16.msra.mxu1 %v12913_v17 }
0x21c2   :  { %9544 = vmatprep.subr.bf16.mxu1 %v12921_v19 }
0x21c5   :  { %9545 = vmatpush1.bf16.msra.mxu1 %v12919_v21 }
0x227b   :  { %v9272_v58 = vpop.f32.mrb[220].mxu1 }
0x227c   :  { %v9278_v59 = vadd.f32 %v9272_v58, %v14762_v16  ;;  %v12342_v1 = vpop.f32.mrb[221].mxu1  ;;  %v12910_v16 = vld [vmem:[%s14803_s4 + $0xc0] ss:$16 sps:$4 sm:$0xff]  }
0x227d   :  { %v9275_v57 = vpop.f32.mrb[222].mxu1  ;;  %9502 = vmatpush1.bf16.msra.mxu0 %v12910_v16 }
0x227e   :  { %v12343_v52 = vpop.f32.mrb[223].mxu1  ;;  %v9280_v53 = vmul.f32 %v9278_v59, %v9278_v59  ;;  %9503 = vmatprep.subr.bf16.mxu0 %v12918_v18 }
0x2280   :  { %v9281_v2 = vsel %vm4624_vm2, %v9280_v53, 0.0 }
0x2281   :  { %9282 = vadd.xlane.f32.xlu0 %v9281_v2  ;;  %9504 = vmatpush1.bf16.msra.mxu0 %v12916_v20 }
0x230e   :  { %v9283_v22 = vpop.xlane.xlu0 %9282 }
0x230f   :  { %v9284_v47 = vmul.f32 0.015625, %v9283_v22 }
0x2311   :  { %v9285_v25 = vadd.f32 1e-06, %v9284_v47 }
0x2313   :  { %13050 = vrsqrt.f32 %v9285_v25 }
0x231d   :  { %v13051_v23 = vpop.eup %13050 }
0x231e   :  { %v9287_v27 = vmul.f32 %v13051_v23, %v9278_v59 }
0x2320   :  { %v9294_v48 = vmul.f32 %v10211_v26, %v9287_v27 }
0x2322   :  { %v9295_v28 = vmul.f32 0.125, %v9294_v48 }
0x2324   :  { %v9296_v29 = vpack.c.bf16 %v9295_v28, %v9295_v28 }
0x2326   :  { %9522 = vmatmul.mubr.bf16.vlgmr.msra.gmra.mrb[208].mxu0 %v9296_v29  ;;  %9563 = vmatmul.mubr.bf16.vlgmr.msra.gmra.mrb[224].mxu1 %v9296_v29 }
0x23f9   :  { %v9523_v30 = vpop.f32.mrb[208].mxu0  ;;  %v9564_v31 = vpop.f32.mrb[224].mxu1 }
0x23fa   :  { %v9571_v24 = vsel %vm4624_vm2, %v9523_v30, -inf  ;;  %v9573_v44 = vsel %vm4624_vm2, %v9564_v31, -inf  ;;  %v9525_v50 = vpop.f32.mrb[209].mxu0  ;;  %v9566_v32 = vpop.f32.mrb[225].mxu1 }
0x23fb   :  { %v9572_v45 = vsel %vm4624_vm2, %v9525_v50, -inf  ;;  %v9574_v49 = vsel %vm4624_vm2, %v9566_v32, -inf  ;;  %v9527_v51 = vpop.f32.mrb[210].mxu0  ;;  %v9568_v33 = vpop.f32.mrb[226].mxu1 }
0x23fc   :  { %v9575_v0 = vmax.f32 %v9571_v24, %v9572_v45  ;;  %v9576_v34 = vmax.f32 %v9573_v44, %v9574_v49  ;;  %v9528_v37 = vpop.f32.mrb[211].mxu0  ;;  %v9569_v60 = vpop.f32.mrb[227].mxu1 }
0x23fe   :  { %v9577_v62 = vmax.f32 %v9575_v0, %v9576_v34 }
0x2400   :  { %9578 = vmax.xlane.f32.xlu1 %v9577_v62 }
0x248d   :  { %v9579_v61 = vpop.xlane.xlu1 %9578 }
0x248e   :  { %vm9585_vm5 = vcmp.eq.f32.partialorder %v9523_v30, %v9579_v61  ;;  %vm9586_vm6 = vcmp.eq.f32.partialorder %v9525_v50, %v9579_v61  ;;  %vm9587_vm7 = vcmp.eq.f32.partialorder %v9564_v31, %v9579_v61  ;;  %vm9588_vm8 = vcmp.eq.f32.partialorder %v9566_v32, %v9579_v61 }
0x248f   :  { %v9589_v63 = vsel %vm9585_vm5, %v9581_v39, 512  ;;  %v9590_v14 = vsel %vm9586_vm6, %v9582_v41, 512  ;;  %v9591_v46 = vsel %vm9587_vm7, %v9583_v11, 512  ;;  %v9592_v56 = vsel %vm9588_vm8, %v9584_v42, 512 }
0x2490   :  { %v9593_v54 = vsel %vm4624_vm2, %v9589_v63, 2147483647  ;;  %v9594_v55 = vsel %vm4624_vm2, %v9590_v14, 2147483647  ;;  %v9595_v58 = vsel %vm4624_vm2, %v9591_v46, 2147483647 }
0x2491   :  { %v9596_v59 = vsel %vm4624_vm2, %v9592_v56, 2147483647  ;;  %vm9597_vm9 = vcmp.lt.s32.totalorder %v9593_v54, %v9594_v55 }
0x2492   :  { %v9598_v1 = vsel %vm9597_vm9, %v9593_v54, %v9594_v55  ;;  %vm9599_vm10 = vcmp.lt.s32.totalorder %v9595_v58, %v9596_v59 }
0x2493   :  { %v9600_v57 = vsel %vm9599_vm10, %v9595_v58, %v9596_v59 }
0x2494   :  { %vm9601_vm11 = vcmp.lt.s32.totalorder %v9598_v1, %v9600_v57 }
0x2495   :  { %v9602_v52 = vsel %vm9601_vm11, %v9598_v1, %v9600_v57 }
0x2496   :  { %v9604_v53 = vshra.s32 %v9602_v52, 16  ;;  %v9603_v36 = vand.u32 65535, %v9602_v52 }
0x2498   :  { %v9606_v2 = vcvt.s32.f32 %v9604_v53  ;;  %v9605_v3 = vcvt.s32.f32 %v9603_v36 }
0x249a   :  { %9607 = vmin.xlane.f32.xlu0 %v9606_v2 }
0x2527   :  { %v9608_v40 = vpop.xlane.xlu0 %9607 }
0x2528   :  { %vm9609_vm12 = vcmp.eq.f32.partialorder %v9606_v2, %v9608_v40  ;;  %v9614_v5 = vcvt.f32.s32 %v9608_v40 }
0x2529   :  { %v9610_v4 = vsel %vm9609_vm12, %v9605_v3, inf }
0x252a   :  { %9611 = vmin.xlane.f32.xlu1 %v9610_v4  ;;  %v9615_v6 = vshll.u32 %v9614_v5, 16 }
0x25b7   :  { %v9612_v35 = vpop.xlane.xlu1 %9611 }
0x25b8   :  { %v9613_v7 = vcvt.f32.s32 %v9612_v35 }
0x25ba   :  { %v9616_v43 = vadd.s32 %v9615_v6, %v9613_v7 }
0x25bc   :  { %9618 = vst.msk [vmem:[%s9661_s12] sm:$0x3] %vm9617_vm13, %v9616_v43 }

</bundles_post_ra>
